<compile_context>
chip_gen: v6e
topology: v6e:2x2x1
jax: 0.10.0
libtpu: 0.0.40
codegen_flags: <defaults>
</compile_context>

<pallas_src>
import jax
import jax.numpy as jnp
from jax.experimental import pallas as pl
from jax.experimental.pallas import tpu as pltpu


# ----------------------------------------------------------------------------
# Pallas kernel: im2col'ed Conv2d(3x3, pad=1, bias) + ReLU  (== one BBlock)
# ----------------------------------------------------------------------------
def _conv3x3_bias_relu_kernel(x_ref, w_ref, b_ref, o_ref):
    """One grid step = one (TM, Cout) output tile.

    x_ref: (TM, 9*Cin)   bf16   flattened pixel rows, 3x3 taps folded into K
    w_ref: (9*Cin, Cout) bf16   (resident in VMEM, constant block index)
    b_ref: (1, Cout)     f32
    o_ref: (TM, Cout)    bf16
    """
    acc = jnp.dot(x_ref[...], w_ref[...], preferred_element_type=jnp.float32)
    acc = acc + b_ref[...]
    o_ref[...] = jnp.maximum(acc, 0.0).astype(o_ref.dtype)


def _round_up(x, m):
    return ((x + m - 1) // m) * m


def _choose_tile_m(m_total, k, cout, *, max_tm=1024, tile_budget=6 << 20):
    """Rows per grid step: multiple of 8, as large as possible (amortises the
    per-step pipeline overhead), capped so one tile (bf16 in/out + f32 acc)
    stays around ~6 MiB of VMEM."""
    bytes_per_row = (k + cout) * 2 + cout * 4
    cap = max(8, (tile_budget // max(bytes_per_row, 1)) // 8 * 8)
    return max(8, min(max_tm, cap, _round_up(m_total, 8)))


def _vmem_limit(tm, k, cout):
    in_tile = tm * k * 2
    out_tile = tm * cout * 2
    w_bytes = k * cout * 2
    b_bytes = cout * 4
    acc_bytes = tm * cout * 4
    need = 2 * (in_tile + out_tile + w_bytes + b_bytes) + acc_bytes + (4 << 20)
    return int(min(max(need, 16 << 20), 60 << 20))


def conv3x3_relu(x, w9, b2, *, out_channels=None):
    """BBlock: Conv2d(Cin, Cout, 3, padding=1, bias=True) + ReLU.  NHWC in/out.

    x  : (N, H, W, Cin) bf16
    w9 : (9*Cin, Cout_p) bf16   (dy, dx, cin) folded into K, Cout maybe padded
    b2 : (1, Cout_p) f32
    """
    n, h, w, cin = x.shape
    k9, cout_p = w9.shape
    cout = cout_p if out_channels is None else out_channels

    # 9-tap im2col in the wrapper: conv becomes a single (M, 9*Cin)x(9*Cin, Cout)
    # matmul; no halos, no in-kernel sublane slices, M/K/N all MXU-friendly.
    xp = jnp.pad(x, ((0, 0), (1, 1), (1, 1), (0, 0)))          # zero 'same' pad
    taps = [xp[:, dy:dy + h, dx:dx + w, :] for dy in range(3) for dx in range(3)]
    xflat = jnp.concatenate(taps, axis=-1).reshape(n * h * w, k9)

    m_total = n * h * w
    tm = _choose_tile_m(m_total, k9, cout_p)
    m_pad = _round_up(m_total, tm)
    if m_pad != m_total:
        xflat = jnp.pad(xflat, ((0, m_pad - m_total), (0, 0)))

    out = pl.pallas_call(
        _conv3x3_bias_relu_kernel,
        out_shape=jax.ShapeDtypeStruct((m_pad, cout_p), x.dtype),
        grid_spec=pltpu.PrefetchScalarGridSpec(
            num_scalar_prefetch=0,
            grid=(m_pad // tm,),
            in_specs=[
                pl.BlockSpec((tm, k9), lambda t: (t, 0)),
                pl.BlockSpec((k9, cout_p), lambda t: (0, 0)),
                pl.BlockSpec((1, cout_p), lambda t: (0, 0)),
            ],
            out_specs=pl.BlockSpec((tm, cout_p), lambda t: (t, 0)),
        ),
        compiler_params=pltpu.CompilerParams(
            dimension_semantics=("parallel",),
            vmem_limit_bytes=_vmem_limit(tm, k9, cout_p)),
    )(xflat, w9, b2)

    out = out[:m_total, :cout]
    return out.reshape(n, h, w, cout)


# ----------------------------------------------------------------------------
# Glue (all NHWC, bf16): Haar DWT / IWT pixel shuffles, reflect padding
# ----------------------------------------------------------------------------
def dwt(x):
    """Haar DWT: (N, H, W, C) -> (N, H/2, W/2, 4C), channels [LL, HL, LH, HH]."""
    n, h, w, c = x.shape
    xr = (x * 0.5).reshape(n, h // 2, 2, w // 2, 2, c)
    x1 = xr[:, :, 0, :, 0, :]   # even row, even col
    x2 = xr[:, :, 1, :, 0, :]   # odd  row, even col
    x3 = xr[:, :, 0, :, 1, :]   # even row, odd  col
    x4 = xr[:, :, 1, :, 1, :]   # odd  row, odd  col
    ll = x1 + x2 + x3 + x4
    hl = -x1 - x2 + x3 + x4
    lh = -x1 + x2 - x3 + x4
    hh = x1 - x2 - x3 + x4
    return jnp.concatenate((ll, hl, lh, hh), axis=-1)


def iwt(x):
    """Inverse Haar DWT: (N, H, W, 4C) -> (N, 2H, 2W, C), one interleave reshape."""
    n, h, w, c4 = x.shape
    c = c4 // 4
    x1 = x[..., 0 * c:1 * c] * 0.5
    x2 = x[..., 1 * c:2 * c] * 0.5
    x3 = x[..., 2 * c:3 * c] * 0.5
    x4 = x[..., 3 * c:4 * c] * 0.5
    ee = x1 - x2 - x3 + x4          # (2i,   2j)
    eo = x1 + x2 - x3 - x4          # (2i,   2j+1)
    oe = x1 - x2 + x3 - x4          # (2i+1, 2j)
    oo = x1 + x2 + x3 + x4          # (2i+1, 2j+1)
    top = jnp.stack((ee, eo), axis=3)        # (N, H, W, 2, C)
    bot = jnp.stack((oe, oo), axis=3)        # (N, H, W, 2, C)
    out = jnp.stack((top, bot), axis=2)      # (N, H, 2, W, 2, C)
    return out.reshape(n, 2 * h, 2 * w, c)


def pad_to_multiple(x, scale):
    """Reflect-pad H and W (NHWC) up to a multiple of `scale`."""
    dh = (-x.shape[1]) % scale
    dw = (-x.shape[2]) % scale
    if dh:
        x = jnp.pad(x, ((0, 0), (0, dh), (0, 0), (0, 0)), mode="reflect")
    if dw:
        x = jnp.pad(x, ((0, 0), (0, 0), (0, dw), (0, 0)), mode="reflect")
    return x, dh, dw


# ----------------------------------------------------------------------------
# Parameters (deterministic synthetic init; shapes follow the module __init__)
# ----------------------------------------------------------------------------
LAYER_SPECS = [
    ("d_l1_0", 3 * 4, 64), ("d_l1_1", 64, 64),
    ("d_l2_0", 64 * 4, 128), ("d_l2_1", 128, 128),
    ("d_l3_0", 128 * 4, 128), ("d_l3_1", 128, 128),
    ("i_l3_0", 128, 128 * 4),
    ("i_l2_0", 128, 128), ("i_l2_1", 128, 128 * 2),
    ("i_l1_0", 64, 64), ("i_l1_1", 64, 12),
]


def init_params(key):
    """Synthetic init in HWIO layout (== torch Conv2d weight (O,I,3,3) permuted)."""
    params = {}
    for i, (name, cin, cout) in enumerate(LAYER_SPECS):
        kw, kb = jax.random.split(jax.random.fold_in(key, i))
        w = jax.random.normal(kw, (3, 3, cin, cout), jnp.float32)
        w = w * jnp.sqrt(2.0 / (9.0 * cin))
        b = 0.01 * jax.random.normal(kb, (cout,), jnp.float32)
        params[name] = (w, b)
    return params


def pack_params(raw):
    """Repack to kernel layout: w -> (9*Cin, Cout_p) bf16 (dy,dx folded into K),
    bias -> (1, Cout_p) f32.  Cout is padded to 128 for the lane-sparse final
    layer (Cout=12) so the kernel's stores stay lane-dense."""
    packed = {}
    for name, (w, b) in raw.items():
        cin, cout = w.shape[2], w.shape[3]
        cout_p = 128 if cout < 64 else cout
        w9 = w.reshape(9 * cin, cout)
        if cout_p != cout:
            w9 = jnp.pad(w9, ((0, 0), (0, cout_p - cout)))
            b = jnp.pad(b, (0, cout_p - cout))
        packed[name] = (w9.astype(jnp.bfloat16),
                        b.reshape(1, cout_p).astype(jnp.float32))
    return packed


# ----------------------------------------------------------------------------
# MWT forward (NHWC end-to-end, bf16 activations)
# ----------------------------------------------------------------------------
def mwt_forward(params, x_nchw):
    _, _, H, W = x_nchw.shape
    x = jnp.transpose(x_nchw, (0, 2, 3, 1)).astype(jnp.bfloat16)   # NHWC, once
    x, _, _ = pad_to_multiple(x, 8)

    x = dwt(x)                                            # (N, H/2, W/2, 12)
    x = conv3x3_relu(x, *params["d_l1_0"])
    x = conv3x3_relu(x, *params["d_l1_1"])                # (N, H/2, W/2, 64)
    x_s1 = x

    x = dwt(x)                                            # (N, H/4, W/4, 256)
    x = conv3x3_relu(x, *params["d_l2_0"])
    x = conv3x3_relu(x, *params["d_l2_1"])                # (N, H/4, W/4, 128)
    x_s2 = x

    x = dwt(x)                                            # (N, H/8, W/8, 512)
    x = conv3x3_relu(x, *params["d_l3_0"])
    x = conv3x3_relu(x, *params["d_l3_1"])                # (N, H/8, W/8, 128)

    x = conv3x3_relu(x, *params["i_l3_0"])                # (N, H/8, W/8, 512)
    x = iwt(x)                                            # (N, H/4, W/4, 128)

    x = conv3x3_relu(x + x_s2, *params["i_l2_0"])
    x = conv3x3_relu(x, *params["i_l2_1"])                # (N, H/4, W/4, 256)
    x = iwt(x)                                            # (N, H/2, W/2, 64)

    x = conv3x3_relu(x + x_s1, *params["i_l1_0"])
    x = conv3x3_relu(x, *params["i_l1_1"], out_channels=12)  # (N, H/2, W/2, 12)
    x = iwt(x)                                            # (N, Hp, Wp, 3)

    x = x[:, :H, :W, :]
    return jnp.transpose(x, (0, 3, 1, 2)).astype(jnp.float32)   # NCHW, once


if __name__ == "__main__":
    key = jax.random.PRNGKey(0)
    k_x, k_p = jax.random.split(key)
    x = jax.random.normal(k_x, (2, 3, 16, 16), jnp.float32)
    params = pack_params(init_params(k_p))

    fwd = jax.jit(mwt_forward)
    out = jax.block_until_ready(fwd(params, x))

    assert out.shape == (2, 3, 16, 16), out.shape
    assert out.dtype == jnp.float32
    assert bool(jnp.all(jnp.isfinite(out)))
    print("KERNEL_OK")
</pallas_src>

<mosaic_0001>
module attributes {stable_mosaic.version = 11 : i64} {
  func.func @_conv3x3_bias_relu_kernel(%arg0: i32, %arg1: memref<128x108xbf16, #tpu.memory_space<vmem>>, %arg2: memref<108x64xbf16, #tpu.memory_space<vmem>>, %arg3: memref<1x64xf32, #tpu.memory_space<vmem>>, %arg4: memref<128x64xbf16, #tpu.memory_space<vmem>>) attributes {dimension_semantics = [#tpu.dimension_semantics<parallel>], iteration_bounds = array<i64: 1>, scalar_prefetch = 0 : i64, scratch_operands = 0 : i64, tpu.core_type = #tpu.core_type<tc>, window_params = [{transform_indices = @transform_0, window_bounds = array<i64: 128, 108>}, {pipeline_mode = #tpu.pipeline_mode<synchronous>, transform_indices = @transform_1, window_bounds = array<i64: 108, 64>}, {pipeline_mode = #tpu.pipeline_mode<synchronous>, transform_indices = @transform_2, window_bounds = array<i64: 1, 64>}, {transform_indices = @transform_3, window_bounds = array<i64: 128, 64>}]} {
    %c0 = arith.constant 0 : index
    %c0_0 = arith.constant 0 : index
    %0 = vector.load %arg1[%c0, %c0_0] : memref<128x108xbf16, #tpu.memory_space<vmem>>, vector<128x108xbf16>
    %c0_1 = arith.constant 0 : index
    %c0_2 = arith.constant 0 : index
    %1 = vector.load %arg2[%c0_1, %c0_2] : memref<108x64xbf16, #tpu.memory_space<vmem>>, vector<108x64xbf16>
    %cst = arith.constant dense<0.000000e+00> : vector<128x64xf32>
    %2 = tpu.matmul %0, %1, %cst {dimension_numbers = #tpu.dot_dimension_numbers<[1], [0], [0], [1], [0, 0, 1, 1], [], []>} : vector<128x108xbf16>, vector<108x64xbf16>, vector<128x64xf32> -> vector<128x64xf32>
    %c0_3 = arith.constant 0 : index
    %c0_4 = arith.constant 0 : index
    %3 = vector.load %arg3[%c0_3, %c0_4] : memref<1x64xf32, #tpu.memory_space<vmem>>, vector<1x64xf32>
    %4 = vector.broadcast %3 : vector<1x64xf32> to vector<128x64xf32>
    %5 = arith.addf %2, %4 : vector<128x64xf32>
    %cst_5 = arith.constant 0.000000e+00 : f32
    %6 = vector.broadcast %cst_5 : f32 to vector<128x64xf32>
    %7 = arith.maximumf %5, %6 : vector<128x64xf32>
    %8 = arith.truncf %7 : vector<128x64xf32> to vector<128x64xbf16>
    %c0_6 = arith.constant 0 : index
    %c0_7 = arith.constant 0 : index
    %9 = vector.load %arg4[%c0_6, %c0_7] : memref<128x64xbf16, #tpu.memory_space<vmem>>, vector<128x64xbf16>
    tpu.vector_store %arg4[%c0_6, %c0_7], %8 {strides = array<i32>} : memref<128x64xbf16, #tpu.memory_space<vmem>>, vector<128x64xbf16>,
    return
  }
  func.func @transform_0(%arg0: i32) -> (i32, i32) {
    %c0_i32 = arith.constant 0 : i32
    %c0_i32_0 = arith.constant 0 : i32
    return %arg0, %c0_i32 : i32, i32
  }
  func.func @transform_1(%arg0: i32) -> (i32, i32) {
    %c0_i32 = arith.constant 0 : i32
    %c0_i32_0 = arith.constant 0 : i32
    %c0_i32_1 = arith.constant 0 : i32
    return %c0_i32, %c0_i32_0 : i32, i32
  }
  func.func @transform_2(%arg0: i32) -> (i32, i32) {
    %c0_i32 = arith.constant 0 : i32
    %c0_i32_0 = arith.constant 0 : i32
    %c0_i32_1 = arith.constant 0 : i32
    return %c0_i32, %c0_i32_0 : i32, i32
  }
  func.func @transform_3(%arg0: i32) -> (i32, i32) {
    %c0_i32 = arith.constant 0 : i32
    %c0_i32_0 = arith.constant 0 : i32
    return %arg0, %c0_i32 : i32, i32
  }
}

module attributes {stable_mosaic.version = 11 : i64} {
  func.func @_conv3x3_bias_relu_kernel(%arg0: i32, %arg1: memref<128x576xbf16, #tpu.memory_space<vmem>>, %arg2: memref<576x64xbf16, #tpu.memory_space<vmem>>, %arg3: memref<1x64xf32, #tpu.memory_space<vmem>>, %arg4: memref<128x64xbf16, #tpu.memory_space<vmem>>) attributes {dimension_semantics = [#tpu.dimension_semantics<parallel>], iteration_bounds = array<i64: 1>, scalar_prefetch = 0 : i64, scratch_operands = 0 : i64, tpu.core_type = #tpu.core_type<tc>, window_params = [{transform_indices = @transform_0, window_bounds = array<i64: 128, 576>}, {pipeline_mode = #tpu.pipeline_mode<synchronous>, transform_indices = @transform_1, window_bounds = array<i64: 576, 64>}, {pipeline_mode = #tpu.pipeline_mode<synchronous>, transform_indices = @transform_2, window_bounds = array<i64: 1, 64>}, {transform_indices = @transform_3, window_bounds = array<i64: 128, 64>}]} {
    %c0 = arith.constant 0 : index
    %c0_0 = arith.constant 0 : index
    %0 = vector.load %arg1[%c0, %c0_0] : memref<128x576xbf16, #tpu.memory_space<vmem>>, vector<128x576xbf16>
    %c0_1 = arith.constant 0 : index
    %c0_2 = arith.constant 0 : index
    %1 = vector.load %arg2[%c0_1, %c0_2] : memref<576x64xbf16, #tpu.memory_space<vmem>>, vector<576x64xbf16>
    %cst = arith.constant dense<0.000000e+00> : vector<128x64xf32>
    %2 = tpu.matmul %0, %1, %cst {dimension_numbers = #tpu.dot_dimension_numbers<[1], [0], [0], [1], [0, 0, 1, 1], [], []>} : vector<128x576xbf16>, vector<576x64xbf16>, vector<128x64xf32> -> vector<128x64xf32>
    %c0_3 = arith.constant 0 : index
    %c0_4 = arith.constant 0 : index
    %3 = vector.load %arg3[%c0_3, %c0_4] : memref<1x64xf32, #tpu.memory_space<vmem>>, vector<1x64xf32>
    %4 = vector.broadcast %3 : vector<1x64xf32> to vector<128x64xf32>
    %5 = arith.addf %2, %4 : vector<128x64xf32>
    %cst_5 = arith.constant 0.000000e+00 : f32
    %6 = vector.broadcast %cst_5 : f32 to vector<128x64xf32>
    %7 = arith.maximumf %5, %6 : vector<128x64xf32>
    %8 = arith.truncf %7 : vector<128x64xf32> to vector<128x64xbf16>
    %c0_6 = arith.constant 0 : index
    %c0_7 = arith.constant 0 : index
    %9 = vector.load %arg4[%c0_6, %c0_7] : memref<128x64xbf16, #tpu.memory_space<vmem>>, vector<128x64xbf16>
    tpu.vector_store %arg4[%c0_6, %c0_7], %8 {strides = array<i32>} : memref<128x64xbf16, #tpu.memory_space<vmem>>, vector<128x64xbf16>,
    return
  }
  func.func @transform_0(%arg0: i32) -> (i32, i32) {
    %c0_i32 = arith.constant 0 : i32
    %c0_i32_0 = arith.constant 0 : i32
    return %arg0, %c0_i32 : i32, i32
  }
  func.func @transform_1(%arg0: i32) -> (i32, i32) {
    %c0_i32 = arith.constant 0 : i32
    %c0_i32_0 = arith.constant 0 : i32
    %c0_i32_1 = arith.constant 0 : i32
    return %c0_i32, %c0_i32_0 : i32, i32
  }
  func.func @transform_2(%arg0: i32) -> (i32, i32) {
    %c0_i32 = arith.constant 0 : i32
    %c0_i32_0 = arith.constant 0 : i32
    %c0_i32_1 = arith.constant 0 : i32
    return %c0_i32, %c0_i32_0 : i32, i32
  }
  func.func @transform_3(%arg0: i32) -> (i32, i32) {
    %c0_i32 = arith.constant 0 : i32
    %c0_i32_0 = arith.constant 0 : i32
    return %arg0, %c0_i32 : i32, i32
  }
}

module attributes {stable_mosaic.version = 11 : i64} {
  func.func @_conv3x3_bias_relu_kernel(%arg0: i32, %arg1: memref<32x2304xbf16, #tpu.memory_space<vmem>>, %arg2: memref<2304x128xbf16, #tpu.memory_space<vmem>>, %arg3: memref<1x128xf32, #tpu.memory_space<vmem>>, %arg4: memref<32x128xbf16, #tpu.memory_space<vmem>>) attributes {dimension_semantics = [#tpu.dimension_semantics<parallel>], iteration_bounds = array<i64: 1>, scalar_prefetch = 0 : i64, scratch_operands = 0 : i64, tpu.core_type = #tpu.core_type<tc>, window_params = [{transform_indices = @transform_0, window_bounds = array<i64: 32, 2304>}, {pipeline_mode = #tpu.pipeline_mode<synchronous>, transform_indices = @transform_1, window_bounds = array<i64: 2304, 128>}, {pipeline_mode = #tpu.pipeline_mode<synchronous>, transform_indices = @transform_2, window_bounds = array<i64: 1, 128>}, {transform_indices = @transform_3, window_bounds = array<i64: 32, 128>}]} {
    %c0 = arith.constant 0 : index
    %c0_0 = arith.constant 0 : index
    %0 = vector.load %arg1[%c0, %c0_0] : memref<32x2304xbf16, #tpu.memory_space<vmem>>, vector<32x2304xbf16>
    %c0_1 = arith.constant 0 : index
    %c0_2 = arith.constant 0 : index
    %1 = vector.load %arg2[%c0_1, %c0_2] : memref<2304x128xbf16, #tpu.memory_space<vmem>>, vector<2304x128xbf16>
    %cst = arith.constant dense<0.000000e+00> : vector<32x128xf32>
    %2 = tpu.matmul %0, %1, %cst {dimension_numbers = #tpu.dot_dimension_numbers<[1], [0], [0], [1], [0, 0, 1, 1], [], []>} : vector<32x2304xbf16>, vector<2304x128xbf16>, vector<32x128xf32> -> vector<32x128xf32>
    %c0_3 = arith.constant 0 : index
    %c0_4 = arith.constant 0 : index
    %3 = vector.load %arg3[%c0_3, %c0_4] : memref<1x128xf32, #tpu.memory_space<vmem>>, vector<1x128xf32>
    %4 = vector.broadcast %3 : vector<1x128xf32> to vector<32x128xf32>
    %5 = arith.addf %2, %4 : vector<32x128xf32>
    %cst_5 = arith.constant 0.000000e+00 : f32
    %6 = vector.broadcast %cst_5 : f32 to vector<32x128xf32>
    %7 = arith.maximumf %5, %6 : vector<32x128xf32>
    %8 = arith.truncf %7 : vector<32x128xf32> to vector<32x128xbf16>
    %c0_6 = arith.constant 0 : index
    %c0_7 = arith.constant 0 : index
    %9 = vector.load %arg4[%c0_6, %c0_7] : memref<32x128xbf16, #tpu.memory_space<vmem>>, vector<32x128xbf16>
    tpu.vector_store %arg4[%c0_6, %c0_7], %8 {strides = array<i32>} : memref<32x128xbf16, #tpu.memory_space<vmem>>, vector<32x128xbf16>,
    return
  }
  func.func @transform_0(%arg0: i32) -> (i32, i32) {
    %c0_i32 = arith.constant 0 : i32
    %c0_i32_0 = arith.constant 0 : i32
    return %arg0, %c0_i32 : i32, i32
  }
  func.func @transform_1(%arg0: i32) -> (i32, i32) {
    %c0_i32 = arith.constant 0 : i32
    %c0_i32_0 = arith.constant 0 : i32
    %c0_i32_1 = arith.constant 0 : i32
    return %c0_i32, %c0_i32_0 : i32, i32
  }
  func.func @transform_2(%arg0: i32) -> (i32, i32) {
    %c0_i32 = arith.constant 0 : i32
    %c0_i32_0 = arith.constant 0 : i32
    %c0_i32_1 = arith.constant 0 : i32
    return %c0_i32, %c0_i32_0 : i32, i32
  }
  func.func @transform_3(%arg0: i32) -> (i32, i32) {
    %c0_i32 = arith.constant 0 : i32
    %c0_i32_0 = arith.constant 0 : i32
    return %arg0, %c0_i32 : i32, i32
  }
}

module attributes {stable_mosaic.version = 11 : i64} {
  func.func @_conv3x3_bias_relu_kernel(%arg0: i32, %arg1: memref<32x1152xbf16, #tpu.memory_space<vmem>>, %arg2: memref<1152x128xbf16, #tpu.memory_space<vmem>>, %arg3: memref<1x128xf32, #tpu.memory_space<vmem>>, %arg4: memref<32x128xbf16, #tpu.memory_space<vmem>>) attributes {dimension_semantics = [#tpu.dimension_semantics<parallel>], iteration_bounds = array<i64: 1>, scalar_prefetch = 0 : i64, scratch_operands = 0 : i64, tpu.core_type = #tpu.core_type<tc>, window_params = [{transform_indices = @transform_0, window_bounds = array<i64: 32, 1152>}, {pipeline_mode = #tpu.pipeline_mode<synchronous>, transform_indices = @transform_1, window_bounds = array<i64: 1152, 128>}, {pipeline_mode = #tpu.pipeline_mode<synchronous>, transform_indices = @transform_2, window_bounds = array<i64: 1, 128>}, {transform_indices = @transform_3, window_bounds = array<i64: 32, 128>}]} {
    %c0 = arith.constant 0 : index
    %c0_0 = arith.constant 0 : index
    %0 = vector.load %arg1[%c0, %c0_0] : memref<32x1152xbf16, #tpu.memory_space<vmem>>, vector<32x1152xbf16>
    %c0_1 = arith.constant 0 : index
    %c0_2 = arith.constant 0 : index
    %1 = vector.load %arg2[%c0_1, %c0_2] : memref<1152x128xbf16, #tpu.memory_space<vmem>>, vector<1152x128xbf16>
    %cst = arith.constant dense<0.000000e+00> : vector<32x128xf32>
    %2 = tpu.matmul %0, %1, %cst {dimension_numbers = #tpu.dot_dimension_numbers<[1], [0], [0], [1], [0, 0, 1, 1], [], []>} : vector<32x1152xbf16>, vector<1152x128xbf16>, vector<32x128xf32> -> vector<32x128xf32>
    %c0_3 = arith.constant 0 : index
    %c0_4 = arith.constant 0 : index
    %3 = vector.load %arg3[%c0_3, %c0_4] : memref<1x128xf32, #tpu.memory_space<vmem>>, vector<1x128xf32>
    %4 = vector.broadcast %3 : vector<1x128xf32> to vector<32x128xf32>
    %5 = arith.addf %2, %4 : vector<32x128xf32>
    %cst_5 = arith.constant 0.000000e+00 : f32
    %6 = vector.broadcast %cst_5 : f32 to vector<32x128xf32>
    %7 = arith.maximumf %5, %6 : vector<32x128xf32>
    %8 = arith.truncf %7 : vector<32x128xf32> to vector<32x128xbf16>
    %c0_6 = arith.constant 0 : index
    %c0_7 = arith.constant 0 : index
    %9 = vector.load %arg4[%c0_6, %c0_7] : memref<32x128xbf16, #tpu.memory_space<vmem>>, vector<32x128xbf16>
    tpu.vector_store %arg4[%c0_6, %c0_7], %8 {strides = array<i32>} : memref<32x128xbf16, #tpu.memory_space<vmem>>, vector<32x128xbf16>,
    return
  }
  func.func @transform_0(%arg0: i32) -> (i32, i32) {
    %c0_i32 = arith.constant 0 : i32
    %c0_i32_0 = arith.constant 0 : i32
    return %arg0, %c0_i32 : i32, i32
  }
  func.func @transform_1(%arg0: i32) -> (i32, i32) {
    %c0_i32 = arith.constant 0 : i32
    %c0_i32_0 = arith.constant 0 : i32
    %c0_i32_1 = arith.constant 0 : i32
    return %c0_i32, %c0_i32_0 : i32, i32
  }
  func.func @transform_2(%arg0: i32) -> (i32, i32) {
    %c0_i32 = arith.constant 0 : i32
    %c0_i32_0 = arith.constant 0 : i32
    %c0_i32_1 = arith.constant 0 : i32
    return %c0_i32, %c0_i32_0 : i32, i32
  }
  func.func @transform_3(%arg0: i32) -> (i32, i32) {
    %c0_i32 = arith.constant 0 : i32
    %c0_i32_0 = arith.constant 0 : i32
    return %arg0, %c0_i32 : i32, i32
  }
}

module attributes {stable_mosaic.version = 11 : i64} {
  func.func @_conv3x3_bias_relu_kernel(%arg0: i32, %arg1: memref<8x4608xbf16, #tpu.memory_space<vmem>>, %arg2: memref<4608x128xbf16, #tpu.memory_space<vmem>>, %arg3: memref<1x128xf32, #tpu.memory_space<vmem>>, %arg4: memref<8x128xbf16, #tpu.memory_space<vmem>>) attributes {dimension_semantics = [#tpu.dimension_semantics<parallel>], iteration_bounds = array<i64: 1>, scalar_prefetch = 0 : i64, scratch_operands = 0 : i64, tpu.core_type = #tpu.core_type<tc>, window_params = [{transform_indices = @transform_0, window_bounds = array<i64: 8, 4608>}, {pipeline_mode = #tpu.pipeline_mode<synchronous>, transform_indices = @transform_1, window_bounds = array<i64: 4608, 128>}, {pipeline_mode = #tpu.pipeline_mode<synchronous>, transform_indices = @transform_2, window_bounds = array<i64: 1, 128>}, {transform_indices = @transform_3, window_bounds = array<i64: 8, 128>}]} {
    %c0 = arith.constant 0 : index
    %c0_0 = arith.constant 0 : index
    %0 = vector.load %arg1[%c0, %c0_0] : memref<8x4608xbf16, #tpu.memory_space<vmem>>, vector<8x4608xbf16>
    %c0_1 = arith.constant 0 : index
    %c0_2 = arith.constant 0 : index
    %1 = vector.load %arg2[%c0_1, %c0_2] : memref<4608x128xbf16, #tpu.memory_space<vmem>>, vector<4608x128xbf16>
    %cst = arith.constant dense<0.000000e+00> : vector<8x128xf32>
    %2 = tpu.matmul %0, %1, %cst {dimension_numbers = #tpu.dot_dimension_numbers<[1], [0], [0], [1], [0, 0, 1, 1], [], []>} : vector<8x4608xbf16>, vector<4608x128xbf16>, vector<8x128xf32> -> vector<8x128xf32>
    %c0_3 = arith.constant 0 : index
    %c0_4 = arith.constant 0 : index
    %3 = vector.load %arg3[%c0_3, %c0_4] : memref<1x128xf32, #tpu.memory_space<vmem>>, vector<1x128xf32>
    %4 = vector.broadcast %3 : vector<1x128xf32> to vector<8x128xf32>
    %5 = arith.addf %2, %4 : vector<8x128xf32>
    %cst_5 = arith.constant 0.000000e+00 : f32
    %6 = vector.broadcast %cst_5 : f32 to vector<8x128xf32>
    %7 = arith.maximumf %5, %6 : vector<8x128xf32>
    %8 = arith.truncf %7 : vector<8x128xf32> to vector<8x128xbf16>
    %c0_6 = arith.constant 0 : index
    %c0_7 = arith.constant 0 : index
    %9 = vector.load %arg4[%c0_6, %c0_7] : memref<8x128xbf16, #tpu.memory_space<vmem>>, vector<8x128xbf16>
    tpu.vector_store %arg4[%c0_6, %c0_7], %8 {strides = array<i32>} : memref<8x128xbf16, #tpu.memory_space<vmem>>, vector<8x128xbf16>,
    return
  }
  func.func @transform_0(%arg0: i32) -> (i32, i32) {
    %c0_i32 = arith.constant 0 : i32
    %c0_i32_0 = arith.constant 0 : i32
    return %arg0, %c0_i32 : i32, i32
  }
  func.func @transform_1(%arg0: i32) -> (i32, i32) {
    %c0_i32 = arith.constant 0 : i32
    %c0_i32_0 = arith.constant 0 : i32
    %c0_i32_1 = arith.constant 0 : i32
    return %c0_i32, %c0_i32_0 : i32, i32
  }
  func.func @transform_2(%arg0: i32) -> (i32, i32) {
    %c0_i32 = arith.constant 0 : i32
    %c0_i32_0 = arith.constant 0 : i32
    %c0_i32_1 = arith.constant 0 : i32
    return %c0_i32, %c0_i32_0 : i32, i32
  }
  func.func @transform_3(%arg0: i32) -> (i32, i32) {
    %c0_i32 = arith.constant 0 : i32
    %c0_i32_0 = arith.constant 0 : i32
    return %arg0, %c0_i32 : i32, i32
  }
}

module attributes {stable_mosaic.version = 11 : i64} {
  func.func @_conv3x3_bias_relu_kernel(%arg0: i32, %arg1: memref<8x1152xbf16, #tpu.memory_space<vmem>>, %arg2: memref<1152x512xbf16, #tpu.memory_space<vmem>>, %arg3: memref<1x512xf32, #tpu.memory_space<vmem>>, %arg4: memref<8x512xbf16, #tpu.memory_space<vmem>>) attributes {dimension_semantics = [#tpu.dimension_semantics<parallel>], iteration_bounds = array<i64: 1>, scalar_prefetch = 0 : i64, scratch_operands = 0 : i64, tpu.core_type = #tpu.core_type<tc>, window_params = [{transform_indices = @transform_0, window_bounds = array<i64: 8, 1152>}, {pipeline_mode = #tpu.pipeline_mode<synchronous>, transform_indices = @transform_1, window_bounds = array<i64: 1152, 512>}, {pipeline_mode = #tpu.pipeline_mode<synchronous>, transform_indices = @transform_2, window_bounds = array<i64: 1, 512>}, {transform_indices = @transform_3, window_bounds = array<i64: 8, 512>}]} {
    %c0 = arith.constant 0 : index
    %c0_0 = arith.constant 0 : index
    %0 = vector.load %arg1[%c0, %c0_0] : memref<8x1152xbf16, #tpu.memory_space<vmem>>, vector<8x1152xbf16>
    %c0_1 = arith.constant 0 : index
    %c0_2 = arith.constant 0 : index
    %1 = vector.load %arg2[%c0_1, %c0_2] : memref<1152x512xbf16, #tpu.memory_space<vmem>>, vector<1152x512xbf16>
    %cst = arith.constant dense<0.000000e+00> : vector<8x512xf32>
    %2 = tpu.matmul %0, %1, %cst {dimension_numbers = #tpu.dot_dimension_numbers<[1], [0], [0], [1], [0, 0, 1, 1], [], []>} : vector<8x1152xbf16>, vector<1152x512xbf16>, vector<8x512xf32> -> vector<8x512xf32>
    %c0_3 = arith.constant 0 : index
    %c0_4 = arith.constant 0 : index
    %3 = vector.load %arg3[%c0_3, %c0_4] : memref<1x512xf32, #tpu.memory_space<vmem>>, vector<1x512xf32>
    %4 = vector.broadcast %3 : vector<1x512xf32> to vector<8x512xf32>
    %5 = arith.addf %2, %4 : vector<8x512xf32>
    %cst_5 = arith.constant 0.000000e+00 : f32
    %6 = vector.broadcast %cst_5 : f32 to vector<8x512xf32>
    %7 = arith.maximumf %5, %6 : vector<8x512xf32>
    %8 = arith.truncf %7 : vector<8x512xf32> to vector<8x512xbf16>
    %c0_6 = arith.constant 0 : index
    %c0_7 = arith.constant 0 : index
    %9 = vector.load %arg4[%c0_6, %c0_7] : memref<8x512xbf16, #tpu.memory_space<vmem>>, vector<8x512xbf16>
    tpu.vector_store %arg4[%c0_6, %c0_7], %8 {strides = array<i32>} : memref<8x512xbf16, #tpu.memory_space<vmem>>, vector<8x512xbf16>,
    return
  }
  func.func @transform_0(%arg0: i32) -> (i32, i32) {
    %c0_i32 = arith.constant 0 : i32
    %c0_i32_0 = arith.constant 0 : i32
    return %arg0, %c0_i32 : i32, i32
  }
  func.func @transform_1(%arg0: i32) -> (i32, i32) {
    %c0_i32 = arith.constant 0 : i32
    %c0_i32_0 = arith.constant 0 : i32
    %c0_i32_1 = arith.constant 0 : i32
    return %c0_i32, %c0_i32_0 : i32, i32
  }
  func.func @transform_2(%arg0: i32) -> (i32, i32) {
    %c0_i32 = arith.constant 0 : i32
    %c0_i32_0 = arith.constant 0 : i32
    %c0_i32_1 = arith.constant 0 : i32
    return %c0_i32, %c0_i32_0 : i32, i32
  }
  func.func @transform_3(%arg0: i32) -> (i32, i32) {
    %c0_i32 = arith.constant 0 : i32
    %c0_i32_0 = arith.constant 0 : i32
    return %arg0, %c0_i32 : i32, i32
  }
}

module attributes {stable_mosaic.version = 11 : i64} {
  func.func @_conv3x3_bias_relu_kernel(%arg0: i32, %arg1: memref<8x1152xbf16, #tpu.memory_space<vmem>>, %arg2: memref<1152x128xbf16, #tpu.memory_space<vmem>>, %arg3: memref<1x128xf32, #tpu.memory_space<vmem>>, %arg4: memref<8x128xbf16, #tpu.memory_space<vmem>>) attributes {dimension_semantics = [#tpu.dimension_semantics<parallel>], iteration_bounds = array<i64: 1>, scalar_prefetch = 0 : i64, scratch_operands = 0 : i64, tpu.core_type = #tpu.core_type<tc>, window_params = [{transform_indices = @transform_0, window_bounds = array<i64: 8, 1152>}, {pipeline_mode = #tpu.pipeline_mode<synchronous>, transform_indices = @transform_1, window_bounds = array<i64: 1152, 128>}, {pipeline_mode = #tpu.pipeline_mode<synchronous>, transform_indices = @transform_2, window_bounds = array<i64: 1, 128>}, {transform_indices = @transform_3, window_bounds = array<i64: 8, 128>}]} {
    %c0 = arith.constant 0 : index
    %c0_0 = arith.constant 0 : index
    %0 = vector.load %arg1[%c0, %c0_0] : memref<8x1152xbf16, #tpu.memory_space<vmem>>, vector<8x1152xbf16>
    %c0_1 = arith.constant 0 : index
    %c0_2 = arith.constant 0 : index
    %1 = vector.load %arg2[%c0_1, %c0_2] : memref<1152x128xbf16, #tpu.memory_space<vmem>>, vector<1152x128xbf16>
    %cst = arith.constant dense<0.000000e+00> : vector<8x128xf32>
    %2 = tpu.matmul %0, %1, %cst {dimension_numbers = #tpu.dot_dimension_numbers<[1], [0], [0], [1], [0, 0, 1, 1], [], []>} : vector<8x1152xbf16>, vector<1152x128xbf16>, vector<8x128xf32> -> vector<8x128xf32>
    %c0_3 = arith.constant 0 : index
    %c0_4 = arith.constant 0 : index
    %3 = vector.load %arg3[%c0_3, %c0_4] : memref<1x128xf32, #tpu.memory_space<vmem>>, vector<1x128xf32>
    %4 = vector.broadcast %3 : vector<1x128xf32> to vector<8x128xf32>
    %5 = arith.addf %2, %4 : vector<8x128xf32>
    %cst_5 = arith.constant 0.000000e+00 : f32
    %6 = vector.broadcast %cst_5 : f32 to vector<8x128xf32>
    %7 = arith.maximumf %5, %6 : vector<8x128xf32>
    %8 = arith.truncf %7 : vector<8x128xf32> to vector<8x128xbf16>
    %c0_6 = arith.constant 0 : index
    %c0_7 = arith.constant 0 : index
    %9 = vector.load %arg4[%c0_6, %c0_7] : memref<8x128xbf16, #tpu.memory_space<vmem>>, vector<8x128xbf16>
    tpu.vector_store %arg4[%c0_6, %c0_7], %8 {strides = array<i32>} : memref<8x128xbf16, #tpu.memory_space<vmem>>, vector<8x128xbf16>,
    return
  }
  func.func @transform_0(%arg0: i32) -> (i32, i32) {
    %c0_i32 = arith.constant 0 : i32
    %c0_i32_0 = arith.constant 0 : i32
    return %arg0, %c0_i32 : i32, i32
  }
  func.func @transform_1(%arg0: i32) -> (i32, i32) {
    %c0_i32 = arith.constant 0 : i32
    %c0_i32_0 = arith.constant 0 : i32
    %c0_i32_1 = arith.constant 0 : i32
    return %c0_i32, %c0_i32_0 : i32, i32
  }
  func.func @transform_2(%arg0: i32) -> (i32, i32) {
    %c0_i32 = arith.constant 0 : i32
    %c0_i32_0 = arith.constant 0 : i32
    %c0_i32_1 = arith.constant 0 : i32
    return %c0_i32, %c0_i32_0 : i32, i32
  }
  func.func @transform_3(%arg0: i32) -> (i32, i32) {
    %c0_i32 = arith.constant 0 : i32
    %c0_i32_0 = arith.constant 0 : i32
    return %arg0, %c0_i32 : i32, i32
  }
}

module attributes {stable_mosaic.version = 11 : i64} {
  func.func @_conv3x3_bias_relu_kernel(%arg0: i32, %arg1: memref<32x1152xbf16, #tpu.memory_space<vmem>>, %arg2: memref<1152x256xbf16, #tpu.memory_space<vmem>>, %arg3: memref<1x256xf32, #tpu.memory_space<vmem>>, %arg4: memref<32x256xbf16, #tpu.memory_space<vmem>>) attributes {dimension_semantics = [#tpu.dimension_semantics<parallel>], iteration_bounds = array<i64: 1>, scalar_prefetch = 0 : i64, scratch_operands = 0 : i64, tpu.core_type = #tpu.core_type<tc>, window_params = [{transform_indices = @transform_0, window_bounds = array<i64: 32, 1152>}, {pipeline_mode = #tpu.pipeline_mode<synchronous>, transform_indices = @transform_1, window_bounds = array<i64: 1152, 256>}, {pipeline_mode = #tpu.pipeline_mode<synchronous>, transform_indices = @transform_2, window_bounds = array<i64: 1, 256>}, {transform_indices = @transform_3, window_bounds = array<i64: 32, 256>}]} {
    %c0 = arith.constant 0 : index
    %c0_0 = arith.constant 0 : index
    %0 = vector.load %arg1[%c0, %c0_0] : memref<32x1152xbf16, #tpu.memory_space<vmem>>, vector<32x1152xbf16>
    %c0_1 = arith.constant 0 : index
    %c0_2 = arith.constant 0 : index
    %1 = vector.load %arg2[%c0_1, %c0_2] : memref<1152x256xbf16, #tpu.memory_space<vmem>>, vector<1152x256xbf16>
    %cst = arith.constant dense<0.000000e+00> : vector<32x256xf32>
    %2 = tpu.matmul %0, %1, %cst {dimension_numbers = #tpu.dot_dimension_numbers<[1], [0], [0], [1], [0, 0, 1, 1], [], []>} : vector<32x1152xbf16>, vector<1152x256xbf16>, vector<32x256xf32> -> vector<32x256xf32>
    %c0_3 = arith.constant 0 : index
    %c0_4 = arith.constant 0 : index
    %3 = vector.load %arg3[%c0_3, %c0_4] : memref<1x256xf32, #tpu.memory_space<vmem>>, vector<1x256xf32>
    %4 = vector.broadcast %3 : vector<1x256xf32> to vector<32x256xf32>
    %5 = arith.addf %2, %4 : vector<32x256xf32>
    %cst_5 = arith.constant 0.000000e+00 : f32
    %6 = vector.broadcast %cst_5 : f32 to vector<32x256xf32>
    %7 = arith.maximumf %5, %6 : vector<32x256xf32>
    %8 = arith.truncf %7 : vector<32x256xf32> to vector<32x256xbf16>
    %c0_6 = arith.constant 0 : index
    %c0_7 = arith.constant 0 : index
    %9 = vector.load %arg4[%c0_6, %c0_7] : memref<32x256xbf16, #tpu.memory_space<vmem>>, vector<32x256xbf16>
    tpu.vector_store %arg4[%c0_6, %c0_7], %8 {strides = array<i32>} : memref<32x256xbf16, #tpu.memory_space<vmem>>, vector<32x256xbf16>,
    return
  }
  func.func @transform_0(%arg0: i32) -> (i32, i32) {
    %c0_i32 = arith.constant 0 : i32
    %c0_i32_0 = arith.constant 0 : i32
    return %arg0, %c0_i32 : i32, i32
  }
  func.func @transform_1(%arg0: i32) -> (i32, i32) {
    %c0_i32 = arith.constant 0 : i32
    %c0_i32_0 = arith.constant 0 : i32
    %c0_i32_1 = arith.constant 0 : i32
    return %c0_i32, %c0_i32_0 : i32, i32
  }
  func.func @transform_2(%arg0: i32) -> (i32, i32) {
    %c0_i32 = arith.constant 0 : i32
    %c0_i32_0 = arith.constant 0 : i32
    %c0_i32_1 = arith.constant 0 : i32
    return %c0_i32, %c0_i32_0 : i32, i32
  }
  func.func @transform_3(%arg0: i32) -> (i32, i32) {
    %c0_i32 = arith.constant 0 : i32
    %c0_i32_0 = arith.constant 0 : i32
    return %arg0, %c0_i32 : i32, i32
  }
}

module attributes {stable_mosaic.version = 11 : i64} {
  func.func @_conv3x3_bias_relu_kernel(%arg0: i32, %arg1: memref<128x576xbf16, #tpu.memory_space<vmem>>, %arg2: memref<576x128xbf16, #tpu.memory_space<vmem>>, %arg3: memref<1x128xf32, #tpu.memory_space<vmem>>, %arg4: memref<128x128xbf16, #tpu.memory_space<vmem>>) attributes {dimension_semantics = [#tpu.dimension_semantics<parallel>], iteration_bounds = array<i64: 1>, scalar_prefetch = 0 : i64, scratch_operands = 0 : i64, tpu.core_type = #tpu.core_type<tc>, window_params = [{transform_indices = @transform_0, window_bounds = array<i64: 128, 576>}, {pipeline_mode = #tpu.pipeline_mode<synchronous>, transform_indices = @transform_1, window_bounds = array<i64: 576, 128>}, {pipeline_mode = #tpu.pipeline_mode<synchronous>, transform_indices = @transform_2, window_bounds = array<i64: 1, 128>}, {transform_indices = @transform_3, window_bounds = array<i64: 128, 128>}]} {
    %c0 = arith.constant 0 : index
    %c0_0 = arith.constant 0 : index
    %0 = vector.load %arg1[%c0, %c0_0] : memref<128x576xbf16, #tpu.memory_space<vmem>>, vector<128x576xbf16>
    %c0_1 = arith.constant 0 : index
    %c0_2 = arith.constant 0 : index
    %1 = vector.load %arg2[%c0_1, %c0_2] : memref<576x128xbf16, #tpu.memory_space<vmem>>, vector<576x128xbf16>
    %cst = arith.constant dense<0.000000e+00> : vector<128x128xf32>
    %2 = tpu.matmul %0, %1, %cst {dimension_numbers = #tpu.dot_dimension_numbers<[1], [0], [0], [1], [0, 0, 1, 1], [], []>} : vector<128x576xbf16>, vector<576x128xbf16>, vector<128x128xf32> -> vector<128x128xf32>
    %c0_3 = arith.constant 0 : index
    %c0_4 = arith.constant 0 : index
    %3 = vector.load %arg3[%c0_3, %c0_4] : memref<1x128xf32, #tpu.memory_space<vmem>>, vector<1x128xf32>
    %4 = vector.broadcast %3 : vector<1x128xf32> to vector<128x128xf32>
    %5 = arith.addf %2, %4 : vector<128x128xf32>
    %cst_5 = arith.constant 0.000000e+00 : f32
    %6 = vector.broadcast %cst_5 : f32 to vector<128x128xf32>
    %7 = arith.maximumf %5, %6 : vector<128x128xf32>
    %8 = arith.truncf %7 : vector<128x128xf32> to vector<128x128xbf16>
    %c0_6 = arith.constant 0 : index
    %c0_7 = arith.constant 0 : index
    %9 = vector.load %arg4[%c0_6, %c0_7] : memref<128x128xbf16, #tpu.memory_space<vmem>>, vector<128x128xbf16>
    tpu.vector_store %arg4[%c0_6, %c0_7], %8 {strides = array<i32>} : memref<128x128xbf16, #tpu.memory_space<vmem>>, vector<128x128xbf16>,
    return
  }
  func.func @transform_0(%arg0: i32) -> (i32, i32) {
    %c0_i32 = arith.constant 0 : i32
    %c0_i32_0 = arith.constant 0 : i32
    return %arg0, %c0_i32 : i32, i32
  }
  func.func @transform_1(%arg0: i32) -> (i32, i32) {
    %c0_i32 = arith.constant 0 : i32
    %c0_i32_0 = arith.constant 0 : i32
    %c0_i32_1 = arith.constant 0 : i32
    return %c0_i32, %c0_i32_0 : i32, i32
  }
  func.func @transform_2(%arg0: i32) -> (i32, i32) {
    %c0_i32 = arith.constant 0 : i32
    %c0_i32_0 = arith.constant 0 : i32
    %c0_i32_1 = arith.constant 0 : i32
    return %c0_i32, %c0_i32_0 : i32, i32
  }
  func.func @transform_3(%arg0: i32) -> (i32, i32) {
    %c0_i32 = arith.constant 0 : i32
    %c0_i32_0 = arith.constant 0 : i32
    return %arg0, %c0_i32 : i32, i32
  }
}

</mosaic_0001>

<bundles_post_ra>
// kernel: mwt_forward.11
= control target key start
LH: loop header
LB: loop body
LE: loop exit
PB: predicated region body
PF: predicated region fallthrough
CT: control target
= control target key end

     0   :  { %vm158_vm0 = vcmask 1045504   ;;  %vm133_vm1 = vcmask 883712   ;;  %vm339_vm2 = vcmask 519168   ;;  %s650_s1 = inlined_call_operand.vmem [shape: bf16[108,64], index: 1, kind: input, shape index: {}]   ;;  %s651_s0 = inlined_call_operand.vmem [shape: bf16[128,108], index: 0, kind: input, shape index: {}]   ;;  %s652_s2 = inlined_call_operand.vmem [shape: f32[1,64], index: 2, kind: input, shape index: {}]   ;;  %s653_s3 = inlined_call_operand.vmem [shape: bf16[128,64], index: 3, kind: output, shape index: {}]  }
   0x1   :  { %v477_v0 = vld [vmem:[%s650_s1 + $0x30] sm:$0x3f]   ;;  %v478_v1 = vld [vmem:[%s650_s1 + $0x28] sm:$0xff]   ;;  %v479_v3 = vld [vmem:[%s650_s1 + $0x20] sm:$0xff]  }
   0x2   :  { %475 = vmatprep.subr.msk.bf16.mxu0 %vm158_vm0, %v477_v0  ;;  %476 = vmatprep.subr.msk.bf16.mxu1 %vm158_vm0, %v477_v0  ;;  %v160_v2 = vsel %vm158_vm0, %v477_v0, 0  ;;  %v480_v4 = vld [vmem:[%s650_s1 + $0x18] sm:$0xff]   ;;  %v484_v5 = vld [vmem:[%s651_s0] sm:$0xff]   ;;  %v481_v7 = vld [vmem:[%s650_s1 + $0x10] sm:$0xff]  }
   0x3   :  { %432 = vmatpush3.bf16.msra.mxu0 %v160_v2  ;;  %468 = vmatpush3.bf16.msra.mxu1 %v160_v2  ;;  %v485_v6 = vld [vmem:[%s651_s0 + $0x20] sm:$0xff]   ;;  %v482_v8 = vld [vmem:[%s650_s1 + $0x8] sm:$0xff]   ;;  %v488_v12 = vld [vmem:[%s651_s0 + $0x10] sm:$0xff]  }
   0x4   :  { %433 = vmatprep.subr.bf16.mxu0 %v478_v1  ;;  %462 = vmatprep.subr.bf16.mxu1 %v478_v1  ;;  %v483_v9 = vld [vmem:[%s650_s1] sm:$0xff]   ;;  %v486_v10 = vld [vmem:[%s651_s0 + $0x8] sm:$0xff]   ;;  %v489_v13 = vld [vmem:[%s651_s0 + $0x30] sm:$0xff]  }
   0x5   :  { %445 = vmatprep.mubr.msk.bf16.mxu0 %vm133_vm1, %v484_v5  ;;  %453 = vmatprep.mubr.msk.bf16.mxu1 %vm133_vm1, %v485_v6  ;;  %v487_v11 = vld [vmem:[%s651_s0 + $0x28] sm:$0xff]   ;;  %v490_v14 = vld [vmem:[%s651_s0 + $0x18] sm:$0xff]   ;;  %v568_v16 = vld [vmem:[%s652_s2] ss:$0 sm:$0xff] }
   0x6   :  { %v491_v15 = vld [vmem:[%s651_s0 + $0x38] sm:$0xff]  }
   0x7   :  { %434 = vmatpush3.bf16.msra.mxu0 %v478_v1  ;;  %469 = vmatpush3.bf16.msra.mxu1 %v478_v1 }
   0x8   :  { %435 = vmatprep.subr.bf16.mxu0 %v479_v3  ;;  %463 = vmatprep.subr.bf16.mxu1 %v479_v3 }
   0xb   :  { %436 = vmatpush3.bf16.msra.mxu0 %v479_v3  ;;  %470 = vmatpush3.bf16.msra.mxu1 %v479_v3 }
   0xc   :  { %437 = vmatprep.subr.bf16.mxu0 %v480_v4  ;;  %464 = vmatprep.subr.bf16.mxu1 %v480_v4 }
   0xf   :  { %438 = vmatpush3.bf16.msra.mxu0 %v480_v4  ;;  %471 = vmatpush3.bf16.msra.mxu1 %v480_v4 }
  0x10   :  { %439 = vmatprep.subr.bf16.mxu0 %v481_v7  ;;  %465 = vmatprep.subr.bf16.mxu1 %v481_v7 }
  0x13   :  { %440 = vmatpush3.bf16.msra.mxu0 %v481_v7  ;;  %472 = vmatpush3.bf16.msra.mxu1 %v481_v7 }
  0x14   :  { %441 = vmatprep.subr.bf16.mxu0 %v482_v8  ;;  %466 = vmatprep.subr.bf16.mxu1 %v482_v8 }
  0x17   :  { %442 = vmatpush3.bf16.msra.mxu0 %v482_v8  ;;  %473 = vmatpush3.bf16.msra.mxu1 %v482_v8 }
  0x18   :  { %443 = vmatprep.subr.bf16.mxu0 %v483_v9  ;;  %467 = vmatprep.subr.bf16.mxu1 %v483_v9 }
  0x1b   :  { %444 = vmatpush3.bf16.msra.mxu0 %v483_v9  ;;  %474 = vmatpush3.bf16.msra.mxu1 %v483_v9 }
  0x1e   :  { %446 = vmatmul.mubr.msk.bf16.vlgmr.msra.gmra.mxu0 %vm133_vm1, %v486_v10  ;;  %454 = vmatmul.mubr.msk.bf16.vlgmr.msra.gmra.mxu1 %vm133_vm1, %v487_v11 }
  0x1f   :  { %449 = vmatprep.mubr.msk.bf16.mxu0 %vm133_vm1, %v488_v12  ;;  %457 = vmatprep.mubr.msk.bf16.mxu1 %vm133_vm1, %v489_v13 }
  0x26   :  { %450 = vmatmul.mubr.msk.bf16.gmra.mxu0 %vm133_vm1, %v490_v14  ;;  %458 = vmatmul.mubr.msk.bf16.gmra.mxu1 %vm133_vm1, %v491_v15 }
  0xde   :  { %v447_v17 = vpop.f32.mrf.mxu0  ;;  %v455_v18 = vpop.f32.mrf.mxu1 }
  0xdf   :  { %v205_v19 = vadd.f32 %v447_v17, %v568_v16  ;;  %v237_v20 = vadd.f32 %v455_v18, %v568_v16 }
  0xe0   :  { %v196_v21 = vpop.f32.mrf.mxu0  ;;  %v228_v22 = vpop.f32.mrf.mxu1 }
  0xe1   :  { %v261_v23 = vmax.f32 %v205_v19, 0.0  ;;  %v269_v24 = vmax.f32 %v237_v20, 0.0  ;;  %v197_v25 = vadd.f32 %v568_v16, %v196_v21  ;;  %v229_v26 = vadd.f32 %v568_v16, %v228_v22 }
  0xe2   :  { %v448_v27 = vpop.f32.mrf.mxu0  ;;  %v456_v28 = vpop.f32.mrf.mxu1 }
  0xe3   :  { %v402_v29 = vpack.c.bf16 %v261_v23, %v261_v23  ;;  %v410_v30 = vpack.c.bf16 %v269_v24, %v269_v24  ;;  %v259_v31 = vmax.f32 %v197_v25, 0.0  ;;  %v267_v32 = vmax.f32 %v229_v26, 0.0 }
  0xe4   :  { %v208_v33 = vadd.f32 %v448_v27, %v568_v16  ;;  %v240_v34 = vadd.f32 %v456_v28, %v568_v16  ;;  %v199_v35 = vpop.f32.mrf.mxu0  ;;  %v231_v36 = vpop.f32.mrf.mxu1 }
  0xe5   :  { %342 = vst.msk [vmem:[%s653_s3 + $0x8] sm:$0xf] %vm339_vm2, %v402_v29  ;;  %350 = vst.msk [vmem:[%s653_s3 + $0x28] sm:$0xf] %vm339_vm2, %v410_v30  ;;  %v400_v37 = vpack.c.bf16 %v259_v31, %v259_v31  ;;  %v408_v38 = vpack.c.bf16 %v267_v32, %v267_v32  ;;  %v200_v39 = vadd.f32 %v568_v16, %v199_v35 }
  0xe6   :  { %v232_v40 = vadd.f32 %v568_v16, %v231_v36  ;;  %v262_v41 = vmax.f32 %v208_v33, 0.0  ;;  %v270_v42 = vmax.f32 %v240_v34, 0.0  ;;  %v451_v43 = vpop.f32.mrf.mxu0  ;;  %v459_v44 = vpop.f32.mrf.mxu1 }
  0xe7   :  { %340 = vst.msk [vmem:[%s653_s3] sm:$0xf] %vm339_vm2, %v400_v37  ;;  %348 = vst.msk [vmem:[%s653_s3 + $0x20] sm:$0xf] %vm339_vm2, %v408_v38  ;;  %v260_v45 = vmax.f32 %v200_v39, 0.0  ;;  %v221_v47 = vadd.f32 %v451_v43, %v568_v16  ;;  %v253_v48 = vadd.f32 %v459_v44, %v568_v16 }
  0xe8   :  { %v268_v46 = vmax.f32 %v232_v40, 0.0  ;;  %v403_v49 = vpack.c.bf16 %v262_v41, %v262_v41  ;;  %v411_v50 = vpack.c.bf16 %v270_v42, %v270_v42  ;;  %v212_v51 = vpop.f32.mrf.mxu0  ;;  %v244_v52 = vpop.f32.mrf.mxu1 }
  0xe9   :  { %v401_v53 = vpack.c.bf16 %v260_v45, %v260_v45  ;;  %v265_v55 = vmax.f32 %v221_v47, 0.0  ;;  %v273_v56 = vmax.f32 %v253_v48, 0.0  ;;  %v213_v57 = vadd.f32 %v568_v16, %v212_v51 }
  0xea   :  { %v409_v54 = vpack.c.bf16 %v268_v46, %v268_v46  ;;  %343 = vst.msk [vmem:[%s653_s3 + $0xc] sm:$0xf] %vm339_vm2, %v403_v49  ;;  %351 = vst.msk [vmem:[%s653_s3 + $0x2c] sm:$0xf] %vm339_vm2, %v411_v50  ;;  %v245_v58 = vadd.f32 %v568_v16, %v244_v52  ;;  %v452_v59 = vpop.f32.mrf.mxu0  ;;  %v460_v60 = vpop.f32.mrf.mxu1 }
  0xeb   :  { %341 = vst.msk [vmem:[%s653_s3 + $0x4] sm:$0xf] %vm339_vm2, %v401_v53  ;;  %v406_v61 = vpack.c.bf16 %v265_v55, %v265_v55  ;;  %v414_v62 = vpack.c.bf16 %v273_v56, %v273_v56  ;;  %v224_v63 = vadd.f32 %v452_v59, %v568_v16  ;;  %v256_v0 = vadd.f32 %v460_v60, %v568_v16 }
  0xec   :  { %349 = vst.msk [vmem:[%s653_s3 + $0x24] sm:$0xf] %vm339_vm2, %v409_v54  ;;  %v263_v1 = vmax.f32 %v213_v57, 0.0  ;;  %v271_v2 = vmax.f32 %v245_v58, 0.0  ;;  %v215_v3 = vpop.f32.mrf.mxu0  ;;  %v247_v4 = vpop.f32.mrf.mxu1 }
  0xed   :  { %346 = vst.msk [vmem:[%s653_s3 + $0x18] sm:$0xf] %vm339_vm2, %v406_v61  ;;  %354 = vst.msk [vmem:[%s653_s3 + $0x38] sm:$0xf] %vm339_vm2, %v414_v62  ;;  %v266_v5 = vmax.f32 %v224_v63, 0.0  ;;  %v274_v6 = vmax.f32 %v256_v0, 0.0  ;;  %v216_v7 = vadd.f32 %v568_v16, %v215_v3  ;;  %v248_v8 = vadd.f32 %v568_v16, %v247_v4 }
  0xee   :  { %v404_v9 = vpack.c.bf16 %v263_v1, %v263_v1  ;;  %v412_v10 = vpack.c.bf16 %v271_v2, %v271_v2 }
  0xef   :  { %v407_v11 = vpack.c.bf16 %v266_v5, %v266_v5  ;;  %v415_v12 = vpack.c.bf16 %v274_v6, %v274_v6  ;;  %v264_v13 = vmax.f32 %v216_v7, 0.0  ;;  %v272_v14 = vmax.f32 %v248_v8, 0.0 }
  0xf0   :  { %344 = vst.msk [vmem:[%s653_s3 + $0x10] sm:$0xf] %vm339_vm2, %v404_v9  ;;  %352 = vst.msk [vmem:[%s653_s3 + $0x30] sm:$0xf] %vm339_vm2, %v412_v10 }
  0xf1   :  { %347 = vst.msk [vmem:[%s653_s3 + $0x1c] sm:$0xf] %vm339_vm2, %v407_v11  ;;  %355 = vst.msk [vmem:[%s653_s3 + $0x3c] sm:$0xf] %vm339_vm2, %v415_v12  ;;  %v405_v15 = vpack.c.bf16 %v264_v13, %v264_v13  ;;  %v413_v16 = vpack.c.bf16 %v272_v14, %v272_v14 }
  0xf3   :  { %345 = vst.msk [vmem:[%s653_s3 + $0x14] sm:$0xf] %vm339_vm2, %v405_v15  ;;  %353 = vst.msk [vmem:[%s653_s3 + $0x34] sm:$0xf] %vm339_vm2, %v413_v16 }

// kernel: mwt_forward.12
= control target key start
LH: loop header
LB: loop body
LE: loop exit
PB: predicated region body
PF: predicated region fallthrough
CT: control target
= control target key end

     0   :  { %vm558_vm0 = vcmask 523264   ;;  %vm954_vm1 = vcmask 519168   ;;  %s1775_s1 = inlined_call_operand.vmem [shape: bf16[576,64], index: 1, kind: input, shape index: {}]   ;;  %s1776_s0 = inlined_call_operand.vmem [shape: bf16[128,576], index: 0, kind: input, shape index: {}]   ;;  %s1777_s2 = inlined_call_operand.vmem [shape: f32[1,64], index: 2, kind: input, shape index: {}]   ;;  %s1778_s3 = inlined_call_operand.vmem [shape: bf16[128,64], index: 3, kind: output, shape index: {}]  }
   0x1   :  { %v1264_v0 = vld [vmem:[%s1775_s1 + $0x78] sm:$0xff]   ;;  %v1268_v4 = vld [vmem:[%s1775_s1 + $0x70] sm:$0xff]   ;;  %v1272_v8 = vld [vmem:[%s1775_s1 + $0x68] sm:$0xff]  }
   0x2   :  { %v1265_v1 = vld [vmem:[%s1775_s1 + $0xf8] sm:$0xff]   ;;  %1092 = vmatprep.subr.bf16.mxu0 %v1264_v0  ;;  %v1269_v5 = vld [vmem:[%s1775_s1 + $0xf0] sm:$0xff]   ;;  %v1273_v9 = vld [vmem:[%s1775_s1 + $0xe8] sm:$0xff]  }
   0x3   :  { %v1266_v2 = vld [vmem:[%s1775_s1 + $0x38] sm:$0xff]   ;;  %1156 = vmatprep.subr.bf16.mxu1 %v1265_v1  ;;  %v1270_v6 = vld [vmem:[%s1775_s1 + $0x30] sm:$0xff]   ;;  %v1274_v10 = vld [vmem:[%s1775_s1 + $0x28] sm:$0xff]  }
   0x4   :  { %v1267_v3 = vld [vmem:[%s1775_s1 + $0xb8] sm:$0xff]   ;;  %1093 = vmatpush3.bf16.msra.mxu0 %v1266_v2  ;;  %v1271_v7 = vld [vmem:[%s1775_s1 + $0xb0] sm:$0xff]   ;;  %v1275_v11 = vld [vmem:[%s1775_s1 + $0xa8] sm:$0xff]  }
   0x5   :  { %1157 = vmatpush3.bf16.msra.mxu1 %v1267_v3  ;;  %1094 = vmatprep.subr.bf16.mxu0 %v1268_v4  ;;  %v1276_v12 = vld [vmem:[%s1775_s1 + $0x60] sm:$0xff]   ;;  %v1280_v16 = vld [vmem:[%s1775_s1 + $0x58] sm:$0xff]   ;;  %v1284_v20 = vld [vmem:[%s1775_s1 + $0x50] sm:$0xff]  }
   0x6   :  { %1158 = vmatprep.subr.bf16.mxu1 %v1269_v5  ;;  %v1277_v13 = vld [vmem:[%s1775_s1 + $0xe0] sm:$0xff]   ;;  %v1281_v17 = vld [vmem:[%s1775_s1 + $0xd8] sm:$0xff]   ;;  %v1285_v21 = vld [vmem:[%s1775_s1 + $0xd0] sm:$0xff]  }
   0x7   :  { %v1278_v14 = vld [vmem:[%s1775_s1 + $0x20] sm:$0xff]   ;;  %v1282_v18 = vld [vmem:[%s1775_s1 + $0x18] sm:$0xff]   ;;  %v1286_v22 = vld [vmem:[%s1775_s1 + $0x10] sm:$0xff]  }
   0x8   :  { %1095 = vmatpush3.bf16.msra.mxu0 %v1270_v6  ;;  %v1279_v15 = vld [vmem:[%s1775_s1 + $0xa0] sm:$0xff]   ;;  %v1283_v19 = vld [vmem:[%s1775_s1 + $0x98] sm:$0xff]   ;;  %v1287_v23 = vld [vmem:[%s1775_s1 + $0x90] sm:$0xff]  }
   0x9   :  { %1159 = vmatpush3.bf16.msra.mxu1 %v1271_v7  ;;  %1096 = vmatprep.subr.bf16.mxu0 %v1272_v8  ;;  %v1288_v24 = vld [vmem:[%s1775_s1 + $0x48] sm:$0xff]   ;;  %v1292_v28 = vld [vmem:[%s1775_s1 + $0x40] sm:$0xff]   ;;  %v1302_v36 = vld [vmem:[%s1775_s1 + $0x118] sm:$0xff]  }
   0xa   :  { %1160 = vmatprep.subr.bf16.mxu1 %v1273_v9  ;;  %v1289_v25 = vld [vmem:[%s1775_s1 + $0xc8] sm:$0xff]   ;;  %v1293_v29 = vld [vmem:[%s1775_s1 + $0xc0] sm:$0xff]   ;;  %v1315_v42 = vld [vmem:[%s1775_s1 + $0x110] sm:$0xff]  }
   0xb   :  { %v1290_v26 = vld [vmem:[%s1775_s1 + $0x8] sm:$0xff]   ;;  %v1294_v30 = vld [vmem:[%s1775_s1] sm:$0xff]   ;;  %v1311_v43 = vld [vmem:[%s1776_s0 + $0x5c] ss:$20 sps:$4 sm:$0xff]  }
   0xc   :  { %1097 = vmatpush3.bf16.msra.mxu0 %v1274_v10  ;;  %v1291_v27 = vld [vmem:[%s1775_s1 + $0x88] sm:$0xff]   ;;  %v1295_v31 = vld [vmem:[%s1775_s1 + $0x80] sm:$0xff]   ;;  %v1316_v47 = vld [vmem:[%s1776_s0 + $0x7c] ss:$20 sps:$4 sm:$0xff]  }
   0xd   :  { %1161 = vmatpush3.bf16.msra.mxu1 %v1275_v11  ;;  %1098 = vmatprep.subr.bf16.mxu0 %v1276_v12  ;;  %v1296_v32 = vld [vmem:[%s1776_s0] ss:$20 sps:$4 sm:$0xff]   ;;  %v1298_v33 = vld [vmem:[%s1776_s0 + $0x4] ss:$20 sps:$4 sm:$0xff]   ;;  %v1299_v34 = vld [vmem:[%s1776_s0 + $0x8] ss:$20 sps:$4 sm:$0xff]  }
   0xe   :  { %1162 = vmatprep.subr.bf16.mxu1 %v1277_v13  ;;  %v1301_v35 = vld [vmem:[%s1776_s0 + $0xc] ss:$20 sps:$4 sm:$0xff]   ;;  %615 = vmatprep.mubr.bf16.mxu0 %v1298_v33  ;;  %v1305_v38 = vld [vmem:[%s1776_s0 + $0x34] ss:$20 sps:$4 sm:$0xff]   ;;  %v1308_v40 = vld [vmem:[%s1776_s0 + $0x30] ss:$20 sps:$4 sm:$0xff]  }
   0xf   :  { %712 = vmatprep.mubr.bf16.mxu1 %v1301_v35  ;;  %v1303_v37 = vld [vmem:[%s1776_s0 + $0x2c] ss:$20 sps:$4 sm:$0xff]   ;;  %v1307_v39 = vld [vmem:[%s1776_s0 + $0x28] ss:$20 sps:$4 sm:$0xff]   ;;  %v1313_v44 = vld [vmem:[%s1776_s0 + $0x50] ss:$20 sps:$4 sm:$0xff]  }
  0x10   :  { %1099 = vmatpush3.bf16.msra.mxu0 %v1278_v14  ;;  %v1309_v41 = vld [vmem:[%s1776_s0 + $0x54] ss:$20 sps:$4 sm:$0xff]   ;;  %v1314_v45 = vld [vmem:[%s1776_s0 + $0x58] ss:$20 sps:$4 sm:$0xff]   ;;  %v1341_v49 = vld [vmem:[%s1775_s1 + $0x100] sm:$0xff]  }
  0x11   :  { %1163 = vmatpush3.bf16.msra.mxu1 %v1279_v15  ;;  %1100 = vmatprep.subr.bf16.mxu0 %v1280_v16  ;;  %v1328_v46 = vld [vmem:[%s1775_s1 + $0x108] sm:$0xff]   ;;  %v1318_v48 = vld [vmem:[%s1776_s0 + $0x84] ss:$20 sps:$4 sm:$0xff]   ;;  %v1321_v51 = vld [vmem:[%s1776_s0 + $0x80] ss:$20 sps:$4 sm:$0xff]  }
  0x12   :  { %1164 = vmatprep.subr.bf16.mxu1 %v1281_v17  ;;  %v1320_v50 = vld [vmem:[%s1776_s0 + $0x78] ss:$20 sps:$4 sm:$0xff]   ;;  %v1326_v54 = vld [vmem:[%s1776_s0 + $0xa0] ss:$20 sps:$4 sm:$0xff]   ;;  %v1327_v55 = vld [vmem:[%s1776_s0 + $0xa8] ss:$20 sps:$4 sm:$0xff]  }
  0x13   :  { %v1322_v52 = vld [vmem:[%s1776_s0 + $0xa4] ss:$20 sps:$4 sm:$0xff]   ;;  %v1324_v53 = vld [vmem:[%s1776_s0 + $0xac] ss:$20 sps:$4 sm:$0xff]   ;;  %v1331_v57 = vld [vmem:[%s1776_s0 + $0xd4] ss:$20 sps:$4 sm:$0xff]  }
  0x14   :  { %1101 = vmatpush3.bf16.msra.mxu0 %v1282_v18  ;;  %v1329_v56 = vld [vmem:[%s1776_s0 + $0xcc] ss:$20 sps:$4 sm:$0xff]   ;;  %v1333_v58 = vld [vmem:[%s1776_s0 + $0xc8] ss:$20 sps:$4 sm:$0xff]   ;;  %v1334_v59 = vld [vmem:[%s1776_s0 + $0xd0] ss:$20 sps:$4 sm:$0xff]  }
  0x15   :  { %1165 = vmatpush3.bf16.msra.mxu1 %v1283_v19  ;;  %1102 = vmatprep.subr.bf16.mxu0 %v1284_v20  ;;  %v1335_v60 = vld [vmem:[%s1776_s0 + $0xf4] ss:$20 sps:$4 sm:$0xff]   ;;  %v1337_v61 = vld [vmem:[%s1776_s0 + $0xfc] ss:$20 sps:$4 sm:$0xff]   ;;  %v1340_v63 = vld [vmem:[%s1776_s0 + $0xf8] ss:$20 sps:$4 sm:$0xff]  }
  0x16   :  { %1166 = vmatprep.subr.bf16.mxu1 %v1285_v21  ;;  %v1339_v62 = vld [vmem:[%s1776_s0 + $0xf0] ss:$20 sps:$4 sm:$0xff]   ;;  %v1346_v2 = vld [vmem:[%s1776_s0 + $0x118] ss:$20 sps:$4 sm:$0xff]   ;;  %v1347_v3 = vld [vmem:[%s1776_s0 + $0x120] ss:$20 sps:$4 sm:$0xff]  }
  0x17   :  { %v1342_v0 = vld [vmem:[%s1776_s0 + $0x11c] ss:$20 sps:$4 sm:$0xff]   ;;  %v1344_v1 = vld [vmem:[%s1776_s0 + $0x124] ss:$20 sps:$4 sm:$0xff]   ;;  %v1352_v8 = vld [vmem:[%s1776_s0 + $0x60] ss:$20 sps:$4 sm:$0xff]  }
  0x18   :  { %1103 = vmatpush3.bf16.msra.mxu0 %v1286_v22  ;;  %v1348_v4 = vld [vmem:[%s1776_s0 + $0x10] ss:$20 sps:$4 sm:$0xff]   ;;  %v1350_v6 = vld [vmem:[%s1776_s0 + $0x38] ss:$20 sps:$4 sm:$0xff]   ;;  %v1353_v9 = vld [vmem:[%s1776_s0 + $0x100] ss:$20 sps:$4 sm:$0xff]  }
  0x19   :  { %1167 = vmatpush3.bf16.msra.mxu1 %v1287_v23  ;;  %1104 = vmatprep.subr.bf16.mxu0 %v1288_v24  ;;  %v1349_v5 = vld [vmem:[%s1776_s0 + $0xb0] ss:$20 sps:$4 sm:$0xff]   ;;  %v1351_v7 = vld [vmem:[%s1776_s0 + $0xd8] ss:$20 sps:$4 sm:$0xff]   ;;  %v1354_v10 = vld [vmem:[%s1776_s0 + $0x88] ss:$20 sps:$4 sm:$0xff]  }
  0x1a   :  { %1168 = vmatprep.subr.bf16.mxu1 %v1289_v25  ;;  %v1355_v11 = vld [vmem:[%s1776_s0 + $0x128] ss:$20 sps:$4 sm:$0xff]  }
  0x1c   :  { %1105 = vmatpush3.bf16.msra.mxu0 %v1290_v26 }
  0x1d   :  { %1169 = vmatpush3.bf16.msra.mxu1 %v1291_v27  ;;  %1106 = vmatprep.subr.bf16.mxu0 %v1292_v28 }
  0x1e   :  { %1170 = vmatprep.subr.bf16.mxu1 %v1293_v29 }
  0x20   :  { %1107 = vmatpush3.bf16.msra.mxu0 %v1294_v30 }
  0x21   :  { %1171 = vmatpush3.bf16.msra.mxu1 %v1295_v31  ;;  %1232 = vmatprep.subr.bf16.mxu0 %v1302_v36 }
  0x22   :  { %1256 = vmatprep.subr.bf16.mxu1 %v1302_v36 }
  0x23   :  { %616 = vmatmul.mubr.bf16.vlgmr.msra.gmra.mxu0 %v1296_v32 }
  0x24   :  { %713 = vmatmul.mubr.bf16.vlgmr.msra.gmra.mxu1 %v1299_v34  ;;  %1233 = vmatpush3.bf16.msra.mxu0 %v1302_v36 }
  0x25   :  { %1260 = vmatpush3.bf16.msra.mxu1 %v1302_v36  ;;  %623 = vmatprep.mubr.bf16.mxu0 %v1303_v37 }
  0x26   :  { %720 = vmatprep.mubr.bf16.mxu1 %v1305_v38  ;;  %1234 = vmatprep.subr.bf16.mxu0 %v1315_v42 }
  0x27   :  { %1257 = vmatprep.subr.bf16.mxu1 %v1315_v42 }
  0x28   :  { %1235 = vmatpush3.bf16.msra.mxu0 %v1315_v42 }
  0x29   :  { %1261 = vmatpush3.bf16.msra.mxu1 %v1315_v42  ;;  %1236 = vmatprep.subr.bf16.mxu0 %v1328_v46 }
  0x2a   :  { %1258 = vmatprep.subr.bf16.mxu1 %v1328_v46 }
  0x2b   :  { %624 = vmatmul.mubr.bf16.gmra.mxu0 %v1307_v39 }
  0x2c   :  { %721 = vmatmul.mubr.bf16.gmra.mxu1 %v1308_v40  ;;  %631 = vmatprep.mubr.bf16.mxu0 %v1309_v41 }
  0x2d   :  { %728 = vmatprep.mubr.bf16.mxu1 %v1311_v43  ;;  %1237 = vmatpush3.bf16.msra.mxu0 %v1328_v46 }
  0x2e   :  { %1262 = vmatpush3.bf16.msra.mxu1 %v1328_v46  ;;  %1238 = vmatprep.subr.bf16.mxu0 %v1341_v49 }
  0x2f   :  { %1259 = vmatprep.subr.bf16.mxu1 %v1341_v49 }
  0x31   :  { %1239 = vmatpush3.bf16.msra.mxu0 %v1341_v49 }
  0x32   :  { %1263 = vmatpush3.bf16.msra.mxu1 %v1341_v49 }
  0x33   :  { %632 = vmatmul.mubr.bf16.gmra.mxu0 %v1313_v44 }
  0x34   :  { %729 = vmatmul.mubr.bf16.gmra.mxu1 %v1314_v45  ;;  %639 = vmatprep.mubr.bf16.mxu0 %v1316_v47 }
  0x35   :  { %736 = vmatprep.mubr.bf16.mxu1 %v1318_v48 }
  0x3b   :  { %640 = vmatmul.mubr.bf16.gmra.mxu0 %v1320_v50 }
  0x3c   :  { %737 = vmatmul.mubr.bf16.gmra.mxu1 %v1321_v51  ;;  %647 = vmatprep.mubr.bf16.mxu0 %v1322_v52 }
  0x3d   :  { %744 = vmatprep.mubr.bf16.mxu1 %v1324_v53 }
  0x43   :  { %648 = vmatmul.mubr.bf16.gmra.mxu0 %v1326_v54 }
  0x44   :  { %745 = vmatmul.mubr.bf16.gmra.mxu1 %v1327_v55  ;;  %655 = vmatprep.mubr.bf16.mxu0 %v1329_v56 }
  0x45   :  { %752 = vmatprep.mubr.bf16.mxu1 %v1331_v57 }
  0x4b   :  { %656 = vmatmul.mubr.bf16.gmra.mxu0 %v1333_v58 }
  0x4c   :  { %753 = vmatmul.mubr.bf16.gmra.mxu1 %v1334_v59  ;;  %663 = vmatprep.mubr.bf16.mxu0 %v1335_v60 }
  0x4d   :  { %760 = vmatprep.mubr.bf16.mxu1 %v1337_v61 }
  0x53   :  { %664 = vmatmul.mubr.bf16.gmra.mxu0 %v1339_v62 }
  0x54   :  { %761 = vmatmul.mubr.bf16.gmra.mxu1 %v1340_v63  ;;  %671 = vmatprep.mubr.bf16.mxu0 %v1342_v0 }
  0x55   :  { %768 = vmatprep.mubr.bf16.mxu1 %v1344_v1 }
  0x5b   :  { %672 = vmatmul.mubr.bf16.gmra.mxu0 %v1346_v2 }
  0x5c   :  { %769 = vmatmul.mubr.bf16.gmra.mxu1 %v1347_v3  ;;  %1240 = vmatprep.mubr.msk.bf16.mxu0 %vm558_vm0, %v1348_v4  ;;  %v1649_v3 = vld [vmem:[%s1777_s2] ss:$0 sm:$0xff] }
  0x5d   :  { %1248 = vmatprep.mubr.msk.bf16.mxu1 %vm558_vm0, %v1349_v5 }
  0x63   :  { %1241 = vmatmul.mubr.msk.bf16.vlgmr.msra.gmra.mxu0 %vm558_vm0, %v1350_v6 }
  0x64   :  { %1249 = vmatmul.mubr.msk.bf16.vlgmr.msra.gmra.mxu1 %vm558_vm0, %v1351_v7  ;;  %1244 = vmatprep.mubr.msk.bf16.mxu0 %vm558_vm0, %v1352_v8 }
  0x65   :  { %1252 = vmatprep.mubr.msk.bf16.mxu1 %vm558_vm0, %v1353_v9 }
  0x6b   :  { %1245 = vmatmul.mubr.msk.bf16.gmra.mxu0 %vm558_vm0, %v1354_v10 }
  0x6c   :  { %1253 = vmatmul.mubr.msk.bf16.gmra.mxu1 %vm558_vm0, %v1355_v11 }
  0xe3   :  { %v1108_v12 = vpop.f32.mrf.mxu0 }
  0xe4   :  { %v1172_v13 = vpop.f32.mrf.mxu1 }
  0xe5   :  { %v1109_v14 = vpop.f32.mrf.mxu0 }
  0xe6   :  { %v1173_v15 = vpop.f32.mrf.mxu1  ;;  %v1110_v63 = vadd.f32 %v1109_v14, %v1108_v12 }
  0xe7   :  { %v1111_v16 = vpop.f32.mrf.mxu0  ;;  %v1174_v10 = vadd.f32 %v1173_v15, %v1172_v13 }
  0xe8   :  { %v1175_v17 = vpop.f32.mrf.mxu1  ;;  %v618_v9 = vadd.f32 %v1110_v63, %v1649_v3 }
  0xe9   :  { %v1112_v18 = vpop.f32.mrf.mxu0 }
  0xea   :  { %v1176_v19 = vpop.f32.mrf.mxu1  ;;  %v1113_v0 = vadd.f32 %v1112_v18, %v1111_v16 }
  0xeb   :  { %v1114_v20 = vpop.f32.mrf.mxu0  ;;  %v1177_v16 = vadd.f32 %v1176_v19, %v1175_v17  ;;  %v715_v19 = vadd.f32 %v1174_v10, %v618_v9 }
  0xec   :  { %v1612_v21 = vpop.f32.mrf.mxu1  ;;  %v621_v11 = vadd.f32 %v1113_v0, %v1649_v3 }
  0xed   :  { %v1115_v22 = vpop.f32.mrf.mxu0 }
  0xee   :  { %v1179_v23 = vpop.f32.mrf.mxu1  ;;  %v1116_v1 = vadd.f32 %v1115_v22, %v1114_v20 }
  0xef   :  { %v1117_v24 = vpop.f32.mrf.mxu0 }
  0xf0   :  { %v1614_v25 = vpop.f32.mrf.mxu1  ;;  %v626_v12 = vadd.f32 %v1116_v1, %v1649_v3 }
  0xf1   :  { %v1118_v26 = vpop.f32.mrf.mxu0 }
  0xf2   :  { %v1182_v27 = vpop.f32.mrf.mxu1  ;;  %v1119_v4 = vadd.f32 %v1118_v26, %v1117_v24  ;;  %v1180_v26 = vadd.f32 %v1179_v23, %v1612_v21 }
  0xf3   :  { %v1120_v28 = vpop.f32.mrf.mxu0  ;;  %v1183_v13 = vadd.f32 %v1182_v27, %v1614_v25 }
  0xf4   :  { %v1184_v29 = vpop.f32.mrf.mxu1  ;;  %v629_v18 = vadd.f32 %v1119_v4, %v1649_v3  ;;  %v723_v17 = vadd.f32 %v1180_v26, %v626_v12  ;;  %v718_v4 = vadd.f32 %v1177_v16, %v621_v11 }
  0xf5   :  { %v1121_v30 = vpop.f32.mrf.mxu0 }
  0xf6   :  { %v1185_v31 = vpop.f32.mrf.mxu1  ;;  %v1122_v5 = vadd.f32 %v1121_v30, %v1120_v28  ;;  %v726_v23 = vadd.f32 %v1183_v13, %v629_v18 }
  0xf7   :  { %v1616_v32 = vpop.f32.mrf.mxu0  ;;  %v1186_v15 = vadd.f32 %v1185_v31, %v1184_v29 }
  0xf8   :  { %v1618_v33 = vpop.f32.mrf.mxu1  ;;  %v634_v20 = vadd.f32 %v1122_v5, %v1649_v3 }
  0xf9   :  { %v1620_v34 = vpop.f32.mrf.mxu0 }
  0xfa   :  { %v1622_v35 = vpop.f32.mrf.mxu1 }
  0xfb   :  { %v1126_v36 = vpop.f32.mrf.mxu0  ;;  %v1673_v25 = vadd.f32 %v1622_v35, %v1618_v33 }
  0xfc   :  { %v1624_v37 = vpop.f32.mrf.mxu1 }
  0xfd   :  { %v1127_v38 = vpop.f32.mrf.mxu0 }
  0xfe   :  { %v1626_v39 = vpop.f32.mrf.mxu1  ;;  %v1128_v28 = vadd.f32 %v1127_v38, %v1126_v36  ;;  %v1669_v36 = vadd.f32 %v1186_v15, %v634_v20 }
  0xff   :  { %v1129_v40 = vpop.f32.mrf.mxu0 }
 0x100   :  { %v1628_v41 = vpop.f32.mrf.mxu1  ;;  %v642_v27 = vadd.f32 %v1128_v28, %v1649_v3 }
 0x101   :  { %v1130_v42 = vpop.f32.mrf.mxu0 }
 0x102   :  { %v1630_v43 = vpop.f32.mrf.mxu1  ;;  %v1131_v30 = vadd.f32 %v1130_v42, %v1129_v40 }
 0x103   :  { %v1132_v44 = vpop.f32.mrf.mxu0  ;;  %v1195_v33 = vadd.f32 %v1630_v43, %v1628_v41 }
 0x104   :  { %v1632_v45 = vpop.f32.mrf.mxu1  ;;  %v645_v29 = vadd.f32 %v1131_v30, %v1649_v3 }
 0x105   :  { %v1133_v46 = vpop.f32.mrf.mxu0 }
 0x106   :  { %v1634_v47 = vpop.f32.mrf.mxu1  ;;  %v1694_v41 = vadd.f32 %v1195_v33, %v645_v29 }
 0x107   :  { %v1135_v48 = vpop.f32.mrf.mxu0  ;;  %v1198_v35 = vadd.f32 %v1634_v47, %v1632_v45 }
 0x108   :  { %v1636_v49 = vpop.f32.mrf.mxu1 }
 0x109   :  { %v1136_v50 = vpop.f32.mrf.mxu0 }
 0x10a   :  { %v1638_v51 = vpop.f32.mrf.mxu1  ;;  %v1137_v0 = vadd.f32 %v1136_v50, %v1135_v48 }
 0x10b   :  { %v1138_v52 = vpop.f32.mrf.mxu0 }
 0x10c   :  { %v1202_v53 = vpop.f32.mrf.mxu1 }
 0x10d   :  { %v1139_v54 = vpop.f32.mrf.mxu0 }
 0x10e   :  { %v1203_v55 = vpop.f32.mrf.mxu1  ;;  %v1140_v22 = vadd.f32 %v1139_v54, %v1138_v52  ;;  %v1125_v52 = vadd.f32 %v1620_v34, %v1616_v32  ;;  %v653_v32 = vadd.f32 %v1137_v0, %v1649_v3 }
 0x10f   :  { %v1141_v56 = vpop.f32.mrf.mxu0  ;;  %v1204_v34 = vadd.f32 %v1203_v55, %v1202_v53  ;;  %v1201_v53 = vadd.f32 %v1638_v51, %v1636_v49 }
 0x110   :  { %v1640_v57 = vpop.f32.mrf.mxu1  ;;  %v658_v54 = vadd.f32 %v1140_v22, %v1649_v3 }
 0x111   :  { %v1142_v58 = vpop.f32.mrf.mxu0 }
 0x112   :  { %v1206_v59 = vpop.f32.mrf.mxu1  ;;  %v1143_v1 = vadd.f32 %v1142_v58, %v1141_v56  ;;  %v1689_v56 = vadd.f32 %v1125_v52, %v1649_v3 }
 0x113   :  { %v1144_v60 = vpop.f32.mrf.mxu0  ;;  %v1207_v55 = vadd.f32 %v1206_v59, %v1640_v57 }
 0x114   :  { %v1642_v61 = vpop.f32.mrf.mxu1  ;;  %v661_v40 = vadd.f32 %v1143_v1, %v1649_v3 }
 0x115   :  { %v1145_v62 = vpop.f32.mrf.mxu0 }
 0x116   :  { %v1644_v2 = vpop.f32.mrf.mxu1  ;;  %v1146_v42 = vadd.f32 %v1145_v62, %v1144_v60  ;;  %v755_v60 = vadd.f32 %v1204_v34, %v658_v54 }
 0x117   :  { %v1651_v6 = vpop.f32.mrf.mxu0  ;;  %v1210_v9 = vadd.f32 %v1644_v2, %v1642_v61 }
 0x118   :  { %v1653_v7 = vpop.f32.mrf.mxu1  ;;  %v666_v43 = vadd.f32 %v1146_v42, %v1649_v3 }
 0x119   :  { %1779 = vst [vmem:[#allocation2_spill] sm:$0xff] %v1653_v7  ;;  %v1655_v8 = vpop.f32.mrf.mxu0  ;;  %v1134_v7 = vadd.f32 %v1133_v46, %v1132_v44  ;;  %v1192_v46 = vadd.f32 %v1626_v39, %v1624_v37 }
 0x11a   :  { %1780 = vst [vmem:[#allocation3_spill] sm:$0xff] %v1655_v8  ;;  %v1660_v14 = vpop.f32.mrf.mxu1  ;;  %v763_v0 = vadd.f32 %v1210_v9, %v666_v43 }
 0x11b   :  { %1781 = vst [vmem:[#allocation4_spill] sm:$0xff] %v1660_v14  ;;  %v1150_v24 = vpop.f32.mrf.mxu0  ;;  %v650_v31 = vadd.f32 %v1134_v7, %v1649_v3  ;;  %v739_v5 = vadd.f32 %v1192_v46, %v642_v27  ;;  %v758_v7 = vadd.f32 %v1207_v55, %v661_v40 }
 0x11c   :  { %v1214_v63 = vpop.f32.mrf.mxu1 }
 0x11d   :  { %v1151_v8 = vpop.f32.mrf.mxu0  ;;  %v747_v39 = vadd.f32 %v1198_v35, %v650_v31 }
 0x11e   :  { %v1215_v14 = vpop.f32.mrf.mxu1  ;;  %v1152_v48 = vadd.f32 %v1151_v8, %v1150_v24  ;;  %v750_v8 = vadd.f32 %v1201_v53, %v653_v32 }
 0x11f   :  { %v1153_v21 = vpop.f32.mrf.mxu0  ;;  %v1216_v22 = vadd.f32 %v1215_v14, %v1214_v63 }
 0x120   :  { %v1678_v38 = vpop.f32.mrf.mxu1  ;;  %v674_v49 = vadd.f32 %v1152_v48, %v1649_v3  ;;  %v1783_v46 = vld [vmem:[#allocation2_spill] sm:$0xff] }
 0x121   :  { %v1154_v44 = vpop.f32.mrf.mxu0  ;;  %v1782_v10 = vld [vmem:[#allocation3_spill] sm:$0xff] }
 0x122   :  { %v1218_v50 = vpop.f32.mrf.mxu1  ;;  %v1149_v11 = vadd.f32 %v1782_v10, %v1651_v6  ;;  %v1155_v12 = vadd.f32 %v1154_v44, %v1153_v21  ;;  %v771_v52 = vadd.f32 %v1216_v22, %v674_v49  ;;  %v1784_v33 = vld [vmem:[#allocation4_spill] sm:$0xff] }
 0x123   :  { %v1242_v58 = vpop.f32.mrf.mxu0  ;;  %v1219_v34 = vadd.f32 %v1218_v50, %v1678_v38  ;;  %v1213_v35 = vadd.f32 %v1784_v33, %v1783_v46 }
 0x124   :  { %v820_v62 = vadd.f32 %v1242_v58, %v723_v17  ;;  %v1250_v37 = vpop.f32.mrf.mxu1  ;;  %v677_v14 = vadd.f32 %v1155_v12, %v1649_v3  ;;  %v669_v27 = vadd.f32 %v1149_v11, %v1649_v3 }
 0x125   :  { %v852_v45 = vadd.f32 %v1250_v37, %v755_v60  ;;  %v811_v47 = vpop.f32.mrf.mxu0 }
 0x126   :  { %v876_v51 = vmax.f32 %v820_v62, 0.0  ;;  %v812_v57 = vadd.f32 %v811_v47, %v715_v19  ;;  %v843_v59 = vpop.f32.mrf.mxu1  ;;  %v774_v37 = vadd.f32 %v1219_v34, %v677_v14  ;;  %v766_v49 = vadd.f32 %v1213_v35, %v669_v27 }
 0x127   :  { %v884_v16 = vmax.f32 %v852_v45, 0.0  ;;  %v844_v18 = vadd.f32 %v843_v59, %v747_v39  ;;  %v1243_v20 = vpop.f32.mrf.mxu0  ;;  %v734_v45 = vadd.f32 %v1673_v25, %v1689_v56 }
 0x128   :  { %v1078_v24 = vpack.c.bf16 %v876_v51, %v876_v51  ;;  %v874_v26 = vmax.f32 %v812_v57, 0.0  ;;  %v823_v28 = vadd.f32 %v1243_v20, %v726_v23  ;;  %v1251_v30 = vpop.f32.mrf.mxu1 }
 0x129   :  { %v1086_v13 = vpack.c.bf16 %v884_v16, %v884_v16  ;;  %v882_v15 = vmax.f32 %v844_v18, 0.0  ;;  %v855_v61 = vadd.f32 %v1251_v30, %v758_v7  ;;  %v814_v2 = vpop.f32.mrf.mxu0 }
 0x12a   :  { %957 = vst.msk [vmem:[%s1778_s3 + $0x8] sm:$0xf] %vm954_vm1, %v1078_v24  ;;  %v1076_v6 = vpack.c.bf16 %v874_v26, %v874_v26  ;;  %v877_v1 = vmax.f32 %v823_v28, 0.0  ;;  %v815_v17 = vadd.f32 %v814_v2, %v718_v4  ;;  %v846_v19 = vpop.f32.mrf.mxu1 }
 0x12b   :  { %965 = vst.msk [vmem:[%s1778_s3 + $0x28] sm:$0xf] %vm954_vm1, %v1086_v13  ;;  %v1084_v63 = vpack.c.bf16 %v882_v15, %v882_v15  ;;  %v885_v54 = vmax.f32 %v855_v61, 0.0  ;;  %v847_v21 = vadd.f32 %v846_v19, %v750_v8  ;;  %v1246_v23 = vpop.f32.mrf.mxu0 }
 0x12c   :  { %955 = vst.msk [vmem:[%s1778_s3] sm:$0xf] %vm954_vm1, %v1076_v6  ;;  %v1079_v4 = vpack.c.bf16 %v877_v1, %v877_v1  ;;  %v875_v29 = vmax.f32 %v815_v17, 0.0  ;;  %v836_v31 = vadd.f32 %v1246_v23, %v739_v5  ;;  %v1254_v32 = vpop.f32.mrf.mxu1 }
 0x12d   :  { %963 = vst.msk [vmem:[%s1778_s3 + $0x20] sm:$0xf] %vm954_vm1, %v1084_v63  ;;  %v1087_v40 = vpack.c.bf16 %v885_v54, %v885_v54  ;;  %v883_v42 = vmax.f32 %v847_v21, 0.0  ;;  %v868_v44 = vadd.f32 %v1254_v32, %v771_v52  ;;  %v827_v3 = vpop.f32.mrf.mxu0 }
 0x12e   :  { %958 = vst.msk [vmem:[%s1778_s3 + $0xc] sm:$0xf] %vm954_vm1, %v1079_v4  ;;  %v1077_v48 = vpack.c.bf16 %v875_v29, %v875_v29  ;;  %v880_v53 = vmax.f32 %v836_v31, 0.0  ;;  %v828_v38 = vadd.f32 %v827_v3, %v1669_v36  ;;  %v859_v50 = vpop.f32.mrf.mxu1 }
 0x12f   :  { %966 = vst.msk [vmem:[%s1778_s3 + $0x2c] sm:$0xf] %vm954_vm1, %v1087_v40  ;;  %v1085_v55 = vpack.c.bf16 %v883_v42, %v883_v42  ;;  %v888_v58 = vmax.f32 %v868_v44, 0.0  ;;  %v860_v60 = vadd.f32 %v859_v50, %v763_v0  ;;  %v1247_v62 = vpop.f32.mrf.mxu0 }
 0x130   :  { %956 = vst.msk [vmem:[%s1778_s3 + $0x4] sm:$0xf] %vm954_vm1, %v1077_v48  ;;  %v1082_v39 = vpack.c.bf16 %v880_v53, %v880_v53  ;;  %v878_v5 = vmax.f32 %v828_v38, 0.0  ;;  %v839_v36 = vadd.f32 %v1247_v62, %v1694_v41  ;;  %v1255_v43 = vpop.f32.mrf.mxu1 }
 0x131   :  { %964 = vst.msk [vmem:[%s1778_s3 + $0x24] sm:$0xf] %vm954_vm1, %v1085_v55  ;;  %v1090_v47 = vpack.c.bf16 %v888_v58, %v888_v58  ;;  %v886_v7 = vmax.f32 %v860_v60, 0.0  ;;  %v871_v8 = vadd.f32 %v1255_v43, %v774_v37  ;;  %v830_v9 = vpop.f32.mrf.mxu0 }
 0x132   :  { %961 = vst.msk [vmem:[%s1778_s3 + $0x18] sm:$0xf] %vm954_vm1, %v1082_v39  ;;  %v1080_v41 = vpack.c.bf16 %v878_v5, %v878_v5  ;;  %v881_v51 = vmax.f32 %v839_v36, 0.0  ;;  %v831_v57 = vadd.f32 %v830_v9, %v734_v45  ;;  %v862_v59 = vpop.f32.mrf.mxu1 }
 0x133   :  { %969 = vst.msk [vmem:[%s1778_s3 + $0x38] sm:$0xf] %vm954_vm1, %v1090_v47  ;;  %v1088_v25 = vpack.c.bf16 %v886_v7, %v886_v7  ;;  %v889_v56 = vmax.f32 %v871_v8, 0.0  ;;  %v863_v10 = vadd.f32 %v862_v59, %v766_v49 }
 0x134   :  { %959 = vst.msk [vmem:[%s1778_s3 + $0x10] sm:$0xf] %vm954_vm1, %v1080_v41  ;;  %v1083_v11 = vpack.c.bf16 %v881_v51, %v881_v51  ;;  %v879_v12 = vmax.f32 %v831_v57, 0.0 }
 0x135   :  { %967 = vst.msk [vmem:[%s1778_s3 + $0x30] sm:$0xf] %vm954_vm1, %v1088_v25  ;;  %v1091_v16 = vpack.c.bf16 %v889_v56, %v889_v56  ;;  %v887_v18 = vmax.f32 %v863_v10, 0.0 }
 0x136   :  { %962 = vst.msk [vmem:[%s1778_s3 + $0x1c] sm:$0xf] %vm954_vm1, %v1083_v11  ;;  %v1081_v20 = vpack.c.bf16 %v879_v12, %v879_v12 }
 0x137   :  { %970 = vst.msk [vmem:[%s1778_s3 + $0x3c] sm:$0xf] %vm954_vm1, %v1091_v16  ;;  %v1089_v22 = vpack.c.bf16 %v887_v18, %v887_v18 }
 0x138   :  { %960 = vst.msk [vmem:[%s1778_s3 + $0x14] sm:$0xf] %vm954_vm1, %v1081_v20 }
 0x139   :  { %968 = vst.msk [vmem:[%s1778_s3 + $0x34] sm:$0xf] %vm954_vm1, %v1089_v22 }

// kernel: mwt_forward.13
= control target key start
LH: loop header
LB: loop body
LE: loop exit
PB: predicated region body
PF: predicated region fallthrough
CT: control target
= control target key end

     0   :  { %s3136_s1 = inlined_call_operand.vmem [shape: bf16[2304,128], index: 1, kind: input, shape index: {}]   ;;  %s3137_s0 = inlined_call_operand.vmem [shape: bf16[32,2304], index: 0, kind: input, shape index: {}]   ;;  %s3138_s2 = inlined_call_operand.vmem [shape: f32[1,128], index: 2, kind: input, shape index: {}]   ;;  %s3139_s3 = inlined_call_operand.vmem [shape: bf16[32,128], index: 3, kind: output, shape index: {}]  }
   0x1   :  { %v2327_v0 = vld [vmem:[%s3136_s1 + $0x78] sm:$0xff]   ;;  %v2331_v4 = vld [vmem:[%s3136_s1 + $0x70] sm:$0xff]   ;;  %v2335_v8 = vld [vmem:[%s3136_s1 + $0x68] sm:$0xff]  }
   0x2   :  { %v2328_v1 = vld [vmem:[%s3136_s1 + $0xf8] sm:$0xff]   ;;  %2059 = vmatprep.subr.bf16.mxu0 %v2327_v0  ;;  %v2332_v5 = vld [vmem:[%s3136_s1 + $0xf0] sm:$0xff]   ;;  %v2336_v9 = vld [vmem:[%s3136_s1 + $0xe8] sm:$0xff]  }
   0x3   :  { %v2329_v2 = vld [vmem:[%s3136_s1 + $0x38] sm:$0xff]   ;;  %2087 = vmatprep.subr.bf16.mxu1 %v2328_v1  ;;  %v2333_v6 = vld [vmem:[%s3136_s1 + $0x30] sm:$0xff]   ;;  %v2337_v10 = vld [vmem:[%s3136_s1 + $0x28] sm:$0xff]  }
   0x4   :  { %v2330_v3 = vld [vmem:[%s3136_s1 + $0xb8] sm:$0xff]   ;;  %2060 = vmatpush3.bf16.msra.mxu0 %v2329_v2  ;;  %v2334_v7 = vld [vmem:[%s3136_s1 + $0xb0] sm:$0xff]   ;;  %v2338_v11 = vld [vmem:[%s3136_s1 + $0xa8] sm:$0xff]  }
   0x5   :  { %2088 = vmatpush3.bf16.msra.mxu1 %v2330_v3  ;;  %2061 = vmatprep.subr.bf16.mxu0 %v2331_v4  ;;  %v2339_v12 = vld [vmem:[%s3136_s1 + $0x60] sm:$0xff]   ;;  %v2343_v16 = vld [vmem:[%s3136_s1 + $0x58] sm:$0xff]   ;;  %v2347_v20 = vld [vmem:[%s3136_s1 + $0x50] sm:$0xff]  }
   0x6   :  { %2089 = vmatprep.subr.bf16.mxu1 %v2332_v5  ;;  %v2340_v13 = vld [vmem:[%s3136_s1 + $0xe0] sm:$0xff]   ;;  %v2344_v17 = vld [vmem:[%s3136_s1 + $0xd8] sm:$0xff]   ;;  %v2348_v21 = vld [vmem:[%s3136_s1 + $0xd0] sm:$0xff]  }
   0x7   :  { %v2341_v14 = vld [vmem:[%s3136_s1 + $0x20] sm:$0xff]   ;;  %v2345_v18 = vld [vmem:[%s3136_s1 + $0x18] sm:$0xff]   ;;  %v2349_v22 = vld [vmem:[%s3136_s1 + $0x10] sm:$0xff]  }
   0x8   :  { %2062 = vmatpush3.bf16.msra.mxu0 %v2333_v6  ;;  %v2342_v15 = vld [vmem:[%s3136_s1 + $0xa0] sm:$0xff]   ;;  %v2346_v19 = vld [vmem:[%s3136_s1 + $0x98] sm:$0xff]   ;;  %v2350_v23 = vld [vmem:[%s3136_s1 + $0x90] sm:$0xff]  }
   0x9   :  { %2090 = vmatpush3.bf16.msra.mxu1 %v2334_v7  ;;  %2063 = vmatprep.subr.bf16.mxu0 %v2335_v8  ;;  %v2351_v24 = vld [vmem:[%s3136_s1 + $0x48] sm:$0xff]   ;;  %v2355_v28 = vld [vmem:[%s3136_s1 + $0x40] sm:$0xff]   ;;  %v2365_v36 = vld [vmem:[%s3136_s1 + $0x178] sm:$0xff]  }
   0xa   :  { %2091 = vmatprep.subr.bf16.mxu1 %v2336_v9  ;;  %v2352_v25 = vld [vmem:[%s3136_s1 + $0xc8] sm:$0xff]   ;;  %v2356_v29 = vld [vmem:[%s3136_s1 + $0xc0] sm:$0xff]   ;;  %v2366_v37 = vld [vmem:[%s3136_s1 + $0x1f8] sm:$0xff]  }
   0xb   :  { %v2353_v26 = vld [vmem:[%s3136_s1 + $0x8] sm:$0xff]   ;;  %v2357_v30 = vld [vmem:[%s3136_s1] sm:$0xff]   ;;  %v2367_v38 = vld [vmem:[%s3136_s1 + $0x138] sm:$0xff]  }
   0xc   :  { %2064 = vmatpush3.bf16.msra.mxu0 %v2337_v10  ;;  %v2354_v27 = vld [vmem:[%s3136_s1 + $0x88] sm:$0xff]   ;;  %v2358_v31 = vld [vmem:[%s3136_s1 + $0x80] sm:$0xff]   ;;  %v2368_v39 = vld [vmem:[%s3136_s1 + $0x1b8] sm:$0xff]  }
   0xd   :  { %2092 = vmatpush3.bf16.msra.mxu1 %v2338_v11  ;;  %2065 = vmatprep.subr.bf16.mxu0 %v2339_v12  ;;  %v2359_v32 = vld [vmem:[%s3137_s0] ss:$72 sps:$4 sm:$0xff]   ;;  %v2361_v33 = vld [vmem:[%s3137_s0 + $0x4] ss:$72 sps:$4 sm:$0xff]   ;;  %v2369_v40 = vld [vmem:[%s3136_s1 + $0x170] sm:$0xff]  }
   0xe   :  { %2093 = vmatprep.subr.bf16.mxu1 %v2340_v13  ;;  %v2362_v34 = vld [vmem:[%s3137_s0 + $0x8] ss:$72 sps:$4 sm:$0xff]   ;;  %v2364_v35 = vld [vmem:[%s3137_s0 + $0xc] ss:$72 sps:$4 sm:$0xff]   ;;  %1422 = vmatprep.mubr.bf16.mxu0 %v2361_v33  ;;  %v2377_v48 = vld [vmem:[%s3136_s1 + $0x160] sm:$0xff]  }
   0xf   :  { %1471 = vmatprep.mubr.bf16.mxu1 %v2364_v35  ;;  %v2370_v41 = vld [vmem:[%s3136_s1 + $0x1f0] sm:$0xff]   ;;  %v2373_v44 = vld [vmem:[%s3136_s1 + $0x168] sm:$0xff]   ;;  %v2378_v49 = vld [vmem:[%s3136_s1 + $0x1e0] sm:$0xff]  }
  0x10   :  { %2066 = vmatpush3.bf16.msra.mxu0 %v2341_v14  ;;  %v2371_v42 = vld [vmem:[%s3136_s1 + $0x130] sm:$0xff]   ;;  %v2374_v45 = vld [vmem:[%s3136_s1 + $0x1e8] sm:$0xff]   ;;  %v2379_v50 = vld [vmem:[%s3136_s1 + $0x120] sm:$0xff]  }
  0x11   :  { %2094 = vmatpush3.bf16.msra.mxu1 %v2342_v15  ;;  %2067 = vmatprep.subr.bf16.mxu0 %v2343_v16  ;;  %v2372_v43 = vld [vmem:[%s3136_s1 + $0x1b0] sm:$0xff]   ;;  %v2375_v46 = vld [vmem:[%s3136_s1 + $0x128] sm:$0xff]   ;;  %v2380_v51 = vld [vmem:[%s3136_s1 + $0x1a0] sm:$0xff]  }
  0x12   :  { %2095 = vmatprep.subr.bf16.mxu1 %v2344_v17  ;;  %v2376_v47 = vld [vmem:[%s3136_s1 + $0x1a8] sm:$0xff]   ;;  %v2381_v52 = vld [vmem:[%s3137_s0 + $0x94] ss:$72 sps:$4 sm:$0xff]   ;;  %v2385_v55 = vld [vmem:[%s3137_s0 + $0x90] ss:$72 sps:$4 sm:$0xff]  }
  0x13   :  { %v2383_v53 = vld [vmem:[%s3136_s1 + $0x158] sm:$0xff]   ;;  %v2391_v60 = vld [vmem:[%s3136_s1 + $0x150] sm:$0xff]   ;;  %v2395_v0 = vld [vmem:[%s3136_s1 + $0x148] sm:$0xff]  }
  0x14   :  { %2068 = vmatpush3.bf16.msra.mxu0 %v2345_v18  ;;  %v2384_v54 = vld [vmem:[%s3136_s1 + $0x1d8] sm:$0xff]   ;;  %v2392_v61 = vld [vmem:[%s3136_s1 + $0x1d0] sm:$0xff]   ;;  %v2396_v1 = vld [vmem:[%s3136_s1 + $0x1c8] sm:$0xff]  }
  0x15   :  { %2096 = vmatpush3.bf16.msra.mxu1 %v2346_v19  ;;  %2069 = vmatprep.subr.bf16.mxu0 %v2347_v20  ;;  %v2386_v56 = vld [vmem:[%s3136_s1 + $0x118] sm:$0xff]   ;;  %v2393_v62 = vld [vmem:[%s3136_s1 + $0x110] sm:$0xff]   ;;  %v2397_v2 = vld [vmem:[%s3136_s1 + $0x108] sm:$0xff]  }
  0x16   :  { %2097 = vmatprep.subr.bf16.mxu1 %v2348_v21  ;;  %v2387_v57 = vld [vmem:[%s3136_s1 + $0x198] sm:$0xff]   ;;  %v2394_v63 = vld [vmem:[%s3136_s1 + $0x190] sm:$0xff]   ;;  %v2398_v3 = vld [vmem:[%s3136_s1 + $0x188] sm:$0xff]  }
  0x17   :  { %v2388_v58 = vld [vmem:[%s3137_s0 + $0x9c] ss:$72 sps:$4 sm:$0xff]   ;;  %v2390_v59 = vld [vmem:[%s3137_s0 + $0x98] ss:$72 sps:$4 sm:$0xff]   ;;  %v2413_v16 = vld [vmem:[%s3136_s1 + $0x270] sm:$0xff]  }
  0x18   :  { %2070 = vmatpush3.bf16.msra.mxu0 %v2349_v22  ;;  %v2399_v4 = vld [vmem:[%s3136_s1 + $0x140] sm:$0xff]   ;;  %v2403_v8 = vld [vmem:[%s3137_s0 + $0x10] ss:$72 sps:$4 sm:$0xff]   ;;  %v2405_v9 = vld [vmem:[%s3137_s0 + $0x14] ss:$72 sps:$4 sm:$0xff]  }
  0x19   :  { %2098 = vmatpush3.bf16.msra.mxu1 %v2350_v23  ;;  %2071 = vmatprep.subr.bf16.mxu0 %v2351_v24  ;;  %v2400_v5 = vld [vmem:[%s3136_s1 + $0x1c0] sm:$0xff]   ;;  %v2409_v12 = vld [vmem:[%s3136_s1 + $0x278] sm:$0xff]   ;;  %v2414_v17 = vld [vmem:[%s3136_s1 + $0x2f0] sm:$0xff]  }
  0x1a   :  { %2099 = vmatprep.subr.bf16.mxu1 %v2352_v25  ;;  %v2401_v6 = vld [vmem:[%s3136_s1 + $0x100] sm:$0xff]   ;;  %v2410_v13 = vld [vmem:[%s3136_s1 + $0x2f8] sm:$0xff]   ;;  %v2415_v18 = vld [vmem:[%s3136_s1 + $0x230] sm:$0xff]  }
  0x1b   :  { %v2402_v7 = vld [vmem:[%s3136_s1 + $0x180] sm:$0xff]   ;;  %v2411_v14 = vld [vmem:[%s3136_s1 + $0x238] sm:$0xff]   ;;  %v2416_v19 = vld [vmem:[%s3136_s1 + $0x2b0] sm:$0xff]  }
  0x1c   :  { %2072 = vmatpush3.bf16.msra.mxu0 %v2353_v26  ;;  %v2406_v10 = vld [vmem:[%s3137_s0 + $0x18] ss:$72 sps:$4 sm:$0xff]   ;;  %v2408_v11 = vld [vmem:[%s3137_s0 + $0x1c] ss:$72 sps:$4 sm:$0xff]   ;;  %v2420_v22 = vld [vmem:[%s3136_s1 + $0x268] sm:$0xff]  }
  0x1d   :  { %2100 = vmatpush3.bf16.msra.mxu1 %v2354_v27  ;;  %2073 = vmatprep.subr.bf16.mxu0 %v2355_v28  ;;  %v2412_v15 = vld [vmem:[%s3136_s1 + $0x2b8] sm:$0xff]   ;;  %v2417_v20 = vld [vmem:[%s3137_s0 + $0xa4] ss:$72 sps:$4 sm:$0xff]   ;;  %v2419_v21 = vld [vmem:[%s3137_s0 + $0xa0] ss:$72 sps:$4 sm:$0xff]  }
  0x1e   :  { %2101 = vmatprep.subr.bf16.mxu1 %v2356_v29  ;;  %v2421_v23 = vld [vmem:[%s3136_s1 + $0x2e8] sm:$0xff]   ;;  %v2427_v28 = vld [vmem:[%s3136_s1 + $0x260] sm:$0xff]   ;;  %v2432_v33 = vld [vmem:[%s3136_s1 + $0x2d8] sm:$0xff]  }
  0x1f   :  { %v2422_v24 = vld [vmem:[%s3137_s0 + $0xac] ss:$72 sps:$4 sm:$0xff]   ;;  %v2426_v27 = vld [vmem:[%s3137_s0 + $0xa8] ss:$72 sps:$4 sm:$0xff]   ;;  %v2428_v29 = vld [vmem:[%s3136_s1 + $0x2e0] sm:$0xff]  }
  0x20   :  { %2074 = vmatpush3.bf16.msra.mxu0 %v2357_v30  ;;  %v2424_v25 = vld [vmem:[%s3136_s1 + $0x228] sm:$0xff]   ;;  %v2429_v30 = vld [vmem:[%s3136_s1 + $0x220] sm:$0xff]   ;;  %v2434_v35 = vld [vmem:[%s3136_s1 + $0x298] sm:$0xff]  }
  0x21   :  { %2102 = vmatpush3.bf16.msra.mxu1 %v2358_v31  ;;  %2115 = vmatprep.subr.bf16.mxu0 %v2365_v36  ;;  %v2425_v26 = vld [vmem:[%s3136_s1 + $0x2a8] sm:$0xff]   ;;  %v2430_v31 = vld [vmem:[%s3136_s1 + $0x2a0] sm:$0xff]   ;;  %v2435_v36 = vld [vmem:[%s3136_s1 + $0x250] sm:$0xff]  }
  0x22   :  { %2143 = vmatprep.subr.bf16.mxu1 %v2366_v37  ;;  %v2436_v37 = vld [vmem:[%s3136_s1 + $0x2d0] sm:$0xff]  }
  0x23   :  { %1423 = vmatmul.mubr.bf16.vlgmr.msra.gmra.mxu0 %v2359_v32  ;;  %v2431_v32 = vld [vmem:[%s3136_s1 + $0x258] sm:$0xff]  }
  0x24   :  { %1472 = vmatmul.mubr.bf16.vlgmr.msra.gmra.mxu1 %v2362_v34  ;;  %2116 = vmatpush3.bf16.msra.mxu0 %v2367_v38  ;;  %v2433_v34 = vld [vmem:[%s3136_s1 + $0x218] sm:$0xff]   ;;  %v2437_v38 = vld [vmem:[%s3136_s1 + $0x210] sm:$0xff]  }
  0x25   :  { %2144 = vmatpush3.bf16.msra.mxu1 %v2368_v39  ;;  %2117 = vmatprep.subr.bf16.mxu0 %v2369_v40  ;;  %v2438_v39 = vld [vmem:[%s3136_s1 + $0x290] sm:$0xff]   ;;  %v2439_v40 = vld [vmem:[%s3136_s1 + $0x248] sm:$0xff]  }
  0x26   :  { %2145 = vmatprep.subr.bf16.mxu1 %v2370_v41  ;;  %1430 = vmatprep.mubr.bf16.mxu0 %v2381_v52  ;;  %v2440_v41 = vld [vmem:[%s3136_s1 + $0x2c8] sm:$0xff]   ;;  %v2453_v52 = vld [vmem:[%s3136_s1 + $0x378] sm:$0xff]  }
  0x27   :  { %1479 = vmatprep.mubr.bf16.mxu1 %v2388_v58  ;;  %v2459_v58 = vld [vmem:[%s3136_s1 + $0x330] sm:$0xff]  }
  0x28   :  { %2118 = vmatpush3.bf16.msra.mxu0 %v2371_v42  ;;  %v2441_v42 = vld [vmem:[%s3136_s1 + $0x208] sm:$0xff]  }
  0x29   :  { %2146 = vmatpush3.bf16.msra.mxu1 %v2372_v43  ;;  %2119 = vmatprep.subr.bf16.mxu0 %v2373_v44  ;;  %v2442_v43 = vld [vmem:[%s3136_s1 + $0x288] sm:$0xff]   ;;  %v2443_v44 = vld [vmem:[%s3136_s1 + $0x240] sm:$0xff]  }
  0x2a   :  { %2147 = vmatprep.subr.bf16.mxu1 %v2374_v45  ;;  %v2444_v45 = vld [vmem:[%s3136_s1 + $0x2c0] sm:$0xff]  }
  0x2b   :  { %1431 = vmatmul.mubr.bf16.gmra.mxu0 %v2385_v55  ;;  %v2456_v55 = vld [vmem:[%s3136_s1 + $0x3b8] sm:$0xff]  }
  0x2c   :  { %2120 = vmatpush3.bf16.msra.mxu0 %v2375_v46  ;;  %1480 = vmatmul.mubr.bf16.gmra.mxu1 %v2390_v59  ;;  %v2445_v46 = vld [vmem:[%s3136_s1 + $0x200] sm:$0xff]   ;;  %v2460_v59 = vld [vmem:[%s3136_s1 + $0x3b0] sm:$0xff]  }
  0x2d   :  { %2148 = vmatpush3.bf16.msra.mxu1 %v2376_v47  ;;  %2121 = vmatprep.subr.bf16.mxu0 %v2377_v48  ;;  %v2446_v47 = vld [vmem:[%s3136_s1 + $0x280] sm:$0xff]  }
  0x2e   :  { %2149 = vmatprep.subr.bf16.mxu1 %v2378_v49  ;;  %1520 = vmatprep.mubr.bf16.mxu0 %v2405_v9  ;;  %v2447_v48 = vld [vmem:[%s3137_s0 + $0x20] ss:$72 sps:$4 sm:$0xff]   ;;  %v2449_v49 = vld [vmem:[%s3137_s0 + $0x24] ss:$72 sps:$4 sm:$0xff]   ;;  %v2476_v9 = vld [vmem:[%s3136_s1 + $0x3d8] sm:$0xff]  }
  0x2f   :  { %1569 = vmatprep.mubr.bf16.mxu1 %v2408_v11  ;;  %v2478_v11 = vld [vmem:[%s3136_s1 + $0x398] sm:$0xff]  }
  0x30   :  { %2122 = vmatpush3.bf16.msra.mxu0 %v2379_v50  ;;  %v2450_v50 = vld [vmem:[%s3137_s0 + $0x28] ss:$72 sps:$4 sm:$0xff]  }
  0x31   :  { %2150 = vmatpush3.bf16.msra.mxu1 %v2380_v51  ;;  %2123 = vmatprep.subr.bf16.mxu0 %v2383_v53  ;;  %v2452_v51 = vld [vmem:[%s3137_s0 + $0x2c] ss:$72 sps:$4 sm:$0xff]   ;;  %v2454_v53 = vld [vmem:[%s3136_s1 + $0x3f8] sm:$0xff]  }
  0x32   :  { %2151 = vmatprep.subr.bf16.mxu1 %v2384_v54  ;;  %v2455_v54 = vld [vmem:[%s3136_s1 + $0x338] sm:$0xff]  }
  0x34   :  { %2124 = vmatpush3.bf16.msra.mxu0 %v2386_v56  ;;  %v2457_v56 = vld [vmem:[%s3136_s1 + $0x370] sm:$0xff]  }
  0x35   :  { %2152 = vmatpush3.bf16.msra.mxu1 %v2387_v57  ;;  %2125 = vmatprep.subr.bf16.mxu0 %v2391_v60  ;;  %v2458_v57 = vld [vmem:[%s3136_s1 + $0x3f0] sm:$0xff]  }
  0x36   :  { %2153 = vmatprep.subr.bf16.mxu1 %v2392_v61  ;;  %v2461_v60 = vld [vmem:[%s3137_s0 + $0xb4] ss:$72 sps:$4 sm:$0xff]   ;;  %v2463_v61 = vld [vmem:[%s3137_s0 + $0xb0] ss:$72 sps:$4 sm:$0xff]  }
  0x38   :  { %2126 = vmatpush3.bf16.msra.mxu0 %v2393_v62  ;;  %v2464_v62 = vld [vmem:[%s3136_s1 + $0x368] sm:$0xff]  }
  0x39   :  { %2154 = vmatpush3.bf16.msra.mxu1 %v2394_v63  ;;  %2127 = vmatprep.subr.bf16.mxu0 %v2395_v0  ;;  %v2465_v63 = vld [vmem:[%s3136_s1 + $0x3e8] sm:$0xff]   ;;  %v2466_v0 = vld [vmem:[%s3137_s0 + $0xbc] ss:$72 sps:$4 sm:$0xff]  }
  0x3a   :  { %2155 = vmatprep.subr.bf16.mxu1 %v2396_v1  ;;  %v2468_v1 = vld [vmem:[%s3136_s1 + $0x328] sm:$0xff]  }
  0x3c   :  { %2128 = vmatpush3.bf16.msra.mxu0 %v2397_v2  ;;  %v2469_v2 = vld [vmem:[%s3136_s1 + $0x3a8] sm:$0xff]  }
  0x3d   :  { %2156 = vmatpush3.bf16.msra.mxu1 %v2398_v3  ;;  %2129 = vmatprep.subr.bf16.mxu0 %v2399_v4  ;;  %v2470_v3 = vld [vmem:[%s3137_s0 + $0xb8] ss:$72 sps:$4 sm:$0xff]  }
  0x3e   :  { %2157 = vmatprep.subr.bf16.mxu1 %v2400_v5  ;;  %v2471_v4 = vld [vmem:[%s3136_s1 + $0x360] sm:$0xff]  }
  0x3f   :  { %v2472_v5 = vld [vmem:[%s3136_s1 + $0x3e0] sm:$0xff]  }
  0x40   :  { %2130 = vmatpush3.bf16.msra.mxu0 %v2401_v6  ;;  %v2473_v6 = vld [vmem:[%s3136_s1 + $0x320] sm:$0xff]  }
  0x41   :  { %2158 = vmatpush3.bf16.msra.mxu1 %v2402_v7  ;;  %2171 = vmatprep.subr.bf16.mxu0 %v2409_v12  ;;  %v2474_v7 = vld [vmem:[%s3136_s1 + $0x3a0] sm:$0xff]   ;;  %v2479_v12 = vld [vmem:[%s3136_s1 + $0x350] sm:$0xff]  }
  0x42   :  { %2199 = vmatprep.subr.bf16.mxu1 %v2410_v13  ;;  %v2480_v13 = vld [vmem:[%s3136_s1 + $0x3d0] sm:$0xff]  }
  0x43   :  { %1521 = vmatmul.mubr.bf16.vlgmr.msra.gmra.mxu0 %v2403_v8  ;;  %v2475_v8 = vld [vmem:[%s3136_s1 + $0x358] sm:$0xff]  }
  0x44   :  { %1570 = vmatmul.mubr.bf16.vlgmr.msra.gmra.mxu1 %v2406_v10  ;;  %2172 = vmatpush3.bf16.msra.mxu0 %v2411_v14  ;;  %v2477_v10 = vld [vmem:[%s3136_s1 + $0x318] sm:$0xff]   ;;  %v2481_v14 = vld [vmem:[%s3136_s1 + $0x310] sm:$0xff]  }
  0x45   :  { %2200 = vmatpush3.bf16.msra.mxu1 %v2412_v15  ;;  %2173 = vmatprep.subr.bf16.mxu0 %v2413_v16  ;;  %v2482_v15 = vld [vmem:[%s3136_s1 + $0x390] sm:$0xff]   ;;  %v2483_v16 = vld [vmem:[%s3136_s1 + $0x348] sm:$0xff]  }
  0x46   :  { %2201 = vmatprep.subr.bf16.mxu1 %v2414_v17  ;;  %1528 = vmatprep.mubr.bf16.mxu0 %v2417_v20  ;;  %v2484_v17 = vld [vmem:[%s3136_s1 + $0x3c8] sm:$0xff]   ;;  %v2487_v20 = vld [vmem:[%s3136_s1 + $0x340] sm:$0xff]  }
  0x47   :  { %1577 = vmatprep.mubr.bf16.mxu1 %v2422_v24  ;;  %v2491_v24 = vld [vmem:[%s3137_s0 + $0x30] ss:$72 sps:$4 sm:$0xff]  }
  0x48   :  { %2174 = vmatpush3.bf16.msra.mxu0 %v2415_v18  ;;  %v2485_v18 = vld [vmem:[%s3136_s1 + $0x308] sm:$0xff]  }
  0x49   :  { %2202 = vmatpush3.bf16.msra.mxu1 %v2416_v19  ;;  %2175 = vmatprep.subr.bf16.mxu0 %v2420_v22  ;;  %v2486_v19 = vld [vmem:[%s3136_s1 + $0x388] sm:$0xff]   ;;  %v2489_v22 = vld [vmem:[%s3136_s1 + $0x300] sm:$0xff]  }
  0x4a   :  { %2203 = vmatprep.subr.bf16.mxu1 %v2421_v23  ;;  %v2490_v23 = vld [vmem:[%s3136_s1 + $0x380] sm:$0xff]  }
  0x4b   :  { %1529 = vmatmul.mubr.bf16.gmra.mxu0 %v2419_v21  ;;  %v2488_v21 = vld [vmem:[%s3136_s1 + $0x3c0] sm:$0xff]  }
  0x4c   :  { %2176 = vmatpush3.bf16.msra.mxu0 %v2424_v25  ;;  %1578 = vmatmul.mubr.bf16.gmra.mxu1 %v2426_v27  ;;  %v2493_v25 = vld [vmem:[%s3137_s0 + $0x34] ss:$72 sps:$4 sm:$0xff]  }
  0x4d   :  { %2204 = vmatpush3.bf16.msra.mxu1 %v2425_v26  ;;  %2177 = vmatprep.subr.bf16.mxu0 %v2427_v28  ;;  %v2494_v26 = vld [vmem:[%s3137_s0 + $0x38] ss:$72 sps:$4 sm:$0xff]   ;;  %v2496_v27 = vld [vmem:[%s3137_s0 + $0x3c] ss:$72 sps:$4 sm:$0xff]  }
  0x4e   :  { %2205 = vmatprep.subr.bf16.mxu1 %v2428_v29  ;;  %1618 = vmatprep.mubr.bf16.mxu0 %v2449_v49  ;;  %v2497_v28 = vld [vmem:[%s3136_s1 + $0x478] sm:$0xff]   ;;  %v2518_v49 = vld [vmem:[%s3136_s1 + $0x400] sm:$0xff]  }
  0x4f   :  { %1667 = vmatprep.mubr.bf16.mxu1 %v2452_v51  ;;  %v2498_v29 = vld [vmem:[%s3136_s1 + $0x438] sm:$0xff]  }
  0x50   :  { %2178 = vmatpush3.bf16.msra.mxu0 %v2429_v30  ;;  %v2499_v30 = vld [vmem:[%s3136_s1 + $0x470] sm:$0xff]  }
  0x51   :  { %2206 = vmatpush3.bf16.msra.mxu1 %v2430_v31  ;;  %2179 = vmatprep.subr.bf16.mxu0 %v2431_v32  ;;  %v2500_v31 = vld [vmem:[%s3136_s1 + $0x430] sm:$0xff]   ;;  %v2501_v32 = vld [vmem:[%s3137_s0 + $0xc4] ss:$72 sps:$4 sm:$0xff]  }
  0x52   :  { %2207 = vmatprep.subr.bf16.mxu1 %v2432_v33  ;;  %v2503_v33 = vld [vmem:[%s3137_s0 + $0xc0] ss:$72 sps:$4 sm:$0xff]   ;;  %v2522_v51 = vld [vmem:[%s3137_s0 + $0xd0] ss:$72 sps:$4 sm:$0xff]  }
  0x54   :  { %2180 = vmatpush3.bf16.msra.mxu0 %v2433_v34  ;;  %v2504_v34 = vld [vmem:[%s3136_s1 + $0x468] sm:$0xff]  }
  0x55   :  { %2208 = vmatpush3.bf16.msra.mxu1 %v2434_v35  ;;  %2181 = vmatprep.subr.bf16.mxu0 %v2435_v36  ;;  %v2505_v35 = vld [vmem:[%s3137_s0 + $0xcc] ss:$72 sps:$4 sm:$0xff]  }
  0x56   :  { %2209 = vmatprep.subr.bf16.mxu1 %v2436_v37  ;;  %v2507_v36 = vld [vmem:[%s3136_s1 + $0x428] sm:$0xff]  }
  0x57   :  { %v2508_v37 = vld [vmem:[%s3137_s0 + $0xc8] ss:$72 sps:$4 sm:$0xff]  }
  0x58   :  { %2182 = vmatpush3.bf16.msra.mxu0 %v2437_v38  ;;  %v2509_v38 = vld [vmem:[%s3136_s1 + $0x460] sm:$0xff]  }
  0x59   :  { %2210 = vmatpush3.bf16.msra.mxu1 %v2438_v39  ;;  %2183 = vmatprep.subr.bf16.mxu0 %v2439_v40  ;;  %v2510_v39 = vld [vmem:[%s3136_s1 + $0x420] sm:$0xff]   ;;  %v2511_v40 = vld [vmem:[%s3136_s1 + $0x458] sm:$0xff]  }
  0x5a   :  { %2211 = vmatprep.subr.bf16.mxu1 %v2440_v41  ;;  %v2512_v41 = vld [vmem:[%s3136_s1 + $0x418] sm:$0xff]  }
  0x5c   :  { %2184 = vmatpush3.bf16.msra.mxu0 %v2441_v42  ;;  %v2513_v42 = vld [vmem:[%s3136_s1 + $0x450] sm:$0xff]  }
  0x5d   :  { %2212 = vmatpush3.bf16.msra.mxu1 %v2442_v43  ;;  %2185 = vmatprep.subr.bf16.mxu0 %v2443_v44  ;;  %v2514_v43 = vld [vmem:[%s3136_s1 + $0x410] sm:$0xff]   ;;  %v2521_v44 = vld [vmem:[%s3137_s0 + $0x44] ss:$72 sps:$4 sm:$0xff]  }
  0x5e   :  { %2213 = vmatprep.subr.bf16.mxu1 %v2444_v45  ;;  %v2515_v45 = vld [vmem:[%s3136_s1 + $0x448] sm:$0xff]  }
  0x60   :  { %2186 = vmatpush3.bf16.msra.mxu0 %v2445_v46  ;;  %v2524_v46 = vld [vmem:[%s3137_s0 + $0xd4] ss:$72 sps:$4 sm:$0xff]  }
  0x61   :  { %2214 = vmatpush3.bf16.msra.mxu1 %v2446_v47  ;;  %2227 = vmatprep.subr.bf16.mxu0 %v2453_v52  ;;  %v2516_v47 = vld [vmem:[%s3136_s1 + $0x408] sm:$0xff]  }
  0x62   :  { %2255 = vmatprep.subr.bf16.mxu1 %v2454_v53 }
  0x63   :  { %1619 = vmatmul.mubr.bf16.vlgmr.msra.gmra.mxu0 %v2447_v48  ;;  %v2517_v48 = vld [vmem:[%s3136_s1 + $0x440] sm:$0xff]  }
  0x64   :  { %1668 = vmatmul.mubr.bf16.vlgmr.msra.gmra.mxu1 %v2450_v50  ;;  %2228 = vmatpush3.bf16.msra.mxu0 %v2455_v54  ;;  %v2519_v50 = vld [vmem:[%s3137_s0 + $0x40] ss:$72 sps:$4 sm:$0xff]  }
  0x65   :  { %2256 = vmatpush3.bf16.msra.mxu1 %v2456_v55  ;;  %2229 = vmatprep.subr.bf16.mxu0 %v2457_v56 }
  0x66   :  { %2257 = vmatprep.subr.bf16.mxu1 %v2458_v57  ;;  %1626 = vmatprep.mubr.bf16.mxu0 %v2461_v60 }
  0x67   :  { %1675 = vmatprep.mubr.bf16.mxu1 %v2466_v0 }
  0x68   :  { %2230 = vmatpush3.bf16.msra.mxu0 %v2459_v58 }
  0x69   :  { %2258 = vmatpush3.bf16.msra.mxu1 %v2460_v59  ;;  %2231 = vmatprep.subr.bf16.mxu0 %v2464_v62 }
  0x6a   :  { %2259 = vmatprep.subr.bf16.mxu1 %v2465_v63 }
  0x6b   :  { %1627 = vmatmul.mubr.bf16.gmra.mxu0 %v2463_v61 }
  0x6c   :  { %2232 = vmatpush3.bf16.msra.mxu0 %v2468_v1  ;;  %1676 = vmatmul.mubr.bf16.gmra.mxu1 %v2470_v3 }
  0x6d   :  { %2260 = vmatpush3.bf16.msra.mxu1 %v2469_v2  ;;  %2233 = vmatprep.subr.bf16.mxu0 %v2471_v4 }
  0x6e   :  { %2261 = vmatprep.subr.bf16.mxu1 %v2472_v5  ;;  %1716 = vmatprep.mubr.bf16.mxu0 %v2493_v25 }
  0x6f   :  { %1765 = vmatprep.mubr.bf16.mxu1 %v2496_v27 }
  0x70   :  { %2234 = vmatpush3.bf16.msra.mxu0 %v2473_v6 }
  0x71   :  { %2262 = vmatpush3.bf16.msra.mxu1 %v2474_v7  ;;  %2235 = vmatprep.subr.bf16.mxu0 %v2475_v8 }
  0x72   :  { %2263 = vmatprep.subr.bf16.mxu1 %v2476_v9 }
  0x74   :  { %2236 = vmatpush3.bf16.msra.mxu0 %v2477_v10 }
  0x75   :  { %2264 = vmatpush3.bf16.msra.mxu1 %v2478_v11  ;;  %2237 = vmatprep.subr.bf16.mxu0 %v2479_v12 }
  0x76   :  { %2265 = vmatprep.subr.bf16.mxu1 %v2480_v13 }
  0x78   :  { %2238 = vmatpush3.bf16.msra.mxu0 %v2481_v14 }
  0x79   :  { %2266 = vmatpush3.bf16.msra.mxu1 %v2482_v15  ;;  %2239 = vmatprep.subr.bf16.mxu0 %v2483_v16 }
  0x7a   :  { %2267 = vmatprep.subr.bf16.mxu1 %v2484_v17 }
  0x7c   :  { %2240 = vmatpush3.bf16.msra.mxu0 %v2485_v18 }
  0x7d   :  { %2268 = vmatpush3.bf16.msra.mxu1 %v2486_v19  ;;  %2241 = vmatprep.subr.bf16.mxu0 %v2487_v20 }
  0x7e   :  { %2269 = vmatprep.subr.bf16.mxu1 %v2488_v21 }
  0x80   :  { %2242 = vmatpush3.bf16.msra.mxu0 %v2489_v22 }
  0x81   :  { %2270 = vmatpush3.bf16.msra.mxu1 %v2490_v23  ;;  %2283 = vmatprep.subr.bf16.mxu0 %v2497_v28 }
  0x82   :  { %2311 = vmatprep.subr.bf16.mxu1 %v2497_v28 }
  0x83   :  { %1717 = vmatmul.mubr.bf16.vlgmr.msra.gmra.mxu0 %v2491_v24 }
  0x84   :  { %1766 = vmatmul.mubr.bf16.vlgmr.msra.gmra.mxu1 %v2494_v26  ;;  %2284 = vmatpush3.bf16.msra.mxu0 %v2498_v29 }
  0x85   :  { %2319 = vmatpush3.bf16.msra.mxu1 %v2498_v29  ;;  %2285 = vmatprep.subr.bf16.mxu0 %v2499_v30 }
  0x86   :  { %2312 = vmatprep.subr.bf16.mxu1 %v2499_v30  ;;  %1724 = vmatprep.mubr.bf16.mxu0 %v2501_v32 }
  0x87   :  { %1773 = vmatprep.mubr.bf16.mxu1 %v2505_v35 }
  0x88   :  { %2286 = vmatpush3.bf16.msra.mxu0 %v2500_v31 }
  0x89   :  { %2320 = vmatpush3.bf16.msra.mxu1 %v2500_v31  ;;  %2287 = vmatprep.subr.bf16.mxu0 %v2504_v34 }
  0x8a   :  { %2313 = vmatprep.subr.bf16.mxu1 %v2504_v34 }
  0x8b   :  { %1725 = vmatmul.mubr.bf16.gmra.mxu0 %v2503_v33 }
  0x8c   :  { %2288 = vmatpush3.bf16.msra.mxu0 %v2507_v36  ;;  %1774 = vmatmul.mubr.bf16.gmra.mxu1 %v2508_v37 }
  0x8d   :  { %2321 = vmatpush3.bf16.msra.mxu1 %v2507_v36  ;;  %2289 = vmatprep.subr.bf16.mxu0 %v2509_v38 }
  0x8e   :  { %2314 = vmatprep.subr.bf16.mxu1 %v2509_v38  ;;  %1814 = vmatprep.mubr.bf16.mxu0 %v2521_v44 }
  0x8f   :  { %1822 = vmatprep.mubr.bf16.mxu1 %v2524_v46 }
  0x90   :  { %2290 = vmatpush3.bf16.msra.mxu0 %v2510_v39 }
  0x91   :  { %2322 = vmatpush3.bf16.msra.mxu1 %v2510_v39  ;;  %2291 = vmatprep.subr.bf16.mxu0 %v2511_v40 }
  0x92   :  { %2315 = vmatprep.subr.bf16.mxu1 %v2511_v40 }
  0x94   :  { %2292 = vmatpush3.bf16.msra.mxu0 %v2512_v41 }
  0x95   :  { %2323 = vmatpush3.bf16.msra.mxu1 %v2512_v41  ;;  %2293 = vmatprep.subr.bf16.mxu0 %v2513_v42 }
  0x96   :  { %2316 = vmatprep.subr.bf16.mxu1 %v2513_v42  ;;  %v1859_v42 = vld [vmem:[%s3138_s2] ss:$0 sm:$0xff] }
  0x98   :  { %2294 = vmatpush3.bf16.msra.mxu0 %v2514_v43 }
  0x99   :  { %2324 = vmatpush3.bf16.msra.mxu1 %v2514_v43  ;;  %2295 = vmatprep.subr.bf16.mxu0 %v2515_v45 }
  0x9a   :  { %2317 = vmatprep.subr.bf16.mxu1 %v2515_v45 }
  0x9c   :  { %2296 = vmatpush3.bf16.msra.mxu0 %v2516_v47 }
  0x9d   :  { %2325 = vmatpush3.bf16.msra.mxu1 %v2516_v47  ;;  %2297 = vmatprep.subr.bf16.mxu0 %v2517_v48 }
  0x9e   :  { %2318 = vmatprep.subr.bf16.mxu1 %v2517_v48 }
  0xa0   :  { %2298 = vmatpush3.bf16.msra.mxu0 %v2518_v49 }
  0xa1   :  { %2326 = vmatpush3.bf16.msra.mxu1 %v2518_v49 }
  0xa3   :  { %1815 = vmatmul.mubr.bf16.vlgmr.msra.gmra.mxu0 %v2519_v50 }
  0xa4   :  { %1823 = vmatmul.mubr.bf16.vlgmr.msra.gmra.mxu1 %v2522_v51 }
  0xe3   :  { %v2075_v52 = vpop.f32.mrf.mxu0 }
  0xe4   :  { %v2103_v54 = vpop.f32.mrf.mxu1 }
  0xe5   :  { %v2076_v53 = vpop.f32.mrf.mxu0 }
  0xe6   :  { %v2104_v56 = vpop.f32.mrf.mxu1  ;;  %v2077_v41 = vadd.f32 %v2076_v53, %v2075_v52 }
  0xe7   :  { %v2078_v55 = vpop.f32.mrf.mxu0  ;;  %v2105_v51 = vadd.f32 %v2104_v56, %v2103_v54 }
  0xe8   :  { %v3085_v59 = vpop.f32.mrf.mxu1  ;;  %v1425_v48 = vadd.f32 %v2077_v41, %v1859_v42 }
  0xe9   :  { %v2079_v57 = vpop.f32.mrf.mxu0 }
  0xea   :  { %v3087_v61 = vpop.f32.mrf.mxu1  ;;  %v2080_v44 = vadd.f32 %v2079_v57, %v2078_v55 }
  0xeb   :  { %v2081_v58 = vpop.f32.mrf.mxu0  ;;  %v2108_v55 = vadd.f32 %v3087_v61, %v3085_v59 }
  0xec   :  { %v2109_v62 = vpop.f32.mrf.mxu1 }
  0xed   :  { %v2082_v60 = vpop.f32.mrf.mxu0 }
  0xee   :  { %v2110_v0 = vpop.f32.mrf.mxu1  ;;  %v2083_v43 = vadd.f32 %v2082_v60, %v2081_v58 }
  0xef   :  { %v2084_v63 = vpop.f32.mrf.mxu0  ;;  %v2111_v50 = vadd.f32 %v2110_v0, %v2109_v62 }
  0xf0   :  { %v2112_v3 = vpop.f32.mrf.mxu1  ;;  %v1433_v49 = vadd.f32 %v2083_v43, %v1859_v42 }
  0xf1   :  { %v2085_v1 = vpop.f32.mrf.mxu0 }
  0xf2   :  { %v2113_v5 = vpop.f32.mrf.mxu1  ;;  %v2086_v47 = vadd.f32 %v2085_v1, %v2084_v63  ;;  %v1482_v60 = vadd.f32 %v2111_v50, %v1433_v49 }
  0xf3   :  { %v2114_v53 = vadd.f32 %v2113_v5, %v2112_v3 }
  0xf4   :  { %v1436_v52 = vadd.f32 %v2086_v47, %v1859_v42 }
  0xf6   :  { %v1485_v54 = vadd.f32 %v2114_v53, %v1436_v52 }
 0x103   :  { %v2131_v2 = vpop.f32.mrf.mxu0 }
 0x104   :  { %v3089_v6 = vpop.f32.mrf.mxu1 }
 0x105   :  { %v2132_v4 = vpop.f32.mrf.mxu0 }
 0x106   :  { %v3091_v8 = vpop.f32.mrf.mxu1 }
 0x107   :  { %v2134_v7 = vpop.f32.mrf.mxu0 }
 0x108   :  { %v3093_v10 = vpop.f32.mrf.mxu1 }
 0x109   :  { %v2135_v9 = vpop.f32.mrf.mxu0 }
 0x10a   :  { %v3095_v12 = vpop.f32.mrf.mxu1  ;;  %v2136_v57 = vadd.f32 %v2135_v9, %v2134_v7 }
 0x10b   :  { %v2137_v11 = vpop.f32.mrf.mxu0  ;;  %v2164_v61 = vadd.f32 %v3095_v12, %v3093_v10 }
 0x10c   :  { %v2165_v14 = vpop.f32.mrf.mxu1 }
 0x10d   :  { %v2138_v13 = vpop.f32.mrf.mxu0 }
 0x10e   :  { %v2166_v16 = vpop.f32.mrf.mxu1 }
 0x10f   :  { %v2140_v15 = vpop.f32.mrf.mxu0  ;;  %v2167_v0 = vadd.f32 %v2166_v16, %v2165_v14 }
 0x110   :  { %v2168_v18 = vpop.f32.mrf.mxu1 }
 0x111   :  { %v2141_v17 = vpop.f32.mrf.mxu0 }
 0x112   :  { %v2169_v20 = vpop.f32.mrf.mxu1  ;;  %v2142_v63 = vadd.f32 %v2141_v17, %v2140_v15 }
 0x123   :  { %v2187_v19 = vpop.f32.mrf.mxu0 }
 0x124   :  { %v3097_v22 = vpop.f32.mrf.mxu1 }
 0x125   :  { %v2188_v21 = vpop.f32.mrf.mxu0  ;;  %3140 = vst [vmem:[#allocation2_spill] sm:$0xff] %v3097_v22  ;;  %v1474_v22 = vadd.f32 %v2105_v51, %v1425_v48 }
 0x126   :  { %v3099_v24 = vpop.f32.mrf.mxu1  ;;  %v2189_v3 = vadd.f32 %v2188_v21, %v2187_v19 }
 0x127   :  { %v2190_v23 = vpop.f32.mrf.mxu0  ;;  %3141 = vst [vmem:[#allocation3_spill] sm:$0xff] %v3099_v24  ;;  %v2139_v24 = vadd.f32 %v2138_v13, %v2137_v11  ;;  %v1534_v11 = vadd.f32 %v2142_v63, %v1485_v54  ;;  %v2170_v13 = vadd.f32 %v2169_v20, %v2168_v18 }
 0x128   :  { %v3101_v26 = vpop.f32.mrf.mxu1 }
 0x129   :  { %v2191_v25 = vpop.f32.mrf.mxu0  ;;  %3142 = vst [vmem:[#allocation4_spill] sm:$0xff] %v3101_v26  ;;  %v1531_v56 = vadd.f32 %v2139_v24, %v1482_v60  ;;  %v1583_v16 = vadd.f32 %v2170_v13, %v1534_v11 }
 0x12a   :  { %v3103_v28 = vpop.f32.mrf.mxu1  ;;  %v2192_v7 = vadd.f32 %v2191_v25, %v2190_v23 }
 0x12b   :  { %v2193_v27 = vpop.f32.mrf.mxu0  ;;  %3143 = vst [vmem:[#allocation5_spill] sm:$0xff] %v3103_v28  ;;  %v2133_v28 = vadd.f32 %v2132_v4, %v2131_v2  ;;  %v2161_v2 = vadd.f32 %v3091_v8, %v3089_v6  ;;  %v1580_v15 = vadd.f32 %v2167_v0, %v1531_v56 }
 0x12c   :  { %v2221_v30 = vpop.f32.mrf.mxu1  ;;  %v3146_v8 = vld [vmem:[#allocation2_spill] sm:$0xff] }
 0x12d   :  { %v2194_v29 = vpop.f32.mrf.mxu0  ;;  %v1523_v41 = vadd.f32 %v2133_v28, %v1474_v22 }
 0x12e   :  { %v2222_v32 = vpop.f32.mrf.mxu1  ;;  %v3147_v19 = vld [vmem:[#allocation3_spill] sm:$0xff] }
 0x12f   :  { %v2196_v31 = vpop.f32.mrf.mxu0  ;;  %v1572_v59 = vadd.f32 %v2161_v2, %v1523_v41  ;;  %v2223_v6 = vadd.f32 %v2222_v32, %v2221_v30  ;;  %v2217_v21 = vadd.f32 %v3147_v19, %v3146_v8 }
 0x130   :  { %v2224_v34 = vpop.f32.mrf.mxu1  ;;  %v3148_v12 = vld [vmem:[#allocation4_spill] sm:$0xff] }
 0x131   :  { %v2197_v33 = vpop.f32.mrf.mxu0  ;;  %v1621_v24 = vadd.f32 %v2189_v3, %v1572_v59 }
 0x132   :  { %v2225_v36 = vpop.f32.mrf.mxu1  ;;  %v2198_v17 = vadd.f32 %v2197_v33, %v2196_v31  ;;  %v3149_v23 = vld [vmem:[#allocation5_spill] sm:$0xff] }
 0x133   :  { %v1670_v10 = vadd.f32 %v2217_v21, %v1621_v24  ;;  %v2220_v25 = vadd.f32 %v3149_v23, %v3148_v12 }
 0x143   :  { %v2243_v35 = vpop.f32.mrf.mxu0 }
 0x144   :  { %v3105_v37 = vpop.f32.mrf.mxu1 }
 0x145   :  { %3144 = vst [vmem:[#allocation6_spill] sm:$0xff] %v3105_v37  ;;  %v2244_v38 = vpop.f32.mrf.mxu0  ;;  %v1428_v37 = vadd.f32 %v2080_v44, %v1859_v42  ;;  %v2195_v42 = vadd.f32 %v2194_v29, %v2193_v27  ;;  %v1632_v27 = vadd.f32 %v2198_v17, %v1583_v16  ;;  %v2226_v29 = vadd.f32 %v2225_v36, %v2224_v34 }
 0x146   :  { %v3107_v39 = vpop.f32.mrf.mxu1  ;;  %v2245_v18 = vadd.f32 %v2244_v38, %v2243_v35 }
 0x147   :  { %3145 = vst [vmem:[#allocation7_spill] sm:$0xff] %v3107_v39  ;;  %v2246_v40 = vpop.f32.mrf.mxu0  ;;  %v1477_v1 = vadd.f32 %v2108_v55, %v1428_v37  ;;  %v1629_v28 = vadd.f32 %v2195_v42, %v1580_v15  ;;  %v1681_v50 = vadd.f32 %v2226_v29, %v1632_v27 }
 0x148   :  { %v3112_v45 = vpop.f32.mrf.mxu1  ;;  %v1719_v30 = vadd.f32 %v2245_v18, %v1670_v10 }
 0x149   :  { %v2247_v46 = vpop.f32.mrf.mxu0  ;;  %v1526_v4 = vadd.f32 %v2136_v57, %v1477_v1  ;;  %v1678_v44 = vadd.f32 %v2223_v6, %v1629_v28 }
 0x14a   :  { %v3114_v26 = vpop.f32.mrf.mxu1  ;;  %v2248_v31 = vadd.f32 %v2247_v46, %v2246_v40 }
 0x14b   :  { %v2249_v39 = vpop.f32.mrf.mxu0  ;;  %v1575_v22 = vadd.f32 %v2164_v61, %v1526_v4  ;;  %v2276_v1 = vadd.f32 %v3114_v26, %v3112_v45 }
 0x14c   :  { %v2277_v58 = vpop.f32.mrf.mxu1  ;;  %v3150_v38 = vld [vmem:[#allocation6_spill] sm:$0xff] }
 0x14d   :  { %v2250_v62 = vpop.f32.mrf.mxu0  ;;  %v1624_v37 = vadd.f32 %v2192_v7, %v1575_v22 }
 0x14e   :  { %v2278_v5 = vpop.f32.mrf.mxu1  ;;  %v2251_v43 = vadd.f32 %v2250_v62, %v2249_v39  ;;  %v3151_v53 = vld [vmem:[#allocation7_spill] sm:$0xff] }
 0x14f   :  { %v2252_v9 = vpop.f32.mrf.mxu0  ;;  %v1673_v49 = vadd.f32 %v2220_v25, %v1624_v37  ;;  %v2279_v52 = vadd.f32 %v2278_v5, %v2277_v58  ;;  %v2273_v34 = vadd.f32 %v3151_v53, %v3150_v38 }
 0x150   :  { %v2280_v14 = vpop.f32.mrf.mxu1  ;;  %v1727_v51 = vadd.f32 %v2251_v43, %v1678_v44 }
 0x151   :  { %v2253_v20 = vpop.f32.mrf.mxu0  ;;  %v1722_v36 = vadd.f32 %v2248_v31, %v1673_v49  ;;  %v1768_v63 = vadd.f32 %v2273_v34, %v1719_v30 }
 0x152   :  { %v2281_v33 = vpop.f32.mrf.mxu1  ;;  %v2254_v47 = vadd.f32 %v2253_v20, %v2252_v9  ;;  %v1776_v62 = vadd.f32 %v2279_v52, %v1727_v51 }
 0x153   :  { %v2282_v60 = vadd.f32 %v2281_v33, %v2280_v14  ;;  %v1771_v56 = vadd.f32 %v2276_v1, %v1722_v36 }
 0x154   :  { %v1730_v57 = vadd.f32 %v2254_v47, %v1681_v50 }
 0x156   :  { %v1779_v4 = vadd.f32 %v2282_v60, %v1730_v57 }
 0x163   :  { %v2299_v48 = vpop.f32.mrf.mxu0 }
 0x164   :  { %v2305_v32 = vpop.f32.mrf.mxu1 }
 0x165   :  { %v2300_v35 = vpop.f32.mrf.mxu0 }
 0x166   :  { %v2301_v39 = vadd.f32 %v2300_v35, %v2299_v48  ;;  %v2306_v55 = vpop.f32.mrf.mxu1 }
 0x167   :  { %v2307_v40 = vadd.f32 %v2306_v55, %v2305_v32  ;;  %v2302_v46 = vpop.f32.mrf.mxu0 }
 0x168   :  { %v2308_v41 = vpop.f32.mrf.mxu1  ;;  %v1817_v58 = vadd.f32 %v2301_v39, %v1768_v63 }
 0x169   :  { %v2303_v54 = vpop.f32.mrf.mxu0  ;;  %v1825_v3 = vadd.f32 %v2307_v40, %v1776_v62 }
 0x16a   :  { %v2304_v0 = vadd.f32 %v2303_v54, %v2302_v46  ;;  %v2309_v2 = vpop.f32.mrf.mxu1  ;;  %v1831_v42 = vmax.f32 %v1817_v58, 0.0 }
 0x16b   :  { %v2310_v5 = vadd.f32 %v2309_v2, %v2308_v41  ;;  %v1833_v61 = vmax.f32 %v1825_v3, 0.0 }
 0x16c   :  { %v1820_v11 = vadd.f32 %v2304_v0, %v1771_v56 }
 0x16d   :  { %v1828_v13 = vadd.f32 %v2310_v5, %v1779_v4 }
 0x16e   :  { %v1832_v59 = vmax.f32 %v1820_v11, 0.0 }
 0x16f   :  { %v1834_v7 = vmax.f32 %v1828_v13, 0.0 }
 0x170   :  { %v2051_v9 = vpack.c.bf16 %v1832_v59, %v1831_v42 }
 0x171   :  { %v2056_v15 = vpack.c.bf16 %v1834_v7, %v1833_v61 }
 0x172   :  { %2052 = vst [vmem:[%s3139_s3] sm:$0xff] %v2051_v9  }
 0x173   :  { %2058 = vst [vmem:[%s3139_s3 + $0x8] sm:$0xff] %v2056_v15  }

// kernel: mwt_forward.14
= control target key start
LH: loop header
LB: loop body
LE: loop exit
PB: predicated region body
PF: predicated region fallthrough
CT: control target
= control target key end

     0   :  { %s1632_s1 = inlined_call_operand.vmem [shape: bf16[1152,128], index: 1, kind: input, shape index: {}]   ;;  %s1633_s0 = inlined_call_operand.vmem [shape: bf16[32,1152], index: 0, kind: input, shape index: {}]   ;;  %s1634_s2 = inlined_call_operand.vmem [shape: f32[1,128], index: 2, kind: input, shape index: {}]   ;;  %s1635_s3 = inlined_call_operand.vmem [shape: bf16[32,128], index: 3, kind: output, shape index: {}]  }
   0x1   :  { %v1235_v0 = vld [vmem:[%s1632_s1 + $0x78] sm:$0xff]   ;;  %v1239_v4 = vld [vmem:[%s1632_s1 + $0x70] sm:$0xff]   ;;  %v1243_v8 = vld [vmem:[%s1632_s1 + $0x68] sm:$0xff]  }
   0x2   :  { %v1236_v1 = vld [vmem:[%s1632_s1 + $0x38] sm:$0xff]   ;;  %1093 = vmatprep.subr.bf16.mxu0 %v1235_v0  ;;  %v1240_v5 = vld [vmem:[%s1632_s1 + $0x30] sm:$0xff]   ;;  %v1244_v9 = vld [vmem:[%s1632_s1 + $0x28] sm:$0xff]  }
   0x3   :  { %v1237_v2 = vld [vmem:[%s1632_s1 + $0xf8] sm:$0xff]   ;;  %1094 = vmatpush3.bf16.msra.mxu0 %v1236_v1  ;;  %v1241_v6 = vld [vmem:[%s1632_s1 + $0xf0] sm:$0xff]   ;;  %v1245_v10 = vld [vmem:[%s1632_s1 + $0xe8] sm:$0xff]  }
   0x4   :  { %v1238_v3 = vld [vmem:[%s1632_s1 + $0xb8] sm:$0xff]   ;;  %1121 = vmatprep.subr.bf16.mxu1 %v1237_v2  ;;  %1095 = vmatprep.subr.bf16.mxu0 %v1239_v4  ;;  %v1242_v7 = vld [vmem:[%s1632_s1 + $0xb0] sm:$0xff]   ;;  %v1246_v11 = vld [vmem:[%s1632_s1 + $0xa8] sm:$0xff]  }
   0x5   :  { %1122 = vmatpush3.bf16.msra.mxu1 %v1238_v3  ;;  %v1247_v12 = vld [vmem:[%s1632_s1 + $0x60] sm:$0xff]   ;;  %v1251_v16 = vld [vmem:[%s1632_s1 + $0x58] sm:$0xff]   ;;  %v1255_v20 = vld [vmem:[%s1632_s1 + $0x50] sm:$0xff]  }
   0x6   :  { %1123 = vmatprep.subr.bf16.mxu1 %v1241_v6  ;;  %v1248_v13 = vld [vmem:[%s1632_s1 + $0x20] sm:$0xff]   ;;  %v1252_v17 = vld [vmem:[%s1632_s1 + $0x18] sm:$0xff]   ;;  %v1256_v21 = vld [vmem:[%s1632_s1 + $0x10] sm:$0xff]  }
   0x7   :  { %1096 = vmatpush3.bf16.msra.mxu0 %v1240_v5  ;;  %v1249_v14 = vld [vmem:[%s1632_s1 + $0xe0] sm:$0xff]   ;;  %v1253_v18 = vld [vmem:[%s1632_s1 + $0xd8] sm:$0xff]   ;;  %v1257_v22 = vld [vmem:[%s1632_s1 + $0xd0] sm:$0xff]  }
   0x8   :  { %1097 = vmatprep.subr.bf16.mxu0 %v1243_v8  ;;  %v1250_v15 = vld [vmem:[%s1632_s1 + $0xa0] sm:$0xff]   ;;  %v1254_v19 = vld [vmem:[%s1632_s1 + $0x98] sm:$0xff]   ;;  %v1258_v23 = vld [vmem:[%s1632_s1 + $0x90] sm:$0xff]  }
   0x9   :  { %1124 = vmatpush3.bf16.msra.mxu1 %v1242_v7  ;;  %v1259_v24 = vld [vmem:[%s1632_s1 + $0x48] sm:$0xff]   ;;  %v1263_v28 = vld [vmem:[%s1632_s1 + $0x40] sm:$0xff]   ;;  %v1270_v34 = vld [vmem:[%s1632_s1 + $0x178] sm:$0xff]  }
   0xa   :  { %1125 = vmatprep.subr.bf16.mxu1 %v1245_v10  ;;  %v1260_v25 = vld [vmem:[%s1632_s1 + $0x8] sm:$0xff]   ;;  %v1264_v29 = vld [vmem:[%s1632_s1] sm:$0xff]   ;;  %v1274_v37 = vld [vmem:[%s1632_s1 + $0x138] sm:$0xff]  }
   0xb   :  { %1098 = vmatpush3.bf16.msra.mxu0 %v1244_v9  ;;  %v1261_v26 = vld [vmem:[%s1632_s1 + $0xc8] sm:$0xff]   ;;  %v1265_v30 = vld [vmem:[%s1632_s1 + $0xc0] sm:$0xff]   ;;  %v1275_v38 = vld [vmem:[%s1632_s1 + $0x1f8] sm:$0xff]  }
   0xc   :  { %1099 = vmatprep.subr.bf16.mxu0 %v1247_v12  ;;  %v1262_v27 = vld [vmem:[%s1632_s1 + $0x88] sm:$0xff]   ;;  %v1266_v31 = vld [vmem:[%s1633_s0] ss:$36 sps:$4 sm:$0xff]   ;;  %v1276_v39 = vld [vmem:[%s1632_s1 + $0x1b8] sm:$0xff]  }
   0xd   :  { %1126 = vmatpush3.bf16.msra.mxu1 %v1246_v11  ;;  %v1268_v32 = vld [vmem:[%s1633_s0 + $0x4] ss:$36 sps:$4 sm:$0xff]   ;;  %v1273_v36 = vld [vmem:[%s1633_s0 + $0xc] ss:$36 sps:$4 sm:$0xff]   ;;  %v1289_v52 = vld [vmem:[%s1632_s1 + $0x158] sm:$0xff]  }
   0xe   :  { %1127 = vmatprep.subr.bf16.mxu1 %v1249_v14  ;;  %v1269_v33 = vld [vmem:[%s1632_s1 + $0x80] sm:$0xff]   ;;  %742 = vmatprep.mubr.bf16.mxu0 %v1268_v32  ;;  %v1271_v35 = vld [vmem:[%s1633_s0 + $0x8] ss:$36 sps:$4 sm:$0xff]   ;;  %v1277_v40 = vld [vmem:[%s1632_s1 + $0x170] sm:$0xff]  }
   0xf   :  { %1100 = vmatpush3.bf16.msra.mxu0 %v1248_v13  ;;  %791 = vmatprep.mubr.bf16.mxu1 %v1273_v36  ;;  %v1278_v41 = vld [vmem:[%s1632_s1 + $0x130] sm:$0xff]   ;;  %v1281_v44 = vld [vmem:[%s1632_s1 + $0x168] sm:$0xff]   ;;  %v1285_v48 = vld [vmem:[%s1632_s1 + $0x160] sm:$0xff]  }
  0x10   :  { %1101 = vmatprep.subr.bf16.mxu0 %v1251_v16  ;;  %v1279_v42 = vld [vmem:[%s1632_s1 + $0x1f0] sm:$0xff]   ;;  %v1282_v45 = vld [vmem:[%s1632_s1 + $0x128] sm:$0xff]   ;;  %v1286_v49 = vld [vmem:[%s1632_s1 + $0x120] sm:$0xff]  }
  0x11   :  { %1128 = vmatpush3.bf16.msra.mxu1 %v1250_v15  ;;  %v1280_v43 = vld [vmem:[%s1632_s1 + $0x1b0] sm:$0xff]   ;;  %v1283_v46 = vld [vmem:[%s1632_s1 + $0x1e8] sm:$0xff]   ;;  %v1287_v50 = vld [vmem:[%s1632_s1 + $0x1e0] sm:$0xff]  }
  0x12   :  { %1129 = vmatprep.subr.bf16.mxu1 %v1253_v18  ;;  %v1284_v47 = vld [vmem:[%s1632_s1 + $0x1a8] sm:$0xff]   ;;  %v1288_v51 = vld [vmem:[%s1632_s1 + $0x1a0] sm:$0xff]   ;;  %v1290_v53 = vld [vmem:[%s1632_s1 + $0x118] sm:$0xff]  }
  0x13   :  { %1102 = vmatpush3.bf16.msra.mxu0 %v1252_v17  ;;  %v1291_v54 = vld [vmem:[%s1633_s0 + $0x4c] ss:$36 sps:$4 sm:$0xff]   ;;  %v1293_v55 = vld [vmem:[%s1632_s1 + $0x1d8] sm:$0xff]   ;;  %v1307_v4 = vld [vmem:[%s1632_s1 + $0x140] sm:$0xff]  }
  0x14   :  { %1103 = vmatprep.subr.bf16.mxu0 %v1255_v20  ;;  %v1294_v56 = vld [vmem:[%s1633_s0 + $0x48] ss:$36 sps:$4 sm:$0xff]   ;;  %v1295_v57 = vld [vmem:[%s1632_s1 + $0x198] sm:$0xff]   ;;  %v1298_v59 = vld [vmem:[%s1632_s1 + $0x150] sm:$0xff]  }
  0x15   :  { %1130 = vmatpush3.bf16.msra.mxu1 %v1254_v19  ;;  %v1296_v58 = vld [vmem:[%s1633_s0 + $0x54] ss:$36 sps:$4 sm:$0xff]   ;;  %v1303_v0 = vld [vmem:[%s1632_s1 + $0x148] sm:$0xff]   ;;  %v1308_v5 = vld [vmem:[%s1632_s1 + $0x100] sm:$0xff]  }
  0x16   :  { %1131 = vmatprep.subr.bf16.mxu1 %v1257_v22  ;;  %v1299_v60 = vld [vmem:[%s1633_s0 + $0x50] ss:$36 sps:$4 sm:$0xff]   ;;  %v1304_v1 = vld [vmem:[%s1632_s1 + $0x108] sm:$0xff]   ;;  %v1309_v6 = vld [vmem:[%s1632_s1 + $0x1c0] sm:$0xff]  }
  0x17   :  { %1104 = vmatpush3.bf16.msra.mxu0 %v1256_v21  ;;  %v1300_v61 = vld [vmem:[%s1632_s1 + $0x110] sm:$0xff]   ;;  %v1305_v2 = vld [vmem:[%s1632_s1 + $0x1c8] sm:$0xff]   ;;  %v1313_v9 = vld [vmem:[%s1632_s1 + $0x180] sm:$0xff]  }
  0x18   :  { %1105 = vmatprep.subr.bf16.mxu0 %v1259_v24  ;;  %v1301_v62 = vld [vmem:[%s1632_s1 + $0x1d0] sm:$0xff]   ;;  %v1306_v3 = vld [vmem:[%s1632_s1 + $0x188] sm:$0xff]   ;;  %v1314_v10 = vld [vmem:[%s1632_s1 + $0x238] sm:$0xff]  }
  0x19   :  { %1132 = vmatpush3.bf16.msra.mxu1 %v1258_v23  ;;  %v1302_v63 = vld [vmem:[%s1632_s1 + $0x190] sm:$0xff]   ;;  %v1315_v11 = vld [vmem:[%s1633_s0 + $0x18] ss:$36 sps:$4 sm:$0xff]   ;;  %v1322_v16 = vld [vmem:[%s1632_s1 + $0x228] sm:$0xff]  }
  0x1a   :  { %1133 = vmatprep.subr.bf16.mxu1 %v1261_v26  ;;  %v1310_v7 = vld [vmem:[%s1633_s0 + $0x10] ss:$36 sps:$4 sm:$0xff]   ;;  %v1317_v12 = vld [vmem:[%s1633_s0 + $0x1c] ss:$36 sps:$4 sm:$0xff]   ;;  %v1323_v17 = vld [vmem:[%s1633_s0 + $0x64] ss:$36 sps:$4 sm:$0xff]  }
  0x1b   :  { %1106 = vmatpush3.bf16.msra.mxu0 %v1260_v25  ;;  %v1312_v8 = vld [vmem:[%s1633_s0 + $0x14] ss:$36 sps:$4 sm:$0xff]   ;;  %v1319_v14 = vld [vmem:[%s1633_s0 + $0x5c] ss:$36 sps:$4 sm:$0xff]   ;;  %v1329_v23 = vld [vmem:[%s1632_s1 + $0x208] sm:$0xff]  }
  0x1c   :  { %1107 = vmatprep.subr.bf16.mxu0 %v1263_v28  ;;  %v1318_v13 = vld [vmem:[%s1632_s1 + $0x230] sm:$0xff]   ;;  %v1321_v15 = vld [vmem:[%s1633_s0 + $0x58] ss:$36 sps:$4 sm:$0xff]   ;;  %v1325_v18 = vld [vmem:[%s1633_s0 + $0x60] ss:$36 sps:$4 sm:$0xff]  }
  0x1d   :  { %1134 = vmatpush3.bf16.msra.mxu1 %v1262_v27  ;;  %v1326_v19 = vld [vmem:[%s1632_s1 + $0x220] sm:$0xff]   ;;  %v1327_v20 = vld [vmem:[%s1632_s1 + $0x218] sm:$0xff]   ;;  %v1328_v22 = vld [vmem:[%s1632_s1 + $0x210] sm:$0xff]  }
  0x1e   :  { %1135 = vmatprep.subr.bf16.mxu1 %v1265_v30  ;;  %v1331_v21 = vld [vmem:[%s1633_s0 + $0x20] ss:$36 sps:$4 sm:$0xff]   ;;  %v1332_v25 = vld [vmem:[%s1633_s0 + $0x68] ss:$36 sps:$4 sm:$0xff]  }
  0x1f   :  { %1108 = vmatpush3.bf16.msra.mxu0 %v1264_v29  ;;  %v1330_v24 = vld [vmem:[%s1632_s1 + $0x200] sm:$0xff]  }
  0x20   :  { %1149 = vmatprep.subr.bf16.mxu0 %v1270_v34 }
  0x21   :  { %1136 = vmatpush3.bf16.msra.mxu1 %v1269_v33 }
  0x22   :  { %743 = vmatmul.mubr.bf16.vlgmr.msra.gmra.mxu0 %v1266_v31  ;;  %1177 = vmatprep.subr.bf16.mxu1 %v1275_v38 }
  0x23   :  { %1150 = vmatpush3.bf16.msra.mxu0 %v1274_v37  ;;  %750 = vmatprep.mubr.bf16.mxu0 %v1291_v54 }
  0x24   :  { %792 = vmatmul.mubr.bf16.vlgmr.msra.gmra.mxu1 %v1271_v35  ;;  %1151 = vmatprep.subr.bf16.mxu0 %v1277_v40 }
  0x25   :  { %1178 = vmatpush3.bf16.msra.mxu1 %v1276_v39  ;;  %799 = vmatprep.mubr.bf16.mxu1 %v1296_v58 }
  0x26   :  { %1179 = vmatprep.subr.bf16.mxu1 %v1279_v42 }
  0x27   :  { %1152 = vmatpush3.bf16.msra.mxu0 %v1278_v41 }
  0x28   :  { %1153 = vmatprep.subr.bf16.mxu0 %v1281_v44 }
  0x29   :  { %1180 = vmatpush3.bf16.msra.mxu1 %v1280_v43 }
  0x2a   :  { %1181 = vmatprep.subr.bf16.mxu1 %v1283_v46  ;;  %751 = vmatmul.mubr.bf16.gmra.mxu0 %v1294_v56 }
  0x2b   :  { %1154 = vmatpush3.bf16.msra.mxu0 %v1282_v45  ;;  %840 = vmatprep.mubr.bf16.mxu0 %v1312_v8 }
  0x2c   :  { %1155 = vmatprep.subr.bf16.mxu0 %v1285_v48  ;;  %800 = vmatmul.mubr.bf16.gmra.mxu1 %v1299_v60 }
  0x2d   :  { %1182 = vmatpush3.bf16.msra.mxu1 %v1284_v47  ;;  %889 = vmatprep.mubr.bf16.mxu1 %v1317_v12 }
  0x2e   :  { %1183 = vmatprep.subr.bf16.mxu1 %v1287_v50 }
  0x2f   :  { %1156 = vmatpush3.bf16.msra.mxu0 %v1286_v49 }
  0x30   :  { %1157 = vmatprep.subr.bf16.mxu0 %v1289_v52 }
  0x31   :  { %1184 = vmatpush3.bf16.msra.mxu1 %v1288_v51 }
  0x32   :  { %1185 = vmatprep.subr.bf16.mxu1 %v1293_v55 }
  0x33   :  { %1158 = vmatpush3.bf16.msra.mxu0 %v1290_v53 }
  0x34   :  { %1159 = vmatprep.subr.bf16.mxu0 %v1298_v59 }
  0x35   :  { %1186 = vmatpush3.bf16.msra.mxu1 %v1295_v57  ;;  %v983_v57 = vld [vmem:[%s1634_s2] ss:$0 sm:$0xff] }
  0x36   :  { %1187 = vmatprep.subr.bf16.mxu1 %v1301_v62 }
  0x37   :  { %1160 = vmatpush3.bf16.msra.mxu0 %v1300_v61 }
  0x38   :  { %1161 = vmatprep.subr.bf16.mxu0 %v1303_v0 }
  0x39   :  { %1188 = vmatpush3.bf16.msra.mxu1 %v1302_v63 }
  0x3a   :  { %1189 = vmatprep.subr.bf16.mxu1 %v1305_v2 }
  0x3b   :  { %1162 = vmatpush3.bf16.msra.mxu0 %v1304_v1 }
  0x3c   :  { %1163 = vmatprep.subr.bf16.mxu0 %v1307_v4 }
  0x3d   :  { %1190 = vmatpush3.bf16.msra.mxu1 %v1306_v3 }
  0x3e   :  { %1191 = vmatprep.subr.bf16.mxu1 %v1309_v6 }
  0x3f   :  { %1164 = vmatpush3.bf16.msra.mxu0 %v1308_v5 }
  0x40   :  { %1215 = vmatprep.subr.bf16.mxu0 %v1314_v10 }
  0x41   :  { %1192 = vmatpush3.bf16.msra.mxu1 %v1313_v9 }
  0x42   :  { %841 = vmatmul.mubr.bf16.vlgmr.msra.gmra.mxu0 %v1310_v7 }
  0x43   :  { %1216 = vmatpush3.bf16.msra.mxu0 %v1314_v10  ;;  %848 = vmatprep.mubr.bf16.mxu0 %v1319_v14 }
  0x44   :  { %890 = vmatmul.mubr.bf16.vlgmr.msra.gmra.mxu1 %v1315_v11  ;;  %1217 = vmatprep.subr.bf16.mxu0 %v1318_v13 }
  0x45   :  { %897 = vmatprep.mubr.bf16.mxu1 %v1323_v17 }
  0x47   :  { %1218 = vmatpush3.bf16.msra.mxu0 %v1318_v13 }
  0x48   :  { %1219 = vmatprep.subr.bf16.mxu0 %v1322_v16 }
  0x4a   :  { %849 = vmatmul.mubr.bf16.gmra.mxu0 %v1321_v15 }
  0x4b   :  { %1220 = vmatpush3.bf16.msra.mxu0 %v1322_v16  ;;  %1231 = vmatprep.mubr.bf16.mxu0 %v1331_v21 }
  0x4c   :  { %898 = vmatmul.mubr.bf16.gmra.mxu1 %v1325_v18  ;;  %1221 = vmatprep.subr.bf16.mxu0 %v1326_v19 }
  0x4f   :  { %1222 = vmatpush3.bf16.msra.mxu0 %v1326_v19 }
  0x50   :  { %1223 = vmatprep.subr.bf16.mxu0 %v1327_v20 }
  0x53   :  { %1224 = vmatpush3.bf16.msra.mxu0 %v1327_v20 }
  0x54   :  { %1225 = vmatprep.subr.bf16.mxu0 %v1328_v22 }
  0x57   :  { %1226 = vmatpush3.bf16.msra.mxu0 %v1328_v22 }
  0x58   :  { %1227 = vmatprep.subr.bf16.mxu0 %v1329_v23 }
  0x5b   :  { %1228 = vmatpush3.bf16.msra.mxu0 %v1329_v23 }
  0x5c   :  { %1229 = vmatprep.subr.bf16.mxu0 %v1330_v24 }
  0x5f   :  { %1230 = vmatpush3.bf16.msra.mxu0 %v1330_v24 }
  0x62   :  { %1232 = vmatmul.mubr.bf16.vlgmr.msra.gmra.mxu0 %v1332_v25 }
  0xe2   :  { %v1109_v26 = vpop.f32.mrf.mxu0 }
  0xe4   :  { %v1137_v27 = vpop.f32.mrf.mxu1  ;;  %v1110_v28 = vpop.f32.mrf.mxu0 }
  0xe5   :  { %v1111_v54 = vadd.f32 %v1110_v28, %v1109_v26 }
  0xe6   :  { %v1138_v29 = vpop.f32.mrf.mxu1  ;;  %v1112_v30 = vpop.f32.mrf.mxu0 }
  0xe7   :  { %v745_v62 = vadd.f32 %v1111_v54, %v983_v57  ;;  %v1139_v63 = vadd.f32 %v1138_v29, %v1137_v27 }
  0xe8   :  { %v1140_v31 = vpop.f32.mrf.mxu1  ;;  %v1113_v32 = vpop.f32.mrf.mxu0 }
  0xe9   :  { %v1114_v59 = vadd.f32 %v1113_v32, %v1112_v30  ;;  %v794_v10 = vadd.f32 %v1139_v63, %v745_v62 }
  0xea   :  { %v1115_v33 = vpop.f32.mrf.mxu0  ;;  %v1141_v34 = vpop.f32.mrf.mxu1 }
  0xeb   :  { %v748_v5 = vadd.f32 %v1114_v59, %v983_v57  ;;  %v1142_v6 = vadd.f32 %v1141_v34, %v1140_v31 }
  0xec   :  { %v1143_v35 = vpop.f32.mrf.mxu1  ;;  %v1116_v36 = vpop.f32.mrf.mxu0 }
  0xed   :  { %v1117_v53 = vadd.f32 %v1116_v36, %v1115_v33  ;;  %v797_v16 = vadd.f32 %v1142_v6, %v748_v5 }
  0xee   :  { %v1144_v37 = vpop.f32.mrf.mxu1  ;;  %v1118_v38 = vpop.f32.mrf.mxu0 }
  0xef   :  { %v753_v60 = vadd.f32 %v1117_v53, %v983_v57  ;;  %v1145_v61 = vadd.f32 %v1144_v37, %v1143_v35 }
  0xf0   :  { %v1146_v39 = vpop.f32.mrf.mxu1  ;;  %v1119_v40 = vpop.f32.mrf.mxu0 }
  0xf1   :  { %v1120_v58 = vadd.f32 %v1119_v40, %v1118_v38  ;;  %v802_v7 = vadd.f32 %v1145_v61, %v753_v60 }
  0xf2   :  { %v1147_v42 = vpop.f32.mrf.mxu1 }
  0xf3   :  { %v756_v2 = vadd.f32 %v1120_v58, %v983_v57  ;;  %v1148_v3 = vadd.f32 %v1147_v42, %v1146_v39 }
  0xf5   :  { %v805_v12 = vadd.f32 %v1148_v3, %v756_v2 }
 0x102   :  { %v1165_v41 = vpop.f32.mrf.mxu0 }
 0x104   :  { %v1166_v43 = vpop.f32.mrf.mxu0  ;;  %v1193_v44 = vpop.f32.mrf.mxu1 }
 0x105   :  { %v1167_v8 = vadd.f32 %v1166_v43, %v1165_v41 }
 0x106   :  { %v1168_v45 = vpop.f32.mrf.mxu0  ;;  %v1194_v46 = vpop.f32.mrf.mxu1 }
 0x107   :  { %v843_v17 = vadd.f32 %v1167_v8, %v794_v10  ;;  %v1195_v18 = vadd.f32 %v1194_v46, %v1193_v44 }
 0x108   :  { %v1169_v47 = vpop.f32.mrf.mxu0  ;;  %v1196_v48 = vpop.f32.mrf.mxu1 }
 0x109   :  { %v1170_v13 = vadd.f32 %v1169_v47, %v1168_v45  ;;  %v892_v27 = vadd.f32 %v1195_v18, %v843_v17 }
 0x10a   :  { %v1171_v49 = vpop.f32.mrf.mxu0  ;;  %v1197_v50 = vpop.f32.mrf.mxu1 }
 0x10b   :  { %v846_v22 = vadd.f32 %v1170_v13, %v797_v16  ;;  %v1198_v23 = vadd.f32 %v1197_v50, %v1196_v48 }
 0x10c   :  { %v1172_v51 = vpop.f32.mrf.mxu0  ;;  %v1199_v52 = vpop.f32.mrf.mxu1 }
 0x10d   :  { %v1173_v4 = vadd.f32 %v1172_v51, %v1171_v49  ;;  %v895_v32 = vadd.f32 %v1198_v23, %v846_v22 }
 0x10e   :  { %v1174_v55 = vpop.f32.mrf.mxu0  ;;  %v1200_v56 = vpop.f32.mrf.mxu1 }
 0x10f   :  { %v851_v14 = vadd.f32 %v1173_v4, %v802_v7  ;;  %v1201_v15 = vadd.f32 %v1200_v56, %v1199_v52 }
 0x110   :  { %v1175_v0 = vpop.f32.mrf.mxu0  ;;  %v1202_v1 = vpop.f32.mrf.mxu1 }
 0x111   :  { %v1176_v9 = vadd.f32 %v1175_v0, %v1174_v55  ;;  %v900_v24 = vadd.f32 %v1201_v15, %v851_v14 }
 0x112   :  { %v1203_v11 = vpop.f32.mrf.mxu1 }
 0x113   :  { %v854_v19 = vadd.f32 %v1176_v9, %v805_v12  ;;  %v1204_v20 = vadd.f32 %v1203_v11, %v1202_v1 }
 0x115   :  { %v903_v28 = vadd.f32 %v1204_v20, %v854_v19 }
 0x122   :  { %v1233_v21 = vpop.f32.mrf.mxu0 }
 0x123   :  { %v949_v26 = vadd.f32 %v1233_v21, %v900_v24 }
 0x124   :  { %v940_v25 = vpop.f32.mrf.mxu0 }
 0x125   :  { %v941_v30 = vadd.f32 %v940_v25, %v892_v27  ;;  %v957_v34 = vmax.f32 %v949_v26, 0.0 }
 0x126   :  { %v1234_v29 = vpop.f32.mrf.mxu0 }
 0x127   :  { %v952_v31 = vadd.f32 %v1234_v29, %v903_v28  ;;  %v955_v37 = vmax.f32 %v941_v30, 0.0 }
 0x128   :  { %v943_v33 = vpop.f32.mrf.mxu0 }
 0x129   :  { %v958_v35 = vmax.f32 %v952_v31, 0.0  ;;  %v944_v36 = vadd.f32 %v943_v33, %v895_v32 }
 0x12b   :  { %v1090_v38 = vpack.c.bf16 %v958_v35, %v957_v34  ;;  %v956_v39 = vmax.f32 %v944_v36, 0.0 }
 0x12d   :  { %1092 = vst [vmem:[%s1635_s3 + $0x8] sm:$0xff] %v1090_v38   ;;  %v1085_v40 = vpack.c.bf16 %v956_v39, %v955_v37 }
 0x12f   :  { %1086 = vst [vmem:[%s1635_s3] sm:$0xff] %v1085_v40  }

// kernel: mwt_forward.17
= control target key start
LH: loop header
LB: loop body
LE: loop exit
PB: predicated region body
PF: predicated region fallthrough
CT: control target
= control target key end

     0   :  { %s3955_s1 = inlined_call_operand.vmem [shape: bf16[1152,512], index: 1, kind: input, shape index: {}]   ;;  %s3956_s0 = inlined_call_operand.vmem [shape: bf16[8,1152], index: 0, kind: input, shape index: {}]   ;;  %s3957_s2 = inlined_call_operand.vmem [shape: f32[1,512], index: 2, kind: input, shape index: {}]   ;;  %s3958_s3 = inlined_call_operand.vmem [shape: bf16[8,512], index: 3, kind: output, shape index: {}]  }
   0x1   :  { %v2540_v0 = vld [vmem:[%s3955_s1 + $0xe4] ss:$16 sps:$4 sm:$0xff]   ;;  %v2544_v2 = vld [vmem:[%s3955_s1 + $0xe0] ss:$16 sps:$4 sm:$0xff]   ;;  %v16_v48 = vld [vmem:[%s3956_s0 + $0x8] sm:$0xff] }
   0x2   :  { %v2542_v1 = vld [vmem:[%s3955_s1 + $0x2e4] ss:$16 sps:$4 sm:$0xff]   ;;  %1802 = vmatprep.subr.bf16.mxu0 %v2540_v0  ;;  %v2545_v3 = vld [vmem:[%s3955_s1 + $0x2e0] ss:$16 sps:$4 sm:$0xff]   ;;  %v3154_v51 = vcombine.high %v16_v48, %v16_v48 }
   0x3   :  { %1843 = vmatprep.subr.bf16.mxu1 %v2542_v1  ;;  %v2546_v4 = vld [vmem:[%s3955_s1 + $0xc4] ss:$16 sps:$4 sm:$0xff]   ;;  %1803 = vmatpush1.bf16.msra.mxu0 %v2544_v2  ;;  %v2550_v6 = vld [vmem:[%s3955_s1 + $0xc0] ss:$16 sps:$4 sm:$0xff]  }
   0x4   :  { %1844 = vmatpush1.bf16.msra.mxu1 %v2545_v3  ;;  %v2548_v5 = vld [vmem:[%s3955_s1 + $0x2c4] ss:$16 sps:$4 sm:$0xff]   ;;  %1804 = vmatprep.subr.bf16.mxu0 %v2546_v4  ;;  %v2551_v7 = vld [vmem:[%s3955_s1 + $0x2c0] ss:$16 sps:$4 sm:$0xff]  }
   0x5   :  { %1845 = vmatprep.subr.bf16.mxu1 %v2548_v5  ;;  %v2552_v8 = vld [vmem:[%s3955_s1 + $0xa4] ss:$16 sps:$4 sm:$0xff]   ;;  %v2556_v10 = vld [vmem:[%s3955_s1 + $0xa0] ss:$16 sps:$4 sm:$0xff]   ;;  %1875 = vmatprep.mubr.bf16.mxu1 %v3154_v51 }
   0x6   :  { %v2554_v9 = vld [vmem:[%s3955_s1 + $0x2a4] ss:$16 sps:$4 sm:$0xff]   ;;  %v2557_v11 = vld [vmem:[%s3955_s1 + $0x2a0] ss:$16 sps:$4 sm:$0xff]  }
   0x7   :  { %1805 = vmatpush1.bf16.msra.mxu0 %v2550_v6  ;;  %v2558_v12 = vld [vmem:[%s3955_s1 + $0x84] ss:$16 sps:$4 sm:$0xff]   ;;  %v2562_v14 = vld [vmem:[%s3955_s1 + $0x80] ss:$16 sps:$4 sm:$0xff]  }
   0x8   :  { %1846 = vmatpush1.bf16.msra.mxu1 %v2551_v7  ;;  %1806 = vmatprep.subr.bf16.mxu0 %v2552_v8  ;;  %v2560_v13 = vld [vmem:[%s3955_s1 + $0x284] ss:$16 sps:$4 sm:$0xff]   ;;  %v2563_v15 = vld [vmem:[%s3955_s1 + $0x280] ss:$16 sps:$4 sm:$0xff]   ;;  %v3214_v7 = vcombine.low %v16_v48, %v16_v48 }
   0x9   :  { %1847 = vmatprep.subr.bf16.mxu1 %v2554_v9  ;;  %v2564_v16 = vld [vmem:[%s3955_s1 + $0x64] ss:$16 sps:$4 sm:$0xff]   ;;  %v2568_v18 = vld [vmem:[%s3955_s1 + $0x60] ss:$16 sps:$4 sm:$0xff]  }
   0xa   :  { %v2566_v17 = vld [vmem:[%s3955_s1 + $0x264] ss:$16 sps:$4 sm:$0xff]   ;;  %v2569_v19 = vld [vmem:[%s3955_s1 + $0x260] ss:$16 sps:$4 sm:$0xff]  }
   0xb   :  { %1807 = vmatpush1.bf16.msra.mxu0 %v2556_v10  ;;  %v2570_v20 = vld [vmem:[%s3955_s1 + $0x44] ss:$16 sps:$4 sm:$0xff]   ;;  %v2574_v22 = vld [vmem:[%s3955_s1 + $0x40] ss:$16 sps:$4 sm:$0xff]  }
   0xc   :  { %1848 = vmatpush1.bf16.msra.mxu1 %v2557_v11  ;;  %1808 = vmatprep.subr.bf16.mxu0 %v2558_v12  ;;  %v2572_v21 = vld [vmem:[%s3955_s1 + $0x244] ss:$16 sps:$4 sm:$0xff]   ;;  %v2575_v23 = vld [vmem:[%s3955_s1 + $0x240] ss:$16 sps:$4 sm:$0xff]  }
   0xd   :  { %1849 = vmatprep.subr.bf16.mxu1 %v2560_v13  ;;  %v2576_v24 = vld [vmem:[%s3955_s1 + $0x24] ss:$16 sps:$4 sm:$0xff]   ;;  %v2580_v26 = vld [vmem:[%s3955_s1 + $0x20] ss:$16 sps:$4 sm:$0xff]  }
   0xe   :  { %v2578_v25 = vld [vmem:[%s3955_s1 + $0x224] ss:$16 sps:$4 sm:$0xff]   ;;  %v2581_v27 = vld [vmem:[%s3955_s1 + $0x220] ss:$16 sps:$4 sm:$0xff]  }
   0xf   :  { %1809 = vmatpush1.bf16.msra.mxu0 %v2562_v14  ;;  %v2582_v28 = vld [vmem:[%s3955_s1 + $0x4] ss:$16 sps:$4 sm:$0xff]   ;;  %v2586_v30 = vld [vmem:[%s3955_s1] ss:$16 sps:$4 sm:$0xff]  }
  0x10   :  { %1850 = vmatpush1.bf16.msra.mxu1 %v2563_v15  ;;  %1810 = vmatprep.subr.bf16.mxu0 %v2564_v16  ;;  %v2584_v29 = vld [vmem:[%s3955_s1 + $0x204] ss:$16 sps:$4 sm:$0xff]   ;;  %v2587_v31 = vld [vmem:[%s3955_s1 + $0x200] ss:$16 sps:$4 sm:$0xff]  }
  0x11   :  { %1851 = vmatprep.subr.bf16.mxu1 %v2566_v17  ;;  %v2588_v32 = vld [vmem:[%s3955_s1 + $0x1e4] ss:$16 sps:$4 sm:$0xff]   ;;  %v2592_v34 = vld [vmem:[%s3955_s1 + $0x1e0] ss:$16 sps:$4 sm:$0xff]  }
  0x12   :  { %v2590_v33 = vld [vmem:[%s3955_s1 + $0x3e4] ss:$16 sps:$4 sm:$0xff]   ;;  %v2593_v35 = vld [vmem:[%s3955_s1 + $0x3e0] ss:$16 sps:$4 sm:$0xff]  }
  0x13   :  { %1811 = vmatpush1.bf16.msra.mxu0 %v2568_v18  ;;  %v2594_v36 = vld [vmem:[%s3955_s1 + $0x1c4] ss:$16 sps:$4 sm:$0xff]   ;;  %v2598_v38 = vld [vmem:[%s3955_s1 + $0x1c0] ss:$16 sps:$4 sm:$0xff]  }
  0x14   :  { %1852 = vmatpush1.bf16.msra.mxu1 %v2569_v19  ;;  %1812 = vmatprep.subr.bf16.mxu0 %v2570_v20  ;;  %v2596_v37 = vld [vmem:[%s3955_s1 + $0x3c4] ss:$16 sps:$4 sm:$0xff]   ;;  %v2599_v39 = vld [vmem:[%s3955_s1 + $0x3c0] ss:$16 sps:$4 sm:$0xff]  }
  0x15   :  { %1853 = vmatprep.subr.bf16.mxu1 %v2572_v21  ;;  %v2600_v40 = vld [vmem:[%s3955_s1 + $0x1a4] ss:$16 sps:$4 sm:$0xff]   ;;  %v2604_v42 = vld [vmem:[%s3955_s1 + $0x1a0] ss:$16 sps:$4 sm:$0xff]  }
  0x16   :  { %v2602_v41 = vld [vmem:[%s3955_s1 + $0x3a4] ss:$16 sps:$4 sm:$0xff]   ;;  %v2605_v43 = vld [vmem:[%s3955_s1 + $0x3a0] ss:$16 sps:$4 sm:$0xff]  }
  0x17   :  { %1813 = vmatpush1.bf16.msra.mxu0 %v2574_v22  ;;  %v2606_v44 = vld [vmem:[%s3955_s1 + $0x184] ss:$16 sps:$4 sm:$0xff]   ;;  %v2610_v49 = vld [vmem:[%s3955_s1 + $0x180] ss:$16 sps:$4 sm:$0xff]  }
  0x18   :  { %1854 = vmatpush1.bf16.msra.mxu1 %v2575_v23  ;;  %1814 = vmatprep.subr.bf16.mxu0 %v2576_v24  ;;  %v2608_v45 = vld [vmem:[%s3955_s1 + $0x384] ss:$16 sps:$4 sm:$0xff]   ;;  %v2611_v50 = vld [vmem:[%s3955_s1 + $0x380] ss:$16 sps:$4 sm:$0xff]  }
  0x19   :  { %1855 = vmatprep.subr.bf16.mxu1 %v2578_v25  ;;  %v15_v46 = vld [vmem:[%s3956_s0] sm:$0xff] }
  0x1a   :  { %v3143_v47 = vcombine.high %v15_v46, %v15_v46  ;;  %v2612_v52 = vld [vmem:[%s3955_s1 + $0x164] ss:$16 sps:$4 sm:$0xff]   ;;  %v2616_v54 = vld [vmem:[%s3955_s1 + $0x160] ss:$16 sps:$4 sm:$0xff]   ;;  %v3212_v6 = vcombine.low %v15_v46, %v15_v46 }
  0x1b   :  { %1815 = vmatpush1.bf16.msra.mxu0 %v2580_v26  ;;  %v2614_v53 = vld [vmem:[%s3955_s1 + $0x364] ss:$16 sps:$4 sm:$0xff]   ;;  %v2617_v55 = vld [vmem:[%s3955_s1 + $0x360] ss:$16 sps:$4 sm:$0xff]  }
  0x1c   :  { %1856 = vmatpush1.bf16.msra.mxu1 %v2581_v27  ;;  %1816 = vmatprep.subr.bf16.mxu0 %v2582_v28  ;;  %v2618_v56 = vld [vmem:[%s3955_s1 + $0x144] ss:$16 sps:$4 sm:$0xff]   ;;  %v2622_v58 = vld [vmem:[%s3955_s1 + $0x140] ss:$16 sps:$4 sm:$0xff]  }
  0x1d   :  { %1857 = vmatprep.subr.bf16.mxu1 %v2584_v29  ;;  %1834 = vmatprep.mubr.bf16.mxu0 %v3143_v47  ;;  %v2620_v57 = vld [vmem:[%s3955_s1 + $0x344] ss:$16 sps:$4 sm:$0xff]   ;;  %v2623_v59 = vld [vmem:[%s3955_s1 + $0x340] ss:$16 sps:$4 sm:$0xff]  }
  0x1e   :  { %v2624_v60 = vld [vmem:[%s3955_s1 + $0x124] ss:$16 sps:$4 sm:$0xff]   ;;  %v2628_v62 = vld [vmem:[%s3955_s1 + $0x120] ss:$16 sps:$4 sm:$0xff]  }
  0x1f   :  { %1817 = vmatpush1.bf16.msra.mxu0 %v2586_v30  ;;  %v2626_v61 = vld [vmem:[%s3955_s1 + $0x324] ss:$16 sps:$4 sm:$0xff]   ;;  %v2629_v63 = vld [vmem:[%s3955_s1 + $0x320] ss:$16 sps:$4 sm:$0xff]  }
  0x20   :  { %1858 = vmatpush1.bf16.msra.mxu1 %v2587_v31  ;;  %1818 = vmatprep.subr.bf16.mxu0 %v2588_v32  ;;  %v2630_v0 = vld [vmem:[%s3955_s1 + $0x104] ss:$16 sps:$4 sm:$0xff]   ;;  %v2634_v2 = vld [vmem:[%s3955_s1 + $0x100] ss:$16 sps:$4 sm:$0xff]  }
  0x21   :  { %1859 = vmatprep.subr.bf16.mxu1 %v2590_v33  ;;  %v2632_v1 = vld [vmem:[%s3955_s1 + $0x304] ss:$16 sps:$4 sm:$0xff]   ;;  %v2635_v3 = vld [vmem:[%s3955_s1 + $0x300] ss:$16 sps:$4 sm:$0xff]   ;;  %v3298_v33 = vld [vmem:[%s3956_s0 + $0x18] sm:$0xff] }
  0x22   :  { %v2642_v4 = vld [vmem:[%s3955_s1 + $0x4e4] ss:$16 sps:$4 sm:$0xff]   ;;  %v2640_v8 = vld [vmem:[%s3955_s1 + $0x4e0] ss:$16 sps:$4 sm:$0xff]  }
  0x23   :  { %1819 = vmatpush2.bf16.msra.mxu0 %v2592_v34  ;;  %v2645_v5 = vld [vmem:[%s3955_s1 + $0x6e4] ss:$16 sps:$4 sm:$0xff]   ;;  %v2643_v9 = vld [vmem:[%s3955_s1 + $0x6e0] ss:$16 sps:$4 sm:$0xff]  }
  0x24   :  { %1860 = vmatpush2.bf16.msra.mxu1 %v2593_v35  ;;  %1820 = vmatprep.subr.bf16.mxu0 %v2594_v36  ;;  %v2648_v10 = vld [vmem:[%s3955_s1 + $0x4c4] ss:$16 sps:$4 sm:$0xff]   ;;  %v2646_v12 = vld [vmem:[%s3955_s1 + $0x4c0] ss:$16 sps:$4 sm:$0xff]  }
  0x25   :  { %1861 = vmatprep.subr.bf16.mxu1 %v2596_v37  ;;  %v2651_v11 = vld [vmem:[%s3955_s1 + $0x6c4] ss:$16 sps:$4 sm:$0xff]   ;;  %v2649_v13 = vld [vmem:[%s3955_s1 + $0x6c0] ss:$16 sps:$4 sm:$0xff]   ;;  %v3312_v37 = vcombine.high %v3298_v33, %v3298_v33 }
  0x26   :  { %v2654_v14 = vld [vmem:[%s3955_s1 + $0x4a4] ss:$16 sps:$4 sm:$0xff]   ;;  %v2652_v16 = vld [vmem:[%s3955_s1 + $0x4a0] ss:$16 sps:$4 sm:$0xff]  }
  0x27   :  { %1821 = vmatpush2.bf16.msra.mxu0 %v2598_v38  ;;  %v2657_v15 = vld [vmem:[%s3955_s1 + $0x6a4] ss:$16 sps:$4 sm:$0xff]   ;;  %v2655_v17 = vld [vmem:[%s3955_s1 + $0x6a0] ss:$16 sps:$4 sm:$0xff]  }
  0x28   :  { %1862 = vmatpush2.bf16.msra.mxu1 %v2599_v39  ;;  %1822 = vmatprep.subr.bf16.mxu0 %v2600_v40  ;;  %v2660_v18 = vld [vmem:[%s3955_s1 + $0x484] ss:$16 sps:$4 sm:$0xff]   ;;  %v2658_v20 = vld [vmem:[%s3955_s1 + $0x480] ss:$16 sps:$4 sm:$0xff]  }
  0x29   :  { %1863 = vmatprep.subr.bf16.mxu1 %v2602_v41  ;;  %v2663_v19 = vld [vmem:[%s3955_s1 + $0x684] ss:$16 sps:$4 sm:$0xff]   ;;  %v2661_v21 = vld [vmem:[%s3955_s1 + $0x680] ss:$16 sps:$4 sm:$0xff]  }
  0x2a   :  { %v2666_v22 = vld [vmem:[%s3955_s1 + $0x464] ss:$16 sps:$4 sm:$0xff]   ;;  %v2664_v24 = vld [vmem:[%s3955_s1 + $0x460] ss:$16 sps:$4 sm:$0xff]  }
  0x2b   :  { %1823 = vmatpush2.bf16.msra.mxu0 %v2604_v42  ;;  %v2669_v23 = vld [vmem:[%s3955_s1 + $0x664] ss:$16 sps:$4 sm:$0xff]   ;;  %v2667_v25 = vld [vmem:[%s3955_s1 + $0x660] ss:$16 sps:$4 sm:$0xff]  }
  0x2c   :  { %1864 = vmatpush2.bf16.msra.mxu1 %v2605_v43  ;;  %1824 = vmatprep.subr.bf16.mxu0 %v2606_v44  ;;  %v2672_v26 = vld [vmem:[%s3955_s1 + $0x444] ss:$16 sps:$4 sm:$0xff]   ;;  %v2670_v28 = vld [vmem:[%s3955_s1 + $0x440] ss:$16 sps:$4 sm:$0xff]  }
  0x2d   :  { %1865 = vmatprep.subr.bf16.mxu1 %v2608_v45  ;;  %v2675_v27 = vld [vmem:[%s3955_s1 + $0x644] ss:$16 sps:$4 sm:$0xff]   ;;  %v2673_v29 = vld [vmem:[%s3955_s1 + $0x640] ss:$16 sps:$4 sm:$0xff]  }
  0x2e   :  { %v2678_v30 = vld [vmem:[%s3955_s1 + $0x424] ss:$16 sps:$4 sm:$0xff]   ;;  %v2676_v34 = vld [vmem:[%s3955_s1 + $0x420] ss:$16 sps:$4 sm:$0xff]  }
  0x2f   :  { %1825 = vmatpush2.bf16.msra.mxu0 %v2610_v49  ;;  %v2681_v31 = vld [vmem:[%s3955_s1 + $0x624] ss:$16 sps:$4 sm:$0xff]   ;;  %v2679_v35 = vld [vmem:[%s3955_s1 + $0x620] ss:$16 sps:$4 sm:$0xff]  }
  0x30   :  { %1866 = vmatpush2.bf16.msra.mxu1 %v2611_v50  ;;  %1826 = vmatprep.subr.bf16.mxu0 %v2612_v52  ;;  %v3293_v32 = vld [vmem:[%s3956_s0 + $0x10] sm:$0xff] }
  0x31   :  { %1867 = vmatprep.subr.bf16.mxu1 %v2614_v53  ;;  %v3308_v36 = vcombine.high %v3293_v32, %v3293_v32  ;;  %v2684_v38 = vld [vmem:[%s3955_s1 + $0x404] ss:$16 sps:$4 sm:$0xff]   ;;  %v2682_v40 = vld [vmem:[%s3955_s1 + $0x400] ss:$16 sps:$4 sm:$0xff]  }
  0x32   :  { %v2687_v39 = vld [vmem:[%s3955_s1 + $0x604] ss:$16 sps:$4 sm:$0xff]   ;;  %v2685_v41 = vld [vmem:[%s3955_s1 + $0x600] ss:$16 sps:$4 sm:$0xff]  }
  0x33   :  { %1827 = vmatpush2.bf16.msra.mxu0 %v2616_v54  ;;  %v2690_v42 = vld [vmem:[%s3955_s1 + $0x5e4] ss:$16 sps:$4 sm:$0xff]   ;;  %v2688_v44 = vld [vmem:[%s3955_s1 + $0x5e0] ss:$16 sps:$4 sm:$0xff]  }
  0x34   :  { %1868 = vmatpush2.bf16.msra.mxu1 %v2617_v55  ;;  %1828 = vmatprep.subr.bf16.mxu0 %v2618_v56  ;;  %v2693_v43 = vld [vmem:[%s3955_s1 + $0x7e4] ss:$16 sps:$4 sm:$0xff]   ;;  %v2691_v45 = vld [vmem:[%s3955_s1 + $0x7e0] ss:$16 sps:$4 sm:$0xff]  }
  0x35   :  { %1869 = vmatprep.subr.bf16.mxu1 %v2620_v57  ;;  %v2696_v46 = vld [vmem:[%s3955_s1 + $0x5c4] ss:$16 sps:$4 sm:$0xff]   ;;  %v2694_v49 = vld [vmem:[%s3955_s1 + $0x5c0] ss:$16 sps:$4 sm:$0xff]  }
  0x36   :  { %v2699_v48 = vld [vmem:[%s3955_s1 + $0x7c4] ss:$16 sps:$4 sm:$0xff]   ;;  %v2697_v50 = vld [vmem:[%s3955_s1 + $0x7c0] ss:$16 sps:$4 sm:$0xff]  }
  0x37   :  { %1829 = vmatpush2.bf16.msra.mxu0 %v2622_v58  ;;  %v2702_v52 = vld [vmem:[%s3955_s1 + $0x5a4] ss:$16 sps:$4 sm:$0xff]   ;;  %v2700_v54 = vld [vmem:[%s3955_s1 + $0x5a0] ss:$16 sps:$4 sm:$0xff]  }
  0x38   :  { %1870 = vmatpush2.bf16.msra.mxu1 %v2623_v59  ;;  %1830 = vmatprep.subr.bf16.mxu0 %v2624_v60  ;;  %v2705_v53 = vld [vmem:[%s3955_s1 + $0x7a4] ss:$16 sps:$4 sm:$0xff]   ;;  %v2703_v55 = vld [vmem:[%s3955_s1 + $0x7a0] ss:$16 sps:$4 sm:$0xff]  }
  0x39   :  { %1871 = vmatprep.subr.bf16.mxu1 %v2626_v61  ;;  %v2708_v56 = vld [vmem:[%s3955_s1 + $0x584] ss:$16 sps:$4 sm:$0xff]   ;;  %v2706_v58 = vld [vmem:[%s3955_s1 + $0x580] ss:$16 sps:$4 sm:$0xff]  }
  0x3a   :  { %v2711_v57 = vld [vmem:[%s3955_s1 + $0x784] ss:$16 sps:$4 sm:$0xff]   ;;  %v2709_v59 = vld [vmem:[%s3955_s1 + $0x780] ss:$16 sps:$4 sm:$0xff]  }
  0x3b   :  { %1831 = vmatpush2.bf16.msra.mxu0 %v2628_v62  ;;  %v2714_v60 = vld [vmem:[%s3955_s1 + $0x564] ss:$16 sps:$4 sm:$0xff]   ;;  %v2712_v62 = vld [vmem:[%s3955_s1 + $0x560] ss:$16 sps:$4 sm:$0xff]  }
  0x3c   :  { %1872 = vmatpush2.bf16.msra.mxu1 %v2629_v63  ;;  %1832 = vmatprep.subr.bf16.mxu0 %v2630_v0  ;;  %v2717_v61 = vld [vmem:[%s3955_s1 + $0x764] ss:$16 sps:$4 sm:$0xff]   ;;  %v2715_v63 = vld [vmem:[%s3955_s1 + $0x760] ss:$16 sps:$4 sm:$0xff]  }
  0x3d   :  { %1873 = vmatprep.subr.bf16.mxu1 %v2632_v1  ;;  %v2720_v0 = vld [vmem:[%s3955_s1 + $0x544] ss:$16 sps:$4 sm:$0xff]  }
  0x3e   :  { %v2723_v1 = vld [vmem:[%s3955_s1 + $0x744] ss:$16 sps:$4 sm:$0xff]  }
  0x3f   :  { %1833 = vmatpush2.bf16.msra.mxu0 %v2634_v2  ;;  %v2718_v2 = vld [vmem:[%s3955_s1 + $0x540] ss:$16 sps:$4 sm:$0xff]  }
  0x40   :  { %1874 = vmatpush2.bf16.msra.mxu1 %v2635_v3  ;;  %1884 = vmatprep.subr.bf16.mxu0 %v2642_v4  ;;  %v2721_v3 = vld [vmem:[%s3955_s1 + $0x740] ss:$16 sps:$4 sm:$0xff]   ;;  %v2726_v4 = vld [vmem:[%s3955_s1 + $0x524] ss:$16 sps:$4 sm:$0xff]  }
  0x41   :  { %1925 = vmatprep.subr.bf16.mxu1 %v2645_v5  ;;  %v2729_v5 = vld [vmem:[%s3955_s1 + $0x724] ss:$16 sps:$4 sm:$0xff]  }
  0x42   :  { %1835 = vmatmul.mubr.bf16.vlgmr.msra.gmra.mxu0 %v3212_v6 }
  0x43   :  { %1876 = vmatmul.mubr.bf16.vlgmr.msra.gmra.mxu1 %v3214_v7  ;;  %1885 = vmatpush1.bf16.msra.mxu0 %v2640_v8  ;;  %v2724_v8 = vld [vmem:[%s3955_s1 + $0x520] ss:$16 sps:$4 sm:$0xff]  }
  0x44   :  { %1926 = vmatpush1.bf16.msra.mxu1 %v2643_v9  ;;  %1886 = vmatprep.subr.bf16.mxu0 %v2648_v10  ;;  %v2727_v9 = vld [vmem:[%s3955_s1 + $0x720] ss:$16 sps:$4 sm:$0xff]   ;;  %v2732_v10 = vld [vmem:[%s3955_s1 + $0x504] ss:$16 sps:$4 sm:$0xff]  }
  0x45   :  { %1927 = vmatprep.subr.bf16.mxu1 %v2651_v11  ;;  %1916 = vmatprep.mubr.bf16.mxu0 %v3308_v36  ;;  %v2735_v11 = vld [vmem:[%s3955_s1 + $0x704] ss:$16 sps:$4 sm:$0xff]  }
  0x46   :  { %1957 = vmatprep.mubr.bf16.mxu1 %v3312_v37 }
  0x47   :  { %1887 = vmatpush1.bf16.msra.mxu0 %v2646_v12  ;;  %v2730_v12 = vld [vmem:[%s3955_s1 + $0x500] ss:$16 sps:$4 sm:$0xff]  }
  0x48   :  { %1928 = vmatpush1.bf16.msra.mxu1 %v2649_v13  ;;  %1888 = vmatprep.subr.bf16.mxu0 %v2654_v14  ;;  %v2733_v13 = vld [vmem:[%s3955_s1 + $0x700] ss:$16 sps:$4 sm:$0xff]   ;;  %v2742_v14 = vld [vmem:[%s3955_s1 + $0x8e4] ss:$16 sps:$4 sm:$0xff]  }
  0x49   :  { %1929 = vmatprep.subr.bf16.mxu1 %v2657_v15  ;;  %v2745_v15 = vld [vmem:[%s3955_s1 + $0xec] ss:$16 sps:$4 sm:$0xff]  }
  0x4b   :  { %1889 = vmatpush1.bf16.msra.mxu0 %v2652_v16  ;;  %v3432_v16 = vcombine.low %v3293_v32, %v3293_v32  ;;  %v2766_v32 = vld [vmem:[%s3955_s1 + $0x864] ss:$16 sps:$4 sm:$0xff]  }
  0x4c   :  { %1930 = vmatpush1.bf16.msra.mxu1 %v2655_v17  ;;  %1890 = vmatprep.subr.bf16.mxu0 %v2660_v18  ;;  %v3436_v17 = vcombine.low %v3298_v33, %v3298_v33  ;;  %v2740_v18 = vld [vmem:[%s3955_s1 + $0x8e0] ss:$16 sps:$4 sm:$0xff]   ;;  %v2769_v33 = vld [vmem:[%s3955_s1 + $0x6c] ss:$16 sps:$4 sm:$0xff]  }
  0x4d   :  { %1931 = vmatprep.subr.bf16.mxu1 %v2663_v19  ;;  %v2743_v19 = vld [vmem:[%s3955_s1 + $0xe8] ss:$16 sps:$4 sm:$0xff]  }
  0x4f   :  { %1891 = vmatpush1.bf16.msra.mxu0 %v2658_v20  ;;  %v2748_v20 = vld [vmem:[%s3955_s1 + $0x8c4] ss:$16 sps:$4 sm:$0xff]  }
  0x50   :  { %1932 = vmatpush1.bf16.msra.mxu1 %v2661_v21  ;;  %1892 = vmatprep.subr.bf16.mxu0 %v2666_v22  ;;  %v2751_v21 = vld [vmem:[%s3955_s1 + $0xcc] ss:$16 sps:$4 sm:$0xff]   ;;  %v2746_v22 = vld [vmem:[%s3955_s1 + $0x8c0] ss:$16 sps:$4 sm:$0xff]  }
  0x51   :  { %1933 = vmatprep.subr.bf16.mxu1 %v2669_v23  ;;  %v2749_v23 = vld [vmem:[%s3955_s1 + $0xc8] ss:$16 sps:$4 sm:$0xff]  }
  0x53   :  { %1893 = vmatpush1.bf16.msra.mxu0 %v2664_v24  ;;  %v2754_v24 = vld [vmem:[%s3955_s1 + $0x8a4] ss:$16 sps:$4 sm:$0xff]  }
  0x54   :  { %1934 = vmatpush1.bf16.msra.mxu1 %v2667_v25  ;;  %1894 = vmatprep.subr.bf16.mxu0 %v2672_v26  ;;  %v2757_v25 = vld [vmem:[%s3955_s1 + $0xac] ss:$16 sps:$4 sm:$0xff]   ;;  %v2981_v26 = vmov 0  }
  0x55   :  { %1935 = vmatprep.subr.bf16.mxu1 %v2675_v27  ;;  %v2752_v27 = vld [vmem:[%s3955_s1 + $0x8a0] ss:$16 sps:$4 sm:$0xff]  }
  0x57   :  { %1895 = vmatpush1.bf16.msra.mxu0 %v2670_v28  ;;  %v2755_v28 = vld [vmem:[%s3955_s1 + $0xa8] ss:$16 sps:$4 sm:$0xff]  }
  0x58   :  { %1936 = vmatpush1.bf16.msra.mxu1 %v2673_v29  ;;  %1896 = vmatprep.subr.bf16.mxu0 %v2678_v30  ;;  %v2760_v29 = vld [vmem:[%s3955_s1 + $0x884] ss:$16 sps:$4 sm:$0xff]   ;;  %v2758_v30 = vld [vmem:[%s3955_s1 + $0x880] ss:$16 sps:$4 sm:$0xff]  }
  0x59   :  { %1937 = vmatprep.subr.bf16.mxu1 %v2681_v31  ;;  %v2761_v31 = vld [vmem:[%s3955_s1 + $0x88] ss:$16 sps:$4 sm:$0xff]  }
  0x5b   :  { %1897 = vmatpush1.bf16.msra.mxu0 %v2676_v34  ;;  %v2764_v34 = vld [vmem:[%s3955_s1 + $0x860] ss:$16 sps:$4 sm:$0xff]  }
  0x5c   :  { %1938 = vmatpush1.bf16.msra.mxu1 %v2679_v35  ;;  %1898 = vmatprep.subr.bf16.mxu0 %v2684_v38  ;;  %v2767_v35 = vld [vmem:[%s3955_s1 + $0x68] ss:$16 sps:$4 sm:$0xff]   ;;  %v2772_v38 = vld [vmem:[%s3955_s1 + $0x844] ss:$16 sps:$4 sm:$0xff]  }
  0x5d   :  { %1939 = vmatprep.subr.bf16.mxu1 %v2687_v39  ;;  %v2775_v39 = vld [vmem:[%s3955_s1 + $0x4c] ss:$16 sps:$4 sm:$0xff]  }
  0x5f   :  { %1899 = vmatpush1.bf16.msra.mxu0 %v2682_v40  ;;  %v2770_v40 = vld [vmem:[%s3955_s1 + $0x840] ss:$16 sps:$4 sm:$0xff]  }
  0x60   :  { %1940 = vmatpush1.bf16.msra.mxu1 %v2685_v41  ;;  %1900 = vmatprep.subr.bf16.mxu0 %v2690_v42  ;;  %v2773_v41 = vld [vmem:[%s3955_s1 + $0x48] ss:$16 sps:$4 sm:$0xff]   ;;  %v2778_v42 = vld [vmem:[%s3955_s1 + $0x824] ss:$16 sps:$4 sm:$0xff]  }
  0x61   :  { %1941 = vmatprep.subr.bf16.mxu1 %v2693_v43  ;;  %v2781_v43 = vld [vmem:[%s3955_s1 + $0x2c] ss:$16 sps:$4 sm:$0xff]  }
  0x63   :  { %1901 = vmatpush2.bf16.msra.mxu0 %v2688_v44  ;;  %v2776_v44 = vld [vmem:[%s3955_s1 + $0x820] ss:$16 sps:$4 sm:$0xff]  }
  0x64   :  { %1942 = vmatpush2.bf16.msra.mxu1 %v2691_v45  ;;  %1902 = vmatprep.subr.bf16.mxu0 %v2696_v46  ;;  %v2779_v45 = vld [vmem:[%s3955_s1 + $0x28] ss:$16 sps:$4 sm:$0xff]   ;;  %v2784_v46 = vld [vmem:[%s3955_s1 + $0x804] ss:$16 sps:$4 sm:$0xff]  }
  0x65   :  { %1943 = vmatprep.subr.bf16.mxu1 %v2699_v48  ;;  %v2787_v48 = vld [vmem:[%s3955_s1 + $0xc] ss:$16 sps:$4 sm:$0xff]  }
  0x67   :  { %1903 = vmatpush2.bf16.msra.mxu0 %v2694_v49  ;;  %v2782_v49 = vld [vmem:[%s3955_s1 + $0x800] ss:$16 sps:$4 sm:$0xff]  }
  0x68   :  { %1944 = vmatpush2.bf16.msra.mxu1 %v2697_v50  ;;  %1904 = vmatprep.subr.bf16.mxu0 %v2702_v52  ;;  %v2785_v50 = vld [vmem:[%s3955_s1 + $0x8] ss:$16 sps:$4 sm:$0xff]   ;;  %v2791_v52 = vld [vmem:[%s3955_s1 + $0x1ec] ss:$16 sps:$4 sm:$0xff]  }
  0x69   :  { %1945 = vmatprep.subr.bf16.mxu1 %v2705_v53  ;;  %v2794_v53 = vld [vmem:[%s3955_s1 + $0x2ec] ss:$16 sps:$4 sm:$0xff]  }
  0x6b   :  { %1905 = vmatpush2.bf16.msra.mxu0 %v2700_v54  ;;  %v3541_v54 = vld [vmem:[%s3956_s0 + $0x20] ss:$0 sps:$4 sm:$0xff]  }
  0x6c   :  { %1946 = vmatpush2.bf16.msra.mxu1 %v2703_v55  ;;  %1906 = vmatprep.subr.bf16.mxu0 %v2708_v56  ;;  %v2789_v55 = vld [vmem:[%s3955_s1 + $0x1e8] ss:$16 sps:$4 sm:$0xff]  }
  0x6d   :  { %1947 = vmatprep.subr.bf16.mxu1 %v2711_v57  ;;  %v2792_v56 = vld [vmem:[%s3955_s1 + $0x2e8] ss:$16 sps:$4 sm:$0xff]   ;;  %v2797_v57 = vld [vmem:[%s3955_s1 + $0x1cc] ss:$16 sps:$4 sm:$0xff]  }
  0x6f   :  { %1907 = vmatpush2.bf16.msra.mxu0 %v2706_v58  ;;  %v2800_v58 = vld [vmem:[%s3955_s1 + $0x2cc] ss:$16 sps:$4 sm:$0xff]  }
  0x70   :  { %1948 = vmatpush2.bf16.msra.mxu1 %v2709_v59  ;;  %1908 = vmatprep.subr.bf16.mxu0 %v2714_v60  ;;  %v2795_v59 = vld [vmem:[%s3955_s1 + $0x1c8] ss:$16 sps:$4 sm:$0xff]  }
  0x71   :  { %1949 = vmatprep.subr.bf16.mxu1 %v2717_v61  ;;  %v2798_v60 = vld [vmem:[%s3955_s1 + $0x2c8] ss:$16 sps:$4 sm:$0xff]   ;;  %v2803_v61 = vld [vmem:[%s3955_s1 + $0x1ac] ss:$16 sps:$4 sm:$0xff]  }
  0x73   :  { %1909 = vmatpush2.bf16.msra.mxu0 %v2712_v62  ;;  %v2806_v62 = vld [vmem:[%s3955_s1 + $0x2ac] ss:$16 sps:$4 sm:$0xff]  }
  0x74   :  { %1950 = vmatpush2.bf16.msra.mxu1 %v2715_v63  ;;  %1910 = vmatprep.subr.bf16.mxu0 %v2720_v0  ;;  %v2801_v63 = vld [vmem:[%s3955_s1 + $0x1a8] ss:$16 sps:$4 sm:$0xff]  }
  0x75   :  { %1951 = vmatprep.subr.bf16.mxu1 %v2723_v1  ;;  %v2804_v0 = vld [vmem:[%s3955_s1 + $0x2a8] ss:$16 sps:$4 sm:$0xff]   ;;  %v2809_v1 = vld [vmem:[%s3955_s1 + $0x18c] ss:$16 sps:$4 sm:$0xff]  }
  0x77   :  { %1911 = vmatpush2.bf16.msra.mxu0 %v2718_v2  ;;  %v2807_v2 = vld [vmem:[%s3955_s1 + $0x188] ss:$16 sps:$4 sm:$0xff]  }
  0x78   :  { %1952 = vmatpush2.bf16.msra.mxu1 %v2721_v3  ;;  %1912 = vmatprep.subr.bf16.mxu0 %v2726_v4  ;;  %v2810_v3 = vld [vmem:[%s3955_s1 + $0x288] ss:$16 sps:$4 sm:$0xff]   ;;  %v2815_v4 = vld [vmem:[%s3955_s1 + $0x16c] ss:$16 sps:$4 sm:$0xff]  }
  0x79   :  { %1953 = vmatprep.subr.bf16.mxu1 %v2729_v5  ;;  %v2818_v5 = vld [vmem:[%s3955_s1 + $0x26c] ss:$16 sps:$4 sm:$0xff]  }
  0x7b   :  { %1913 = vmatpush2.bf16.msra.mxu0 %v2724_v8  ;;  %v2813_v8 = vld [vmem:[%s3955_s1 + $0x168] ss:$16 sps:$4 sm:$0xff]  }
  0x7c   :  { %1954 = vmatpush2.bf16.msra.mxu1 %v2727_v9  ;;  %1914 = vmatprep.subr.bf16.mxu0 %v2732_v10  ;;  %v2816_v9 = vld [vmem:[%s3955_s1 + $0x268] ss:$16 sps:$4 sm:$0xff]   ;;  %v2821_v10 = vld [vmem:[%s3955_s1 + $0x14c] ss:$16 sps:$4 sm:$0xff]  }
  0x7d   :  { %1955 = vmatprep.subr.bf16.mxu1 %v2735_v11  ;;  %v2824_v11 = vld [vmem:[%s3955_s1 + $0x24c] ss:$16 sps:$4 sm:$0xff]  }
  0x7f   :  { %1915 = vmatpush2.bf16.msra.mxu0 %v2730_v12  ;;  %v2819_v12 = vld [vmem:[%s3955_s1 + $0x148] ss:$16 sps:$4 sm:$0xff]  }
  0x80   :  { %1956 = vmatpush2.bf16.msra.mxu1 %v2733_v13  ;;  %1966 = vmatprep.subr.bf16.mxu0 %v2742_v14  ;;  %v2822_v13 = vld [vmem:[%s3955_s1 + $0x248] ss:$16 sps:$4 sm:$0xff]   ;;  %v2827_v14 = vld [vmem:[%s3955_s1 + $0x12c] ss:$16 sps:$4 sm:$0xff]  }
  0x81   :  { %2007 = vmatprep.subr.bf16.mxu1 %v2745_v15  ;;  %v2830_v15 = vld [vmem:[%s3955_s1 + $0x22c] ss:$16 sps:$4 sm:$0xff]  }
  0x82   :  { %1917 = vmatmul.mubr.bf16.vlgmr.msra.gmra.mxu0 %v3432_v16 }
  0x83   :  { %1958 = vmatmul.mubr.bf16.vlgmr.msra.gmra.mxu1 %v3436_v17  ;;  %1967 = vmatpush1.bf16.msra.mxu0 %v2740_v18  ;;  %v2825_v18 = vld [vmem:[%s3955_s1 + $0x128] ss:$16 sps:$4 sm:$0xff]  }
  0x84   :  { %2008 = vmatpush1.bf16.msra.mxu1 %v2743_v19  ;;  %1968 = vmatprep.subr.bf16.mxu0 %v2748_v20  ;;  %v2828_v19 = vld [vmem:[%s3955_s1 + $0x228] ss:$16 sps:$4 sm:$0xff]   ;;  %v2833_v20 = vld [vmem:[%s3955_s1 + $0x10c] ss:$16 sps:$4 sm:$0xff]  }
  0x85   :  { %2009 = vmatprep.subr.bf16.mxu1 %v2751_v21  ;;  %1998 = vmatprep.mubr.bf16.mxu0 %v2981_v26  ;;  %v2836_v21 = vld [vmem:[%s3955_s1 + $0x20c] ss:$16 sps:$4 sm:$0xff]  }
  0x86   :  { %2039 = vmatprep.mubr.bf16.mxu1 %v3143_v47  ;;  %v2763_v47 = vld [vmem:[%s3955_s1 + $0x8c] ss:$16 sps:$4 sm:$0xff]  }
  0x87   :  { %1969 = vmatpush1.bf16.msra.mxu0 %v2746_v22  ;;  %v2831_v22 = vld [vmem:[%s3955_s1 + $0x108] ss:$16 sps:$4 sm:$0xff]  }
  0x88   :  { %2010 = vmatpush1.bf16.msra.mxu1 %v2749_v23  ;;  %1970 = vmatprep.subr.bf16.mxu0 %v2754_v24  ;;  %v2834_v23 = vld [vmem:[%s3955_s1 + $0x208] ss:$16 sps:$4 sm:$0xff]   ;;  %v2839_v24 = vld [vmem:[%s3955_s1 + $0x3ec] ss:$16 sps:$4 sm:$0xff]  }
  0x89   :  { %2011 = vmatprep.subr.bf16.mxu1 %v2757_v25  ;;  %v2842_v25 = vld [vmem:[%s3955_s1 + $0x4ec] ss:$16 sps:$4 sm:$0xff]  }
  0x8b   :  { %1971 = vmatpush1.bf16.msra.mxu0 %v2752_v27  ;;  %v2837_v27 = vld [vmem:[%s3955_s1 + $0x3e8] ss:$16 sps:$4 sm:$0xff]  }
  0x8c   :  { %2012 = vmatpush1.bf16.msra.mxu1 %v2755_v28  ;;  %1972 = vmatprep.subr.bf16.mxu0 %v2760_v29  ;;  %v2840_v28 = vld [vmem:[%s3955_s1 + $0x4e8] ss:$16 sps:$4 sm:$0xff]   ;;  %v2845_v29 = vld [vmem:[%s3955_s1 + $0x3cc] ss:$16 sps:$4 sm:$0xff]  }
  0x8d   :  { %2013 = vmatprep.subr.bf16.mxu1 %v2763_v47  ;;  %v2848_v47 = vld [vmem:[%s3955_s1 + $0x4cc] ss:$16 sps:$4 sm:$0xff]  }
  0x8f   :  { %1973 = vmatpush1.bf16.msra.mxu0 %v2758_v30  ;;  %v2843_v30 = vld [vmem:[%s3955_s1 + $0x3c8] ss:$16 sps:$4 sm:$0xff]  }
  0x90   :  { %2014 = vmatpush1.bf16.msra.mxu1 %v2761_v31  ;;  %1974 = vmatprep.subr.bf16.mxu0 %v2766_v32  ;;  %v2846_v31 = vld [vmem:[%s3955_s1 + $0x4c8] ss:$16 sps:$4 sm:$0xff]   ;;  %v2851_v32 = vld [vmem:[%s3955_s1 + $0x3ac] ss:$16 sps:$4 sm:$0xff]  }
  0x91   :  { %2015 = vmatprep.subr.bf16.mxu1 %v2769_v33  ;;  %v2849_v33 = vld [vmem:[%s3955_s1 + $0x3a8] ss:$16 sps:$4 sm:$0xff]  }
  0x93   :  { %1975 = vmatpush1.bf16.msra.mxu0 %v2764_v34  ;;  %v2852_v34 = vld [vmem:[%s3955_s1 + $0x4a8] ss:$16 sps:$4 sm:$0xff]  }
  0x94   :  { %2016 = vmatpush1.bf16.msra.mxu1 %v2767_v35  ;;  %1976 = vmatprep.subr.bf16.mxu0 %v2772_v38  ;;  %v2857_v35 = vld [vmem:[%s3955_s1 + $0x38c] ss:$16 sps:$4 sm:$0xff]   ;;  %v2855_v38 = vld [vmem:[%s3955_s1 + $0x388] ss:$16 sps:$4 sm:$0xff]  }
  0x95   :  { %2017 = vmatprep.subr.bf16.mxu1 %v2775_v39  ;;  %v2858_v39 = vld [vmem:[%s3955_s1 + $0x488] ss:$16 sps:$4 sm:$0xff]  }
  0x97   :  { %1977 = vmatpush1.bf16.msra.mxu0 %v2770_v40  ;;  %v2863_v40 = vld [vmem:[%s3955_s1 + $0x36c] ss:$16 sps:$4 sm:$0xff]  }
  0x98   :  { %2018 = vmatpush1.bf16.msra.mxu1 %v2773_v41  ;;  %1978 = vmatprep.subr.bf16.mxu0 %v2778_v42  ;;  %v2866_v41 = vld [vmem:[%s3955_s1 + $0x46c] ss:$16 sps:$4 sm:$0xff]   ;;  %v2861_v42 = vld [vmem:[%s3955_s1 + $0x368] ss:$16 sps:$4 sm:$0xff]  }
  0x99   :  { %2019 = vmatprep.subr.bf16.mxu1 %v2781_v43  ;;  %v2864_v43 = vld [vmem:[%s3955_s1 + $0x468] ss:$16 sps:$4 sm:$0xff]  }
  0x9b   :  { %1979 = vmatpush1.bf16.msra.mxu0 %v2776_v44  ;;  %v2869_v44 = vld [vmem:[%s3955_s1 + $0x34c] ss:$16 sps:$4 sm:$0xff]  }
  0x9c   :  { %2020 = vmatpush1.bf16.msra.mxu1 %v2779_v45  ;;  %1980 = vmatprep.subr.bf16.mxu0 %v2784_v46  ;;  %v2872_v45 = vld [vmem:[%s3955_s1 + $0x44c] ss:$16 sps:$4 sm:$0xff]   ;;  %v2867_v46 = vld [vmem:[%s3955_s1 + $0x348] ss:$16 sps:$4 sm:$0xff]  }
  0x9d   :  { %2021 = vmatprep.subr.bf16.mxu1 %v2787_v48  ;;  %v2870_v48 = vld [vmem:[%s3955_s1 + $0x448] ss:$16 sps:$4 sm:$0xff]  }
  0x9f   :  { %1981 = vmatpush1.bf16.msra.mxu0 %v2782_v49  ;;  %v2875_v49 = vld [vmem:[%s3955_s1 + $0x32c] ss:$16 sps:$4 sm:$0xff]  }
  0xa0   :  { %2022 = vmatpush1.bf16.msra.mxu1 %v2785_v50  ;;  %2048 = vmatprep.subr.bf16.mxu0 %v2794_v53  ;;  %v2878_v50 = vld [vmem:[%s3955_s1 + $0x42c] ss:$16 sps:$4 sm:$0xff]   ;;  %v2876_v53 = vld [vmem:[%s3955_s1 + $0x428] ss:$16 sps:$4 sm:$0xff]  }
  0xa1   :  { %2023 = vmatprep.subr.bf16.mxu1 %v2791_v52  ;;  %v2873_v52 = vld [vmem:[%s3955_s1 + $0x328] ss:$16 sps:$4 sm:$0xff]  }
  0xa2   :  { %1999 = vmatmul.mubr.bf16.vlgmr.msra.gmra.mxu0 %v3541_v54 }
  0xa3   :  { %2049 = vmatpush1.bf16.msra.mxu0 %v2792_v56  ;;  %2080 = vmatprep.mubr.bf16.mxu0 %v3154_v51  ;;  %v2812_v51 = vld [vmem:[%s3955_s1 + $0x28c] ss:$16 sps:$4 sm:$0xff]  }
  0xa4   :  { %2024 = vmatpush2.bf16.msra.mxu1 %v2789_v55  ;;  %2050 = vmatprep.subr.bf16.mxu0 %v2800_v58  ;;  %v2881_v55 = vld [vmem:[%s3955_s1 + $0x30c] ss:$16 sps:$4 sm:$0xff]   ;;  %v2882_v58 = vld [vmem:[%s3955_s1 + $0x408] ss:$16 sps:$4 sm:$0xff]  }
  0xa5   :  { %2025 = vmatprep.subr.bf16.mxu1 %v2797_v57  ;;  %v2884_v56 = vld [vmem:[%s3955_s1 + $0x40c] ss:$16 sps:$4 sm:$0xff]   ;;  %v2879_v57 = vld [vmem:[%s3955_s1 + $0x308] ss:$16 sps:$4 sm:$0xff]  }
  0xa7   :  { %2051 = vmatpush1.bf16.msra.mxu0 %v2798_v60  ;;  %v2890_v60 = vld [vmem:[%s3955_s1 + $0x6ec] ss:$16 sps:$4 sm:$0xff]  }
  0xa8   :  { %2026 = vmatpush2.bf16.msra.mxu1 %v2795_v59  ;;  %2052 = vmatprep.subr.bf16.mxu0 %v2806_v62  ;;  %v2887_v59 = vld [vmem:[%s3955_s1 + $0x5ec] ss:$16 sps:$4 sm:$0xff]   ;;  %v2888_v62 = vld [vmem:[%s3955_s1 + $0x6e8] ss:$16 sps:$4 sm:$0xff]  }
  0xa9   :  { %2027 = vmatprep.subr.bf16.mxu1 %v2803_v61  ;;  %v2885_v61 = vld [vmem:[%s3955_s1 + $0x5e8] ss:$16 sps:$4 sm:$0xff]  }
  0xab   :  { %2053 = vmatpush1.bf16.msra.mxu0 %v2804_v0  ;;  %v2896_v0 = vld [vmem:[%s3955_s1 + $0x6cc] ss:$16 sps:$4 sm:$0xff]  }
  0xac   :  { %2028 = vmatpush2.bf16.msra.mxu1 %v2801_v63  ;;  %2054 = vmatprep.subr.bf16.mxu0 %v2812_v51  ;;  %v2893_v63 = vld [vmem:[%s3955_s1 + $0x5cc] ss:$16 sps:$4 sm:$0xff]   ;;  %v2894_v51 = vld [vmem:[%s3955_s1 + $0x6c8] ss:$16 sps:$4 sm:$0xff]  }
  0xad   :  { %2029 = vmatprep.subr.bf16.mxu1 %v2809_v1  ;;  %v2891_v1 = vld [vmem:[%s3955_s1 + $0x5c8] ss:$16 sps:$4 sm:$0xff]  }
  0xaf   :  { %2055 = vmatpush1.bf16.msra.mxu0 %v2810_v3  ;;  %v2897_v3 = vld [vmem:[%s3955_s1 + $0x5a8] ss:$16 sps:$4 sm:$0xff]  }
  0xb0   :  { %2030 = vmatpush2.bf16.msra.mxu1 %v2807_v2  ;;  %2056 = vmatprep.subr.bf16.mxu0 %v2818_v5  ;;  %v2899_v2 = vld [vmem:[%s3955_s1 + $0x5ac] ss:$16 sps:$4 sm:$0xff]  }
  0xb1   :  { %2031 = vmatprep.subr.bf16.mxu1 %v2815_v4  ;;  %v2900_v4 = vld [vmem:[%s3955_s1 + $0x6a8] ss:$16 sps:$4 sm:$0xff]   ;;  %v2905_v5 = vld [vmem:[%s3955_s1 + $0x58c] ss:$16 sps:$4 sm:$0xff]  }
  0xb3   :  { %2057 = vmatpush1.bf16.msra.mxu0 %v2816_v9  ;;  %v2906_v9 = vld [vmem:[%s3955_s1 + $0x688] ss:$16 sps:$4 sm:$0xff]  }
  0xb4   :  { %2032 = vmatpush2.bf16.msra.mxu1 %v2813_v8  ;;  %2058 = vmatprep.subr.bf16.mxu0 %v2824_v11  ;;  %v2903_v8 = vld [vmem:[%s3955_s1 + $0x588] ss:$16 sps:$4 sm:$0xff]   ;;  %v2914_v11 = vld [vmem:[%s3955_s1 + $0x66c] ss:$16 sps:$4 sm:$0xff]  }
  0xb5   :  { %2033 = vmatprep.subr.bf16.mxu1 %v2821_v10  ;;  %v2911_v10 = vld [vmem:[%s3955_s1 + $0x56c] ss:$16 sps:$4 sm:$0xff]  }
  0xb7   :  { %2059 = vmatpush1.bf16.msra.mxu0 %v2822_v13  ;;  %v2912_v13 = vld [vmem:[%s3955_s1 + $0x668] ss:$16 sps:$4 sm:$0xff]  }
  0xb8   :  { %2034 = vmatpush2.bf16.msra.mxu1 %v2819_v12  ;;  %2060 = vmatprep.subr.bf16.mxu0 %v2830_v15  ;;  %v2909_v12 = vld [vmem:[%s3955_s1 + $0x568] ss:$16 sps:$4 sm:$0xff]   ;;  %v2920_v15 = vld [vmem:[%s3955_s1 + $0x64c] ss:$16 sps:$4 sm:$0xff]  }
  0xb9   :  { %2035 = vmatprep.subr.bf16.mxu1 %v2827_v14  ;;  %v2917_v14 = vld [vmem:[%s3955_s1 + $0x54c] ss:$16 sps:$4 sm:$0xff]  }
  0xbb   :  { %2061 = vmatpush1.bf16.msra.mxu0 %v2828_v19  ;;  %v2918_v19 = vld [vmem:[%s3955_s1 + $0x648] ss:$16 sps:$4 sm:$0xff]  }
  0xbc   :  { %2036 = vmatpush2.bf16.msra.mxu1 %v2825_v18  ;;  %2062 = vmatprep.subr.bf16.mxu0 %v2836_v21  ;;  %v2915_v18 = vld [vmem:[%s3955_s1 + $0x548] ss:$16 sps:$4 sm:$0xff]   ;;  %v2923_v21 = vld [vmem:[%s3955_s1 + $0x52c] ss:$16 sps:$4 sm:$0xff]  }
  0xbd   :  { %2037 = vmatprep.subr.bf16.mxu1 %v2833_v20  ;;  %v310_v20 = vlaneseq }
  0xbf   :  { %2063 = vmatpush1.bf16.msra.mxu0 %v2834_v23  ;;  %v2921_v23 = vld [vmem:[%s3955_s1 + $0x528] ss:$16 sps:$4 sm:$0xff]  }
  0xc0   :  { %2038 = vmatpush2.bf16.msra.mxu1 %v2831_v22  ;;  %2064 = vmatprep.subr.bf16.mxu0 %v2839_v24  ;;  %v2926_v22 = vld [vmem:[%s3955_s1 + $0x62c] ss:$16 sps:$4 sm:$0xff]   ;;  %v2924_v24 = vld [vmem:[%s3955_s1 + $0x628] ss:$16 sps:$4 sm:$0xff]  }
  0xc1   :  { %2089 = vmatprep.subr.bf16.mxu1 %v2842_v25  ;;  %v3819_v25 = vshrl.u32 %v310_v20, 7 }
  0xc3   :  { %2040 = vmatmul.mubr.bf16.vlgmr.msra.gmra.mxu1 %v3212_v6  ;;  %2065 = vmatpush2.bf16.msra.mxu0 %v2837_v27  ;;  %v2854_v6 = vld [vmem:[%s3955_s1 + $0x4ac] ss:$16 sps:$4 sm:$0xff]  }
  0xc4   :  { %2090 = vmatpush1.bf16.msra.mxu1 %v2840_v28  ;;  %2066 = vmatprep.subr.bf16.mxu0 %v2845_v29  ;;  %v2929_v27 = vld [vmem:[%s3955_s1 + $0x50c] ss:$16 sps:$4 sm:$0xff]   ;;  %v2927_v29 = vld [vmem:[%s3955_s1 + $0x508] ss:$16 sps:$4 sm:$0xff]  }
  0xc5   :  { %2091 = vmatprep.subr.bf16.mxu1 %v2848_v47  ;;  %2121 = vmatprep.mubr.bf16.mxu1 %v3308_v36  ;;  %v2860_v36 = vld [vmem:[%s3955_s1 + $0x48c] ss:$16 sps:$4 sm:$0xff]   ;;  %v2930_v47 = vld [vmem:[%s3955_s1 + $0x608] ss:$16 sps:$4 sm:$0xff]  }
  0xc6   :  { %v2932_v28 = vld [vmem:[%s3955_s1 + $0x60c] ss:$16 sps:$4 sm:$0xff]  }
  0xc7   :  { %2067 = vmatpush2.bf16.msra.mxu0 %v2843_v30  ;;  %v312_v30 = vsub.s32 0, %v3819_v25 }
  0xc8   :  { %2092 = vmatpush1.bf16.msra.mxu1 %v2846_v31  ;;  %2068 = vmatprep.subr.bf16.mxu0 %v2851_v32  ;;  %v3837_v31 = vld [vmem:[%s3957_s2] sm:$0xf]  ;;  %v2935_v32 = vld [vmem:[%s3955_s1 + $0x7ec] ss:$16 sps:$4 sm:$0xff]  }
  0xc9   :  { %2093 = vmatprep.subr.bf16.mxu1 %v2854_v6  ;;  %v2938_v6 = vld [vmem:[%s3955_s1 + $0x8ec] ss:$16 sps:$4 sm:$0xff]  }
  0xcb   :  { %2069 = vmatpush2.bf16.msra.mxu0 %v2849_v33  ;;  %v316_v33 = vsub.s32 1, %v3819_v25 }
  0xcc   :  { %2094 = vmatpush1.bf16.msra.mxu1 %v2852_v34  ;;  %2070 = vmatprep.subr.bf16.mxu0 %v2857_v35  ;;  %v313_v34 = vrot.slane %v3837_v31, %v312_v30  ;;  %v2933_v35 = vld [vmem:[%s3955_s1 + $0x7e8] ss:$16 sps:$4 sm:$0xff]  }
  0xcd   :  { %2095 = vmatprep.subr.bf16.mxu1 %v2860_v36  ;;  %v2936_v36 = vld [vmem:[%s3955_s1 + $0x8e8] ss:$16 sps:$4 sm:$0xff]  }
  0xcf   :  { %2071 = vmatpush2.bf16.msra.mxu0 %v2855_v38  ;;  %v2941_v38 = vld [vmem:[%s3955_s1 + $0x7cc] ss:$16 sps:$4 sm:$0xff]  }
  0xd0   :  { %2096 = vmatpush1.bf16.msra.mxu1 %v2858_v39  ;;  %2072 = vmatprep.subr.bf16.mxu0 %v2863_v40  ;;  %v2944_v39 = vld [vmem:[%s3955_s1 + $0x8cc] ss:$16 sps:$4 sm:$0xff]   ;;  %v317_v40 = vrot.slane %v3837_v31, %v316_v33 }
  0xd1   :  { %2097 = vmatprep.subr.bf16.mxu1 %v2866_v41 }
  0xd3   :  { %2073 = vmatpush2.bf16.msra.mxu0 %v2861_v42 }
  0xd4   :  { %2098 = vmatpush1.bf16.msra.mxu1 %v2864_v43  ;;  %2074 = vmatprep.subr.bf16.mxu0 %v2869_v44  ;;  %v2939_v44 = vld [vmem:[%s3955_s1 + $0x7c8] ss:$16 sps:$4 sm:$0xff]  }
  0xd5   :  { %2099 = vmatprep.subr.bf16.mxu1 %v2872_v45  ;;  %v2942_v45 = vld [vmem:[%s3955_s1 + $0x8c8] ss:$16 sps:$4 sm:$0xff]  }
  0xd7   :  { %2075 = vmatpush2.bf16.msra.mxu0 %v2867_v46 }
  0xd8   :  { %2100 = vmatpush1.bf16.msra.mxu1 %v2870_v48  ;;  %2076 = vmatprep.subr.bf16.mxu0 %v2875_v49  ;;  %v2947_v49 = vld [vmem:[%s3955_s1 + $0x7ac] ss:$16 sps:$4 sm:$0xff]  }
  0xd9   :  { %2101 = vmatprep.subr.bf16.mxu1 %v2878_v50 }
  0xdb   :  { %2077 = vmatpush2.bf16.msra.mxu0 %v2873_v52 }
  0xdc   :  { %2102 = vmatpush1.bf16.msra.mxu1 %v2876_v53  ;;  %2078 = vmatprep.subr.bf16.mxu0 %v2881_v55 }
  0xdd   :  { %2103 = vmatprep.subr.bf16.mxu1 %v2884_v56 }
  0xdf   :  { %2079 = vmatpush2.bf16.msra.mxu0 %v2879_v57  ;;  %v2945_v57 = vld [vmem:[%s3955_s1 + $0x7a8] ss:$16 sps:$4 sm:$0xff]  }
  0xe0   :  { %2104 = vmatpush1.bf16.msra.mxu1 %v2882_v58  ;;  %2130 = vmatprep.subr.bf16.mxu0 %v2890_v60  ;;  %v2948_v58 = vld [vmem:[%s3955_s1 + $0x8a8] ss:$16 sps:$4 sm:$0xff]  }
  0xe1   :  { %2105 = vmatprep.subr.bf16.mxu1 %v2887_v59 }
  0xe2   :  { %2081 = vmatmul.mubr.bf16.vlgmr.msra.gmra.mxu0 %v3214_v7  ;;  %v2902_v7 = vld [vmem:[%s3955_s1 + $0x6ac] ss:$16 sps:$4 sm:$0xff]  }
  0xe3   :  { %2131 = vmatpush1.bf16.msra.mxu0 %v2888_v62  ;;  %2162 = vmatprep.mubr.bf16.mxu0 %v3312_v37  ;;  %v2908_v37 = vld [vmem:[%s3955_s1 + $0x68c] ss:$16 sps:$4 sm:$0xff]   ;;  %v2951_v62 = vld [vmem:[%s3955_s1 + $0x788] ss:$16 sps:$4 sm:$0xff]  }
  0xe4   :  { %2106 = vmatpush2.bf16.msra.mxu1 %v2885_v61  ;;  %2132 = vmatprep.subr.bf16.mxu0 %v2896_v0  ;;  %v2956_v61 = vld [vmem:[%s3955_s1 + $0x88c] ss:$16 sps:$4 sm:$0xff]  }
  0xe5   :  { %2107 = vmatprep.subr.bf16.mxu1 %v2893_v63  ;;  %v2954_v63 = vld [vmem:[%s3955_s1 + $0x888] ss:$16 sps:$4 sm:$0xff]   ;;  %v2959_v0 = vld [vmem:[%s3955_s1 + $0x76c] ss:$16 sps:$4 sm:$0xff]  }
  0xe7   :  { %2133 = vmatpush1.bf16.msra.mxu0 %v2894_v51  ;;  %v2957_v51 = vld [vmem:[%s3955_s1 + $0x768] ss:$16 sps:$4 sm:$0xff]  }
  0xe8   :  { %2108 = vmatpush2.bf16.msra.mxu1 %v2891_v1  ;;  %2134 = vmatprep.subr.bf16.mxu0 %v2902_v7  ;;  %v2962_v1 = vld [vmem:[%s3955_s1 + $0x86c] ss:$16 sps:$4 sm:$0xff]  }
  0xe9   :  { %2109 = vmatprep.subr.bf16.mxu1 %v2899_v2  ;;  %v2960_v2 = vld [vmem:[%s3955_s1 + $0x868] ss:$16 sps:$4 sm:$0xff]   ;;  %v2965_v7 = vld [vmem:[%s3955_s1 + $0x74c] ss:$16 sps:$4 sm:$0xff]  }
  0xeb   :  { %2135 = vmatpush1.bf16.msra.mxu0 %v2900_v4  ;;  %v2963_v4 = vld [vmem:[%s3955_s1 + $0x748] ss:$16 sps:$4 sm:$0xff]  }
  0xec   :  { %2110 = vmatpush2.bf16.msra.mxu1 %v2897_v3  ;;  %2136 = vmatprep.subr.bf16.mxu0 %v2908_v37  ;;  %v2968_v3 = vld [vmem:[%s3955_s1 + $0x84c] ss:$16 sps:$4 sm:$0xff]  }
  0xed   :  { %2111 = vmatprep.subr.bf16.mxu1 %v2905_v5  ;;  %v2966_v5 = vld [vmem:[%s3955_s1 + $0x848] ss:$16 sps:$4 sm:$0xff]   ;;  %v2971_v37 = vld [vmem:[%s3955_s1 + $0x72c] ss:$16 sps:$4 sm:$0xff]  }
  0xef   :  { %2137 = vmatpush1.bf16.msra.mxu0 %v2906_v9  ;;  %v2969_v9 = vld [vmem:[%s3955_s1 + $0x728] ss:$16 sps:$4 sm:$0xff]  }
  0xf0   :  { %2112 = vmatpush2.bf16.msra.mxu1 %v2903_v8  ;;  %2138 = vmatprep.subr.bf16.mxu0 %v2914_v11  ;;  %v2974_v8 = vld [vmem:[%s3955_s1 + $0x82c] ss:$16 sps:$4 sm:$0xff]  }
  0xf1   :  { %2113 = vmatprep.subr.bf16.mxu1 %v2911_v10  ;;  %v2972_v10 = vld [vmem:[%s3955_s1 + $0x828] ss:$16 sps:$4 sm:$0xff]   ;;  %v2977_v11 = vld [vmem:[%s3955_s1 + $0x70c] ss:$16 sps:$4 sm:$0xff]  }
  0xf3   :  { %2139 = vmatpush1.bf16.msra.mxu0 %v2912_v13  ;;  %v2975_v13 = vld [vmem:[%s3955_s1 + $0x708] ss:$16 sps:$4 sm:$0xff]  }
  0xf4   :  { %2114 = vmatpush2.bf16.msra.mxu1 %v2909_v12  ;;  %2140 = vmatprep.subr.bf16.mxu0 %v2920_v15  ;;  %v2980_v12 = vld [vmem:[%s3955_s1 + $0x80c] ss:$16 sps:$4 sm:$0xff]  }
  0xf5   :  { %2115 = vmatprep.subr.bf16.mxu1 %v2917_v14  ;;  %v2978_v14 = vld [vmem:[%s3955_s1 + $0x808] ss:$16 sps:$4 sm:$0xff]  }
  0xf7   :  { %2141 = vmatpush1.bf16.msra.mxu0 %v2918_v19 }
  0xf8   :  { %2116 = vmatpush2.bf16.msra.mxu1 %v2915_v18  ;;  %2142 = vmatprep.subr.bf16.mxu0 %v2926_v22 }
  0xf9   :  { %2117 = vmatprep.subr.bf16.mxu1 %v2923_v21 }
  0xfb   :  { %2143 = vmatpush1.bf16.msra.mxu0 %v2924_v24 }
  0xfc   :  { %2118 = vmatpush2.bf16.msra.mxu1 %v2921_v23  ;;  %2144 = vmatprep.subr.bf16.mxu0 %v2932_v28 }
  0xfd   :  { %2119 = vmatprep.subr.bf16.mxu1 %v2929_v27 }
  0xff   :  { %2145 = vmatpush1.bf16.msra.mxu0 %v2930_v47 }
 0x100   :  { %2120 = vmatpush2.bf16.msra.mxu1 %v2927_v29  ;;  %2146 = vmatprep.subr.bf16.mxu0 %v2935_v32 }
 0x101   :  { %2171 = vmatprep.subr.bf16.mxu1 %v2938_v6 }
 0x102   :  { %v1836_v41 = vpop.f32.mrf.mxu0 }
 0x103   :  { %v1877_v42 = vpop.f32.mrf.mxu1  ;;  %2122 = vmatmul.mubr.bf16.vlgmr.msra.gmra.mxu1 %v3432_v16  ;;  %v1837_v43 = vadd.f32 %v1836_v41, %v313_v34  ;;  %2147 = vmatpush2.bf16.msra.mxu0 %v2933_v35  ;;  %v2950_v16 = vld [vmem:[%s3955_s1 + $0x8ac] ss:$16 sps:$4 sm:$0xff]  }
 0x104   :  { %2172 = vmatpush1.bf16.msra.mxu1 %v2936_v36  ;;  %v1838_v46 = vpop.f32.mrf.mxu0  ;;  %2148 = vmatprep.subr.bf16.mxu0 %v2941_v38 }
 0x105   :  { %v1879_v48 = vpop.f32.mrf.mxu1  ;;  %2173 = vmatprep.subr.bf16.mxu1 %v2944_v39  ;;  %v3873_v50 = vadd.f32 %v1877_v42, %v1837_v43  ;;  %v1839_v52 = vadd.f32 %v1838_v46, %v317_v40  ;;  %2203 = vmatprep.mubr.bf16.mxu1 %v2981_v26  ;;  %v2953_v26 = vld [vmem:[%s3955_s1 + $0x78c] ss:$16 sps:$4 sm:$0xff]  }
 0x106   :  { %v1840_v53 = vpop.f32.mrf.mxu0 }
 0x107   :  { %v1881_v55 = vpop.f32.mrf.mxu1  ;;  %v1880_v56 = vadd.f32 %v1879_v48, %v1839_v52  ;;  %2149 = vmatpush2.bf16.msra.mxu0 %v2939_v44  ;;  %v324_v52 = vsub.s32 3, %v3819_v25 }
 0x108   :  { %2174 = vmatpush1.bf16.msra.mxu1 %v2942_v45  ;;  %v1841_v59 = vpop.f32.mrf.mxu0  ;;  %2150 = vmatprep.subr.bf16.mxu0 %v2947_v49 }
 0x109   :  { %v1882_v60 = vpop.f32.mrf.mxu1  ;;  %2175 = vmatprep.subr.bf16.mxu1 %v2950_v16  ;;  %v325_v55 = vrot.slane %v3837_v31, %v324_v52 }
 0x10b   :  { %2151 = vmatpush2.bf16.msra.mxu0 %v2945_v57 }
 0x10c   :  { %2176 = vmatpush1.bf16.msra.mxu1 %v2948_v58  ;;  %2152 = vmatprep.subr.bf16.mxu0 %v2953_v26 }
 0x10d   :  { %2177 = vmatprep.subr.bf16.mxu1 %v2956_v61 }
 0x10f   :  { %2153 = vmatpush2.bf16.msra.mxu0 %v2951_v62 }
 0x110   :  { %2178 = vmatpush1.bf16.msra.mxu1 %v2954_v63  ;;  %2154 = vmatprep.subr.bf16.mxu0 %v2959_v0 }
 0x111   :  { %2179 = vmatprep.subr.bf16.mxu1 %v2962_v1 }
 0x113   :  { %2155 = vmatpush2.bf16.msra.mxu0 %v2957_v51 }
 0x114   :  { %2180 = vmatpush1.bf16.msra.mxu1 %v2960_v2  ;;  %2156 = vmatprep.subr.bf16.mxu0 %v2965_v7 }
 0x115   :  { %2181 = vmatprep.subr.bf16.mxu1 %v2968_v3 }
 0x117   :  { %2157 = vmatpush2.bf16.msra.mxu0 %v2963_v4 }
 0x118   :  { %2182 = vmatpush1.bf16.msra.mxu1 %v2966_v5  ;;  %2158 = vmatprep.subr.bf16.mxu0 %v2971_v37 }
 0x119   :  { %2183 = vmatprep.subr.bf16.mxu1 %v2974_v8 }
 0x11b   :  { %2159 = vmatpush2.bf16.msra.mxu0 %v2969_v9 }
 0x11c   :  { %2184 = vmatpush1.bf16.msra.mxu1 %v2972_v10  ;;  %2160 = vmatprep.subr.bf16.mxu0 %v2977_v11 }
 0x11d   :  { %2185 = vmatprep.subr.bf16.mxu1 %v2980_v12 }
 0x11f   :  { %2161 = vmatpush2.bf16.msra.mxu0 %v2975_v13 }
 0x120   :  { %2186 = vmatpush1.bf16.msra.mxu1 %v2978_v14 }
 0x122   :  { %2163 = vmatmul.mubr.bf16.vlgmr.msra.gmra.mxu0 %v3436_v17 }
 0x123   :  { %2204 = vmatmul.mubr.bf16.vlgmr.msra.gmra.mxu1 %v3541_v54 }
 0x142   :  { %v1918_v15 = vpop.f32.mrf.mxu0 }
 0x143   :  { %v1959_v18 = vpop.f32.mrf.mxu1  ;;  %v1919_v27 = vadd.f32 %v1918_v15, %v3873_v50  ;;  %v320_v50 = vsub.s32 2, %v3819_v25 }
 0x144   :  { %v1920_v19 = vpop.f32.mrf.mxu0 }
 0x145   :  { %v1961_v20 = vpop.f32.mrf.mxu1  ;;  %v1921_v28 = vadd.f32 %v1920_v19, %v1880_v56  ;;  %v1960_v29 = vadd.f32 %v1959_v18, %v1919_v27  ;;  %v321_v53 = vrot.slane %v3837_v31, %v320_v50 }
 0x146   :  { %v1922_v21 = vpop.f32.mrf.mxu0 }
 0x147   :  { %v1963_v22 = vpop.f32.mrf.mxu1  ;;  %v1962_v30 = vadd.f32 %v1961_v20, %v1921_v28 }
 0x148   :  { %v1923_v23 = vpop.f32.mrf.mxu0 }
 0x149   :  { %v1964_v24 = vpop.f32.mrf.mxu1 }
 0x162   :  { %v2000_v47 = vpop.f32.mrf.mxu0 }
 0x163   :  { %v2001_v32 = vadd.f32 %v2000_v47, %v1960_v29 }
 0x164   :  { %v2002_v6 = vpop.f32.mrf.mxu0 }
 0x165   :  { %v2003_v33 = vadd.f32 %v2002_v6, %v1962_v30  ;;  %v2212_v34 = vmax.f32 %v2001_v32, 0.0 }
 0x166   :  { %v2004_v17 = vpop.f32.mrf.mxu0 }
 0x167   :  { %v2213_v54 = vmax.f32 %v2003_v33, 0.0 }
 0x168   :  { %v2005_v35 = vpop.f32.mrf.mxu0 }
 0x169   :  { %v2537_v36 = vpack.c.bf16 %v2213_v54, %v2212_v34 }
 0x16b   :  { %2232 = vst [vmem:[%s3958_s3] sm:$0xff] %v2537_v36 }
 0x183   :  { %v2041_v38 = vpop.f32.mrf.mxu1 }
 0x184   :  { %v2042_v56 = vadd.f32 %v2041_v38, %v321_v53 }
 0x185   :  { %v2043_v39 = vpop.f32.mrf.mxu1 }
 0x186   :  { %v2044_v57 = vadd.f32 %v2043_v39, %v325_v55 }
 0x187   :  { %v2045_v40 = vpop.f32.mrf.mxu1 }
 0x189   :  { %v2046_v41 = vpop.f32.mrf.mxu1 }
 0x1a2   :  { %v2082_v42 = vpop.f32.mrf.mxu0 }
 0x1a3   :  { %v2083_v58 = vadd.f32 %v2082_v42, %v2042_v56 }
 0x1a4   :  { %v2084_v43 = vpop.f32.mrf.mxu0 }
 0x1a5   :  { %v2085_v59 = vadd.f32 %v2084_v43, %v2044_v57 }
 0x1a6   :  { %v2086_v44 = vpop.f32.mrf.mxu0 }
 0x1a8   :  { %v2087_v45 = vpop.f32.mrf.mxu0 }
 0x1c3   :  { %v2123_v46 = vpop.f32.mrf.mxu1 }
 0x1c4   :  { %v2124_v60 = vadd.f32 %v2123_v46, %v2083_v58 }
 0x1c5   :  { %v2125_v48 = vpop.f32.mrf.mxu1 }
 0x1c6   :  { %v2126_v62 = vadd.f32 %v2125_v48, %v2085_v59 }
 0x1c7   :  { %v2127_v49 = vpop.f32.mrf.mxu1 }
 0x1c9   :  { %v2128_v16 = vpop.f32.mrf.mxu1 }
 0x1e2   :  { %v2164_v26 = vpop.f32.mrf.mxu0 }
 0x1e3   :  { %v2205_v61 = vpop.f32.mrf.mxu1  ;;  %v2165_v63 = vadd.f32 %v2164_v26, %v2124_v60 }
 0x1e4   :  { %v2166_v0 = vpop.f32.mrf.mxu0 }
 0x1e5   :  { %v2207_v1 = vpop.f32.mrf.mxu1  ;;  %v2206_v51 = vadd.f32 %v2205_v61, %v2165_v63  ;;  %v2167_v2 = vadd.f32 %v2166_v0, %v2126_v62 }
 0x1e6   :  { %v2168_v7 = vpop.f32.mrf.mxu0 }
 0x1e7   :  { %v2209_v3 = vpop.f32.mrf.mxu1  ;;  %v2208_v25 = vadd.f32 %v2207_v1, %v2167_v2  ;;  %v2214_v37 = vmax.f32 %v2206_v51, 0.0 }
 0x1e8   :  { %v2169_v4 = vpop.f32.mrf.mxu0 }
 0x1e9   :  { %v2210_v5 = vpop.f32.mrf.mxu1  ;;  %v2215_v31 = vmax.f32 %v2208_v25, 0.0 }
 0x1eb   :  { %v2538_v8 = vpack.c.bf16 %v2215_v31, %v2214_v37 }
 0x1ed   :  { %2233 = vst [vmem:[%s3958_s3 + $0x8] sm:$0xff] %v2538_v8 }

// kernel: mwt_forward.16
= control target key start
LH: loop header
LB: loop body
LE: loop exit
PB: predicated region body
PF: predicated region fallthrough
CT: control target
= control target key end

     0   :  { %vm1125_vm0 = vmmov 0   ;;  %s1383_s1 = inlined_call_operand.vmem [shape: bf16[1152,128], index: 1, kind: input, shape index: {}]   ;;  %s1384_s0 = inlined_call_operand.vmem [shape: bf16[8,1152], index: 0, kind: input, shape index: {}]   ;;  %s1385_s2 = inlined_call_operand.vmem [shape: f32[1,128], index: 2, kind: input, shape index: {}]   ;;  %s1386_s3 = inlined_call_operand.vmem [shape: bf16[8,128], index: 3, kind: output, shape index: {}]  }
   0x1   :  { %v1043_v0 = vld [vmem:[%s1383_s1 + $0x78] sm:$0xff]   ;;  %v1047_v4 = vld [vmem:[%s1383_s1 + $0x70] sm:$0xff]   ;;  %v1051_v8 = vld [vmem:[%s1383_s1 + $0x68] sm:$0xff]  }
   0x2   :  { %v1044_v1 = vld [vmem:[%s1383_s1 + $0x38] sm:$0xff]   ;;  %924 = vmatprep.subr.bf16.mxu0 %v1043_v0  ;;  %v1048_v5 = vld [vmem:[%s1383_s1 + $0x30] sm:$0xff]   ;;  %v1052_v9 = vld [vmem:[%s1383_s1 + $0x28] sm:$0xff]  }
   0x3   :  { %v1045_v2 = vld [vmem:[%s1383_s1 + $0xf8] sm:$0xff]   ;;  %925 = vmatpush3.bf16.msra.mxu0 %v1044_v1  ;;  %v1049_v6 = vld [vmem:[%s1383_s1 + $0xf0] sm:$0xff]   ;;  %v1053_v10 = vld [vmem:[%s1383_s1 + $0xe8] sm:$0xff]  }
   0x4   :  { %v1046_v3 = vld [vmem:[%s1383_s1 + $0xb8] sm:$0xff]   ;;  %946 = vmatprep.subr.bf16.mxu1 %v1045_v2  ;;  %926 = vmatprep.subr.bf16.mxu0 %v1047_v4  ;;  %v1050_v7 = vld [vmem:[%s1383_s1 + $0xb0] sm:$0xff]   ;;  %v1054_v11 = vld [vmem:[%s1383_s1 + $0xa8] sm:$0xff]  }
   0x5   :  { %947 = vmatpush3.bf16.msra.mxu1 %v1046_v3  ;;  %v1055_v12 = vld [vmem:[%s1383_s1 + $0x60] sm:$0xff]   ;;  %v1059_v16 = vld [vmem:[%s1383_s1 + $0x58] sm:$0xff]   ;;  %v1063_v20 = vld [vmem:[%s1383_s1 + $0x50] sm:$0xff]  }
   0x6   :  { %948 = vmatprep.subr.bf16.mxu1 %v1049_v6  ;;  %v1056_v13 = vld [vmem:[%s1383_s1 + $0x20] sm:$0xff]   ;;  %v1060_v17 = vld [vmem:[%s1383_s1 + $0x18] sm:$0xff]   ;;  %v1064_v21 = vld [vmem:[%s1383_s1 + $0x10] sm:$0xff]  }
   0x7   :  { %927 = vmatpush3.bf16.msra.mxu0 %v1048_v5  ;;  %v1057_v14 = vld [vmem:[%s1383_s1 + $0xe0] sm:$0xff]   ;;  %v1061_v18 = vld [vmem:[%s1383_s1 + $0xd8] sm:$0xff]   ;;  %v1065_v22 = vld [vmem:[%s1383_s1 + $0xd0] sm:$0xff]  }
   0x8   :  { %928 = vmatprep.subr.bf16.mxu0 %v1051_v8  ;;  %v1058_v15 = vld [vmem:[%s1383_s1 + $0xa0] sm:$0xff]   ;;  %v1062_v19 = vld [vmem:[%s1383_s1 + $0x98] sm:$0xff]   ;;  %v1066_v23 = vld [vmem:[%s1383_s1 + $0x90] sm:$0xff]  }
   0x9   :  { %949 = vmatpush3.bf16.msra.mxu1 %v1050_v7  ;;  %v1067_v24 = vld [vmem:[%s1383_s1 + $0x48] sm:$0xff]   ;;  %v1071_v28 = vld [vmem:[%s1383_s1 + $0x40] sm:$0xff]   ;;  %v1077_v35 = vld [vmem:[%s1383_s1 + $0x178] sm:$0xff]  }
   0xa   :  { %950 = vmatprep.subr.bf16.mxu1 %v1053_v10  ;;  %v1068_v25 = vld [vmem:[%s1383_s1 + $0x8] sm:$0xff]   ;;  %v1072_v29 = vld [vmem:[%s1383_s1] sm:$0xff]   ;;  %v1080_v39 = vld [vmem:[%s1383_s1 + $0x138] sm:$0xff]  }
   0xb   :  { %929 = vmatpush3.bf16.msra.mxu0 %v1052_v9  ;;  %v1069_v26 = vld [vmem:[%s1383_s1 + $0xc8] sm:$0xff]   ;;  %v1073_v30 = vld [vmem:[%s1383_s1 + $0xc0] sm:$0xff]   ;;  %v1081_v40 = vld [vmem:[%s1383_s1 + $0x1f8] sm:$0xff]   ;;  %v1124_v9 = vmov 0.0  }
   0xc   :  { %930 = vmatprep.subr.bf16.mxu0 %v1055_v12  ;;  %v1070_v27 = vld [vmem:[%s1383_s1 + $0x88] sm:$0xff]   ;;  %v15_v31 = vld [vmem:[%s1384_s0] sm:$0xff]  ;;  %v1082_v41 = vld [vmem:[%s1383_s1 + $0x1b8] sm:$0xff]  }
   0xd   :  { %951 = vmatpush3.bf16.msra.mxu1 %v1054_v11  ;;  %v843_v32 = vcombine.low %v15_v31, %v15_v31  ;;  %v844_v33 = vcombine.high %v15_v31, %v15_v31  ;;  %v1076_v34 = vld [vmem:[%s1383_s1 + $0x80] sm:$0xff]   ;;  %v16_v36 = vld [vmem:[%s1384_s0 + $0x8] sm:$0xff]  ;;  %v1083_v42 = vld [vmem:[%s1383_s1 + $0x170] sm:$0xff]  }
   0xe   :  { %952 = vmatprep.subr.bf16.mxu1 %v1057_v14  ;;  %v845_v37 = vcombine.low %v16_v36, %v16_v36  ;;  %v846_v38 = vcombine.high %v16_v36, %v16_v36  ;;  %v1084_v43 = vld [vmem:[%s1383_s1 + $0x130] sm:$0xff]   ;;  %v1087_v46 = vld [vmem:[%s1383_s1 + $0x168] sm:$0xff]   ;;  %v1091_v50 = vld [vmem:[%s1383_s1 + $0x160] sm:$0xff]  }
   0xf   :  { %931 = vmatpush3.bf16.msra.mxu0 %v1056_v13  ;;  %667 = vmatprep.mubr.bf16.mxu0 %v844_v33  ;;  %v1085_v44 = vld [vmem:[%s1383_s1 + $0x1f0] sm:$0xff]   ;;  %v1088_v47 = vld [vmem:[%s1383_s1 + $0x128] sm:$0xff]   ;;  %v1092_v51 = vld [vmem:[%s1383_s1 + $0x120] sm:$0xff]  }
  0x10   :  { %932 = vmatprep.subr.bf16.mxu0 %v1059_v16  ;;  %707 = vmatprep.mubr.bf16.mxu1 %v846_v38  ;;  %v1086_v45 = vld [vmem:[%s1383_s1 + $0x1b0] sm:$0xff]   ;;  %v1089_v48 = vld [vmem:[%s1383_s1 + $0x1e8] sm:$0xff]   ;;  %v1093_v52 = vld [vmem:[%s1383_s1 + $0x1e0] sm:$0xff]  }
  0x11   :  { %953 = vmatpush3.bf16.msra.mxu1 %v1058_v15  ;;  %v1090_v49 = vld [vmem:[%s1383_s1 + $0x1a8] sm:$0xff]   ;;  %v1094_v53 = vld [vmem:[%s1383_s1 + $0x1a0] sm:$0xff]   ;;  %v1095_v54 = vld [vmem:[%s1383_s1 + $0x158] sm:$0xff]  }
  0x12   :  { %954 = vmatprep.subr.bf16.mxu1 %v1061_v18  ;;  %v1096_v55 = vld [vmem:[%s1383_s1 + $0x118] sm:$0xff]   ;;  %v1099_v58 = vld [vmem:[%s1383_s1 + $0x150] sm:$0xff]   ;;  %v1103_v62 = vld [vmem:[%s1383_s1 + $0x148] sm:$0xff]  }
  0x13   :  { %933 = vmatpush3.bf16.msra.mxu0 %v1060_v17  ;;  %v1097_v56 = vld [vmem:[%s1383_s1 + $0x1d8] sm:$0xff]   ;;  %v1100_v59 = vld [vmem:[%s1383_s1 + $0x110] sm:$0xff]   ;;  %v1104_v63 = vld [vmem:[%s1383_s1 + $0x108] sm:$0xff]  }
  0x14   :  { %934 = vmatprep.subr.bf16.mxu0 %v1063_v20  ;;  %v1098_v57 = vld [vmem:[%s1383_s1 + $0x198] sm:$0xff]   ;;  %v1101_v60 = vld [vmem:[%s1383_s1 + $0x1d0] sm:$0xff]   ;;  %v1105_v0 = vld [vmem:[%s1383_s1 + $0x1c8] sm:$0xff]  }
  0x15   :  { %955 = vmatpush3.bf16.msra.mxu1 %v1062_v19  ;;  %v1102_v61 = vld [vmem:[%s1383_s1 + $0x190] sm:$0xff]   ;;  %v1106_v1 = vld [vmem:[%s1383_s1 + $0x188] sm:$0xff]   ;;  %v1107_v2 = vld [vmem:[%s1383_s1 + $0x140] sm:$0xff]  }
  0x16   :  { %956 = vmatprep.subr.bf16.mxu1 %v1065_v22  ;;  %v1108_v3 = vld [vmem:[%s1383_s1 + $0x100] sm:$0xff]   ;;  %v17_v5 = vld [vmem:[%s1384_s0 + $0x10] sm:$0xff]  ;;  %v18_v10 = vld [vmem:[%s1384_s0 + $0x18] sm:$0xff] }
  0x17   :  { %935 = vmatpush3.bf16.msra.mxu0 %v1064_v21  ;;  %v1109_v4 = vld [vmem:[%s1383_s1 + $0x1c0] sm:$0xff]   ;;  %v847_v6 = vcombine.low %v17_v5, %v17_v5  ;;  %v848_v7 = vcombine.high %v17_v5, %v17_v5  ;;  %v849_v11 = vcombine.low %v18_v10, %v18_v10  ;;  %v850_v12 = vcombine.high %v18_v10, %v18_v10  ;;  %v1115_v13 = vld [vmem:[%s1383_s1 + $0x238] sm:$0xff]   ;;  %v1116_v14 = vld [vmem:[%s1383_s1 + $0x230] sm:$0xff]  }
  0x18   :  { %936 = vmatprep.subr.bf16.mxu0 %v1067_v24  ;;  %v1112_v8 = vld [vmem:[%s1383_s1 + $0x180] sm:$0xff]   ;;  %v1117_v15 = vld [vmem:[%s1383_s1 + $0x228] sm:$0xff]   ;;  %v1119_v17 = vld [vmem:[%s1383_s1 + $0x218] sm:$0xff]  }
  0x19   :  { %957 = vmatpush3.bf16.msra.mxu1 %v1066_v23  ;;  %v1118_v16 = vld [vmem:[%s1383_s1 + $0x220] sm:$0xff]   ;;  %v1120_v18 = vld [vmem:[%s1383_s1 + $0x210] sm:$0xff]   ;;  %v1121_v19 = vld [vmem:[%s1383_s1 + $0x208] sm:$0xff]  }
  0x1a   :  { %958 = vmatprep.subr.bf16.mxu1 %v1069_v26  ;;  %v1122_v20 = vld [vmem:[%s1383_s1 + $0x200] sm:$0xff]  }
  0x1b   :  { %937 = vmatpush3.bf16.msra.mxu0 %v1068_v25  ;;  %v1123_v21 = vld [vmem:[%s1384_s0 + $0x20] ss:$0 sps:$4 sm:$0xff]  }
  0x1c   :  { %938 = vmatprep.subr.bf16.mxu0 %v1071_v28 }
  0x1d   :  { %959 = vmatpush3.bf16.msra.mxu1 %v1070_v27 }
  0x1e   :  { %960 = vmatprep.subr.bf16.mxu1 %v1073_v30 }
  0x1f   :  { %939 = vmatpush3.bf16.msra.mxu0 %v1072_v29 }
  0x20   :  { %968 = vmatprep.subr.bf16.mxu0 %v1077_v35 }
  0x21   :  { %961 = vmatpush3.bf16.msra.mxu1 %v1076_v34 }
  0x22   :  { %668 = vmatmul.mubr.bf16.vlgmr.msra.gmra.mxu0 %v843_v32  ;;  %990 = vmatprep.subr.bf16.mxu1 %v1081_v40 }
  0x23   :  { %969 = vmatpush3.bf16.msra.mxu0 %v1080_v39  ;;  %747 = vmatprep.mubr.bf16.mxu0 %v848_v7  ;;  %v842_v39 = vld [vmem:[%s1385_s2] ss:$0 sm:$0xff] }
  0x24   :  { %708 = vmatmul.mubr.bf16.vlgmr.msra.gmra.mxu1 %v845_v37  ;;  %970 = vmatprep.subr.bf16.mxu0 %v1083_v42 }
  0x25   :  { %991 = vmatpush3.bf16.msra.mxu1 %v1082_v41  ;;  %787 = vmatprep.mubr.bf16.mxu1 %v850_v12 }
  0x26   :  { %992 = vmatprep.subr.bf16.mxu1 %v1085_v44 }
  0x27   :  { %971 = vmatpush3.bf16.msra.mxu0 %v1084_v43 }
  0x28   :  { %972 = vmatprep.subr.bf16.mxu0 %v1087_v46 }
  0x29   :  { %993 = vmatpush3.bf16.msra.mxu1 %v1086_v45 }
  0x2a   :  { %994 = vmatprep.subr.bf16.mxu1 %v1089_v48 }
  0x2b   :  { %973 = vmatpush3.bf16.msra.mxu0 %v1088_v47 }
  0x2c   :  { %974 = vmatprep.subr.bf16.mxu0 %v1091_v50 }
  0x2d   :  { %995 = vmatpush3.bf16.msra.mxu1 %v1090_v49 }
  0x2e   :  { %996 = vmatprep.subr.bf16.mxu1 %v1093_v52 }
  0x2f   :  { %975 = vmatpush3.bf16.msra.mxu0 %v1092_v51 }
  0x30   :  { %976 = vmatprep.subr.bf16.mxu0 %v1095_v54 }
  0x31   :  { %997 = vmatpush3.bf16.msra.mxu1 %v1094_v53 }
  0x32   :  { %998 = vmatprep.subr.bf16.mxu1 %v1097_v56 }
  0x33   :  { %977 = vmatpush3.bf16.msra.mxu0 %v1096_v55 }
  0x34   :  { %978 = vmatprep.subr.bf16.mxu0 %v1099_v58 }
  0x35   :  { %999 = vmatpush3.bf16.msra.mxu1 %v1098_v57 }
  0x36   :  { %1000 = vmatprep.subr.bf16.mxu1 %v1101_v60 }
  0x37   :  { %979 = vmatpush3.bf16.msra.mxu0 %v1100_v59 }
  0x38   :  { %980 = vmatprep.subr.bf16.mxu0 %v1103_v62 }
  0x39   :  { %1001 = vmatpush3.bf16.msra.mxu1 %v1102_v61 }
  0x3a   :  { %1002 = vmatprep.subr.bf16.mxu1 %v1105_v0 }
  0x3b   :  { %981 = vmatpush3.bf16.msra.mxu0 %v1104_v63 }
  0x3c   :  { %982 = vmatprep.subr.bf16.mxu0 %v1107_v2 }
  0x3d   :  { %1003 = vmatpush3.bf16.msra.mxu1 %v1106_v1 }
  0x3e   :  { %1004 = vmatprep.subr.bf16.mxu1 %v1109_v4 }
  0x3f   :  { %983 = vmatpush3.bf16.msra.mxu0 %v1108_v3 }
  0x40   :  { %1021 = vmatprep.subr.bf16.mxu0 %v1124_v9 }
  0x41   :  { %1005 = vmatpush3.bf16.msra.mxu1 %v1112_v8 }
  0x42   :  { %748 = vmatmul.mubr.bf16.vlgmr.msra.gmra.mxu0 %v847_v6 }
  0x43   :  { %1022 = vmatpush3.bf16.msra.mxu0 %v1115_v13  ;;  %1037 = vmatprep.mubr.msk.bf16.mxu0 %vm1125_vm0, %v1124_v9 }
  0x44   :  { %788 = vmatmul.mubr.bf16.vlgmr.msra.gmra.mxu1 %v849_v11  ;;  %1023 = vmatprep.subr.bf16.mxu0 %v1124_v9 }
  0x47   :  { %1024 = vmatpush3.bf16.msra.mxu0 %v1116_v14 }
  0x48   :  { %1025 = vmatprep.subr.bf16.mxu0 %v1124_v9 }
  0x4b   :  { %1026 = vmatpush3.bf16.msra.mxu0 %v1117_v15 }
  0x4c   :  { %1027 = vmatprep.subr.bf16.mxu0 %v1124_v9 }
  0x4f   :  { %1028 = vmatpush3.bf16.msra.mxu0 %v1118_v16 }
  0x50   :  { %1029 = vmatprep.subr.bf16.mxu0 %v1124_v9 }
  0x53   :  { %1030 = vmatpush3.bf16.msra.mxu0 %v1119_v17 }
  0x54   :  { %1031 = vmatprep.subr.bf16.mxu0 %v1124_v9 }
  0x57   :  { %1032 = vmatpush3.bf16.msra.mxu0 %v1120_v18 }
  0x58   :  { %1033 = vmatprep.subr.bf16.mxu0 %v1124_v9 }
  0x5b   :  { %1034 = vmatpush3.bf16.msra.mxu0 %v1121_v19 }
  0x5c   :  { %1035 = vmatprep.subr.bf16.mxu0 %v1124_v9 }
  0x5f   :  { %1036 = vmatpush3.bf16.msra.mxu0 %v1122_v20 }
  0x62   :  { %1038 = vmatmul.mubr.bf16.vlgmr.msra.gmra.mxu0 %v1123_v21 }
  0xe2   :  { %v940_v22 = vpop.f32.mrf.mxu0 }
  0xe4   :  { %v941_v23 = vpop.f32.mrf.mxu0  ;;  %v962_v24 = vpop.f32.mrf.mxu1 }
  0xe5   :  { %v942_v38 = vadd.f32 %v941_v23, %v940_v22 }
  0xe6   :  { %v943_v25 = vpop.f32.mrf.mxu0  ;;  %v963_v26 = vpop.f32.mrf.mxu1 }
  0xe7   :  { %v670_v40 = vadd.f32 %v942_v38, %v842_v39  ;;  %v964_v41 = vadd.f32 %v963_v26, %v962_v24 }
  0xe8   :  { %v944_v27 = vpop.f32.mrf.mxu0  ;;  %v965_v28 = vpop.f32.mrf.mxu1 }
  0xe9   :  { %v710_v43 = vadd.f32 %v964_v41, %v670_v40 }
  0xea   :  { %v966_v29 = vpop.f32.mrf.mxu1 }
 0x102   :  { %v984_v30 = vpop.f32.mrf.mxu0 }
 0x104   :  { %v985_v31 = vpop.f32.mrf.mxu0  ;;  %v1006_v32 = vpop.f32.mrf.mxu1 }
 0x105   :  { %v986_v42 = vadd.f32 %v985_v31, %v984_v30 }
 0x106   :  { %v987_v33 = vpop.f32.mrf.mxu0  ;;  %v1007_v34 = vpop.f32.mrf.mxu1 }
 0x107   :  { %v750_v44 = vadd.f32 %v986_v42, %v710_v43  ;;  %v1008_v45 = vadd.f32 %v1007_v34, %v1006_v32 }
 0x108   :  { %v988_v35 = vpop.f32.mrf.mxu0  ;;  %v1009_v36 = vpop.f32.mrf.mxu1 }
 0x109   :  { %v790_v46 = vadd.f32 %v1008_v45, %v750_v44 }
 0x10a   :  { %v1010_v37 = vpop.f32.mrf.mxu1 }
 0x122   :  { %v829_v47 = vpop.f32.mrf.mxu0 }
 0x123   :  { %v830_v48 = vadd.f32 %v829_v47, %v790_v46 }
 0x124   :  { %v1039_v49 = vpop.f32.mrf.mxu0 }
 0x125   :  { %v835_v50 = vmax.f32 %v830_v48, 0.0 }
 0x126   :  { %v832_v51 = vpop.f32.mrf.mxu0 }
 0x127   :  { %v836_v52 = vpack.c.bf16 %v835_v50, %v835_v50 }
 0x128   :  { %v1040_v53 = vpop.f32.mrf.mxu0 }
 0x129   :  { %837 = vst [vmem:[%s1386_s3] sm:$0xf] %v836_v52 }

// kernel: mwt_forward.15
= control target key start
LH: loop header
LB: loop body
LE: loop exit
PB: predicated region body
PF: predicated region fallthrough
CT: control target
= control target key end

     0   :  { %s5192_s1 = inlined_call_operand.vmem [shape: bf16[4608,128], index: 1, kind: input, shape index: {}]   ;;  %s5193_s0 = inlined_call_operand.vmem [shape: bf16[8,4608], index: 0, kind: input, shape index: {}]   ;;  %s5194_s2 = inlined_call_operand.vmem [shape: f32[1,128], index: 2, kind: input, shape index: {}]   ;;  %s5195_s3 = inlined_call_operand.vmem [shape: bf16[8,128], index: 3, kind: output, shape index: {}]  }
   0x1   :  { %v3918_v0 = vld [vmem:[%s5192_s1 + $0x78] sm:$0xff]   ;;  %v3922_v4 = vld [vmem:[%s5192_s1 + $0x70] sm:$0xff]   ;;  %v3926_v8 = vld [vmem:[%s5192_s1 + $0x68] sm:$0xff]  }
   0x2   :  { %v3919_v1 = vld [vmem:[%s5192_s1 + $0xf8] sm:$0xff]   ;;  %3522 = vmatprep.subr.bf16.mxu0 %v3918_v0  ;;  %v3923_v5 = vld [vmem:[%s5192_s1 + $0xf0] sm:$0xff]   ;;  %v3927_v9 = vld [vmem:[%s5192_s1 + $0xe8] sm:$0xff]  }
   0x3   :  { %v3920_v2 = vld [vmem:[%s5192_s1 + $0x38] sm:$0xff]   ;;  %3544 = vmatprep.subr.bf16.mxu1 %v3919_v1  ;;  %v3924_v6 = vld [vmem:[%s5192_s1 + $0x30] sm:$0xff]   ;;  %v3928_v10 = vld [vmem:[%s5192_s1 + $0x28] sm:$0xff]  }
   0x4   :  { %v3921_v3 = vld [vmem:[%s5192_s1 + $0xb8] sm:$0xff]   ;;  %3523 = vmatpush3.bf16.msra.mxu0 %v3920_v2  ;;  %v3925_v7 = vld [vmem:[%s5192_s1 + $0xb0] sm:$0xff]   ;;  %v3929_v11 = vld [vmem:[%s5192_s1 + $0xa8] sm:$0xff]  }
   0x5   :  { %3545 = vmatpush3.bf16.msra.mxu1 %v3921_v3  ;;  %3524 = vmatprep.subr.bf16.mxu0 %v3922_v4  ;;  %v3930_v12 = vld [vmem:[%s5192_s1 + $0x60] sm:$0xff]   ;;  %v3934_v16 = vld [vmem:[%s5192_s1 + $0x58] sm:$0xff]   ;;  %v3938_v20 = vld [vmem:[%s5192_s1 + $0x50] sm:$0xff]  }
   0x6   :  { %3546 = vmatprep.subr.bf16.mxu1 %v3923_v5  ;;  %v3931_v13 = vld [vmem:[%s5192_s1 + $0xe0] sm:$0xff]   ;;  %v3935_v17 = vld [vmem:[%s5192_s1 + $0xd8] sm:$0xff]   ;;  %v3939_v21 = vld [vmem:[%s5192_s1 + $0xd0] sm:$0xff]  }
   0x7   :  { %v3932_v14 = vld [vmem:[%s5192_s1 + $0x20] sm:$0xff]   ;;  %v3936_v18 = vld [vmem:[%s5192_s1 + $0x18] sm:$0xff]   ;;  %v3940_v22 = vld [vmem:[%s5192_s1 + $0x10] sm:$0xff]  }
   0x8   :  { %3525 = vmatpush3.bf16.msra.mxu0 %v3924_v6  ;;  %v3933_v15 = vld [vmem:[%s5192_s1 + $0xa0] sm:$0xff]   ;;  %v3937_v19 = vld [vmem:[%s5192_s1 + $0x98] sm:$0xff]   ;;  %v3941_v23 = vld [vmem:[%s5192_s1 + $0x90] sm:$0xff]  }
   0x9   :  { %3547 = vmatpush3.bf16.msra.mxu1 %v3925_v7  ;;  %3526 = vmatprep.subr.bf16.mxu0 %v3926_v8  ;;  %v3942_v24 = vld [vmem:[%s5192_s1 + $0x48] sm:$0xff]   ;;  %v3946_v28 = vld [vmem:[%s5192_s1 + $0x40] sm:$0xff]   ;;  %v3954_v38 = vld [vmem:[%s5192_s1 + $0x178] sm:$0xff]  }
   0xa   :  { %3548 = vmatprep.subr.bf16.mxu1 %v3927_v9  ;;  %v3943_v25 = vld [vmem:[%s5192_s1 + $0xc8] sm:$0xff]   ;;  %v3947_v29 = vld [vmem:[%s5192_s1 + $0xc0] sm:$0xff]   ;;  %v3955_v39 = vld [vmem:[%s5192_s1 + $0x1f8] sm:$0xff]  }
   0xb   :  { %v3944_v26 = vld [vmem:[%s5192_s1 + $0x8] sm:$0xff]   ;;  %v3948_v30 = vld [vmem:[%s5192_s1] sm:$0xff]   ;;  %v3956_v40 = vld [vmem:[%s5192_s1 + $0x138] sm:$0xff]  }
   0xc   :  { %3527 = vmatpush3.bf16.msra.mxu0 %v3928_v10  ;;  %v3945_v27 = vld [vmem:[%s5192_s1 + $0x88] sm:$0xff]   ;;  %v3949_v31 = vld [vmem:[%s5192_s1 + $0x80] sm:$0xff]   ;;  %v3957_v41 = vld [vmem:[%s5192_s1 + $0x1b8] sm:$0xff]  }
   0xd   :  { %3549 = vmatpush3.bf16.msra.mxu1 %v3929_v11  ;;  %3528 = vmatprep.subr.bf16.mxu0 %v3930_v12  ;;  %v15_v32 = vld [vmem:[%s5193_s0] sm:$0xff]  ;;  %v16_v33 = vld [vmem:[%s5193_s0 + $0x8] sm:$0xff]  ;;  %v3958_v42 = vld [vmem:[%s5192_s1 + $0x170] sm:$0xff]  }
   0xe   :  { %3550 = vmatprep.subr.bf16.mxu1 %v3931_v13  ;;  %v3198_v34 = vcombine.low %v15_v32, %v15_v32  ;;  %v3199_v35 = vcombine.high %v15_v32, %v15_v32  ;;  %v3200_v36 = vcombine.low %v16_v33, %v16_v33  ;;  %v3201_v37 = vcombine.high %v16_v33, %v16_v33  ;;  %v3959_v43 = vld [vmem:[%s5192_s1 + $0x1f0] sm:$0xff]   ;;  %v3962_v46 = vld [vmem:[%s5192_s1 + $0x168] sm:$0xff]   ;;  %v3966_v50 = vld [vmem:[%s5192_s1 + $0x160] sm:$0xff]  }
   0xf   :  { %v3960_v44 = vld [vmem:[%s5192_s1 + $0x130] sm:$0xff]   ;;  %v3963_v47 = vld [vmem:[%s5192_s1 + $0x1e8] sm:$0xff]   ;;  %v3967_v51 = vld [vmem:[%s5192_s1 + $0x1e0] sm:$0xff]  }
  0x10   :  { %3529 = vmatpush3.bf16.msra.mxu0 %v3932_v14  ;;  %2502 = vmatprep.mubr.bf16.mxu0 %v3199_v35  ;;  %v3961_v45 = vld [vmem:[%s5192_s1 + $0x1b0] sm:$0xff]   ;;  %v3964_v48 = vld [vmem:[%s5192_s1 + $0x128] sm:$0xff]   ;;  %v3968_v52 = vld [vmem:[%s5192_s1 + $0x120] sm:$0xff]  }
  0x11   :  { %3551 = vmatpush3.bf16.msra.mxu1 %v3933_v15  ;;  %3530 = vmatprep.subr.bf16.mxu0 %v3934_v16  ;;  %v3965_v49 = vld [vmem:[%s5192_s1 + $0x1a8] sm:$0xff]   ;;  %v3969_v53 = vld [vmem:[%s5192_s1 + $0x1a0] sm:$0xff]   ;;  %v3970_v54 = vld [vmem:[%s5192_s1 + $0x158] sm:$0xff]  }
  0x12   :  { %3552 = vmatprep.subr.bf16.mxu1 %v3935_v17  ;;  %2542 = vmatprep.mubr.bf16.mxu1 %v3201_v37  ;;  %v3971_v55 = vld [vmem:[%s5192_s1 + $0x1d8] sm:$0xff]   ;;  %v3974_v58 = vld [vmem:[%s5192_s1 + $0x150] sm:$0xff]   ;;  %v3978_v62 = vld [vmem:[%s5192_s1 + $0x148] sm:$0xff]  }
  0x13   :  { %v3972_v56 = vld [vmem:[%s5192_s1 + $0x118] sm:$0xff]   ;;  %v3975_v59 = vld [vmem:[%s5192_s1 + $0x1d0] sm:$0xff]   ;;  %v3979_v63 = vld [vmem:[%s5192_s1 + $0x1c8] sm:$0xff]  }
  0x14   :  { %3531 = vmatpush3.bf16.msra.mxu0 %v3936_v18  ;;  %v3973_v57 = vld [vmem:[%s5192_s1 + $0x198] sm:$0xff]   ;;  %v3976_v60 = vld [vmem:[%s5192_s1 + $0x110] sm:$0xff]   ;;  %v3980_v0 = vld [vmem:[%s5192_s1 + $0x108] sm:$0xff]  }
  0x15   :  { %3553 = vmatpush3.bf16.msra.mxu1 %v3937_v19  ;;  %3532 = vmatprep.subr.bf16.mxu0 %v3938_v20  ;;  %v3977_v61 = vld [vmem:[%s5192_s1 + $0x190] sm:$0xff]   ;;  %v3981_v1 = vld [vmem:[%s5192_s1 + $0x188] sm:$0xff]   ;;  %v3982_v2 = vld [vmem:[%s5192_s1 + $0x140] sm:$0xff]  }
  0x16   :  { %3554 = vmatprep.subr.bf16.mxu1 %v3939_v21  ;;  %v3983_v3 = vld [vmem:[%s5192_s1 + $0x1c0] sm:$0xff]   ;;  %v17_v6 = vld [vmem:[%s5193_s0 + $0x10] sm:$0xff]  ;;  %v18_v9 = vld [vmem:[%s5193_s0 + $0x18] sm:$0xff] }
  0x17   :  { %v3984_v4 = vld [vmem:[%s5192_s1 + $0x100] sm:$0xff]   ;;  %v3202_v7 = vcombine.low %v17_v6, %v17_v6  ;;  %v3203_v8 = vcombine.high %v17_v6, %v17_v6  ;;  %v3204_v10 = vcombine.low %v18_v9, %v18_v9  ;;  %v3205_v11 = vcombine.high %v18_v9, %v18_v9  ;;  %v3990_v12 = vld [vmem:[%s5192_s1 + $0x278] sm:$0xff]   ;;  %v3994_v16 = vld [vmem:[%s5192_s1 + $0x270] sm:$0xff]  }
  0x18   :  { %3533 = vmatpush3.bf16.msra.mxu0 %v3940_v22  ;;  %v3985_v5 = vld [vmem:[%s5192_s1 + $0x180] sm:$0xff]   ;;  %v3991_v13 = vld [vmem:[%s5192_s1 + $0x2f8] sm:$0xff]   ;;  %v3995_v17 = vld [vmem:[%s5192_s1 + $0x2f0] sm:$0xff]  }
  0x19   :  { %3555 = vmatpush3.bf16.msra.mxu1 %v3941_v23  ;;  %3534 = vmatprep.subr.bf16.mxu0 %v3942_v24  ;;  %v3992_v14 = vld [vmem:[%s5192_s1 + $0x238] sm:$0xff]   ;;  %v3996_v18 = vld [vmem:[%s5192_s1 + $0x230] sm:$0xff]   ;;  %v3998_v20 = vld [vmem:[%s5192_s1 + $0x268] sm:$0xff]  }
  0x1a   :  { %3556 = vmatprep.subr.bf16.mxu1 %v3943_v25  ;;  %v3993_v15 = vld [vmem:[%s5192_s1 + $0x2b8] sm:$0xff]   ;;  %v3997_v19 = vld [vmem:[%s5192_s1 + $0x2b0] sm:$0xff]   ;;  %v3999_v21 = vld [vmem:[%s5192_s1 + $0x2e8] sm:$0xff]  }
  0x1b   :  { %v4000_v22 = vld [vmem:[%s5192_s1 + $0x228] sm:$0xff]   ;;  %v4002_v24 = vld [vmem:[%s5192_s1 + $0x260] sm:$0xff]   ;;  %v4010_v32 = vld [vmem:[%s5192_s1 + $0x250] sm:$0xff]  }
  0x1c   :  { %3535 = vmatpush3.bf16.msra.mxu0 %v3944_v26  ;;  %v4001_v23 = vld [vmem:[%s5192_s1 + $0x2a8] sm:$0xff]   ;;  %v4003_v25 = vld [vmem:[%s5192_s1 + $0x2e0] sm:$0xff]   ;;  %v4011_v33 = vld [vmem:[%s5192_s1 + $0x2d0] sm:$0xff]  }
  0x1d   :  { %3557 = vmatpush3.bf16.msra.mxu1 %v3945_v27  ;;  %3536 = vmatprep.subr.bf16.mxu0 %v3946_v28  ;;  %v4004_v26 = vld [vmem:[%s5192_s1 + $0x220] sm:$0xff]   ;;  %v4006_v28 = vld [vmem:[%s5192_s1 + $0x258] sm:$0xff]   ;;  %v4013_v35 = vld [vmem:[%s5192_s1 + $0x290] sm:$0xff]  }
  0x1e   :  { %3558 = vmatprep.subr.bf16.mxu1 %v3947_v29  ;;  %v4005_v27 = vld [vmem:[%s5192_s1 + $0x2a0] sm:$0xff]   ;;  %v4007_v29 = vld [vmem:[%s5192_s1 + $0x2d8] sm:$0xff]   ;;  %v4015_v37 = vld [vmem:[%s5192_s1 + $0x2c8] sm:$0xff]  }
  0x1f   :  { %v4046_v6 = vld [vmem:[%s5192_s1 + $0x350] sm:$0xff]  }
  0x20   :  { %3537 = vmatpush3.bf16.msra.mxu0 %v3948_v30  ;;  %v4008_v30 = vld [vmem:[%s5192_s1 + $0x218] sm:$0xff]   ;;  %v4049_v9 = vld [vmem:[%s5192_s1 + $0x390] sm:$0xff]  }
  0x21   :  { %3559 = vmatpush3.bf16.msra.mxu1 %v3949_v31  ;;  %3566 = vmatprep.subr.bf16.mxu0 %v3954_v38  ;;  %v4009_v31 = vld [vmem:[%s5192_s1 + $0x298] sm:$0xff]   ;;  %v4016_v38 = vld [vmem:[%s5192_s1 + $0x208] sm:$0xff]  }
  0x22   :  { %3588 = vmatprep.subr.bf16.mxu1 %v3955_v39  ;;  %v4017_v39 = vld [vmem:[%s5192_s1 + $0x288] sm:$0xff]  }
  0x23   :  { %2503 = vmatmul.mubr.bf16.vlgmr.msra.gmra.mxu0 %v3198_v34  ;;  %v4012_v34 = vld [vmem:[%s5192_s1 + $0x210] sm:$0xff]  }
  0x24   :  { %2543 = vmatmul.mubr.bf16.vlgmr.msra.gmra.mxu1 %v3200_v36  ;;  %3567 = vmatpush3.bf16.msra.mxu0 %v3956_v40  ;;  %v4014_v36 = vld [vmem:[%s5192_s1 + $0x248] sm:$0xff]   ;;  %v4018_v40 = vld [vmem:[%s5192_s1 + $0x240] sm:$0xff]  }
  0x25   :  { %3589 = vmatpush3.bf16.msra.mxu1 %v3957_v41  ;;  %3568 = vmatprep.subr.bf16.mxu0 %v3958_v42  ;;  %v4019_v41 = vld [vmem:[%s5192_s1 + $0x2c0] sm:$0xff]  }
  0x26   :  { %3590 = vmatprep.subr.bf16.mxu1 %v3959_v43  ;;  %2582 = vmatprep.mubr.bf16.mxu0 %v3203_v8  ;;  %v4020_v42 = vld [vmem:[%s5192_s1 + $0x200] sm:$0xff]   ;;  %v4048_v8 = vld [vmem:[%s5192_s1 + $0x310] sm:$0xff]  }
  0x27   :  { %2622 = vmatprep.mubr.bf16.mxu1 %v3205_v11  ;;  %v4021_v43 = vld [vmem:[%s5192_s1 + $0x280] sm:$0xff]   ;;  %v4051_v11 = vld [vmem:[%s5192_s1 + $0x3c8] sm:$0xff]  }
  0x28   :  { %3569 = vmatpush3.bf16.msra.mxu0 %v3960_v44  ;;  %v19_v44 = vld [vmem:[%s5193_s0 + $0x20] sm:$0xff] }
  0x29   :  { %3591 = vmatpush3.bf16.msra.mxu1 %v3961_v45  ;;  %3570 = vmatprep.subr.bf16.mxu0 %v3962_v46  ;;  %v20_v45 = vld [vmem:[%s5193_s0 + $0x28] sm:$0xff]  ;;  %v3206_v46 = vcombine.low %v19_v44, %v19_v44 }
  0x2a   :  { %3592 = vmatprep.subr.bf16.mxu1 %v3963_v47  ;;  %v3207_v47 = vcombine.high %v19_v44, %v19_v44  ;;  %v4082_v44 = vld [vmem:[%s5192_s1 + $0x450] sm:$0xff]  }
  0x2c   :  { %3571 = vmatpush3.bf16.msra.mxu0 %v3964_v48  ;;  %v3208_v48 = vcombine.low %v20_v45, %v20_v45 }
  0x2d   :  { %3593 = vmatpush3.bf16.msra.mxu1 %v3965_v49  ;;  %3572 = vmatprep.subr.bf16.mxu0 %v3966_v50  ;;  %v3209_v49 = vcombine.high %v20_v45, %v20_v45  ;;  %v4026_v50 = vld [vmem:[%s5192_s1 + $0x378] sm:$0xff]   ;;  %v4083_v45 = vld [vmem:[%s5192_s1 + $0x4d0] sm:$0xff]  }
  0x2e   :  { %3594 = vmatprep.subr.bf16.mxu1 %v3967_v51  ;;  %v4027_v51 = vld [vmem:[%s5192_s1 + $0x3f8] sm:$0xff]  }
  0x30   :  { %3573 = vmatpush3.bf16.msra.mxu0 %v3968_v52  ;;  %v4028_v52 = vld [vmem:[%s5192_s1 + $0x338] sm:$0xff]  }
  0x31   :  { %3595 = vmatpush3.bf16.msra.mxu1 %v3969_v53  ;;  %3574 = vmatprep.subr.bf16.mxu0 %v3970_v54  ;;  %v4029_v53 = vld [vmem:[%s5192_s1 + $0x3b8] sm:$0xff]   ;;  %v4030_v54 = vld [vmem:[%s5192_s1 + $0x370] sm:$0xff]  }
  0x32   :  { %3596 = vmatprep.subr.bf16.mxu1 %v3971_v55  ;;  %v4031_v55 = vld [vmem:[%s5192_s1 + $0x3f0] sm:$0xff]  }
  0x34   :  { %3575 = vmatpush3.bf16.msra.mxu0 %v3972_v56  ;;  %v4032_v56 = vld [vmem:[%s5192_s1 + $0x330] sm:$0xff]  }
  0x35   :  { %3597 = vmatpush3.bf16.msra.mxu1 %v3973_v57  ;;  %3576 = vmatprep.subr.bf16.mxu0 %v3974_v58  ;;  %v4033_v57 = vld [vmem:[%s5192_s1 + $0x3b0] sm:$0xff]   ;;  %v4034_v58 = vld [vmem:[%s5192_s1 + $0x368] sm:$0xff]  }
  0x36   :  { %3598 = vmatprep.subr.bf16.mxu1 %v3975_v59  ;;  %v4035_v59 = vld [vmem:[%s5192_s1 + $0x3e8] sm:$0xff]  }
  0x38   :  { %3577 = vmatpush3.bf16.msra.mxu0 %v3976_v60  ;;  %v4036_v60 = vld [vmem:[%s5192_s1 + $0x328] sm:$0xff]  }
  0x39   :  { %3599 = vmatpush3.bf16.msra.mxu1 %v3977_v61  ;;  %3578 = vmatprep.subr.bf16.mxu0 %v3978_v62  ;;  %v4037_v61 = vld [vmem:[%s5192_s1 + $0x3a8] sm:$0xff]   ;;  %v4038_v62 = vld [vmem:[%s5192_s1 + $0x360] sm:$0xff]  }
  0x3a   :  { %3600 = vmatprep.subr.bf16.mxu1 %v3979_v63  ;;  %v4039_v63 = vld [vmem:[%s5192_s1 + $0x3e0] sm:$0xff]  }
  0x3c   :  { %3579 = vmatpush3.bf16.msra.mxu0 %v3980_v0  ;;  %v4040_v0 = vld [vmem:[%s5192_s1 + $0x320] sm:$0xff]  }
  0x3d   :  { %3601 = vmatpush3.bf16.msra.mxu1 %v3981_v1  ;;  %3580 = vmatprep.subr.bf16.mxu0 %v3982_v2  ;;  %v4041_v1 = vld [vmem:[%s5192_s1 + $0x3a0] sm:$0xff]   ;;  %v4042_v2 = vld [vmem:[%s5192_s1 + $0x358] sm:$0xff]  }
  0x3e   :  { %3602 = vmatprep.subr.bf16.mxu1 %v3983_v3  ;;  %v4043_v3 = vld [vmem:[%s5192_s1 + $0x3d8] sm:$0xff]  }
  0x40   :  { %3581 = vmatpush3.bf16.msra.mxu0 %v3984_v4  ;;  %v4044_v4 = vld [vmem:[%s5192_s1 + $0x318] sm:$0xff]  }
  0x41   :  { %3603 = vmatpush3.bf16.msra.mxu1 %v3985_v5  ;;  %3610 = vmatprep.subr.bf16.mxu0 %v3990_v12  ;;  %v4045_v5 = vld [vmem:[%s5192_s1 + $0x398] sm:$0xff]   ;;  %v4052_v12 = vld [vmem:[%s5192_s1 + $0x308] sm:$0xff]  }
  0x42   :  { %3632 = vmatprep.subr.bf16.mxu1 %v3991_v13  ;;  %v4053_v13 = vld [vmem:[%s5192_s1 + $0x388] sm:$0xff]  }
  0x43   :  { %2583 = vmatmul.mubr.bf16.vlgmr.msra.gmra.mxu0 %v3202_v7  ;;  %v4047_v7 = vld [vmem:[%s5192_s1 + $0x3d0] sm:$0xff]  }
  0x44   :  { %2623 = vmatmul.mubr.bf16.vlgmr.msra.gmra.mxu1 %v3204_v10  ;;  %3611 = vmatpush3.bf16.msra.mxu0 %v3992_v14  ;;  %v4050_v10 = vld [vmem:[%s5192_s1 + $0x348] sm:$0xff]   ;;  %v4054_v14 = vld [vmem:[%s5192_s1 + $0x340] sm:$0xff]  }
  0x45   :  { %3633 = vmatpush3.bf16.msra.mxu1 %v3993_v15  ;;  %3612 = vmatprep.subr.bf16.mxu0 %v3994_v16  ;;  %v4055_v15 = vld [vmem:[%s5192_s1 + $0x3c0] sm:$0xff]  }
  0x46   :  { %3634 = vmatprep.subr.bf16.mxu1 %v3995_v17  ;;  %2662 = vmatprep.mubr.bf16.mxu0 %v3207_v47  ;;  %v4056_v16 = vld [vmem:[%s5192_s1 + $0x300] sm:$0xff]   ;;  %v4085_v47 = vld [vmem:[%s5192_s1 + $0x490] sm:$0xff]  }
  0x47   :  { %2702 = vmatprep.mubr.bf16.mxu1 %v3209_v49  ;;  %v4057_v17 = vld [vmem:[%s5192_s1 + $0x380] sm:$0xff]   ;;  %v4087_v49 = vld [vmem:[%s5192_s1 + $0x4c8] sm:$0xff]  }
  0x48   :  { %3613 = vmatpush3.bf16.msra.mxu0 %v3996_v18  ;;  %v21_v18 = vld [vmem:[%s5193_s0 + $0x30] sm:$0xff] }
  0x49   :  { %3635 = vmatpush3.bf16.msra.mxu1 %v3997_v19  ;;  %3614 = vmatprep.subr.bf16.mxu0 %v3998_v20  ;;  %v22_v19 = vld [vmem:[%s5193_s0 + $0x38] sm:$0xff]  ;;  %v3210_v20 = vcombine.low %v21_v18, %v21_v18 }
  0x4a   :  { %3636 = vmatprep.subr.bf16.mxu1 %v3999_v21  ;;  %v3211_v21 = vcombine.high %v21_v18, %v21_v18  ;;  %v4118_v18 = vld [vmem:[%s5192_s1 + $0x550] sm:$0xff]  }
  0x4c   :  { %3615 = vmatpush3.bf16.msra.mxu0 %v4000_v22  ;;  %v3212_v22 = vcombine.low %v22_v19, %v22_v19 }
  0x4d   :  { %3637 = vmatpush3.bf16.msra.mxu1 %v4001_v23  ;;  %3616 = vmatprep.subr.bf16.mxu0 %v4002_v24  ;;  %v4062_v23 = vld [vmem:[%s5192_s1 + $0x478] sm:$0xff]   ;;  %v3213_v24 = vcombine.high %v22_v19, %v22_v19  ;;  %v4119_v19 = vld [vmem:[%s5192_s1 + $0x5d0] sm:$0xff]  }
  0x4e   :  { %3638 = vmatprep.subr.bf16.mxu1 %v4003_v25  ;;  %v4063_v25 = vld [vmem:[%s5192_s1 + $0x4f8] sm:$0xff]  }
  0x50   :  { %3617 = vmatpush3.bf16.msra.mxu0 %v4004_v26  ;;  %v4064_v26 = vld [vmem:[%s5192_s1 + $0x438] sm:$0xff]  }
  0x51   :  { %3639 = vmatpush3.bf16.msra.mxu1 %v4005_v27  ;;  %3618 = vmatprep.subr.bf16.mxu0 %v4006_v28  ;;  %v4065_v27 = vld [vmem:[%s5192_s1 + $0x4b8] sm:$0xff]   ;;  %v4066_v28 = vld [vmem:[%s5192_s1 + $0x470] sm:$0xff]  }
  0x52   :  { %3640 = vmatprep.subr.bf16.mxu1 %v4007_v29  ;;  %v4067_v29 = vld [vmem:[%s5192_s1 + $0x4f0] sm:$0xff]  }
  0x54   :  { %3619 = vmatpush3.bf16.msra.mxu0 %v4008_v30  ;;  %v4068_v30 = vld [vmem:[%s5192_s1 + $0x430] sm:$0xff]  }
  0x55   :  { %3641 = vmatpush3.bf16.msra.mxu1 %v4009_v31  ;;  %3620 = vmatprep.subr.bf16.mxu0 %v4010_v32  ;;  %v4069_v31 = vld [vmem:[%s5192_s1 + $0x4b0] sm:$0xff]   ;;  %v4070_v32 = vld [vmem:[%s5192_s1 + $0x468] sm:$0xff]  }
  0x56   :  { %3642 = vmatprep.subr.bf16.mxu1 %v4011_v33  ;;  %v4071_v33 = vld [vmem:[%s5192_s1 + $0x4e8] sm:$0xff]  }
  0x58   :  { %3621 = vmatpush3.bf16.msra.mxu0 %v4012_v34  ;;  %v4072_v34 = vld [vmem:[%s5192_s1 + $0x428] sm:$0xff]  }
  0x59   :  { %3643 = vmatpush3.bf16.msra.mxu1 %v4013_v35  ;;  %3622 = vmatprep.subr.bf16.mxu0 %v4014_v36  ;;  %v4073_v35 = vld [vmem:[%s5192_s1 + $0x4a8] sm:$0xff]   ;;  %v4074_v36 = vld [vmem:[%s5192_s1 + $0x460] sm:$0xff]  }
  0x5a   :  { %3644 = vmatprep.subr.bf16.mxu1 %v4015_v37  ;;  %v4075_v37 = vld [vmem:[%s5192_s1 + $0x4e0] sm:$0xff]  }
  0x5c   :  { %3623 = vmatpush3.bf16.msra.mxu0 %v4016_v38  ;;  %v4076_v38 = vld [vmem:[%s5192_s1 + $0x420] sm:$0xff]  }
  0x5d   :  { %3645 = vmatpush3.bf16.msra.mxu1 %v4017_v39  ;;  %3624 = vmatprep.subr.bf16.mxu0 %v4018_v40  ;;  %v4077_v39 = vld [vmem:[%s5192_s1 + $0x4a0] sm:$0xff]   ;;  %v4078_v40 = vld [vmem:[%s5192_s1 + $0x458] sm:$0xff]  }
  0x5e   :  { %3646 = vmatprep.subr.bf16.mxu1 %v4019_v41  ;;  %v4079_v41 = vld [vmem:[%s5192_s1 + $0x4d8] sm:$0xff]  }
  0x60   :  { %3625 = vmatpush3.bf16.msra.mxu0 %v4020_v42  ;;  %v4080_v42 = vld [vmem:[%s5192_s1 + $0x418] sm:$0xff]  }
  0x61   :  { %3647 = vmatpush3.bf16.msra.mxu1 %v4021_v43  ;;  %3654 = vmatprep.subr.bf16.mxu0 %v4026_v50  ;;  %v4081_v43 = vld [vmem:[%s5192_s1 + $0x498] sm:$0xff]   ;;  %v4088_v50 = vld [vmem:[%s5192_s1 + $0x408] sm:$0xff]  }
  0x62   :  { %3676 = vmatprep.subr.bf16.mxu1 %v4027_v51  ;;  %v4089_v51 = vld [vmem:[%s5192_s1 + $0x488] sm:$0xff]  }
  0x63   :  { %2663 = vmatmul.mubr.bf16.vlgmr.msra.gmra.mxu0 %v3206_v46  ;;  %v4084_v46 = vld [vmem:[%s5192_s1 + $0x410] sm:$0xff]  }
  0x64   :  { %2703 = vmatmul.mubr.bf16.vlgmr.msra.gmra.mxu1 %v3208_v48  ;;  %3655 = vmatpush3.bf16.msra.mxu0 %v4028_v52  ;;  %v4086_v48 = vld [vmem:[%s5192_s1 + $0x448] sm:$0xff]   ;;  %v4090_v52 = vld [vmem:[%s5192_s1 + $0x440] sm:$0xff]  }
  0x65   :  { %3677 = vmatpush3.bf16.msra.mxu1 %v4029_v53  ;;  %3656 = vmatprep.subr.bf16.mxu0 %v4030_v54  ;;  %v4091_v53 = vld [vmem:[%s5192_s1 + $0x4c0] sm:$0xff]  }
  0x66   :  { %3678 = vmatprep.subr.bf16.mxu1 %v4031_v55  ;;  %2742 = vmatprep.mubr.bf16.mxu0 %v3211_v21  ;;  %v4092_v54 = vld [vmem:[%s5192_s1 + $0x400] sm:$0xff]   ;;  %v4121_v21 = vld [vmem:[%s5192_s1 + $0x590] sm:$0xff]  }
  0x67   :  { %2782 = vmatprep.mubr.bf16.mxu1 %v3213_v24  ;;  %v4093_v55 = vld [vmem:[%s5192_s1 + $0x480] sm:$0xff]   ;;  %v4124_v24 = vld [vmem:[%s5192_s1 + $0x508] sm:$0xff]  }
  0x68   :  { %3657 = vmatpush3.bf16.msra.mxu0 %v4032_v56  ;;  %v23_v56 = vld [vmem:[%s5193_s0 + $0x40] sm:$0xff] }
  0x69   :  { %3679 = vmatpush3.bf16.msra.mxu1 %v4033_v57  ;;  %3658 = vmatprep.subr.bf16.mxu0 %v4034_v58  ;;  %v3214_v57 = vcombine.low %v23_v56, %v23_v56  ;;  %v3215_v58 = vcombine.high %v23_v56, %v23_v56  ;;  %v4154_v56 = vld [vmem:[%s5192_s1 + $0x650] sm:$0xff]  }
  0x6a   :  { %3680 = vmatprep.subr.bf16.mxu1 %v4035_v59  ;;  %v24_v59 = vld [vmem:[%s5193_s0 + $0x48] sm:$0xff] }
  0x6c   :  { %3659 = vmatpush3.bf16.msra.mxu0 %v4036_v60  ;;  %v3216_v60 = vcombine.low %v24_v59, %v24_v59 }
  0x6d   :  { %3681 = vmatpush3.bf16.msra.mxu1 %v4037_v61  ;;  %3660 = vmatprep.subr.bf16.mxu0 %v4038_v62  ;;  %v3217_v61 = vcombine.high %v24_v59, %v24_v59  ;;  %v4098_v62 = vld [vmem:[%s5192_s1 + $0x578] sm:$0xff]   ;;  %v4157_v59 = vld [vmem:[%s5192_s1 + $0x690] sm:$0xff]  }
  0x6e   :  { %3682 = vmatprep.subr.bf16.mxu1 %v4039_v63  ;;  %v4099_v63 = vld [vmem:[%s5192_s1 + $0x5f8] sm:$0xff]  }
  0x70   :  { %3661 = vmatpush3.bf16.msra.mxu0 %v4040_v0  ;;  %v4100_v0 = vld [vmem:[%s5192_s1 + $0x538] sm:$0xff]  }
  0x71   :  { %3683 = vmatpush3.bf16.msra.mxu1 %v4041_v1  ;;  %3662 = vmatprep.subr.bf16.mxu0 %v4042_v2  ;;  %v4101_v1 = vld [vmem:[%s5192_s1 + $0x5b8] sm:$0xff]   ;;  %v4102_v2 = vld [vmem:[%s5192_s1 + $0x570] sm:$0xff]  }
  0x72   :  { %3684 = vmatprep.subr.bf16.mxu1 %v4043_v3  ;;  %v4103_v3 = vld [vmem:[%s5192_s1 + $0x5f0] sm:$0xff]  }
  0x74   :  { %3663 = vmatpush3.bf16.msra.mxu0 %v4044_v4  ;;  %v4104_v4 = vld [vmem:[%s5192_s1 + $0x530] sm:$0xff]  }
  0x75   :  { %3685 = vmatpush3.bf16.msra.mxu1 %v4045_v5  ;;  %3664 = vmatprep.subr.bf16.mxu0 %v4046_v6  ;;  %v4105_v5 = vld [vmem:[%s5192_s1 + $0x5b0] sm:$0xff]   ;;  %v4106_v6 = vld [vmem:[%s5192_s1 + $0x568] sm:$0xff]  }
  0x76   :  { %3686 = vmatprep.subr.bf16.mxu1 %v4047_v7  ;;  %v4107_v7 = vld [vmem:[%s5192_s1 + $0x5e8] sm:$0xff]  }
  0x78   :  { %3665 = vmatpush3.bf16.msra.mxu0 %v4048_v8  ;;  %v4108_v8 = vld [vmem:[%s5192_s1 + $0x528] sm:$0xff]  }
  0x79   :  { %3687 = vmatpush3.bf16.msra.mxu1 %v4049_v9  ;;  %3666 = vmatprep.subr.bf16.mxu0 %v4050_v10  ;;  %v4109_v9 = vld [vmem:[%s5192_s1 + $0x5a8] sm:$0xff]   ;;  %v4110_v10 = vld [vmem:[%s5192_s1 + $0x560] sm:$0xff]  }
  0x7a   :  { %3688 = vmatprep.subr.bf16.mxu1 %v4051_v11  ;;  %v4111_v11 = vld [vmem:[%s5192_s1 + $0x5e0] sm:$0xff]  }
  0x7c   :  { %3667 = vmatpush3.bf16.msra.mxu0 %v4052_v12  ;;  %v4112_v12 = vld [vmem:[%s5192_s1 + $0x520] sm:$0xff]  }
  0x7d   :  { %3689 = vmatpush3.bf16.msra.mxu1 %v4053_v13  ;;  %3668 = vmatprep.subr.bf16.mxu0 %v4054_v14  ;;  %v4113_v13 = vld [vmem:[%s5192_s1 + $0x5a0] sm:$0xff]   ;;  %v4114_v14 = vld [vmem:[%s5192_s1 + $0x558] sm:$0xff]  }
  0x7e   :  { %3690 = vmatprep.subr.bf16.mxu1 %v4055_v15  ;;  %v4115_v15 = vld [vmem:[%s5192_s1 + $0x5d8] sm:$0xff]  }
  0x80   :  { %3669 = vmatpush3.bf16.msra.mxu0 %v4056_v16  ;;  %v4116_v16 = vld [vmem:[%s5192_s1 + $0x518] sm:$0xff]  }
  0x81   :  { %3691 = vmatpush3.bf16.msra.mxu1 %v4057_v17  ;;  %3698 = vmatprep.subr.bf16.mxu0 %v4062_v23  ;;  %v4117_v17 = vld [vmem:[%s5192_s1 + $0x598] sm:$0xff]   ;;  %v4123_v23 = vld [vmem:[%s5192_s1 + $0x5c8] sm:$0xff]  }
  0x82   :  { %3720 = vmatprep.subr.bf16.mxu1 %v4063_v25  ;;  %v4125_v25 = vld [vmem:[%s5192_s1 + $0x588] sm:$0xff]  }
  0x83   :  { %2743 = vmatmul.mubr.bf16.vlgmr.msra.gmra.mxu0 %v3210_v20  ;;  %v4120_v20 = vld [vmem:[%s5192_s1 + $0x510] sm:$0xff]  }
  0x84   :  { %2783 = vmatmul.mubr.bf16.vlgmr.msra.gmra.mxu1 %v3212_v22  ;;  %3699 = vmatpush3.bf16.msra.mxu0 %v4064_v26  ;;  %v4122_v22 = vld [vmem:[%s5192_s1 + $0x548] sm:$0xff]   ;;  %v4126_v26 = vld [vmem:[%s5192_s1 + $0x540] sm:$0xff]  }
  0x85   :  { %3721 = vmatpush3.bf16.msra.mxu1 %v4065_v27  ;;  %3700 = vmatprep.subr.bf16.mxu0 %v4066_v28  ;;  %v4127_v27 = vld [vmem:[%s5192_s1 + $0x5c0] sm:$0xff]  }
  0x86   :  { %3722 = vmatprep.subr.bf16.mxu1 %v4067_v29  ;;  %2822 = vmatprep.mubr.bf16.mxu0 %v3215_v58  ;;  %v4128_v28 = vld [vmem:[%s5192_s1 + $0x500] sm:$0xff]   ;;  %v4156_v58 = vld [vmem:[%s5192_s1 + $0x610] sm:$0xff]  }
  0x87   :  { %2862 = vmatprep.mubr.bf16.mxu1 %v3217_v61  ;;  %v4129_v29 = vld [vmem:[%s5192_s1 + $0x580] sm:$0xff]   ;;  %v4159_v61 = vld [vmem:[%s5192_s1 + $0x6c8] sm:$0xff]  }
  0x88   :  { %3701 = vmatpush3.bf16.msra.mxu0 %v4068_v30  ;;  %v25_v30 = vld [vmem:[%s5193_s0 + $0x50] sm:$0xff] }
  0x89   :  { %3723 = vmatpush3.bf16.msra.mxu1 %v4069_v31  ;;  %3702 = vmatprep.subr.bf16.mxu0 %v4070_v32  ;;  %v26_v31 = vld [vmem:[%s5193_s0 + $0x58] sm:$0xff]  ;;  %v3218_v32 = vcombine.low %v25_v30, %v25_v30 }
  0x8a   :  { %3724 = vmatprep.subr.bf16.mxu1 %v4071_v33  ;;  %v3219_v33 = vcombine.high %v25_v30, %v25_v30  ;;  %v4177_v30 = vld [vmem:[%s5192_s1 + $0x7b0] sm:$0xff]  }
  0x8c   :  { %3703 = vmatpush3.bf16.msra.mxu0 %v4072_v34  ;;  %v3220_v34 = vcombine.low %v26_v31, %v26_v31 }
  0x8d   :  { %3725 = vmatpush3.bf16.msra.mxu1 %v4073_v35  ;;  %3704 = vmatprep.subr.bf16.mxu0 %v4074_v36  ;;  %v3221_v35 = vcombine.high %v26_v31, %v26_v31  ;;  %v4134_v36 = vld [vmem:[%s5192_s1 + $0x678] sm:$0xff]   ;;  %v4178_v31 = vld [vmem:[%s5192_s1 + $0x768] sm:$0xff]  }
  0x8e   :  { %3726 = vmatprep.subr.bf16.mxu1 %v4075_v37  ;;  %v4135_v37 = vld [vmem:[%s5192_s1 + $0x6f8] sm:$0xff]  }
  0x90   :  { %3705 = vmatpush3.bf16.msra.mxu0 %v4076_v38  ;;  %v4136_v38 = vld [vmem:[%s5192_s1 + $0x638] sm:$0xff]  }
  0x91   :  { %3727 = vmatpush3.bf16.msra.mxu1 %v4077_v39  ;;  %3706 = vmatprep.subr.bf16.mxu0 %v4078_v40  ;;  %v4137_v39 = vld [vmem:[%s5192_s1 + $0x6b8] sm:$0xff]   ;;  %v4138_v40 = vld [vmem:[%s5192_s1 + $0x670] sm:$0xff]  }
  0x92   :  { %3728 = vmatprep.subr.bf16.mxu1 %v4079_v41  ;;  %v4139_v41 = vld [vmem:[%s5192_s1 + $0x6f0] sm:$0xff]  }
  0x94   :  { %3707 = vmatpush3.bf16.msra.mxu0 %v4080_v42  ;;  %v4140_v42 = vld [vmem:[%s5192_s1 + $0x630] sm:$0xff]  }
  0x95   :  { %3729 = vmatpush3.bf16.msra.mxu1 %v4081_v43  ;;  %3708 = vmatprep.subr.bf16.mxu0 %v4082_v44  ;;  %v4141_v43 = vld [vmem:[%s5192_s1 + $0x6b0] sm:$0xff]   ;;  %v4142_v44 = vld [vmem:[%s5192_s1 + $0x668] sm:$0xff]  }
  0x96   :  { %3730 = vmatprep.subr.bf16.mxu1 %v4083_v45  ;;  %v4143_v45 = vld [vmem:[%s5192_s1 + $0x6e8] sm:$0xff]  }
  0x98   :  { %3709 = vmatpush3.bf16.msra.mxu0 %v4084_v46  ;;  %v4144_v46 = vld [vmem:[%s5192_s1 + $0x628] sm:$0xff]  }
  0x99   :  { %3731 = vmatpush3.bf16.msra.mxu1 %v4085_v47  ;;  %3710 = vmatprep.subr.bf16.mxu0 %v4086_v48  ;;  %v4145_v47 = vld [vmem:[%s5192_s1 + $0x6a8] sm:$0xff]   ;;  %v4146_v48 = vld [vmem:[%s5192_s1 + $0x660] sm:$0xff]  }
  0x9a   :  { %3732 = vmatprep.subr.bf16.mxu1 %v4087_v49  ;;  %v4147_v49 = vld [vmem:[%s5192_s1 + $0x6e0] sm:$0xff]  }
  0x9c   :  { %3711 = vmatpush3.bf16.msra.mxu0 %v4088_v50  ;;  %v4148_v50 = vld [vmem:[%s5192_s1 + $0x620] sm:$0xff]  }
  0x9d   :  { %3733 = vmatpush3.bf16.msra.mxu1 %v4089_v51  ;;  %3712 = vmatprep.subr.bf16.mxu0 %v4090_v52  ;;  %v4149_v51 = vld [vmem:[%s5192_s1 + $0x6a0] sm:$0xff]   ;;  %v4150_v52 = vld [vmem:[%s5192_s1 + $0x658] sm:$0xff]  }
  0x9e   :  { %3734 = vmatprep.subr.bf16.mxu1 %v4091_v53  ;;  %v4151_v53 = vld [vmem:[%s5192_s1 + $0x6d8] sm:$0xff]  }
  0xa0   :  { %3713 = vmatpush3.bf16.msra.mxu0 %v4092_v54  ;;  %v4152_v54 = vld [vmem:[%s5192_s1 + $0x618] sm:$0xff]  }
  0xa1   :  { %3735 = vmatpush3.bf16.msra.mxu1 %v4093_v55  ;;  %3742 = vmatprep.subr.bf16.mxu0 %v4098_v62  ;;  %v4153_v55 = vld [vmem:[%s5192_s1 + $0x698] sm:$0xff]   ;;  %v4160_v62 = vld [vmem:[%s5192_s1 + $0x608] sm:$0xff]  }
  0xa2   :  { %3764 = vmatprep.subr.bf16.mxu1 %v4099_v63  ;;  %v4161_v63 = vld [vmem:[%s5192_s1 + $0x688] sm:$0xff]  }
  0xa3   :  { %2823 = vmatmul.mubr.bf16.vlgmr.msra.gmra.mxu0 %v3214_v57  ;;  %v4155_v57 = vld [vmem:[%s5192_s1 + $0x6d0] sm:$0xff]  }
  0xa4   :  { %2863 = vmatmul.mubr.bf16.vlgmr.msra.gmra.mxu1 %v3216_v60  ;;  %3743 = vmatpush3.bf16.msra.mxu0 %v4100_v0  ;;  %v4158_v60 = vld [vmem:[%s5192_s1 + $0x648] sm:$0xff]   ;;  %v4162_v0 = vld [vmem:[%s5192_s1 + $0x640] sm:$0xff]  }
  0xa5   :  { %3765 = vmatpush3.bf16.msra.mxu1 %v4101_v1  ;;  %3744 = vmatprep.subr.bf16.mxu0 %v4102_v2  ;;  %v4163_v1 = vld [vmem:[%s5192_s1 + $0x6c0] sm:$0xff]  }
  0xa6   :  { %3766 = vmatprep.subr.bf16.mxu1 %v4103_v3  ;;  %2902 = vmatprep.mubr.bf16.mxu0 %v3219_v33  ;;  %v4164_v2 = vld [vmem:[%s5192_s1 + $0x600] sm:$0xff]   ;;  %v4180_v33 = vld [vmem:[%s5192_s1 + $0x728] sm:$0xff]  }
  0xa7   :  { %2942 = vmatprep.mubr.bf16.mxu1 %v3221_v35  ;;  %v4165_v3 = vld [vmem:[%s5192_s1 + $0x680] sm:$0xff]  }
  0xa8   :  { %3745 = vmatpush3.bf16.msra.mxu0 %v4104_v4  ;;  %v27_v4 = vld [vmem:[%s5193_s0 + $0x60] sm:$0xff] }
  0xa9   :  { %3767 = vmatpush3.bf16.msra.mxu1 %v4105_v5  ;;  %3746 = vmatprep.subr.bf16.mxu0 %v4106_v6  ;;  %v28_v5 = vld [vmem:[%s5193_s0 + $0x68] sm:$0xff]  ;;  %v4182_v35 = vld [vmem:[%s5192_s1 + $0x760] sm:$0xff]  }
  0xaa   :  { %3768 = vmatprep.subr.bf16.mxu1 %v4107_v7 }
  0xac   :  { %3747 = vmatpush3.bf16.msra.mxu0 %v4108_v8  ;;  %v3222_v8 = vcombine.low %v27_v4, %v27_v4 }
  0xad   :  { %3769 = vmatpush3.bf16.msra.mxu1 %v4109_v9  ;;  %3748 = vmatprep.subr.bf16.mxu0 %v4110_v10  ;;  %v3223_v9 = vcombine.high %v27_v4, %v27_v4  ;;  %v3224_v10 = vcombine.low %v28_v5, %v28_v5 }
  0xae   :  { %3770 = vmatprep.subr.bf16.mxu1 %v4111_v11  ;;  %v4170_v11 = vld [vmem:[%s5192_s1 + $0x778] sm:$0xff]  }
  0xb0   :  { %3749 = vmatpush3.bf16.msra.mxu0 %v4112_v12  ;;  %v3225_v12 = vcombine.high %v28_v5, %v28_v5 }
  0xb1   :  { %3771 = vmatpush3.bf16.msra.mxu1 %v4113_v13  ;;  %3750 = vmatprep.subr.bf16.mxu0 %v4114_v14  ;;  %v4171_v13 = vld [vmem:[%s5192_s1 + $0x7f8] sm:$0xff]  }
  0xb2   :  { %3772 = vmatprep.subr.bf16.mxu1 %v4115_v15 }
  0xb4   :  { %3751 = vmatpush3.bf16.msra.mxu0 %v4116_v16  ;;  %v4172_v16 = vld [vmem:[%s5192_s1 + $0x738] sm:$0xff]  }
  0xb5   :  { %3773 = vmatpush3.bf16.msra.mxu1 %v4117_v17  ;;  %3752 = vmatprep.subr.bf16.mxu0 %v4118_v18 }
  0xb6   :  { %3774 = vmatprep.subr.bf16.mxu1 %v4119_v19  ;;  %v4173_v19 = vld [vmem:[%s5192_s1 + $0x7b8] sm:$0xff]  }
  0xb8   :  { %3753 = vmatpush3.bf16.msra.mxu0 %v4120_v20  ;;  %v3197_v20 = vld [vmem:[%s5194_s2] ss:$0 sm:$0xff] }
  0xb9   :  { %3775 = vmatpush3.bf16.msra.mxu1 %v4121_v21  ;;  %3754 = vmatprep.subr.bf16.mxu0 %v4122_v22 }
  0xba   :  { %3776 = vmatprep.subr.bf16.mxu1 %v4123_v23 }
  0xbc   :  { %3755 = vmatpush3.bf16.msra.mxu0 %v4124_v24  ;;  %v4174_v24 = vld [vmem:[%s5192_s1 + $0x770] sm:$0xff]  }
  0xbd   :  { %3777 = vmatpush3.bf16.msra.mxu1 %v4125_v25  ;;  %3756 = vmatprep.subr.bf16.mxu0 %v4126_v26  ;;  %v4175_v25 = vld [vmem:[%s5192_s1 + $0x7f0] sm:$0xff]  }
  0xbe   :  { %3778 = vmatprep.subr.bf16.mxu1 %v4127_v27 }
  0xc0   :  { %3757 = vmatpush3.bf16.msra.mxu0 %v4128_v28 }
  0xc1   :  { %3779 = vmatpush3.bf16.msra.mxu1 %v4129_v29  ;;  %3786 = vmatprep.subr.bf16.mxu0 %v4134_v36  ;;  %v4176_v29 = vld [vmem:[%s5192_s1 + $0x730] sm:$0xff]   ;;  %v4183_v36 = vld [vmem:[%s5192_s1 + $0x7e0] sm:$0xff]  }
  0xc2   :  { %3808 = vmatprep.subr.bf16.mxu1 %v4135_v37  ;;  %v4184_v37 = vld [vmem:[%s5192_s1 + $0x720] sm:$0xff]  }
  0xc3   :  { %2903 = vmatmul.mubr.bf16.vlgmr.msra.gmra.mxu0 %v3218_v32  ;;  %v4179_v32 = vld [vmem:[%s5192_s1 + $0x7e8] sm:$0xff]  }
  0xc4   :  { %2943 = vmatmul.mubr.bf16.vlgmr.msra.gmra.mxu1 %v3220_v34  ;;  %3787 = vmatpush3.bf16.msra.mxu0 %v4136_v38  ;;  %v4181_v34 = vld [vmem:[%s5192_s1 + $0x7a8] sm:$0xff]   ;;  %v4185_v38 = vld [vmem:[%s5192_s1 + $0x7a0] sm:$0xff]  }
  0xc5   :  { %3809 = vmatpush3.bf16.msra.mxu1 %v4137_v39  ;;  %3788 = vmatprep.subr.bf16.mxu0 %v4138_v40  ;;  %v4186_v39 = vld [vmem:[%s5192_s1 + $0x758] sm:$0xff]  }
  0xc6   :  { %3810 = vmatprep.subr.bf16.mxu1 %v4139_v41  ;;  %2982 = vmatprep.mubr.bf16.mxu0 %v3223_v9  ;;  %v4187_v40 = vld [vmem:[%s5192_s1 + $0x7d8] sm:$0xff]  }
  0xc7   :  { %3022 = vmatprep.mubr.bf16.mxu1 %v3225_v12  ;;  %v4188_v41 = vld [vmem:[%s5192_s1 + $0x718] sm:$0xff]  }
  0xc8   :  { %3789 = vmatpush3.bf16.msra.mxu0 %v4140_v42  ;;  %v4189_v42 = vld [vmem:[%s5192_s1 + $0x798] sm:$0xff]  }
  0xc9   :  { %3811 = vmatpush3.bf16.msra.mxu1 %v4141_v43  ;;  %3790 = vmatprep.subr.bf16.mxu0 %v4142_v44  ;;  %v4190_v43 = vld [vmem:[%s5192_s1 + $0x750] sm:$0xff]  }
  0xca   :  { %3812 = vmatprep.subr.bf16.mxu1 %v4143_v45  ;;  %v4191_v44 = vld [vmem:[%s5192_s1 + $0x7d0] sm:$0xff]  }
  0xcb   :  { %v4192_v45 = vld [vmem:[%s5192_s1 + $0x710] sm:$0xff]  }
  0xcc   :  { %3791 = vmatpush3.bf16.msra.mxu0 %v4144_v46  ;;  %v4193_v46 = vld [vmem:[%s5192_s1 + $0x790] sm:$0xff]  }
  0xcd   :  { %3813 = vmatpush3.bf16.msra.mxu1 %v4145_v47  ;;  %3792 = vmatprep.subr.bf16.mxu0 %v4146_v48  ;;  %v4194_v47 = vld [vmem:[%s5192_s1 + $0x748] sm:$0xff]  }
  0xce   :  { %3814 = vmatprep.subr.bf16.mxu1 %v4147_v49  ;;  %v4195_v48 = vld [vmem:[%s5192_s1 + $0x7c8] sm:$0xff]  }
  0xcf   :  { %v4196_v49 = vld [vmem:[%s5192_s1 + $0x708] sm:$0xff]  }
  0xd0   :  { %3793 = vmatpush3.bf16.msra.mxu0 %v4148_v50  ;;  %v4197_v50 = vld [vmem:[%s5192_s1 + $0x788] sm:$0xff]  }
  0xd1   :  { %3815 = vmatpush3.bf16.msra.mxu1 %v4149_v51  ;;  %3794 = vmatprep.subr.bf16.mxu0 %v4150_v52  ;;  %v4198_v51 = vld [vmem:[%s5192_s1 + $0x740] sm:$0xff]  }
  0xd2   :  { %3816 = vmatprep.subr.bf16.mxu1 %v4151_v53  ;;  %v4199_v52 = vld [vmem:[%s5192_s1 + $0x7c0] sm:$0xff]  }
  0xd3   :  { %v4200_v53 = vld [vmem:[%s5192_s1 + $0x700] sm:$0xff]  }
  0xd4   :  { %3795 = vmatpush3.bf16.msra.mxu0 %v4152_v54  ;;  %v4201_v54 = vld [vmem:[%s5192_s1 + $0x780] sm:$0xff]  }
  0xd5   :  { %3817 = vmatpush3.bf16.msra.mxu1 %v4153_v55  ;;  %3796 = vmatprep.subr.bf16.mxu0 %v4154_v56  ;;  %v29_v55 = vld [vmem:[%s5193_s0 + $0x70] sm:$0xff]  ;;  %v30_v56 = vld [vmem:[%s5193_s0 + $0x78] sm:$0xff] }
  0xd6   :  { %3818 = vmatprep.subr.bf16.mxu1 %v4155_v57 }
  0xd8   :  { %3797 = vmatpush3.bf16.msra.mxu0 %v4156_v58 }
  0xd9   :  { %3819 = vmatpush3.bf16.msra.mxu1 %v4157_v59  ;;  %3798 = vmatprep.subr.bf16.mxu0 %v4158_v60  ;;  %v3226_v59 = vcombine.low %v29_v55, %v29_v55  ;;  %v3227_v60 = vcombine.high %v29_v55, %v29_v55 }
  0xda   :  { %3820 = vmatprep.subr.bf16.mxu1 %v4159_v61  ;;  %v3228_v61 = vcombine.low %v30_v56, %v30_v56 }
  0xdc   :  { %3799 = vmatpush3.bf16.msra.mxu0 %v4160_v62  ;;  %v4206_v62 = vld [vmem:[%s5192_s1 + $0x878] sm:$0xff]  }
  0xdd   :  { %3821 = vmatpush3.bf16.msra.mxu1 %v4161_v63  ;;  %3800 = vmatprep.subr.bf16.mxu0 %v4162_v0  ;;  %v3229_v63 = vcombine.high %v30_v56, %v30_v56  ;;  %v4207_v0 = vld [vmem:[%s5192_s1 + $0x8f8] sm:$0xff]  }
  0xde   :  { %3822 = vmatprep.subr.bf16.mxu1 %v4163_v1 }
  0xe0   :  { %3801 = vmatpush3.bf16.msra.mxu0 %v4164_v2 }
  0xe1   :  { %3823 = vmatpush3.bf16.msra.mxu1 %v4165_v3  ;;  %3830 = vmatprep.subr.bf16.mxu0 %v4170_v11  ;;  %v4208_v3 = vld [vmem:[%s5192_s1 + $0x838] sm:$0xff]   ;;  %v4211_v11 = vld [vmem:[%s5192_s1 + $0x8f0] sm:$0xff]  }
  0xe2   :  { %3852 = vmatprep.subr.bf16.mxu1 %v4171_v13 }
  0xe3   :  { %v3538_v6 = vpop.f32.mrf.mxu0  ;;  %2983 = vmatmul.mubr.bf16.vlgmr.msra.gmra.mxu0 %v3222_v8 }
  0xe4   :  { %v3560_v7 = vpop.f32.mrf.mxu1  ;;  %3023 = vmatmul.mubr.bf16.vlgmr.msra.gmra.mxu1 %v3224_v10  ;;  %3831 = vmatpush3.bf16.msra.mxu0 %v4172_v16  ;;  %v4210_v10 = vld [vmem:[%s5192_s1 + $0x870] sm:$0xff]  }
  0xe5   :  { %v3539_v14 = vpop.f32.mrf.mxu0  ;;  %3853 = vmatpush3.bf16.msra.mxu1 %v4173_v19  ;;  %3832 = vmatprep.subr.bf16.mxu0 %v4174_v24  ;;  %v4213_v16 = vld [vmem:[%s5192_s1 + $0x8b0] sm:$0xff]   ;;  %v4216_v19 = vld [vmem:[%s5192_s1 + $0x828] sm:$0xff]   ;;  %v4221_v24 = vld [vmem:[%s5192_s1 + $0x8a0] sm:$0xff]  }
  0xe6   :  { %v3561_v15 = vpop.f32.mrf.mxu1  ;;  %v3540_v17 = vadd.f32 %v3539_v14, %v3538_v6  ;;  %3854 = vmatprep.subr.bf16.mxu1 %v4175_v25  ;;  %3062 = vmatprep.mubr.bf16.mxu0 %v3227_v60  ;;  %v4209_v6 = vld [vmem:[%s5192_s1 + $0x8b8] sm:$0xff]  }
  0xe7   :  { %v3562_v18 = vadd.f32 %v3561_v15, %v3560_v7  ;;  %v3541_v21 = vpop.f32.mrf.mxu0  ;;  %3102 = vmatprep.mubr.bf16.mxu1 %v3229_v63  ;;  %v4212_v15 = vld [vmem:[%s5192_s1 + $0x830] sm:$0xff]   ;;  %v4222_v25 = vld [vmem:[%s5192_s1 + $0x858] sm:$0xff]  }
  0xe8   :  { %v3563_v22 = vpop.f32.mrf.mxu1  ;;  %v2505_v23 = vadd.f32 %v3540_v17, %v3197_v20  ;;  %3833 = vmatpush3.bf16.msra.mxu0 %v4176_v29  ;;  %v4214_v17 = vld [vmem:[%s5192_s1 + $0x868] sm:$0xff]   ;;  %v4218_v21 = vld [vmem:[%s5192_s1 + $0x860] sm:$0xff]   ;;  %v4226_v29 = vld [vmem:[%s5192_s1 + $0x850] sm:$0xff]  }
  0xe9   :  { %v3542_v26 = vpop.f32.mrf.mxu0  ;;  %3855 = vmatpush3.bf16.msra.mxu1 %v4177_v30  ;;  %3834 = vmatprep.subr.bf16.mxu0 %v4178_v31  ;;  %v4217_v20 = vld [vmem:[%s5192_s1 + $0x8a8] sm:$0xff]   ;;  %v4219_v22 = vld [vmem:[%s5192_s1 + $0x8e0] sm:$0xff]   ;;  %v4227_v30 = vld [vmem:[%s5192_s1 + $0x8d0] sm:$0xff]  }
  0xea   :  { %v3564_v27 = vpop.f32.mrf.mxu1  ;;  %v4997_v28 = vadd.f32 %v3562_v18, %v2505_v23  ;;  %3856 = vmatprep.subr.bf16.mxu1 %v4179_v32  ;;  %v4215_v18 = vld [vmem:[%s5192_s1 + $0x8e8] sm:$0xff]   ;;  %v4220_v23 = vld [vmem:[%s5192_s1 + $0x820] sm:$0xff]   ;;  %v4223_v26 = vld [vmem:[%s5192_s1 + $0x8d8] sm:$0xff]  }
  0xeb   :  { %v4224_v27 = vld [vmem:[%s5192_s1 + $0x818] sm:$0xff]   ;;  %v4228_v31 = vld [vmem:[%s5192_s1 + $0x810] sm:$0xff]  }
  0xec   :  { %3835 = vmatpush3.bf16.msra.mxu0 %v4180_v33  ;;  %v4229_v32 = vld [vmem:[%s5192_s1 + $0x890] sm:$0xff]   ;;  %v4230_v33 = vld [vmem:[%s5192_s1 + $0x848] sm:$0xff]  }
  0xed   :  { %3857 = vmatpush3.bf16.msra.mxu1 %v4181_v34  ;;  %3836 = vmatprep.subr.bf16.mxu0 %v4182_v35  ;;  %v4231_v34 = vld [vmem:[%s5192_s1 + $0x8c8] sm:$0xff]  }
  0xee   :  { %3858 = vmatprep.subr.bf16.mxu1 %v4183_v36  ;;  %v4232_v35 = vld [vmem:[%s5192_s1 + $0x808] sm:$0xff]  }
  0xef   :  { %v4233_v36 = vld [vmem:[%s5192_s1 + $0x888] sm:$0xff]  }
  0xf0   :  { %3837 = vmatpush3.bf16.msra.mxu0 %v4184_v37  ;;  %v4234_v37 = vld [vmem:[%s5192_s1 + $0x840] sm:$0xff]  }
  0xf1   :  { %3859 = vmatpush3.bf16.msra.mxu1 %v4185_v38  ;;  %3838 = vmatprep.subr.bf16.mxu0 %v4186_v39  ;;  %v4235_v38 = vld [vmem:[%s5192_s1 + $0x8c0] sm:$0xff]  }
  0xf2   :  { %3860 = vmatprep.subr.bf16.mxu1 %v4187_v40  ;;  %v4236_v39 = vld [vmem:[%s5192_s1 + $0x800] sm:$0xff]  }
  0xf3   :  { %v4237_v40 = vld [vmem:[%s5192_s1 + $0x880] sm:$0xff]  }
  0xf4   :  { %3839 = vmatpush3.bf16.msra.mxu0 %v4188_v41  ;;  %v31_v41 = vld [vmem:[%s5193_s0 + $0x80] sm:$0xff] }
  0xf5   :  { %3861 = vmatpush3.bf16.msra.mxu1 %v4189_v42  ;;  %3840 = vmatprep.subr.bf16.mxu0 %v4190_v43  ;;  %v3230_v43 = vcombine.low %v31_v41, %v31_v41 }
  0xf6   :  { %3862 = vmatprep.subr.bf16.mxu1 %v4191_v44  ;;  %v3231_v44 = vcombine.high %v31_v41, %v31_v41 }
  0xf8   :  { %3841 = vmatpush3.bf16.msra.mxu0 %v4192_v45  ;;  %v32_v45 = vld [vmem:[%s5193_s0 + $0x88] sm:$0xff] }
  0xf9   :  { %3863 = vmatpush3.bf16.msra.mxu1 %v4193_v46  ;;  %3842 = vmatprep.subr.bf16.mxu0 %v4194_v47  ;;  %v3232_v47 = vcombine.low %v32_v45, %v32_v45 }
  0xfa   :  { %3864 = vmatprep.subr.bf16.mxu1 %v4195_v48  ;;  %v3233_v48 = vcombine.high %v32_v45, %v32_v45 }
  0xfc   :  { %3843 = vmatpush3.bf16.msra.mxu0 %v4196_v49 }
  0xfd   :  { %3865 = vmatpush3.bf16.msra.mxu1 %v4197_v50  ;;  %3844 = vmatprep.subr.bf16.mxu0 %v4198_v51 }
  0xfe   :  { %3866 = vmatprep.subr.bf16.mxu1 %v4199_v52 }
 0x100   :  { %3845 = vmatpush3.bf16.msra.mxu0 %v4200_v53 }
 0x101   :  { %3867 = vmatpush3.bf16.msra.mxu1 %v4201_v54  ;;  %3874 = vmatprep.subr.bf16.mxu0 %v4206_v62 }
 0x102   :  { %3896 = vmatprep.subr.bf16.mxu1 %v4207_v0 }
 0x103   :  { %v3582_v57 = vpop.f32.mrf.mxu0  ;;  %3063 = vmatmul.mubr.bf16.vlgmr.msra.gmra.mxu0 %v3226_v59 }
 0x104   :  { %v3604_v58 = vpop.f32.mrf.mxu1  ;;  %3103 = vmatmul.mubr.bf16.vlgmr.msra.gmra.mxu1 %v3228_v61  ;;  %3875 = vmatpush3.bf16.msra.mxu0 %v4208_v3 }
 0x105   :  { %v3583_v1 = vpop.f32.mrf.mxu0  ;;  %3897 = vmatpush3.bf16.msra.mxu1 %v4209_v6  ;;  %3876 = vmatprep.subr.bf16.mxu0 %v4210_v10 }
 0x106   :  { %v3605_v2 = vpop.f32.mrf.mxu1  ;;  %v3584_v4 = vadd.f32 %v3583_v1, %v3582_v57  ;;  %3898 = vmatprep.subr.bf16.mxu1 %v4211_v11  ;;  %3142 = vmatprep.mubr.bf16.mxu0 %v3231_v44 }
 0x107   :  { %v3606_v5 = vadd.f32 %v3605_v2, %v3604_v58  ;;  %v3585_v7 = vpop.f32.mrf.mxu0  ;;  %3182 = vmatprep.mubr.bf16.mxu1 %v3233_v48 }
 0x108   :  { %v3607_v8 = vpop.f32.mrf.mxu1  ;;  %v2585_v9 = vadd.f32 %v3584_v4, %v4997_v28  ;;  %3877 = vmatpush3.bf16.msra.mxu0 %v4212_v15  ;;  %v4225_v28 = vld [vmem:[%s5192_s1 + $0x898] sm:$0xff]  }
 0x109   :  { %v3586_v12 = vpop.f32.mrf.mxu0  ;;  %3899 = vmatpush3.bf16.msra.mxu1 %v4213_v16  ;;  %3878 = vmatprep.subr.bf16.mxu0 %v4214_v17 }
 0x10a   :  { %v3608_v13 = vpop.f32.mrf.mxu1  ;;  %v5102_v14 = vadd.f32 %v3606_v5, %v2585_v9  ;;  %3900 = vmatprep.subr.bf16.mxu1 %v4215_v18 }
 0x10c   :  { %3879 = vmatpush3.bf16.msra.mxu0 %v4216_v19 }
 0x10d   :  { %3901 = vmatpush3.bf16.msra.mxu1 %v4217_v20  ;;  %3880 = vmatprep.subr.bf16.mxu0 %v4218_v21 }
 0x10e   :  { %3902 = vmatprep.subr.bf16.mxu1 %v4219_v22 }
 0x110   :  { %3881 = vmatpush3.bf16.msra.mxu0 %v4220_v23 }
 0x111   :  { %3903 = vmatpush3.bf16.msra.mxu1 %v4221_v24  ;;  %3882 = vmatprep.subr.bf16.mxu0 %v4222_v25 }
 0x112   :  { %3904 = vmatprep.subr.bf16.mxu1 %v4223_v26 }
 0x114   :  { %3883 = vmatpush3.bf16.msra.mxu0 %v4224_v27 }
 0x115   :  { %3905 = vmatpush3.bf16.msra.mxu1 %v4225_v28  ;;  %3884 = vmatprep.subr.bf16.mxu0 %v4226_v29 }
 0x116   :  { %3906 = vmatprep.subr.bf16.mxu1 %v4227_v30 }
 0x118   :  { %3885 = vmatpush3.bf16.msra.mxu0 %v4228_v31 }
 0x119   :  { %3907 = vmatpush3.bf16.msra.mxu1 %v4229_v32  ;;  %3886 = vmatprep.subr.bf16.mxu0 %v4230_v33 }
 0x11a   :  { %3908 = vmatprep.subr.bf16.mxu1 %v4231_v34 }
 0x11c   :  { %3887 = vmatpush3.bf16.msra.mxu0 %v4232_v35 }
 0x11d   :  { %3909 = vmatpush3.bf16.msra.mxu1 %v4233_v36  ;;  %3888 = vmatprep.subr.bf16.mxu0 %v4234_v37 }
 0x11e   :  { %3910 = vmatprep.subr.bf16.mxu1 %v4235_v38 }
 0x120   :  { %3889 = vmatpush3.bf16.msra.mxu0 %v4236_v39 }
 0x121   :  { %3911 = vmatpush3.bf16.msra.mxu1 %v4237_v40 }
 0x123   :  { %v3626_v42 = vpop.f32.mrf.mxu0  ;;  %3143 = vmatmul.mubr.bf16.vlgmr.msra.gmra.mxu0 %v3230_v43 }
 0x124   :  { %v3648_v46 = vpop.f32.mrf.mxu1  ;;  %3183 = vmatmul.mubr.bf16.vlgmr.msra.gmra.mxu1 %v3232_v47 }
 0x125   :  { %v3627_v49 = vpop.f32.mrf.mxu0 }
 0x126   :  { %v3628_v50 = vadd.f32 %v3627_v49, %v3626_v42  ;;  %v3649_v51 = vpop.f32.mrf.mxu1 }
 0x127   :  { %v3650_v52 = vadd.f32 %v3649_v51, %v3648_v46  ;;  %v3629_v53 = vpop.f32.mrf.mxu0 }
 0x128   :  { %v2665_v54 = vadd.f32 %v3628_v50, %v5102_v14  ;;  %v3651_v55 = vpop.f32.mrf.mxu1 }
 0x129   :  { %v3630_v56 = vpop.f32.mrf.mxu0 }
 0x12a   :  { %v2705_v57 = vadd.f32 %v3650_v52, %v2665_v54  ;;  %v3652_v58 = vpop.f32.mrf.mxu1 }
 0x143   :  { %v3670_v59 = vpop.f32.mrf.mxu0 }
 0x144   :  { %v3692_v60 = vpop.f32.mrf.mxu1 }
 0x145   :  { %v3671_v61 = vpop.f32.mrf.mxu0 }
 0x146   :  { %v3672_v62 = vadd.f32 %v3671_v61, %v3670_v59  ;;  %v3693_v63 = vpop.f32.mrf.mxu1 }
 0x147   :  { %v3694_v0 = vadd.f32 %v3693_v63, %v3692_v60  ;;  %v3673_v1 = vpop.f32.mrf.mxu0 }
 0x148   :  { %v2745_v2 = vadd.f32 %v3672_v62, %v2705_v57  ;;  %v3695_v3 = vpop.f32.mrf.mxu1 }
 0x149   :  { %v3674_v4 = vpop.f32.mrf.mxu0 }
 0x14a   :  { %v2785_v5 = vadd.f32 %v3694_v0, %v2745_v2  ;;  %v3696_v6 = vpop.f32.mrf.mxu1 }
 0x163   :  { %v3714_v7 = vpop.f32.mrf.mxu0 }
 0x164   :  { %v3736_v8 = vpop.f32.mrf.mxu1 }
 0x165   :  { %v3715_v9 = vpop.f32.mrf.mxu0 }
 0x166   :  { %v3737_v10 = vpop.f32.mrf.mxu1  ;;  %v3716_v11 = vadd.f32 %v3715_v9, %v3714_v7 }
 0x167   :  { %v3738_v12 = vadd.f32 %v3737_v10, %v3736_v8  ;;  %v3717_v13 = vpop.f32.mrf.mxu0 }
 0x168   :  { %v3739_v14 = vpop.f32.mrf.mxu1  ;;  %v2825_v15 = vadd.f32 %v3716_v11, %v2785_v5 }
 0x169   :  { %v3718_v16 = vpop.f32.mrf.mxu0 }
 0x16a   :  { %v3740_v17 = vpop.f32.mrf.mxu1  ;;  %v2865_v18 = vadd.f32 %v3738_v12, %v2825_v15 }
 0x183   :  { %v3758_v19 = vpop.f32.mrf.mxu0 }
 0x184   :  { %v3780_v20 = vpop.f32.mrf.mxu1 }
 0x185   :  { %v3759_v21 = vpop.f32.mrf.mxu0 }
 0x186   :  { %v3760_v22 = vadd.f32 %v3759_v21, %v3758_v19  ;;  %v3781_v23 = vpop.f32.mrf.mxu1 }
 0x187   :  { %v3782_v24 = vadd.f32 %v3781_v23, %v3780_v20  ;;  %v3761_v25 = vpop.f32.mrf.mxu0 }
 0x188   :  { %v2905_v26 = vadd.f32 %v3760_v22, %v2865_v18  ;;  %v3783_v27 = vpop.f32.mrf.mxu1 }
 0x189   :  { %v3762_v28 = vpop.f32.mrf.mxu0 }
 0x18a   :  { %v2945_v29 = vadd.f32 %v3782_v24, %v2905_v26  ;;  %v3784_v30 = vpop.f32.mrf.mxu1 }
 0x1a3   :  { %v3802_v31 = vpop.f32.mrf.mxu0 }
 0x1a4   :  { %v3824_v32 = vpop.f32.mrf.mxu1 }
 0x1a5   :  { %v3803_v33 = vpop.f32.mrf.mxu0 }
 0x1a6   :  { %v3825_v34 = vpop.f32.mrf.mxu1  ;;  %v3804_v47 = vadd.f32 %v3803_v33, %v3802_v31 }
 0x1a7   :  { %v3805_v35 = vpop.f32.mrf.mxu0  ;;  %v3826_v49 = vadd.f32 %v3825_v34, %v3824_v32 }
 0x1a8   :  { %v3827_v36 = vpop.f32.mrf.mxu1  ;;  %v2985_v48 = vadd.f32 %v3804_v47, %v2945_v29 }
 0x1a9   :  { %v3806_v37 = vpop.f32.mrf.mxu0 }
 0x1aa   :  { %v3828_v38 = vpop.f32.mrf.mxu1  ;;  %v3025_v51 = vadd.f32 %v3826_v49, %v2985_v48 }
 0x1c3   :  { %v3846_v39 = vpop.f32.mrf.mxu0 }
 0x1c4   :  { %v3868_v40 = vpop.f32.mrf.mxu1 }
 0x1c5   :  { %v3847_v41 = vpop.f32.mrf.mxu0 }
 0x1c6   :  { %v3869_v42 = vpop.f32.mrf.mxu1  ;;  %v3848_v50 = vadd.f32 %v3847_v41, %v3846_v39 }
 0x1c7   :  { %v3849_v43 = vpop.f32.mrf.mxu0  ;;  %v3870_v53 = vadd.f32 %v3869_v42, %v3868_v40 }
 0x1c8   :  { %v3871_v44 = vpop.f32.mrf.mxu1  ;;  %v3065_v52 = vadd.f32 %v3848_v50, %v3025_v51 }
 0x1c9   :  { %v3850_v45 = vpop.f32.mrf.mxu0 }
 0x1ca   :  { %v3872_v46 = vpop.f32.mrf.mxu1  ;;  %v3105_v58 = vadd.f32 %v3870_v53, %v3065_v52 }
 0x1e3   :  { %v3890_v54 = vpop.f32.mrf.mxu0 }
 0x1e4   :  { %v3912_v55 = vpop.f32.mrf.mxu1 }
 0x1e5   :  { %v3891_v56 = vpop.f32.mrf.mxu0 }
 0x1e6   :  { %v3913_v57 = vpop.f32.mrf.mxu1  ;;  %v3892_v59 = vadd.f32 %v3891_v56, %v3890_v54 }
 0x1e7   :  { %v3893_v60 = vpop.f32.mrf.mxu0  ;;  %v3914_v63 = vadd.f32 %v3913_v57, %v3912_v55 }
 0x1e8   :  { %v3915_v61 = vpop.f32.mrf.mxu1  ;;  %v3145_v62 = vadd.f32 %v3892_v59, %v3105_v58 }
 0x1e9   :  { %v3894_v0 = vpop.f32.mrf.mxu0 }
 0x1ea   :  { %v3916_v1 = vpop.f32.mrf.mxu1  ;;  %v3185_v2 = vadd.f32 %v3914_v63, %v3145_v62 }
 0x1ec   :  { %v3190_v3 = vmax.f32 %v3185_v2, 0.0 }
 0x1ee   :  { %v3191_v4 = vpack.c.bf16 %v3190_v3, %v3190_v3 }
 0x1f0   :  { %3192 = vst [vmem:[%s5195_s3] sm:$0xf] %v3191_v4 }

// kernel: mwt_forward.21
= control target key start
LH: loop header
LB: loop body
LE: loop exit
PB: predicated region body
PF: predicated region fallthrough
CT: control target
= control target key end

     0   :  { %vm558_vm0 = vcmask 523264   ;;  %s1757_s1 = inlined_call_operand.vmem [shape: bf16[576,128], index: 1, kind: input, shape index: {}]   ;;  %s1758_s0 = inlined_call_operand.vmem [shape: bf16[128,576], index: 0, kind: input, shape index: {}]   ;;  %s1759_s2 = inlined_call_operand.vmem [shape: f32[1,128], index: 2, kind: input, shape index: {}]   ;;  %s1760_s3 = inlined_call_operand.vmem [shape: bf16[128,128], index: 3, kind: output, shape index: {}]  }
   0x1   :  { %v1310_v0 = vld [vmem:[%s1757_s1 + $0x78] sm:$0xff]   ;;  %v1314_v4 = vld [vmem:[%s1757_s1 + $0x70] sm:$0xff]   ;;  %v1318_v8 = vld [vmem:[%s1757_s1 + $0x68] sm:$0xff]  }
   0x2   :  { %v1311_v1 = vld [vmem:[%s1757_s1 + $0xf8] sm:$0xff]   ;;  %1138 = vmatprep.subr.bf16.mxu0 %v1310_v0  ;;  %v1315_v5 = vld [vmem:[%s1757_s1 + $0xf0] sm:$0xff]   ;;  %v1319_v9 = vld [vmem:[%s1757_s1 + $0xe8] sm:$0xff]  }
   0x3   :  { %v1312_v2 = vld [vmem:[%s1757_s1 + $0x38] sm:$0xff]   ;;  %1202 = vmatprep.subr.bf16.mxu1 %v1311_v1  ;;  %v1316_v6 = vld [vmem:[%s1757_s1 + $0x30] sm:$0xff]   ;;  %v1320_v10 = vld [vmem:[%s1757_s1 + $0x28] sm:$0xff]  }
   0x4   :  { %v1313_v3 = vld [vmem:[%s1757_s1 + $0xb8] sm:$0xff]   ;;  %1139 = vmatpush3.bf16.msra.mxu0 %v1312_v2  ;;  %v1317_v7 = vld [vmem:[%s1757_s1 + $0xb0] sm:$0xff]   ;;  %v1321_v11 = vld [vmem:[%s1757_s1 + $0xa8] sm:$0xff]  }
   0x5   :  { %1203 = vmatpush3.bf16.msra.mxu1 %v1313_v3  ;;  %1140 = vmatprep.subr.bf16.mxu0 %v1314_v4  ;;  %v1322_v12 = vld [vmem:[%s1757_s1 + $0x60] sm:$0xff]   ;;  %v1326_v16 = vld [vmem:[%s1757_s1 + $0x58] sm:$0xff]   ;;  %v1330_v20 = vld [vmem:[%s1757_s1 + $0x50] sm:$0xff]  }
   0x6   :  { %1204 = vmatprep.subr.bf16.mxu1 %v1315_v5  ;;  %v1323_v13 = vld [vmem:[%s1757_s1 + $0xe0] sm:$0xff]   ;;  %v1327_v17 = vld [vmem:[%s1757_s1 + $0xd8] sm:$0xff]   ;;  %v1331_v21 = vld [vmem:[%s1757_s1 + $0xd0] sm:$0xff]  }
   0x7   :  { %v1324_v14 = vld [vmem:[%s1757_s1 + $0x20] sm:$0xff]   ;;  %v1328_v18 = vld [vmem:[%s1757_s1 + $0x18] sm:$0xff]   ;;  %v1332_v22 = vld [vmem:[%s1757_s1 + $0x10] sm:$0xff]  }
   0x8   :  { %1141 = vmatpush3.bf16.msra.mxu0 %v1316_v6  ;;  %v1325_v15 = vld [vmem:[%s1757_s1 + $0xa0] sm:$0xff]   ;;  %v1329_v19 = vld [vmem:[%s1757_s1 + $0x98] sm:$0xff]   ;;  %v1333_v23 = vld [vmem:[%s1757_s1 + $0x90] sm:$0xff]  }
   0x9   :  { %1205 = vmatpush3.bf16.msra.mxu1 %v1317_v7  ;;  %1142 = vmatprep.subr.bf16.mxu0 %v1318_v8  ;;  %v1334_v24 = vld [vmem:[%s1757_s1 + $0x48] sm:$0xff]   ;;  %v1338_v28 = vld [vmem:[%s1757_s1 + $0x40] sm:$0xff]   ;;  %v1348_v36 = vld [vmem:[%s1757_s1 + $0x118] sm:$0xff]  }
   0xa   :  { %1206 = vmatprep.subr.bf16.mxu1 %v1319_v9  ;;  %v1335_v25 = vld [vmem:[%s1757_s1 + $0xc8] sm:$0xff]   ;;  %v1339_v29 = vld [vmem:[%s1757_s1 + $0xc0] sm:$0xff]   ;;  %v1361_v42 = vld [vmem:[%s1757_s1 + $0x110] sm:$0xff]  }
   0xb   :  { %v1336_v26 = vld [vmem:[%s1757_s1 + $0x8] sm:$0xff]   ;;  %v1340_v30 = vld [vmem:[%s1757_s1] sm:$0xff]   ;;  %v1357_v43 = vld [vmem:[%s1758_s0 + $0x5c] ss:$20 sps:$4 sm:$0xff]  }
   0xc   :  { %1143 = vmatpush3.bf16.msra.mxu0 %v1320_v10  ;;  %v1337_v27 = vld [vmem:[%s1757_s1 + $0x88] sm:$0xff]   ;;  %v1341_v31 = vld [vmem:[%s1757_s1 + $0x80] sm:$0xff]   ;;  %v1362_v47 = vld [vmem:[%s1758_s0 + $0x7c] ss:$20 sps:$4 sm:$0xff]  }
   0xd   :  { %1207 = vmatpush3.bf16.msra.mxu1 %v1321_v11  ;;  %1144 = vmatprep.subr.bf16.mxu0 %v1322_v12  ;;  %v1342_v32 = vld [vmem:[%s1758_s0] ss:$20 sps:$4 sm:$0xff]   ;;  %v1344_v33 = vld [vmem:[%s1758_s0 + $0x4] ss:$20 sps:$4 sm:$0xff]   ;;  %v1345_v34 = vld [vmem:[%s1758_s0 + $0x8] ss:$20 sps:$4 sm:$0xff]  }
   0xe   :  { %1208 = vmatprep.subr.bf16.mxu1 %v1323_v13  ;;  %v1347_v35 = vld [vmem:[%s1758_s0 + $0xc] ss:$20 sps:$4 sm:$0xff]   ;;  %615 = vmatprep.mubr.bf16.mxu0 %v1344_v33  ;;  %v1351_v38 = vld [vmem:[%s1758_s0 + $0x34] ss:$20 sps:$4 sm:$0xff]   ;;  %v1354_v40 = vld [vmem:[%s1758_s0 + $0x30] ss:$20 sps:$4 sm:$0xff]  }
   0xf   :  { %712 = vmatprep.mubr.bf16.mxu1 %v1347_v35  ;;  %v1349_v37 = vld [vmem:[%s1758_s0 + $0x2c] ss:$20 sps:$4 sm:$0xff]   ;;  %v1353_v39 = vld [vmem:[%s1758_s0 + $0x28] ss:$20 sps:$4 sm:$0xff]   ;;  %v1359_v44 = vld [vmem:[%s1758_s0 + $0x50] ss:$20 sps:$4 sm:$0xff]  }
  0x10   :  { %1145 = vmatpush3.bf16.msra.mxu0 %v1324_v14  ;;  %v1355_v41 = vld [vmem:[%s1758_s0 + $0x54] ss:$20 sps:$4 sm:$0xff]   ;;  %v1360_v45 = vld [vmem:[%s1758_s0 + $0x58] ss:$20 sps:$4 sm:$0xff]   ;;  %v1387_v49 = vld [vmem:[%s1757_s1 + $0x100] sm:$0xff]  }
  0x11   :  { %1209 = vmatpush3.bf16.msra.mxu1 %v1325_v15  ;;  %1146 = vmatprep.subr.bf16.mxu0 %v1326_v16  ;;  %v1374_v46 = vld [vmem:[%s1757_s1 + $0x108] sm:$0xff]   ;;  %v1364_v48 = vld [vmem:[%s1758_s0 + $0x84] ss:$20 sps:$4 sm:$0xff]   ;;  %v1367_v51 = vld [vmem:[%s1758_s0 + $0x80] ss:$20 sps:$4 sm:$0xff]  }
  0x12   :  { %1210 = vmatprep.subr.bf16.mxu1 %v1327_v17  ;;  %v1366_v50 = vld [vmem:[%s1758_s0 + $0x78] ss:$20 sps:$4 sm:$0xff]   ;;  %v1372_v54 = vld [vmem:[%s1758_s0 + $0xa0] ss:$20 sps:$4 sm:$0xff]   ;;  %v1373_v55 = vld [vmem:[%s1758_s0 + $0xa8] ss:$20 sps:$4 sm:$0xff]  }
  0x13   :  { %v1368_v52 = vld [vmem:[%s1758_s0 + $0xa4] ss:$20 sps:$4 sm:$0xff]   ;;  %v1370_v53 = vld [vmem:[%s1758_s0 + $0xac] ss:$20 sps:$4 sm:$0xff]   ;;  %v1377_v57 = vld [vmem:[%s1758_s0 + $0xd4] ss:$20 sps:$4 sm:$0xff]  }
  0x14   :  { %1147 = vmatpush3.bf16.msra.mxu0 %v1328_v18  ;;  %v1375_v56 = vld [vmem:[%s1758_s0 + $0xcc] ss:$20 sps:$4 sm:$0xff]   ;;  %v1379_v58 = vld [vmem:[%s1758_s0 + $0xc8] ss:$20 sps:$4 sm:$0xff]   ;;  %v1380_v59 = vld [vmem:[%s1758_s0 + $0xd0] ss:$20 sps:$4 sm:$0xff]  }
  0x15   :  { %1211 = vmatpush3.bf16.msra.mxu1 %v1329_v19  ;;  %1148 = vmatprep.subr.bf16.mxu0 %v1330_v20  ;;  %v1381_v60 = vld [vmem:[%s1758_s0 + $0xf4] ss:$20 sps:$4 sm:$0xff]   ;;  %v1383_v61 = vld [vmem:[%s1758_s0 + $0xfc] ss:$20 sps:$4 sm:$0xff]   ;;  %v1386_v63 = vld [vmem:[%s1758_s0 + $0xf8] ss:$20 sps:$4 sm:$0xff]  }
  0x16   :  { %1212 = vmatprep.subr.bf16.mxu1 %v1331_v21  ;;  %v1385_v62 = vld [vmem:[%s1758_s0 + $0xf0] ss:$20 sps:$4 sm:$0xff]   ;;  %v1392_v2 = vld [vmem:[%s1758_s0 + $0x118] ss:$20 sps:$4 sm:$0xff]   ;;  %v1393_v3 = vld [vmem:[%s1758_s0 + $0x120] ss:$20 sps:$4 sm:$0xff]  }
  0x17   :  { %v1388_v0 = vld [vmem:[%s1758_s0 + $0x11c] ss:$20 sps:$4 sm:$0xff]   ;;  %v1390_v1 = vld [vmem:[%s1758_s0 + $0x124] ss:$20 sps:$4 sm:$0xff]   ;;  %v1398_v8 = vld [vmem:[%s1758_s0 + $0x60] ss:$20 sps:$4 sm:$0xff]  }
  0x18   :  { %1149 = vmatpush3.bf16.msra.mxu0 %v1332_v22  ;;  %v1394_v4 = vld [vmem:[%s1758_s0 + $0x10] ss:$20 sps:$4 sm:$0xff]   ;;  %v1396_v6 = vld [vmem:[%s1758_s0 + $0x38] ss:$20 sps:$4 sm:$0xff]   ;;  %v1399_v9 = vld [vmem:[%s1758_s0 + $0x100] ss:$20 sps:$4 sm:$0xff]  }
  0x19   :  { %1213 = vmatpush3.bf16.msra.mxu1 %v1333_v23  ;;  %1150 = vmatprep.subr.bf16.mxu0 %v1334_v24  ;;  %v1395_v5 = vld [vmem:[%s1758_s0 + $0xb0] ss:$20 sps:$4 sm:$0xff]   ;;  %v1397_v7 = vld [vmem:[%s1758_s0 + $0xd8] ss:$20 sps:$4 sm:$0xff]   ;;  %v1400_v10 = vld [vmem:[%s1758_s0 + $0x88] ss:$20 sps:$4 sm:$0xff]  }
  0x1a   :  { %1214 = vmatprep.subr.bf16.mxu1 %v1335_v25  ;;  %v1401_v11 = vld [vmem:[%s1758_s0 + $0x128] ss:$20 sps:$4 sm:$0xff]   ;;  %v1661_v14 = vld [vmem:[%s1759_s2] ss:$0 sm:$0xff] }
  0x1c   :  { %1151 = vmatpush3.bf16.msra.mxu0 %v1336_v26 }
  0x1d   :  { %1215 = vmatpush3.bf16.msra.mxu1 %v1337_v27  ;;  %1152 = vmatprep.subr.bf16.mxu0 %v1338_v28 }
  0x1e   :  { %1216 = vmatprep.subr.bf16.mxu1 %v1339_v29 }
  0x20   :  { %1153 = vmatpush3.bf16.msra.mxu0 %v1340_v30 }
  0x21   :  { %1217 = vmatpush3.bf16.msra.mxu1 %v1341_v31  ;;  %1278 = vmatprep.subr.bf16.mxu0 %v1348_v36 }
  0x22   :  { %1302 = vmatprep.subr.bf16.mxu1 %v1348_v36 }
  0x23   :  { %616 = vmatmul.mubr.bf16.vlgmr.msra.gmra.mxu0 %v1342_v32 }
  0x24   :  { %713 = vmatmul.mubr.bf16.vlgmr.msra.gmra.mxu1 %v1345_v34  ;;  %1279 = vmatpush3.bf16.msra.mxu0 %v1348_v36 }
  0x25   :  { %1306 = vmatpush3.bf16.msra.mxu1 %v1348_v36  ;;  %623 = vmatprep.mubr.bf16.mxu0 %v1349_v37 }
  0x26   :  { %720 = vmatprep.mubr.bf16.mxu1 %v1351_v38  ;;  %1280 = vmatprep.subr.bf16.mxu0 %v1361_v42 }
  0x27   :  { %1303 = vmatprep.subr.bf16.mxu1 %v1361_v42 }
  0x28   :  { %1281 = vmatpush3.bf16.msra.mxu0 %v1361_v42 }
  0x29   :  { %1307 = vmatpush3.bf16.msra.mxu1 %v1361_v42  ;;  %1282 = vmatprep.subr.bf16.mxu0 %v1374_v46 }
  0x2a   :  { %1304 = vmatprep.subr.bf16.mxu1 %v1374_v46 }
  0x2b   :  { %624 = vmatmul.mubr.bf16.gmra.mxu0 %v1353_v39 }
  0x2c   :  { %721 = vmatmul.mubr.bf16.gmra.mxu1 %v1354_v40  ;;  %631 = vmatprep.mubr.bf16.mxu0 %v1355_v41 }
  0x2d   :  { %728 = vmatprep.mubr.bf16.mxu1 %v1357_v43  ;;  %1283 = vmatpush3.bf16.msra.mxu0 %v1374_v46 }
  0x2e   :  { %1308 = vmatpush3.bf16.msra.mxu1 %v1374_v46  ;;  %1284 = vmatprep.subr.bf16.mxu0 %v1387_v49 }
  0x2f   :  { %1305 = vmatprep.subr.bf16.mxu1 %v1387_v49 }
  0x31   :  { %1285 = vmatpush3.bf16.msra.mxu0 %v1387_v49 }
  0x32   :  { %1309 = vmatpush3.bf16.msra.mxu1 %v1387_v49 }
  0x33   :  { %632 = vmatmul.mubr.bf16.gmra.mxu0 %v1359_v44 }
  0x34   :  { %729 = vmatmul.mubr.bf16.gmra.mxu1 %v1360_v45  ;;  %639 = vmatprep.mubr.bf16.mxu0 %v1362_v47 }
  0x35   :  { %736 = vmatprep.mubr.bf16.mxu1 %v1364_v48 }
  0x3b   :  { %640 = vmatmul.mubr.bf16.gmra.mxu0 %v1366_v50 }
  0x3c   :  { %737 = vmatmul.mubr.bf16.gmra.mxu1 %v1367_v51  ;;  %647 = vmatprep.mubr.bf16.mxu0 %v1368_v52 }
  0x3d   :  { %744 = vmatprep.mubr.bf16.mxu1 %v1370_v53 }
  0x43   :  { %648 = vmatmul.mubr.bf16.gmra.mxu0 %v1372_v54 }
  0x44   :  { %745 = vmatmul.mubr.bf16.gmra.mxu1 %v1373_v55  ;;  %655 = vmatprep.mubr.bf16.mxu0 %v1375_v56 }
  0x45   :  { %752 = vmatprep.mubr.bf16.mxu1 %v1377_v57 }
  0x4b   :  { %656 = vmatmul.mubr.bf16.gmra.mxu0 %v1379_v58 }
  0x4c   :  { %753 = vmatmul.mubr.bf16.gmra.mxu1 %v1380_v59  ;;  %663 = vmatprep.mubr.bf16.mxu0 %v1381_v60 }
  0x4d   :  { %760 = vmatprep.mubr.bf16.mxu1 %v1383_v61 }
  0x53   :  { %664 = vmatmul.mubr.bf16.gmra.mxu0 %v1385_v62 }
  0x54   :  { %761 = vmatmul.mubr.bf16.gmra.mxu1 %v1386_v63  ;;  %671 = vmatprep.mubr.bf16.mxu0 %v1388_v0 }
  0x55   :  { %768 = vmatprep.mubr.bf16.mxu1 %v1390_v1 }
  0x5b   :  { %672 = vmatmul.mubr.bf16.gmra.mxu0 %v1392_v2 }
  0x5c   :  { %769 = vmatmul.mubr.bf16.gmra.mxu1 %v1393_v3  ;;  %1286 = vmatprep.mubr.msk.bf16.mxu0 %vm558_vm0, %v1394_v4 }
  0x5d   :  { %1294 = vmatprep.mubr.msk.bf16.mxu1 %vm558_vm0, %v1395_v5 }
  0x63   :  { %1287 = vmatmul.mubr.msk.bf16.vlgmr.msra.gmra.mxu0 %vm558_vm0, %v1396_v6 }
  0x64   :  { %1295 = vmatmul.mubr.msk.bf16.vlgmr.msra.gmra.mxu1 %vm558_vm0, %v1397_v7  ;;  %1290 = vmatprep.mubr.msk.bf16.mxu0 %vm558_vm0, %v1398_v8 }
  0x65   :  { %1298 = vmatprep.mubr.msk.bf16.mxu1 %vm558_vm0, %v1399_v9 }
  0x6b   :  { %1291 = vmatmul.mubr.msk.bf16.gmra.mxu0 %vm558_vm0, %v1400_v10 }
  0x6c   :  { %1299 = vmatmul.mubr.msk.bf16.gmra.mxu1 %vm558_vm0, %v1401_v11 }
  0xe3   :  { %v1154_v12 = vpop.f32.mrf.mxu0 }
  0xe4   :  { %v1218_v13 = vpop.f32.mrf.mxu1 }
  0xe5   :  { %v1155_v15 = vpop.f32.mrf.mxu0 }
  0xe6   :  { %v1156_v16 = vadd.f32 %v1155_v15, %v1154_v12  ;;  %v1219_v17 = vpop.f32.mrf.mxu1 }
  0xe7   :  { %v1157_v18 = vpop.f32.mrf.mxu0  ;;  %v1220_v20 = vadd.f32 %v1219_v17, %v1218_v13 }
  0xe8   :  { %v618_v19 = vadd.f32 %v1156_v16, %v1661_v14  ;;  %v1664_v21 = vpop.f32.mrf.mxu1 }
  0xe9   :  { %v1158_v22 = vpop.f32.mrf.mxu0 }
  0xea   :  { %v1666_v23 = vpop.f32.mrf.mxu1  ;;  %v1668_v24 = vadd.f32 %v1220_v20, %v618_v19  ;;  %v1159_v6 = vadd.f32 %v1158_v22, %v1157_v18 }
  0xeb   :  { %v1160_v25 = vpop.f32.mrf.mxu0 }
  0xec   :  { %1761 = vst [vmem:[#allocation2_spill] sm:$0xff] %v1668_v24  ;;  %v1224_v26 = vpop.f32.mrf.mxu1  ;;  %v621_v15 = vadd.f32 %v1159_v6, %v1661_v14 }
  0xed   :  { %v1161_v27 = vpop.f32.mrf.mxu0 }
  0xee   :  { %v1225_v28 = vpop.f32.mrf.mxu1  ;;  %v1162_v8 = vadd.f32 %v1161_v27, %v1160_v25  ;;  %v1223_v25 = vadd.f32 %v1666_v23, %v1664_v21 }
  0xef   :  { %v1163_v29 = vpop.f32.mrf.mxu0  ;;  %v1226_v27 = vadd.f32 %v1225_v28, %v1224_v26 }
  0xf0   :  { %v1227_v30 = vpop.f32.mrf.mxu1  ;;  %v626_v19 = vadd.f32 %v1162_v8, %v1661_v14 }
  0xf1   :  { %v1164_v31 = vpop.f32.mrf.mxu0 }
  0xf2   :  { %v1228_v32 = vpop.f32.mrf.mxu1  ;;  %v1165_v9 = vadd.f32 %v1164_v31, %v1163_v29 }
  0xf3   :  { %v1166_v33 = vpop.f32.mrf.mxu0  ;;  %v1229_v29 = vadd.f32 %v1228_v32, %v1227_v30 }
  0xf4   :  { %v1230_v34 = vpop.f32.mrf.mxu1  ;;  %v629_v20 = vadd.f32 %v1165_v9, %v1661_v14  ;;  %v718_v9 = vadd.f32 %v1223_v25, %v621_v15 }
  0xf5   :  { %v1167_v35 = vpop.f32.mrf.mxu0 }
  0xf6   :  { %v1231_v36 = vpop.f32.mrf.mxu1  ;;  %v1168_v10 = vadd.f32 %v1167_v35, %v1166_v33  ;;  %v726_v24 = vadd.f32 %v1229_v29, %v629_v20 }
  0xf7   :  { %v1169_v37 = vpop.f32.mrf.mxu0  ;;  %v1232_v35 = vadd.f32 %v1231_v36, %v1230_v34 }
  0xf8   :  { %v1670_v38 = vpop.f32.mrf.mxu1  ;;  %v634_v18 = vadd.f32 %v1168_v10, %v1661_v14  ;;  %v723_v10 = vadd.f32 %v1226_v27, %v626_v19 }
  0xf9   :  { %v1170_v39 = vpop.f32.mrf.mxu0 }
  0xfa   :  { %v1672_v40 = vpop.f32.mrf.mxu1  ;;  %v1171_v6 = vadd.f32 %v1170_v39, %v1169_v37  ;;  %v1702_v21 = vadd.f32 %v1232_v35, %v634_v18 }
  0xfb   :  { %v1172_v41 = vpop.f32.mrf.mxu0  ;;  %v1706_v23 = vadd.f32 %v1672_v40, %v1670_v38 }
  0xfc   :  { %v1674_v42 = vpop.f32.mrf.mxu1  ;;  %v1711_v34 = vadd.f32 %v1171_v6, %v1661_v14 }
  0xfd   :  { %v1173_v43 = vpop.f32.mrf.mxu0 }
  0xfe   :  { %v1237_v44 = vpop.f32.mrf.mxu1  ;;  %v1174_v16 = vadd.f32 %v1173_v43, %v1172_v41 }
  0xff   :  { %v1175_v45 = vpop.f32.mrf.mxu0  ;;  %v1238_v26 = vadd.f32 %v1237_v44, %v1674_v42 }
 0x100   :  { %v1676_v46 = vpop.f32.mrf.mxu1  ;;  %v642_v8 = vadd.f32 %v1174_v16, %v1661_v14 }
 0x101   :  { %v1176_v47 = vpop.f32.mrf.mxu0 }
 0x102   :  { %v1678_v48 = vpop.f32.mrf.mxu1  ;;  %v1177_v28 = vadd.f32 %v1176_v47, %v1175_v45 }
 0x103   :  { %v1178_v49 = vpop.f32.mrf.mxu0  ;;  %v1241_v15 = vadd.f32 %v1678_v48, %v1676_v46 }
 0x104   :  { %v1680_v50 = vpop.f32.mrf.mxu1 }
 0x105   :  { %v1179_v51 = vpop.f32.mrf.mxu0 }
 0x106   :  { %v1243_v52 = vpop.f32.mrf.mxu1  ;;  %v1180_v31 = vadd.f32 %v1179_v51, %v1178_v49 }
 0x107   :  { %v1181_v53 = vpop.f32.mrf.mxu0  ;;  %v1244_v51 = vadd.f32 %v1243_v52, %v1680_v50 }
 0x108   :  { %v1245_v54 = vpop.f32.mrf.mxu1  ;;  %v650_v30 = vadd.f32 %v1180_v31, %v1661_v14 }
 0x109   :  { %v1182_v55 = vpop.f32.mrf.mxu0 }
 0x10a   :  { %v1246_v56 = vpop.f32.mrf.mxu1  ;;  %v1183_v41 = vadd.f32 %v1182_v55, %v1181_v53  ;;  %v739_v55 = vadd.f32 %v1238_v26, %v642_v8 }
 0x10b   :  { %v1184_v57 = vpop.f32.mrf.mxu0  ;;  %v1247_v53 = vadd.f32 %v1246_v56, %v1245_v54 }
 0x10c   :  { %v1248_v58 = vpop.f32.mrf.mxu1  ;;  %v653_v36 = vadd.f32 %v1183_v41, %v1661_v14 }
 0x10d   :  { %v1185_v59 = vpop.f32.mrf.mxu0 }
 0x10e   :  { %v1249_v60 = vpop.f32.mrf.mxu1  ;;  %v1186_v22 = vadd.f32 %v1185_v59, %v1184_v57  ;;  %v750_v54 = vadd.f32 %v1247_v53, %v653_v36 }
 0x10f   :  { %v1187_v61 = vpop.f32.mrf.mxu0  ;;  %v1250_v37 = vadd.f32 %v1249_v60, %v1248_v58  ;;  %v747_v60 = vadd.f32 %v1244_v51, %v650_v30 }
 0x110   :  { %v1251_v62 = vpop.f32.mrf.mxu1  ;;  %v658_v57 = vadd.f32 %v1186_v22, %v1661_v14 }
 0x111   :  { %v1188_v63 = vpop.f32.mrf.mxu0 }
 0x112   :  { %v1252_v0 = vpop.f32.mrf.mxu1  ;;  %v1189_v43 = vadd.f32 %v1188_v63, %v1187_v61  ;;  %v755_v47 = vadd.f32 %v1250_v37, %v658_v57  ;;  %v645_v63 = vadd.f32 %v1177_v28, %v1661_v14 }
 0x113   :  { %v1190_v1 = vpop.f32.mrf.mxu0  ;;  %v1253_v42 = vadd.f32 %v1252_v0, %v1251_v62  ;;  %v1765_v0 = vld [vmem:[#allocation2_spill] sm:$0xff] }
 0x114   :  { %v1682_v2 = vpop.f32.mrf.mxu1  ;;  %v661_v39 = vadd.f32 %v1189_v43, %v1661_v14  ;;  %v742_v37 = vadd.f32 %v1241_v15, %v645_v63 }
 0x115   :  { %v1191_v3 = vpop.f32.mrf.mxu0 }
 0x116   :  { %v1684_v4 = vpop.f32.mrf.mxu1  ;;  %v1192_v44 = vadd.f32 %v1191_v3, %v1190_v1  ;;  %v758_v52 = vadd.f32 %v1253_v42, %v661_v39 }
 0x117   :  { %v1193_v5 = vpop.f32.mrf.mxu0  ;;  %v1256_v56 = vadd.f32 %v1684_v4, %v1682_v2 }
 0x118   :  { %v1686_v7 = vpop.f32.mrf.mxu1 }
 0x119   :  { %1762 = vst [vmem:[#allocation3_spill] sm:$0xff] %v1686_v7  ;;  %v1194_v11 = vpop.f32.mrf.mxu0 }
 0x11a   :  { %v1688_v12 = vpop.f32.mrf.mxu1  ;;  %v1195_v45 = vadd.f32 %v1194_v11, %v1193_v5 }
 0x11b   :  { %1763 = vst [vmem:[#allocation4_spill] sm:$0xff] %v1688_v12  ;;  %v1196_v13 = vpop.f32.mrf.mxu0 }
 0x11c   :  { %v1691_v17 = vpop.f32.mrf.mxu1  ;;  %v669_v46 = vadd.f32 %v1195_v45, %v1661_v14 }
 0x11d   :  { %1764 = vst [vmem:[#allocation5_spill] sm:$0xff] %v1691_v17  ;;  %v1197_v7 = vpop.f32.mrf.mxu0 }
 0x11e   :  { %v1261_v33 = vpop.f32.mrf.mxu1  ;;  %v1198_v38 = vadd.f32 %v1197_v7, %v1196_v13  ;;  %v666_v7 = vadd.f32 %v1192_v44, %v1661_v14  ;;  %v734_v44 = vadd.f32 %v1706_v23, %v1711_v34 }
 0x11f   :  { %v1199_v12 = vpop.f32.mrf.mxu0 }
 0x120   :  { %v1699_v17 = vpop.f32.mrf.mxu1  ;;  %v674_v62 = vadd.f32 %v1198_v38, %v1661_v14  ;;  %v763_v30 = vadd.f32 %v1256_v56, %v666_v7  ;;  %v1767_v39 = vld [vmem:[#allocation3_spill] sm:$0xff] }
 0x121   :  { %v1200_v59 = vpop.f32.mrf.mxu0 }
 0x122   :  { %v1264_v32 = vpop.f32.mrf.mxu1  ;;  %v1201_v19 = vadd.f32 %v1200_v59, %v1199_v12 }
 0x123   :  { %v1288_v49 = vpop.f32.mrf.mxu0  ;;  %v1265_v59 = vadd.f32 %v1264_v32, %v1699_v17 }
 0x124   :  { %v1296_v40 = vpop.f32.mrf.mxu1  ;;  %v820_v58 = vadd.f32 %v1288_v49, %v723_v10  ;;  %v1766_v13 = vld [vmem:[#allocation5_spill] sm:$0xff]  ;;  %v677_v2 = vadd.f32 %v1201_v19, %v1661_v14  ;;  %v1768_v49 = vld [vmem:[#allocation4_spill] sm:$0xff] }
 0x125   :  { %v811_v61 = vpop.f32.mrf.mxu0  ;;  %v852_v20 = vadd.f32 %v1296_v40, %v755_v47  ;;  %v1262_v18 = vadd.f32 %v1261_v33, %v1766_v13  ;;  %v1259_v51 = vadd.f32 %v1768_v49, %v1767_v39 }
 0x126   :  { %v843_v16 = vpop.f32.mrf.mxu1  ;;  %v812_v1 = vadd.f32 %v811_v61, %v1765_v0  ;;  %v876_v22 = vmax.f32 %v820_v58, 0.0  ;;  %v774_v38 = vadd.f32 %v1265_v59, %v677_v2 }
 0x127   :  { %v1289_v50 = vpop.f32.mrf.mxu0  ;;  %v844_v48 = vadd.f32 %v843_v16, %v747_v60  ;;  %v884_v4 = vmax.f32 %v852_v20, 0.0  ;;  %v771_v8 = vadd.f32 %v1262_v18, %v674_v62  ;;  %v766_v63 = vadd.f32 %v1259_v51, %v669_v46 }
 0x128   :  { %v823_v3 = vadd.f32 %v1289_v50, %v726_v24  ;;  %v1297_v5 = vpop.f32.mrf.mxu1  ;;  %v874_v6 = vmax.f32 %v812_v1, 0.0 }
 0x129   :  { %v855_v11 = vadd.f32 %v1297_v5, %v758_v52  ;;  %v814_v12 = vpop.f32.mrf.mxu0  ;;  %v882_v10 = vmax.f32 %v844_v48, 0.0 }
 0x12a   :  { %v877_v25 = vmax.f32 %v823_v3, 0.0  ;;  %v815_v27 = vadd.f32 %v814_v12, %v718_v9  ;;  %v846_v29 = vpop.f32.mrf.mxu1 }
 0x12b   :  { %v885_v31 = vmax.f32 %v855_v11, 0.0  ;;  %v847_v35 = vadd.f32 %v846_v29, %v750_v54  ;;  %v1292_v24 = vpop.f32.mrf.mxu0 }
 0x12c   :  { %v1099_v41 = vpack.c.bf16 %v877_v25, %v876_v22  ;;  %v875_v43 = vmax.f32 %v815_v27, 0.0  ;;  %v1300_v57 = vpop.f32.mrf.mxu1  ;;  %v836_v9 = vadd.f32 %v1292_v24, %v739_v55 }
 0x12d   :  { %v1119_v26 = vpack.c.bf16 %v885_v31, %v884_v4  ;;  %v883_v33 = vmax.f32 %v847_v35, 0.0  ;;  %v827_v28 = vpop.f32.mrf.mxu0  ;;  %v868_v32 = vadd.f32 %v1300_v57, %v771_v8 }
 0x12e   :  { %1131 = vst [vmem:[%s1760_s3 + $0x8] sm:$0xff] %v1099_v41   ;;  %v1094_v14 = vpack.c.bf16 %v875_v43, %v874_v6  ;;  %v859_v36 = vpop.f32.mrf.mxu1  ;;  %v828_v40 = vadd.f32 %v827_v28, %v1702_v21  ;;  %v880_v15 = vmax.f32 %v836_v9, 0.0 }
 0x12f   :  { %1135 = vst [vmem:[%s1760_s3 + $0x28] sm:$0xff] %v1119_v26   ;;  %v1114_v17 = vpack.c.bf16 %v883_v33, %v882_v10  ;;  %v1293_v53 = vpop.f32.mrf.mxu0  ;;  %v860_v45 = vadd.f32 %v859_v36, %v763_v30  ;;  %v888_v19 = vmax.f32 %v868_v32, 0.0 }
 0x130   :  { %1095 = vst [vmem:[%s1760_s3] sm:$0xff] %v1094_v14   ;;  %v839_v55 = vadd.f32 %v1293_v53, %v742_v37  ;;  %v1301_v42 = vpop.f32.mrf.mxu1  ;;  %v878_v50 = vmax.f32 %v828_v40, 0.0 }
 0x131   :  { %1134 = vst [vmem:[%s1760_s3 + $0x20] sm:$0xff] %v1114_v17   ;;  %v871_v47 = vadd.f32 %v1301_v42, %v774_v38  ;;  %v830_v61 = vpop.f32.mrf.mxu0  ;;  %v886_v56 = vmax.f32 %v860_v45, 0.0 }
 0x132   :  { %v881_v58 = vmax.f32 %v839_v55, 0.0  ;;  %v831_v60 = vadd.f32 %v830_v61, %v734_v44  ;;  %v862_v16 = vpop.f32.mrf.mxu1 }
 0x133   :  { %v889_v20 = vmax.f32 %v871_v47, 0.0  ;;  %v863_v21 = vadd.f32 %v862_v16, %v766_v63 }
 0x134   :  { %v1109_v52 = vpack.c.bf16 %v881_v58, %v880_v15  ;;  %v879_v54 = vmax.f32 %v831_v60, 0.0 }
 0x135   :  { %v1129_v23 = vpack.c.bf16 %v889_v20, %v888_v19  ;;  %v887_v34 = vmax.f32 %v863_v21, 0.0 }
 0x136   :  { %1133 = vst [vmem:[%s1760_s3 + $0x18] sm:$0xff] %v1109_v52   ;;  %v1104_v62 = vpack.c.bf16 %v879_v54, %v878_v50 }
 0x137   :  { %1137 = vst [vmem:[%s1760_s3 + $0x38] sm:$0xff] %v1129_v23   ;;  %v1124_v0 = vpack.c.bf16 %v887_v34, %v886_v56 }
 0x138   :  { %1132 = vst [vmem:[%s1760_s3 + $0x10] sm:$0xff] %v1104_v62  }
 0x139   :  { %1136 = vst [vmem:[%s1760_s3 + $0x30] sm:$0xff] %v1124_v0  }

// kernel: mwt_forward.19
= control target key start
LH: loop header
LB: loop body
LE: loop exit
PB: predicated region body
PF: predicated region fallthrough
CT: control target
= control target key end

     0   :  { %s2259_s1 = inlined_call_operand.vmem [shape: bf16[1152,256], index: 1, kind: input, shape index: {}]   ;;  %s2260_s0 = inlined_call_operand.vmem [shape: bf16[32,1152], index: 0, kind: input, shape index: {}]   ;;  %s2261_s2 = inlined_call_operand.vmem [shape: f32[1,256], index: 2, kind: input, shape index: {}]   ;;  %s2262_s3 = inlined_call_operand.vmem [shape: bf16[32,256], index: 3, kind: output, shape index: {}]  }
   0x1   :  { %v1495_v0 = vld [vmem:[%s2259_s1 + $0x74] ss:$8 sps:$4 sm:$0xff]   ;;  %v1499_v2 = vld [vmem:[%s2259_s1 + $0x70] ss:$8 sps:$4 sm:$0xff]   ;;  %v1501_v4 = vld [vmem:[%s2259_s1 + $0x64] ss:$8 sps:$4 sm:$0xff]  }
   0x2   :  { %v1497_v1 = vld [vmem:[%s2259_s1 + $0x174] ss:$8 sps:$4 sm:$0xff]   ;;  %1003 = vmatprep.subr.bf16.mxu0 %v1495_v0  ;;  %v1500_v3 = vld [vmem:[%s2259_s1 + $0x170] ss:$8 sps:$4 sm:$0xff]   ;;  %v1503_v5 = vld [vmem:[%s2259_s1 + $0x164] ss:$8 sps:$4 sm:$0xff]  }
   0x3   :  { %1056 = vmatprep.subr.bf16.mxu1 %v1497_v1  ;;  %1004 = vmatpush1.bf16.msra.mxu0 %v1499_v2  ;;  %v1505_v6 = vld [vmem:[%s2259_s1 + $0x60] ss:$8 sps:$4 sm:$0xff]   ;;  %v1507_v8 = vld [vmem:[%s2259_s1 + $0x54] ss:$8 sps:$4 sm:$0xff]   ;;  %v1511_v10 = vld [vmem:[%s2259_s1 + $0x50] ss:$8 sps:$4 sm:$0xff]  }
   0x4   :  { %1057 = vmatpush1.bf16.msra.mxu1 %v1500_v3  ;;  %1005 = vmatprep.subr.bf16.mxu0 %v1501_v4  ;;  %v1506_v7 = vld [vmem:[%s2259_s1 + $0x160] ss:$8 sps:$4 sm:$0xff]   ;;  %v1509_v9 = vld [vmem:[%s2259_s1 + $0x154] ss:$8 sps:$4 sm:$0xff]   ;;  %v1512_v11 = vld [vmem:[%s2259_s1 + $0x150] ss:$8 sps:$4 sm:$0xff]  }
   0x5   :  { %1058 = vmatprep.subr.bf16.mxu1 %v1503_v5  ;;  %v1513_v12 = vld [vmem:[%s2259_s1 + $0x44] ss:$8 sps:$4 sm:$0xff]   ;;  %v1517_v14 = vld [vmem:[%s2259_s1 + $0x40] ss:$8 sps:$4 sm:$0xff]   ;;  %v1519_v16 = vld [vmem:[%s2259_s1 + $0x34] ss:$8 sps:$4 sm:$0xff]  }
   0x6   :  { %v1515_v13 = vld [vmem:[%s2259_s1 + $0x144] ss:$8 sps:$4 sm:$0xff]   ;;  %v1518_v15 = vld [vmem:[%s2259_s1 + $0x140] ss:$8 sps:$4 sm:$0xff]   ;;  %v1521_v17 = vld [vmem:[%s2259_s1 + $0x134] ss:$8 sps:$4 sm:$0xff]  }
   0x7   :  { %1006 = vmatpush1.bf16.msra.mxu0 %v1505_v6  ;;  %v1523_v18 = vld [vmem:[%s2259_s1 + $0x30] ss:$8 sps:$4 sm:$0xff]   ;;  %v1525_v20 = vld [vmem:[%s2259_s1 + $0x24] ss:$8 sps:$4 sm:$0xff]   ;;  %v1529_v22 = vld [vmem:[%s2259_s1 + $0x20] ss:$8 sps:$4 sm:$0xff]  }
   0x8   :  { %1059 = vmatpush1.bf16.msra.mxu1 %v1506_v7  ;;  %1007 = vmatprep.subr.bf16.mxu0 %v1507_v8  ;;  %v1524_v19 = vld [vmem:[%s2259_s1 + $0x130] ss:$8 sps:$4 sm:$0xff]   ;;  %v1527_v21 = vld [vmem:[%s2259_s1 + $0x124] ss:$8 sps:$4 sm:$0xff]   ;;  %v1530_v23 = vld [vmem:[%s2259_s1 + $0x120] ss:$8 sps:$4 sm:$0xff]  }
   0x9   :  { %1060 = vmatprep.subr.bf16.mxu1 %v1509_v9  ;;  %v1531_v24 = vld [vmem:[%s2259_s1 + $0x14] ss:$8 sps:$4 sm:$0xff]   ;;  %v1535_v26 = vld [vmem:[%s2259_s1 + $0x10] ss:$8 sps:$4 sm:$0xff]   ;;  %v1537_v28 = vld [vmem:[%s2259_s1 + $0x4] ss:$8 sps:$4 sm:$0xff]  }
   0xa   :  { %v1533_v25 = vld [vmem:[%s2259_s1 + $0x114] ss:$8 sps:$4 sm:$0xff]   ;;  %v1536_v27 = vld [vmem:[%s2259_s1 + $0x110] ss:$8 sps:$4 sm:$0xff]   ;;  %v1539_v29 = vld [vmem:[%s2259_s1 + $0x104] ss:$8 sps:$4 sm:$0xff]  }
   0xb   :  { %1008 = vmatpush1.bf16.msra.mxu0 %v1511_v10  ;;  %v1541_v30 = vld [vmem:[%s2259_s1] ss:$8 sps:$4 sm:$0xff]   ;;  %v1543_v32 = vld [vmem:[%s2259_s1 + $0xf4] ss:$8 sps:$4 sm:$0xff]   ;;  %v1547_v34 = vld [vmem:[%s2259_s1 + $0xf0] ss:$8 sps:$4 sm:$0xff]  }
   0xc   :  { %1061 = vmatpush1.bf16.msra.mxu1 %v1512_v11  ;;  %1009 = vmatprep.subr.bf16.mxu0 %v1513_v12  ;;  %v1542_v31 = vld [vmem:[%s2259_s1 + $0x100] ss:$8 sps:$4 sm:$0xff]   ;;  %v1545_v33 = vld [vmem:[%s2259_s1 + $0x1f4] ss:$8 sps:$4 sm:$0xff]   ;;  %v1548_v35 = vld [vmem:[%s2259_s1 + $0x1f0] ss:$8 sps:$4 sm:$0xff]  }
   0xd   :  { %1062 = vmatprep.subr.bf16.mxu1 %v1515_v13  ;;  %v1549_v36 = vld [vmem:[%s2259_s1 + $0xe4] ss:$8 sps:$4 sm:$0xff]   ;;  %v1553_v38 = vld [vmem:[%s2259_s1 + $0xe0] ss:$8 sps:$4 sm:$0xff]   ;;  %v1555_v40 = vld [vmem:[%s2259_s1 + $0xd4] ss:$8 sps:$4 sm:$0xff]  }
   0xe   :  { %v1551_v37 = vld [vmem:[%s2259_s1 + $0x1e4] ss:$8 sps:$4 sm:$0xff]   ;;  %v1554_v39 = vld [vmem:[%s2259_s1 + $0x1e0] ss:$8 sps:$4 sm:$0xff]   ;;  %v1557_v41 = vld [vmem:[%s2259_s1 + $0x1d4] ss:$8 sps:$4 sm:$0xff]  }
   0xf   :  { %1010 = vmatpush1.bf16.msra.mxu0 %v1517_v14  ;;  %v1559_v42 = vld [vmem:[%s2259_s1 + $0xd0] ss:$8 sps:$4 sm:$0xff]   ;;  %v1561_v44 = vld [vmem:[%s2259_s1 + $0xc4] ss:$8 sps:$4 sm:$0xff]   ;;  %v1565_v46 = vld [vmem:[%s2259_s1 + $0xc0] ss:$8 sps:$4 sm:$0xff]  }
  0x10   :  { %1063 = vmatpush1.bf16.msra.mxu1 %v1518_v15  ;;  %1011 = vmatprep.subr.bf16.mxu0 %v1519_v16  ;;  %v1560_v43 = vld [vmem:[%s2259_s1 + $0x1d0] ss:$8 sps:$4 sm:$0xff]   ;;  %v1563_v45 = vld [vmem:[%s2259_s1 + $0x1c4] ss:$8 sps:$4 sm:$0xff]   ;;  %v1566_v47 = vld [vmem:[%s2259_s1 + $0x1c0] ss:$8 sps:$4 sm:$0xff]  }
  0x11   :  { %1064 = vmatprep.subr.bf16.mxu1 %v1521_v17  ;;  %v1567_v48 = vld [vmem:[%s2259_s1 + $0xb4] ss:$8 sps:$4 sm:$0xff]   ;;  %v1593_v49 = vld [vmem:[%s2260_s0 + $0x4] ss:$36 sps:$4 sm:$0xff]   ;;  %v1596_v51 = vld [vmem:[%s2260_s0 + $0xc] ss:$36 sps:$4 sm:$0xff]  }
  0x12   :  { %v1569_v50 = vld [vmem:[%s2259_s1 + $0x1b4] ss:$8 sps:$4 sm:$0xff]   ;;  %1035 = vmatprep.mubr.bf16.mxu0 %v1593_v49  ;;  %v1571_v52 = vld [vmem:[%s2259_s1 + $0xb0] ss:$8 sps:$4 sm:$0xff]   ;;  %1088 = vmatprep.mubr.bf16.mxu1 %v1596_v51  ;;  %v1573_v54 = vld [vmem:[%s2259_s1 + $0xa4] ss:$8 sps:$4 sm:$0xff]  }
  0x13   :  { %1012 = vmatpush1.bf16.msra.mxu0 %v1523_v18  ;;  %v1572_v53 = vld [vmem:[%s2259_s1 + $0x1b0] ss:$8 sps:$4 sm:$0xff]   ;;  %v1575_v55 = vld [vmem:[%s2259_s1 + $0x1a4] ss:$8 sps:$4 sm:$0xff]   ;;  %v1577_v56 = vld [vmem:[%s2259_s1 + $0xa0] ss:$8 sps:$4 sm:$0xff]  }
  0x14   :  { %1065 = vmatpush1.bf16.msra.mxu1 %v1524_v19  ;;  %1013 = vmatprep.subr.bf16.mxu0 %v1525_v20  ;;  %v1578_v57 = vld [vmem:[%s2259_s1 + $0x1a0] ss:$8 sps:$4 sm:$0xff]   ;;  %v1579_v58 = vld [vmem:[%s2259_s1 + $0x94] ss:$8 sps:$4 sm:$0xff]   ;;  %v1583_v60 = vld [vmem:[%s2259_s1 + $0x90] ss:$8 sps:$4 sm:$0xff]  }
  0x15   :  { %1066 = vmatprep.subr.bf16.mxu1 %v1527_v21  ;;  %v1581_v59 = vld [vmem:[%s2259_s1 + $0x194] ss:$8 sps:$4 sm:$0xff]   ;;  %v1584_v61 = vld [vmem:[%s2259_s1 + $0x190] ss:$8 sps:$4 sm:$0xff]   ;;  %v1585_v62 = vld [vmem:[%s2259_s1 + $0x84] ss:$8 sps:$4 sm:$0xff]  }
  0x16   :  { %v1587_v63 = vld [vmem:[%s2259_s1 + $0x184] ss:$8 sps:$4 sm:$0xff]   ;;  %v1589_v0 = vld [vmem:[%s2259_s1 + $0x80] ss:$8 sps:$4 sm:$0xff]   ;;  %v1599_v2 = vld [vmem:[%s2259_s1 + $0x274] ss:$8 sps:$4 sm:$0xff]  }
  0x17   :  { %1014 = vmatpush1.bf16.msra.mxu0 %v1529_v22  ;;  %v1590_v1 = vld [vmem:[%s2259_s1 + $0x180] ss:$8 sps:$4 sm:$0xff]   ;;  %v1602_v3 = vld [vmem:[%s2259_s1 + $0x374] ss:$8 sps:$4 sm:$0xff]   ;;  %v1597_v6 = vld [vmem:[%s2259_s1 + $0x270] ss:$8 sps:$4 sm:$0xff]  }
  0x18   :  { %1067 = vmatpush1.bf16.msra.mxu1 %v1530_v23  ;;  %1015 = vmatprep.subr.bf16.mxu0 %v1531_v24  ;;  %v1591_v4 = vld [vmem:[%s2260_s0] ss:$36 sps:$4 sm:$0xff]   ;;  %v1594_v5 = vld [vmem:[%s2260_s0 + $0x8] ss:$36 sps:$4 sm:$0xff]   ;;  %v1600_v7 = vld [vmem:[%s2259_s1 + $0x370] ss:$8 sps:$4 sm:$0xff]  }
  0x19   :  { %1068 = vmatprep.subr.bf16.mxu1 %v1533_v25  ;;  %v1605_v8 = vld [vmem:[%s2259_s1 + $0x264] ss:$8 sps:$4 sm:$0xff]   ;;  %v1603_v10 = vld [vmem:[%s2259_s1 + $0x260] ss:$8 sps:$4 sm:$0xff]   ;;  %v1611_v12 = vld [vmem:[%s2259_s1 + $0x254] ss:$8 sps:$4 sm:$0xff]  }
  0x1a   :  { %v1608_v9 = vld [vmem:[%s2259_s1 + $0x364] ss:$8 sps:$4 sm:$0xff]   ;;  %v1606_v11 = vld [vmem:[%s2259_s1 + $0x360] ss:$8 sps:$4 sm:$0xff]   ;;  %v1614_v13 = vld [vmem:[%s2259_s1 + $0x354] ss:$8 sps:$4 sm:$0xff]  }
  0x1b   :  { %1016 = vmatpush1.bf16.msra.mxu0 %v1535_v26  ;;  %v1609_v14 = vld [vmem:[%s2259_s1 + $0x250] ss:$8 sps:$4 sm:$0xff]   ;;  %v1617_v16 = vld [vmem:[%s2259_s1 + $0x244] ss:$8 sps:$4 sm:$0xff]   ;;  %v1615_v18 = vld [vmem:[%s2259_s1 + $0x240] ss:$8 sps:$4 sm:$0xff]  }
  0x1c   :  { %1069 = vmatpush1.bf16.msra.mxu1 %v1536_v27  ;;  %1017 = vmatprep.subr.bf16.mxu0 %v1537_v28  ;;  %v1612_v15 = vld [vmem:[%s2259_s1 + $0x350] ss:$8 sps:$4 sm:$0xff]   ;;  %v1620_v17 = vld [vmem:[%s2259_s1 + $0x344] ss:$8 sps:$4 sm:$0xff]   ;;  %v1618_v19 = vld [vmem:[%s2259_s1 + $0x340] ss:$8 sps:$4 sm:$0xff]  }
  0x1d   :  { %1070 = vmatprep.subr.bf16.mxu1 %v1539_v29  ;;  %v1623_v20 = vld [vmem:[%s2259_s1 + $0x234] ss:$8 sps:$4 sm:$0xff]   ;;  %v1669_v22 = vld [vmem:[%s2260_s0 + $0x4c] ss:$36 sps:$4 sm:$0xff]   ;;  %v1627_v28 = vld [vmem:[%s2259_s1 + $0x220] ss:$8 sps:$4 sm:$0xff]  }
  0x1e   :  { %v1626_v21 = vld [vmem:[%s2259_s1 + $0x334] ss:$8 sps:$4 sm:$0xff]   ;;  %v1621_v23 = vld [vmem:[%s2259_s1 + $0x230] ss:$8 sps:$4 sm:$0xff]   ;;  %v1629_v25 = vld [vmem:[%s2259_s1 + $0x224] ss:$8 sps:$4 sm:$0xff]  }
  0x1f   :  { %1018 = vmatpush1.bf16.msra.mxu0 %v1541_v30  ;;  %v1624_v24 = vld [vmem:[%s2259_s1 + $0x330] ss:$8 sps:$4 sm:$0xff]   ;;  %v1632_v26 = vld [vmem:[%s2259_s1 + $0x324] ss:$8 sps:$4 sm:$0xff]   ;;  %v1630_v30 = vld [vmem:[%s2259_s1 + $0x320] ss:$8 sps:$4 sm:$0xff]  }
  0x20   :  { %1071 = vmatpush1.bf16.msra.mxu1 %v1542_v31  ;;  %1019 = vmatprep.subr.bf16.mxu0 %v1543_v32  ;;  %v1677_v27 = vld [vmem:[%s2260_s0 + $0x48] ss:$36 sps:$4 sm:$0xff]   ;;  %v1678_v29 = vld [vmem:[%s2260_s0 + $0x54] ss:$36 sps:$4 sm:$0xff]  }
  0x21   :  { %1072 = vmatprep.subr.bf16.mxu1 %v1545_v33  ;;  %v1680_v31 = vld [vmem:[%s2260_s0 + $0x50] ss:$36 sps:$4 sm:$0xff]   ;;  %v1654_v49 = vld [vmem:[%s2259_s1 + $0x3e0] ss:$8 sps:$4 sm:$0xff]  }
  0x22   :  { %v1635_v32 = vld [vmem:[%s2259_s1 + $0x214] ss:$8 sps:$4 sm:$0xff]  }
  0x23   :  { %1020 = vmatpush2.bf16.msra.mxu0 %v1547_v34  ;;  %v1638_v33 = vld [vmem:[%s2259_s1 + $0x314] ss:$8 sps:$4 sm:$0xff]   ;;  %v1633_v34 = vld [vmem:[%s2259_s1 + $0x210] ss:$8 sps:$4 sm:$0xff]  }
  0x24   :  { %1073 = vmatpush2.bf16.msra.mxu1 %v1548_v35  ;;  %1021 = vmatprep.subr.bf16.mxu0 %v1549_v36  ;;  %v1636_v35 = vld [vmem:[%s2259_s1 + $0x310] ss:$8 sps:$4 sm:$0xff]   ;;  %v1641_v36 = vld [vmem:[%s2259_s1 + $0x204] ss:$8 sps:$4 sm:$0xff]   ;;  %v1662_v51 = vld [vmem:[%s2259_s1 + $0x3d4] ss:$8 sps:$4 sm:$0xff]  }
  0x25   :  { %1074 = vmatprep.subr.bf16.mxu1 %v1551_v37  ;;  %v1644_v37 = vld [vmem:[%s2259_s1 + $0x304] ss:$8 sps:$4 sm:$0xff]  }
  0x27   :  { %1022 = vmatpush2.bf16.msra.mxu0 %v1553_v38  ;;  %v1639_v38 = vld [vmem:[%s2259_s1 + $0x200] ss:$8 sps:$4 sm:$0xff]  }
  0x28   :  { %1075 = vmatpush2.bf16.msra.mxu1 %v1554_v39  ;;  %1023 = vmatprep.subr.bf16.mxu0 %v1555_v40  ;;  %v1642_v39 = vld [vmem:[%s2259_s1 + $0x300] ss:$8 sps:$4 sm:$0xff]   ;;  %v1647_v40 = vld [vmem:[%s2259_s1 + $0x2f4] ss:$8 sps:$4 sm:$0xff]  }
  0x29   :  { %1076 = vmatprep.subr.bf16.mxu1 %v1557_v41  ;;  %v1701_v41 = vld [vmem:[%s2260_s0 + $0x14] ss:$36 sps:$4 sm:$0xff]  }
  0x2b   :  { %1024 = vmatpush2.bf16.msra.mxu0 %v1559_v42  ;;  %v1650_v42 = vld [vmem:[%s2259_s1 + $0x3f4] ss:$8 sps:$4 sm:$0xff]  }
  0x2c   :  { %1077 = vmatpush2.bf16.msra.mxu1 %v1560_v43  ;;  %1025 = vmatprep.subr.bf16.mxu0 %v1561_v44  ;;  %v1704_v43 = vld [vmem:[%s2260_s0 + $0x1c] ss:$36 sps:$4 sm:$0xff]   ;;  %v1645_v44 = vld [vmem:[%s2259_s1 + $0x2f0] ss:$8 sps:$4 sm:$0xff]  }
  0x2d   :  { %1078 = vmatprep.subr.bf16.mxu1 %v1563_v45  ;;  %v1648_v45 = vld [vmem:[%s2259_s1 + $0x3f0] ss:$8 sps:$4 sm:$0xff]  }
  0x2f   :  { %1026 = vmatpush2.bf16.msra.mxu0 %v1565_v46  ;;  %v1653_v46 = vld [vmem:[%s2259_s1 + $0x2e4] ss:$8 sps:$4 sm:$0xff]  }
  0x30   :  { %1079 = vmatpush2.bf16.msra.mxu1 %v1566_v47  ;;  %1027 = vmatprep.subr.bf16.mxu0 %v1567_v48  ;;  %v1656_v47 = vld [vmem:[%s2259_s1 + $0x3e4] ss:$8 sps:$4 sm:$0xff]   ;;  %v1651_v48 = vld [vmem:[%s2259_s1 + $0x2e0] ss:$8 sps:$4 sm:$0xff]  }
  0x31   :  { %1080 = vmatprep.subr.bf16.mxu1 %v1569_v50  ;;  %v1659_v50 = vld [vmem:[%s2259_s1 + $0x2d4] ss:$8 sps:$4 sm:$0xff]  }
  0x33   :  { %1028 = vmatpush2.bf16.msra.mxu0 %v1571_v52  ;;  %v1657_v52 = vld [vmem:[%s2259_s1 + $0x2d0] ss:$8 sps:$4 sm:$0xff]  }
  0x34   :  { %1081 = vmatpush2.bf16.msra.mxu1 %v1572_v53  ;;  %1029 = vmatprep.subr.bf16.mxu0 %v1573_v54  ;;  %v1660_v53 = vld [vmem:[%s2259_s1 + $0x3d0] ss:$8 sps:$4 sm:$0xff]   ;;  %v1665_v54 = vld [vmem:[%s2259_s1 + $0x2c4] ss:$8 sps:$4 sm:$0xff]  }
  0x35   :  { %1082 = vmatprep.subr.bf16.mxu1 %v1575_v55  ;;  %v1668_v55 = vld [vmem:[%s2259_s1 + $0x3c4] ss:$8 sps:$4 sm:$0xff]  }
  0x37   :  { %1030 = vmatpush2.bf16.msra.mxu0 %v1577_v56  ;;  %v1663_v56 = vld [vmem:[%s2259_s1 + $0x2c0] ss:$8 sps:$4 sm:$0xff]  }
  0x38   :  { %1083 = vmatpush2.bf16.msra.mxu1 %v1578_v57  ;;  %1031 = vmatprep.subr.bf16.mxu0 %v1579_v58  ;;  %v1666_v57 = vld [vmem:[%s2259_s1 + $0x3c0] ss:$8 sps:$4 sm:$0xff]   ;;  %v1673_v58 = vld [vmem:[%s2259_s1 + $0x2b4] ss:$8 sps:$4 sm:$0xff]  }
  0x39   :  { %1084 = vmatprep.subr.bf16.mxu1 %v1581_v59  ;;  %v1676_v59 = vld [vmem:[%s2259_s1 + $0x3b4] ss:$8 sps:$4 sm:$0xff]  }
  0x3b   :  { %1032 = vmatpush2.bf16.msra.mxu0 %v1583_v60  ;;  %v1671_v60 = vld [vmem:[%s2259_s1 + $0x2b0] ss:$8 sps:$4 sm:$0xff]  }
  0x3c   :  { %1085 = vmatpush2.bf16.msra.mxu1 %v1584_v61  ;;  %1033 = vmatprep.subr.bf16.mxu0 %v1585_v62  ;;  %v1674_v61 = vld [vmem:[%s2259_s1 + $0x3b0] ss:$8 sps:$4 sm:$0xff]   ;;  %v1683_v62 = vld [vmem:[%s2259_s1 + $0x2a4] ss:$8 sps:$4 sm:$0xff]  }
  0x3d   :  { %1086 = vmatprep.subr.bf16.mxu1 %v1587_v63  ;;  %v1686_v63 = vld [vmem:[%s2259_s1 + $0x3a4] ss:$8 sps:$4 sm:$0xff]  }
  0x3f   :  { %1034 = vmatpush2.bf16.msra.mxu0 %v1589_v0  ;;  %v1681_v0 = vld [vmem:[%s2259_s1 + $0x2a0] ss:$8 sps:$4 sm:$0xff]  }
  0x40   :  { %1087 = vmatpush2.bf16.msra.mxu1 %v1590_v1  ;;  %1109 = vmatprep.subr.bf16.mxu0 %v1599_v2  ;;  %v1684_v1 = vld [vmem:[%s2259_s1 + $0x3a0] ss:$8 sps:$4 sm:$0xff]   ;;  %v1689_v2 = vld [vmem:[%s2259_s1 + $0x294] ss:$8 sps:$4 sm:$0xff]  }
  0x41   :  { %1162 = vmatprep.subr.bf16.mxu1 %v1602_v3  ;;  %v1692_v3 = vld [vmem:[%s2259_s1 + $0x394] ss:$8 sps:$4 sm:$0xff]  }
  0x42   :  { %1036 = vmatmul.mubr.bf16.vlgmr.msra.gmra.mxu0 %v1591_v4  ;;  %v1687_v4 = vld [vmem:[%s2259_s1 + $0x290] ss:$8 sps:$4 sm:$0xff]  }
  0x43   :  { %1089 = vmatmul.mubr.bf16.vlgmr.msra.gmra.mxu1 %v1594_v5  ;;  %1110 = vmatpush1.bf16.msra.mxu0 %v1597_v6  ;;  %v1690_v5 = vld [vmem:[%s2259_s1 + $0x390] ss:$8 sps:$4 sm:$0xff]   ;;  %v1695_v6 = vld [vmem:[%s2259_s1 + $0x284] ss:$8 sps:$4 sm:$0xff]  }
  0x44   :  { %1163 = vmatpush1.bf16.msra.mxu1 %v1600_v7  ;;  %1111 = vmatprep.subr.bf16.mxu0 %v1605_v8  ;;  %v1698_v7 = vld [vmem:[%s2259_s1 + $0x384] ss:$8 sps:$4 sm:$0xff]   ;;  %v1693_v8 = vld [vmem:[%s2259_s1 + $0x280] ss:$8 sps:$4 sm:$0xff]  }
  0x45   :  { %1164 = vmatprep.subr.bf16.mxu1 %v1608_v9  ;;  %1045 = vmatprep.mubr.bf16.mxu0 %v1669_v22  ;;  %v1696_v9 = vld [vmem:[%s2259_s1 + $0x380] ss:$8 sps:$4 sm:$0xff]   ;;  %v1722_v22 = vld [vmem:[%s2259_s1 + $0x444] ss:$8 sps:$4 sm:$0xff]  }
  0x46   :  { %1098 = vmatprep.mubr.bf16.mxu1 %v1678_v29  ;;  %v1731_v29 = vld [vmem:[%s2259_s1 + $0x414] ss:$8 sps:$4 sm:$0xff]  }
  0x47   :  { %1112 = vmatpush1.bf16.msra.mxu0 %v1603_v10  ;;  %v1707_v10 = vld [vmem:[%s2259_s1 + $0x474] ss:$8 sps:$4 sm:$0xff]  }
  0x48   :  { %1165 = vmatpush1.bf16.msra.mxu1 %v1606_v11  ;;  %1113 = vmatprep.subr.bf16.mxu0 %v1611_v12  ;;  %v1699_v11 = vld [vmem:[%s2260_s0 + $0x10] ss:$36 sps:$4 sm:$0xff]   ;;  %v1702_v12 = vld [vmem:[%s2260_s0 + $0x18] ss:$36 sps:$4 sm:$0xff]  }
  0x49   :  { %1166 = vmatprep.subr.bf16.mxu1 %v1614_v13  ;;  %v1705_v13 = vld [vmem:[%s2259_s1 + $0x470] ss:$8 sps:$4 sm:$0xff]  }
  0x4a   :  { %1046 = vmatmul.mubr.bf16.gmra.mxu0 %v1677_v27  ;;  %v1728_v27 = vld [vmem:[%s2259_s1 + $0x424] ss:$8 sps:$4 sm:$0xff]  }
  0x4b   :  { %1114 = vmatpush1.bf16.msra.mxu0 %v1609_v14  ;;  %1099 = vmatmul.mubr.bf16.gmra.mxu1 %v1680_v31  ;;  %v1710_v14 = vld [vmem:[%s2259_s1 + $0x464] ss:$8 sps:$4 sm:$0xff]  }
  0x4c   :  { %1167 = vmatpush1.bf16.msra.mxu1 %v1612_v15  ;;  %1115 = vmatprep.subr.bf16.mxu0 %v1617_v16  ;;  %v1711_v15 = vld [vmem:[%s2260_s0 + $0x5c] ss:$36 sps:$4 sm:$0xff]   ;;  %v1717_v16 = vld [vmem:[%s2260_s0 + $0x64] ss:$36 sps:$4 sm:$0xff]  }
  0x4d   :  { %1168 = vmatprep.subr.bf16.mxu1 %v1620_v17  ;;  %1141 = vmatprep.mubr.bf16.mxu0 %v1701_v41  ;;  %v1708_v17 = vld [vmem:[%s2259_s1 + $0x460] ss:$8 sps:$4 sm:$0xff]   ;;  %v1734_v31 = vld [vmem:[%s2259_s1 + $0x404] ss:$8 sps:$4 sm:$0xff]  }
  0x4e   :  { %1194 = vmatprep.mubr.bf16.mxu1 %v1704_v43 }
  0x4f   :  { %1116 = vmatpush1.bf16.msra.mxu0 %v1615_v18  ;;  %v1716_v18 = vld [vmem:[%s2259_s1 + $0x454] ss:$8 sps:$4 sm:$0xff]  }
  0x50   :  { %1169 = vmatpush1.bf16.msra.mxu1 %v1618_v19  ;;  %1117 = vmatprep.subr.bf16.mxu0 %v1623_v20  ;;  %v1713_v19 = vld [vmem:[%s2260_s0 + $0x58] ss:$36 sps:$4 sm:$0xff]   ;;  %v1719_v20 = vld [vmem:[%s2260_s0 + $0x60] ss:$36 sps:$4 sm:$0xff]  }
  0x51   :  { %1170 = vmatprep.subr.bf16.mxu1 %v1626_v21  ;;  %v1714_v21 = vld [vmem:[%s2259_s1 + $0x450] ss:$8 sps:$4 sm:$0xff]  }
  0x53   :  { %1118 = vmatpush1.bf16.msra.mxu0 %v1621_v23  ;;  %v1720_v23 = vld [vmem:[%s2259_s1 + $0x440] ss:$8 sps:$4 sm:$0xff]  }
  0x54   :  { %1171 = vmatpush1.bf16.msra.mxu1 %v1624_v24  ;;  %1119 = vmatprep.subr.bf16.mxu0 %v1629_v25  ;;  %v1725_v24 = vld [vmem:[%s2259_s1 + $0x434] ss:$8 sps:$4 sm:$0xff]   ;;  %v1737_v25 = vmov 0  }
  0x55   :  { %1172 = vmatprep.subr.bf16.mxu1 %v1632_v26  ;;  %v1723_v26 = vld [vmem:[%s2259_s1 + $0x430] ss:$8 sps:$4 sm:$0xff]  }
  0x57   :  { %1120 = vmatpush1.bf16.msra.mxu0 %v1627_v28  ;;  %v1726_v28 = vld [vmem:[%s2259_s1 + $0x420] ss:$8 sps:$4 sm:$0xff]  }
  0x58   :  { %1173 = vmatpush1.bf16.msra.mxu1 %v1630_v30  ;;  %1121 = vmatprep.subr.bf16.mxu0 %v1635_v32  ;;  %v1729_v30 = vld [vmem:[%s2259_s1 + $0x410] ss:$8 sps:$4 sm:$0xff]   ;;  %v1732_v32 = vld [vmem:[%s2259_s1 + $0x400] ss:$8 sps:$4 sm:$0xff]  }
  0x59   :  { %1174 = vmatprep.subr.bf16.mxu1 %v1638_v33  ;;  %v1735_v33 = vld [vmem:[%s2260_s0 + $0x20] ss:$36 sps:$4 sm:$0xff]  }
  0x5b   :  { %1122 = vmatpush1.bf16.msra.mxu0 %v1633_v34  ;;  %v1736_v34 = vld [vmem:[%s2260_s0 + $0x68] ss:$36 sps:$4 sm:$0xff]  }
  0x5c   :  { %1175 = vmatpush1.bf16.msra.mxu1 %v1636_v35  ;;  %1123 = vmatprep.subr.bf16.mxu0 %v1641_v36 }
  0x5d   :  { %1176 = vmatprep.subr.bf16.mxu1 %v1644_v37 }
  0x5f   :  { %1124 = vmatpush1.bf16.msra.mxu0 %v1639_v38 }
  0x60   :  { %1177 = vmatpush1.bf16.msra.mxu1 %v1642_v39  ;;  %1125 = vmatprep.subr.bf16.mxu0 %v1647_v40 }
  0x61   :  { %1178 = vmatprep.subr.bf16.mxu1 %v1650_v42 }
  0x63   :  { %1126 = vmatpush2.bf16.msra.mxu0 %v1645_v44 }
  0x64   :  { %1179 = vmatpush2.bf16.msra.mxu1 %v1648_v45  ;;  %1127 = vmatprep.subr.bf16.mxu0 %v1653_v46 }
  0x65   :  { %1180 = vmatprep.subr.bf16.mxu1 %v1656_v47 }
  0x67   :  { %1128 = vmatpush2.bf16.msra.mxu0 %v1651_v48 }
  0x68   :  { %1181 = vmatpush2.bf16.msra.mxu1 %v1654_v49  ;;  %1129 = vmatprep.subr.bf16.mxu0 %v1659_v50 }
  0x69   :  { %1182 = vmatprep.subr.bf16.mxu1 %v1662_v51 }
  0x6b   :  { %1130 = vmatpush2.bf16.msra.mxu0 %v1657_v52 }
  0x6c   :  { %1183 = vmatpush2.bf16.msra.mxu1 %v1660_v53  ;;  %1131 = vmatprep.subr.bf16.mxu0 %v1665_v54  ;;  %v181_v53 = vlaneseq }
  0x6d   :  { %1184 = vmatprep.subr.bf16.mxu1 %v1668_v55 }
  0x6f   :  { %1132 = vmatpush2.bf16.msra.mxu0 %v1663_v56  ;;  %v182_v56 = vshrl.u32 %v181_v53, 7 }
  0x70   :  { %1185 = vmatpush2.bf16.msra.mxu1 %v1666_v57  ;;  %1133 = vmatprep.subr.bf16.mxu0 %v1673_v58 }
  0x71   :  { %1186 = vmatprep.subr.bf16.mxu1 %v1676_v59  ;;  %v183_v59 = vsub.s32 0, %v182_v56 }
  0x73   :  { %1134 = vmatpush2.bf16.msra.mxu0 %v1671_v60  ;;  %v179_v60 = vld [vmem:[%s2261_s2] sm:$0x3] }
  0x74   :  { %1187 = vmatpush2.bf16.msra.mxu1 %v1674_v61  ;;  %1135 = vmatprep.subr.bf16.mxu0 %v1683_v62  ;;  %v187_v62 = vsub.s32 1, %v182_v56 }
  0x75   :  { %1188 = vmatprep.subr.bf16.mxu1 %v1686_v63 }
  0x77   :  { %1136 = vmatpush2.bf16.msra.mxu0 %v1681_v0  ;;  %v184_v0 = vrot.slane %v179_v60, %v183_v59 }
  0x78   :  { %1189 = vmatpush2.bf16.msra.mxu1 %v1684_v1  ;;  %1137 = vmatprep.subr.bf16.mxu0 %v1689_v2 }
  0x79   :  { %1190 = vmatprep.subr.bf16.mxu1 %v1692_v3  ;;  %v188_v3 = vrot.slane %v179_v60, %v187_v62 }
  0x7b   :  { %1138 = vmatpush2.bf16.msra.mxu0 %v1687_v4 }
  0x7c   :  { %1191 = vmatpush2.bf16.msra.mxu1 %v1690_v5  ;;  %1139 = vmatprep.subr.bf16.mxu0 %v1695_v6 }
  0x7d   :  { %1192 = vmatprep.subr.bf16.mxu1 %v1698_v7 }
  0x7f   :  { %1140 = vmatpush2.bf16.msra.mxu0 %v1693_v8 }
  0x80   :  { %1193 = vmatpush2.bf16.msra.mxu1 %v1696_v9  ;;  %1215 = vmatprep.subr.bf16.mxu0 %v1707_v10 }
  0x81   :  { %1478 = vmatprep.subr.bf16.mxu1 %v1707_v10 }
  0x82   :  { %1142 = vmatmul.mubr.bf16.vlgmr.msra.gmra.mxu0 %v1699_v11 }
  0x83   :  { %1195 = vmatmul.mubr.bf16.vlgmr.msra.gmra.mxu1 %v1702_v12  ;;  %1216 = vmatpush1.bf16.msra.mxu0 %v1705_v13 }
  0x84   :  { %1486 = vmatpush1.bf16.msra.mxu1 %v1705_v13  ;;  %1217 = vmatprep.subr.bf16.mxu0 %v1710_v14 }
  0x85   :  { %1479 = vmatprep.subr.bf16.mxu1 %v1710_v14  ;;  %1151 = vmatprep.mubr.bf16.mxu0 %v1711_v15 }
  0x86   :  { %1204 = vmatprep.mubr.bf16.mxu1 %v1717_v16 }
  0x87   :  { %1218 = vmatpush1.bf16.msra.mxu0 %v1708_v17 }
  0x88   :  { %1487 = vmatpush1.bf16.msra.mxu1 %v1708_v17  ;;  %1219 = vmatprep.subr.bf16.mxu0 %v1716_v18 }
  0x89   :  { %1480 = vmatprep.subr.bf16.mxu1 %v1716_v18 }
  0x8a   :  { %1152 = vmatmul.mubr.bf16.gmra.mxu0 %v1713_v19 }
  0x8b   :  { %1205 = vmatmul.mubr.bf16.gmra.mxu1 %v1719_v20  ;;  %1220 = vmatpush1.bf16.msra.mxu0 %v1714_v21 }
  0x8c   :  { %1488 = vmatpush1.bf16.msra.mxu1 %v1714_v21  ;;  %1221 = vmatprep.subr.bf16.mxu0 %v1722_v22 }
  0x8d   :  { %1481 = vmatprep.subr.bf16.mxu1 %v1722_v22  ;;  %1247 = vmatprep.mubr.bf16.mxu0 %v1737_v25 }
  0x8e   :  { %1257 = vmatprep.mubr.bf16.mxu1 %v1737_v25 }
  0x8f   :  { %1222 = vmatpush1.bf16.msra.mxu0 %v1720_v23 }
  0x90   :  { %1489 = vmatpush1.bf16.msra.mxu1 %v1720_v23  ;;  %1223 = vmatprep.subr.bf16.mxu0 %v1725_v24 }
  0x91   :  { %1482 = vmatprep.subr.bf16.mxu1 %v1725_v24 }
  0x93   :  { %1224 = vmatpush1.bf16.msra.mxu0 %v1723_v26 }
  0x94   :  { %1490 = vmatpush1.bf16.msra.mxu1 %v1723_v26  ;;  %1225 = vmatprep.subr.bf16.mxu0 %v1728_v27 }
  0x95   :  { %1483 = vmatprep.subr.bf16.mxu1 %v1728_v27 }
  0x97   :  { %1226 = vmatpush1.bf16.msra.mxu0 %v1726_v28 }
  0x98   :  { %1491 = vmatpush1.bf16.msra.mxu1 %v1726_v28  ;;  %1227 = vmatprep.subr.bf16.mxu0 %v1731_v29 }
  0x99   :  { %1484 = vmatprep.subr.bf16.mxu1 %v1731_v29 }
  0x9b   :  { %1228 = vmatpush1.bf16.msra.mxu0 %v1729_v30 }
  0x9c   :  { %1492 = vmatpush1.bf16.msra.mxu1 %v1729_v30  ;;  %1229 = vmatprep.subr.bf16.mxu0 %v1734_v31 }
  0x9d   :  { %1485 = vmatprep.subr.bf16.mxu1 %v1734_v31 }
  0x9f   :  { %1230 = vmatpush1.bf16.msra.mxu0 %v1732_v32 }
  0xa0   :  { %1493 = vmatpush1.bf16.msra.mxu1 %v1732_v32 }
  0xa2   :  { %1248 = vmatmul.mubr.bf16.vlgmr.msra.gmra.mxu0 %v1735_v33 }
  0xa3   :  { %1258 = vmatmul.mubr.bf16.vlgmr.msra.gmra.mxu1 %v1736_v34 }
 0x102   :  { %v1037_v35 = vpop.f32.mrf.mxu0 }
 0x103   :  { %v1090_v36 = vpop.f32.mrf.mxu1  ;;  %v1038_v4 = vadd.f32 %v1037_v35, %v184_v0 }
 0x104   :  { %v1039_v37 = vpop.f32.mrf.mxu0 }
 0x105   :  { %v1092_v38 = vpop.f32.mrf.mxu1  ;;  %v1040_v8 = vadd.f32 %v1039_v37, %v188_v3  ;;  %v1091_v10 = vadd.f32 %v1090_v36, %v1038_v4 }
 0x106   :  { %v1041_v39 = vpop.f32.mrf.mxu0 }
 0x107   :  { %v1094_v40 = vpop.f32.mrf.mxu1  ;;  %v1042_v12 = vadd.f32 %v1041_v39, %v184_v0  ;;  %v1093_v16 = vadd.f32 %v1092_v38, %v1040_v8 }
 0x108   :  { %v1043_v41 = vpop.f32.mrf.mxu0 }
 0x109   :  { %v1096_v42 = vpop.f32.mrf.mxu1  ;;  %v1044_v20 = vadd.f32 %v1043_v41, %v188_v3  ;;  %v1095_v24 = vadd.f32 %v1094_v40, %v1042_v12 }
 0x10a   :  { %v1047_v43 = vpop.f32.mrf.mxu0 }
 0x10b   :  { %v1100_v44 = vpop.f32.mrf.mxu1  ;;  %v1048_v5 = vadd.f32 %v1047_v43, %v184_v0  ;;  %v1097_v30 = vadd.f32 %v1096_v42, %v1044_v20 }
 0x10c   :  { %v1049_v45 = vpop.f32.mrf.mxu0 }
 0x10d   :  { %v1102_v46 = vpop.f32.mrf.mxu1  ;;  %v1050_v9 = vadd.f32 %v1049_v45, %v188_v3  ;;  %v1101_v11 = vadd.f32 %v1100_v44, %v1048_v5 }
 0x10e   :  { %v1051_v47 = vpop.f32.mrf.mxu0 }
 0x10f   :  { %v1104_v48 = vpop.f32.mrf.mxu1  ;;  %v1052_v13 = vadd.f32 %v1051_v47, %v184_v0  ;;  %v1103_v17 = vadd.f32 %v1102_v46, %v1050_v9 }
 0x110   :  { %v1053_v49 = vpop.f32.mrf.mxu0 }
 0x111   :  { %v1106_v50 = vpop.f32.mrf.mxu1  ;;  %v1054_v21 = vadd.f32 %v1053_v49, %v188_v3  ;;  %v1105_v25 = vadd.f32 %v1104_v48, %v1052_v13 }
 0x113   :  { %v1107_v31 = vadd.f32 %v1106_v50, %v1054_v21 }
 0x142   :  { %v1143_v51 = vpop.f32.mrf.mxu0 }
 0x143   :  { %v1196_v52 = vpop.f32.mrf.mxu1  ;;  %v1144_v18 = vadd.f32 %v1143_v51, %v1091_v10 }
 0x144   :  { %v1145_v54 = vpop.f32.mrf.mxu0 }
 0x145   :  { %v1198_v55 = vpop.f32.mrf.mxu1  ;;  %v1146_v22 = vadd.f32 %v1145_v54, %v1093_v16  ;;  %v1197_v28 = vadd.f32 %v1196_v52, %v1144_v18 }
 0x146   :  { %v1147_v57 = vpop.f32.mrf.mxu0 }
 0x147   :  { %v1200_v58 = vpop.f32.mrf.mxu1  ;;  %v1148_v32 = vadd.f32 %v1147_v57, %v1095_v24  ;;  %v1199_v36 = vadd.f32 %v1198_v55, %v1146_v22 }
 0x148   :  { %v1149_v61 = vpop.f32.mrf.mxu0 }
 0x149   :  { %v1202_v63 = vpop.f32.mrf.mxu1  ;;  %v1150_v41 = vadd.f32 %v1149_v61, %v1097_v30  ;;  %v1201_v47 = vadd.f32 %v1200_v58, %v1148_v32 }
 0x14a   :  { %v1153_v1 = vpop.f32.mrf.mxu0 }
 0x14b   :  { %v1206_v2 = vpop.f32.mrf.mxu1  ;;  %v1154_v19 = vadd.f32 %v1153_v1, %v1101_v11  ;;  %v1203_v54 = vadd.f32 %v1202_v63, %v1150_v41 }
 0x14c   :  { %v1155_v6 = vpop.f32.mrf.mxu0 }
 0x14d   :  { %v1208_v7 = vpop.f32.mrf.mxu1  ;;  %v1156_v23 = vadd.f32 %v1155_v6, %v1103_v17  ;;  %v1207_v29 = vadd.f32 %v1206_v2, %v1154_v19 }
 0x14e   :  { %v1157_v14 = vpop.f32.mrf.mxu0 }
 0x14f   :  { %v1210_v15 = vpop.f32.mrf.mxu1  ;;  %v1158_v33 = vadd.f32 %v1157_v14, %v1105_v25  ;;  %v1209_v37 = vadd.f32 %v1208_v7, %v1156_v23 }
 0x150   :  { %v1159_v26 = vpop.f32.mrf.mxu0 }
 0x151   :  { %v1212_v27 = vpop.f32.mrf.mxu1  ;;  %v1160_v43 = vadd.f32 %v1159_v26, %v1107_v31  ;;  %v1211_v48 = vadd.f32 %v1210_v15, %v1158_v33 }
 0x153   :  { %v1213_v56 = vadd.f32 %v1212_v27, %v1160_v43 }
 0x162   :  { %v1249_v34 = vpop.f32.mrf.mxu0 }
 0x163   :  { %v1259_v35 = vpop.f32.mrf.mxu1  ;;  %v1250_v38 = vadd.f32 %v1249_v34, %v1197_v28 }
 0x164   :  { %v1260_v39 = vadd.f32 %v1259_v35, %v1207_v29  ;;  %v1251_v44 = vpop.f32.mrf.mxu0 }
 0x165   :  { %v1261_v45 = vpop.f32.mrf.mxu1  ;;  %v1252_v40 = vadd.f32 %v1251_v44, %v1199_v36  ;;  %v1268_v42 = vmax.f32 %v1250_v38, 0.0 }
 0x166   :  { %v1262_v46 = vadd.f32 %v1261_v45, %v1209_v37  ;;  %v1253_v49 = vpop.f32.mrf.mxu0  ;;  %v1272_v50 = vmax.f32 %v1260_v39, 0.0 }
 0x167   :  { %v1263_v51 = vpop.f32.mrf.mxu1  ;;  %v1269_v52 = vmax.f32 %v1252_v40, 0.0  ;;  %v1254_v55 = vadd.f32 %v1253_v49, %v1201_v47 }
 0x168   :  { %v1273_v53 = vmax.f32 %v1262_v46, 0.0  ;;  %v1264_v57 = vadd.f32 %v1263_v51, %v1211_v48  ;;  %v1255_v59 = vpop.f32.mrf.mxu0 }
 0x169   :  { %v1265_v60 = vpop.f32.mrf.mxu1  ;;  %v1474_v61 = vpack.c.bf16 %v1269_v52, %v1268_v42  ;;  %v1256_v0 = vadd.f32 %v1255_v59, %v1203_v54  ;;  %v1270_v58 = vmax.f32 %v1254_v55, 0.0 }
 0x16a   :  { %v1476_v62 = vpack.c.bf16 %v1273_v53, %v1272_v50  ;;  %v1266_v1 = vadd.f32 %v1265_v60, %v1213_v56  ;;  %v1274_v2 = vmax.f32 %v1264_v57, 0.0 }
 0x16b   :  { %1300 = vst [vmem:[%s2262_s3] sm:$0xff] %v1474_v61  ;;  %v1271_v63 = vmax.f32 %v1256_v0, 0.0 }
 0x16c   :  { %1302 = vst [vmem:[%s2262_s3 + $0x10] sm:$0xff] %v1476_v62  ;;  %v1275_v3 = vmax.f32 %v1266_v1, 0.0 }
 0x16d   :  { %v1475_v4 = vpack.c.bf16 %v1271_v63, %v1270_v58 }
 0x16e   :  { %v1477_v5 = vpack.c.bf16 %v1275_v3, %v1274_v2 }
 0x16f   :  { %1301 = vst [vmem:[%s2262_s3 + $0x8] sm:$0xff] %v1475_v4 }
 0x170   :  { %1303 = vst [vmem:[%s2262_s3 + $0x18] sm:$0xff] %v1477_v5 }

</bundles_post_ra>
